<compile_context>
chip_gen: v7x
topology: tpu7x:2x2x1
jax: 0.10.0
libtpu: 0.0.40
codegen_flags: <defaults>
</compile_context>

<pallas_src>
import functools

import jax
import jax.numpy as jnp
from jax.experimental import pallas as pl
from jax.experimental.pallas import tpu as pltpu

_VMEM_LIMIT = 48 * 1024 * 1024   # > default scoped VMEM, < 64 MiB physical on v7x


def _pick_tile_h(H):
    for t in (32, 28, 16, 14, 8, 4, 2):
        if H % t == 0:
            return t
    return H


def _pick_tile_rows(M, K, max_bytes=4 * 1024 * 1024):
    """Largest multiple-of-8 divisor of M whose f32 (rows, K) block fits max_bytes."""
    cap = min(M, max(max_bytes // (4 * K), 0))
    t = (cap // 8) * 8
    while t >= 8:
        if M % t == 0:
            return t
        t -= 8
    return None


# ------------------- fused 3x3 conv + bias + ReLU (+ 2x2 maxpool) -------------------

def conv3x3_relu(x, wk, b, pool=False):
    """3x3 conv (stride 1, pad 1) + bias + ReLU on NHWC input.

    wk : weights reshaped to (3, 3*Cin, Cout) (dw folded into K), bf16.
    b  : (Cout,) f32.
    pool=True additionally returns the 2x2/stride-2 max-pooled activation (fused).
    """
    N, H, W, Cin = x.shape
    Cout = wk.shape[-1]
    TH = _pick_tile_h(H)
    n_tiles = H // TH
    fold_dh = (9 * Cin <= 256)          # conv1 (Cin=3): one im2col matmul, K=27
    b2 = b.reshape(1, Cout).astype(jnp.float32)

    def kernel(prev_ref, curr_ref, next_ref, w_ref, b_ref, *outs):
        if pool:
            o_ref, p_ref = outs
        else:
            (o_ref,) = outs
        i = pl.program_id(1)

        # Assemble the haloed (TH+2, W+2, Cin) window in bf16.  Halo rows come from
        # the clamped 1-row BlockSpecs; at the image boundary they are masked to 0.
        top_ok = (i > 0).astype(jnp.float32)
        bot_ok = (i < pl.num_programs(1) - 1).astype(jnp.float32)
        curr = curr_ref[0].astype(jnp.bfloat16)                            # (TH, W, Cin)
        top = (prev_ref[...].reshape(1, W, Cin) * top_ok).astype(jnp.bfloat16)
        bot = (next_ref[...].reshape(1, W, Cin) * bot_ok).astype(jnp.bfloat16)
        col = jnp.zeros((TH + 2, 1, Cin), jnp.bfloat16)
        xw = jnp.concatenate([top, curr, bot], axis=0)                     # (TH+2, W, Cin)
        xw = jnp.concatenate([col, xw, col], axis=1)                       # (TH+2, W+2, Cin)

        wv = w_ref[...]                                                    # (3, 3*Cin, Cout) bf16
        if fold_dh:
            parts = [xw[dh:dh + TH, dw:dw + W, :]
                     for dh in range(3) for dw in range(3)]
            lhs = jnp.concatenate(parts, axis=-1).reshape(TH * W, 9 * Cin)
            acc = jnp.dot(lhs, wv.reshape(9 * Cin, Cout),
                          preferred_element_type=jnp.float32)
        else:
            acc = jnp.zeros((TH * W, Cout), jnp.float32)
            for dh in range(3):
                parts = [xw[dh:dh + TH, dw:dw + W, :] for dw in range(3)]
                lhs = jnp.concatenate(parts, axis=-1).reshape(TH * W, 3 * Cin)
                acc = acc + jnp.dot(lhs, wv[dh],
                                    preferred_element_type=jnp.float32)

        acc = acc + b_ref[...]                                             # (1, Cout) f32
        r = jnp.maximum(acc, 0.0).reshape(TH, W, Cout)                     # ReLU in f32
        o_ref[0] = r
        if pool:
            rw = jnp.max(r.reshape(TH, W // 2, 2, Cout), axis=2)
            p_ref[0] = jnp.max(rw.reshape(TH // 2, 2, W // 2, Cout), axis=1)

    in_specs = [
        pl.BlockSpec((1, 1, W, Cin),
                     lambda n, i: (n, jnp.maximum(i * TH - 1, 0), 0, 0)),      # halo above
        pl.BlockSpec((1, TH, W, Cin), lambda n, i: (n, i, 0, 0)),              # main tile
        pl.BlockSpec((1, 1, W, Cin),
                     lambda n, i: (n, jnp.minimum(i * TH + TH, H - 1), 0, 0)),  # halo below
        pl.BlockSpec((3, 3 * Cin, Cout), lambda n, i: (0, 0, 0)),
        pl.BlockSpec((1, Cout), lambda n, i: (0, 0)),
    ]
    out_shape = jax.ShapeDtypeStruct((N, H, W, Cout), jnp.float32)
    out_spec = pl.BlockSpec((1, TH, W, Cout), lambda n, i: (n, i, 0, 0))
    if pool:
        out_shape = (out_shape,
                     jax.ShapeDtypeStruct((N, H // 2, W // 2, Cout), jnp.float32))
        out_spec = (out_spec,
                    pl.BlockSpec((1, TH // 2, W // 2, Cout),
                                 lambda n, i: (n, i, 0, 0)))

    return pl.pallas_call(
        kernel,
        out_shape=out_shape,
        grid=(N, n_tiles),
        in_specs=in_specs,
        out_specs=out_spec,
        compiler_params=pltpu.CompilerParams(
            dimension_semantics=("parallel", "parallel"),
            vmem_limit_bytes=_VMEM_LIMIT),
    )(x, x, x, wk, b2)


# ------------------------------- L1 mean (split halves) -------------------------------

def l1_mean_split(xy, channel_scale=None):
    """mean(|first half - second half| * scale) over a (2N, ...) array.

    The array is flattened to a lane-dense (rows, K) layout (K = last-two-dims for
    4-D activations, last dim otherwise) and passed twice with offset index maps, so
    no HBM slicing/copies.  channel_scale is an optional per-channel scale that is
    tiled along K (used to fold 1/std into the pixel L1 of the normalized images).
    """
    xy = xy.astype(jnp.float32)
    C = xy.shape[-1]
    K = xy.shape[-2] * C if xy.ndim >= 4 else C      # lane-dense flatten
    arr = xy.reshape(-1, K)
    M = arr.shape[0] // 2

    if channel_scale is None:
        s = jnp.ones((1, K), jnp.float32)
    else:
        reps = K // channel_scale.shape[-1]
        s = jnp.tile(channel_scale.astype(jnp.float32).reshape(-1), reps).reshape(1, K)

    tm = _pick_tile_rows(M, K)
    if tm is None:
        # Fallback for shapes the row tiling cannot express (tiny M).
        return jnp.sum(jnp.abs(arr[:M] - arr[M:]) * s) / jnp.float32(M * K)

    steps = M // tm

    def kernel(x_ref, y_ref, s_ref, o_ref, acc_ref):
        i = pl.program_id(0)

        @pl.when(i == 0)
        def _():
            acc_ref[...] = jnp.zeros_like(acc_ref)

        d = jnp.abs(x_ref[...] - y_ref[...]) * s_ref[...]
        acc_ref[...] += jnp.sum(d, axis=0, keepdims=True)     # per-lane partial sums

        @pl.when(i == pl.num_programs(0) - 1)
        def _():
            o_ref[...] = jnp.sum(acc_ref[...]).reshape(1, 1)  # single cross-lane reduce

    total = pl.pallas_call(
        kernel,
        out_shape=jax.ShapeDtypeStruct((1, 1), jnp.float32),
        grid=(steps,),
        in_specs=[pl.BlockSpec((tm, K), lambda i: (i, 0)),
                  pl.BlockSpec((tm, K), lambda i: (i + steps, 0)),
                  pl.BlockSpec((1, K), lambda i: (0, 0))],
        out_specs=pl.BlockSpec((1, 1), lambda i: (0, 0)),
        scratch_shapes=[pltpu.VMEM((1, K), jnp.float32)],
        compiler_params=pltpu.CompilerParams(
            dimension_semantics=("arbitrary",),
            vmem_limit_bytes=_VMEM_LIMIT),
    )(arr, arr, s)
    return total[0, 0] / jnp.float32(M * K)


# ------------------------------------- Gram matrix -------------------------------------

def gram(x_nhwc):
    """torch: act = x.reshape(N, C, -1); gram = act @ act^T.
    Computed as sum over HW tiles of a^T @ a with a = (Thw, C); no transposes."""
    N, H, W, C = x_nhwc.shape
    HW = H * W
    act = x_nhwc.reshape(N, HW, C).astype(jnp.float32)
    Thw = _pick_tile_rows(HW, C)
    if Thw is None:
        return jnp.einsum('nkc,nkd->ncd', act, act)   # tiny fallback
    steps = HW // Thw

    def kernel(a_ref, o_ref, acc_ref):
        j = pl.program_id(1)

        @pl.when(j == 0)
        def _():
            acc_ref[...] = jnp.zeros_like(acc_ref)

        a = a_ref[0].astype(jnp.bfloat16)                     # (Thw, C)
        acc_ref[...] += jax.lax.dot_general(
            a, a, (((0,), (0,)), ((), ())),
            preferred_element_type=jnp.float32)

        @pl.when(j == pl.num_programs(1) - 1)
        def _():
            o_ref[0] = acc_ref[...]

    return pl.pallas_call(
        kernel,
        out_shape=jax.ShapeDtypeStruct((N, C, C), jnp.float32),
        grid=(N, steps),
        in_specs=[pl.BlockSpec((1, Thw, C), lambda n, j: (n, j, 0))],
        out_specs=pl.BlockSpec((1, C, C), lambda n, j: (n, 0, 0)),
        scratch_shapes=[pltpu.VMEM((C, C), jnp.float32)],
        compiler_params=pltpu.CompilerParams(
            dimension_semantics=("parallel", "arbitrary"),
            vmem_limit_bytes=_VMEM_LIMIT),
    )(act)


# --------------------------------------- model ---------------------------------------

def init_params(key):
    # Shapes of vgg16.features[0], [2], [5], [7] (HWIO layout), deterministic init.
    # TODO(synk): pretrained torchvision VGG16 weights are not bundled; random init.
    def conv_init(k, cin, cout):
        kw, kb = jax.random.split(k)
        w = jax.random.normal(kw, (3, 3, cin, cout), jnp.float32) * (2.0 / (9 * cin)) ** 0.5
        b = jax.random.normal(kb, (cout,), jnp.float32) * 0.01
        return w, b

    k1, k2, k3, k4 = jax.random.split(key, 4)
    w1, b1 = conv_init(k1, 3, 64)
    w2, b2 = conv_init(k2, 64, 64)
    w3, b3 = conv_init(k3, 64, 128)
    w4, b4 = conv_init(k4, 128, 128)
    return dict(w1=w1, b1=b1, w2=w2, b2=b2, w3=w3, b3=b3, w4=w4, b4=b4)


def _prep_conv_weights(w, b):
    kh, kw, cin, cout = w.shape
    return w.reshape(kh, kw * cin, cout).astype(jnp.bfloat16), b.astype(jnp.float32)


def vgg_perceptual_loss(inp, tgt, params, resize=True,
                        feature_layers=(0, 1, 2, 3), style_layers=()):
    # inp, tgt: NCHW, like the PyTorch module.
    if inp.shape[1] != 3:
        inp = jnp.tile(inp, (1, 3, 1, 1))           # == torch .repeat(1, 3, 1, 1)
        tgt = jnp.tile(tgt, (1, 3, 1, 1))
    x = jnp.transpose(inp, (0, 2, 3, 1)).astype(jnp.float32)   # -> NHWC
    y = jnp.transpose(tgt, (0, 2, 3, 1)).astype(jnp.float32)

    mean = jnp.array([0.485, 0.456, 0.406], jnp.float32)
    std = jnp.array([0.229, 0.224, 0.225], jnp.float32)
    inv_std = 1.0 / std

    if resize:
        N0 = x.shape[0]
        # Bilinear resize commutes with the per-channel affine normalization, so the
        # normalization is folded into conv1 below and the resize runs on raw pixels.
        # TODO(synk): jax.image.resize bilinear may differ by 1 ulp-scale interpolation
        # details from torch F.interpolate(align_corners=False).
        x = jax.image.resize(x, (N0, 224, 224, 3), method='bilinear', antialias=False)
        y = jax.image.resize(y, (N0, 224, 224, 3), method='bilinear', antialias=False)

    # Run input and target through the trunk as ONE batch of 2N.
    xy = jnp.concatenate([x, y], axis=0)

    # Fold (x - mean) / std into conv1 (conv is linear in its input):
    #   w1' = w1 / std (per input channel);  b1' = b1 - sum_hw_i w1 * mean / std
    w1n = params['w1'] * inv_std.reshape(1, 1, 3, 1)
    b1n = params['b1'] - jnp.einsum('hwio,i->o', params['w1'], mean * inv_std)
    w1k, b1k = _prep_conv_weights(w1n, b1n)
    w2k, b2k = _prep_conv_weights(params['w2'], params['b2'])
    w3k, b3k = _prep_conv_weights(params['w3'], params['b3'])
    w4k, b4k = _prep_conv_weights(params['w4'], params['b4'])

    loss = jnp.float32(0.0)

    # block 0: Conv(3->64)+ReLU, Conv(64->64)+ReLU          (vgg16.features[:4])
    h = conv3x3_relu(xy, w1k, b1k)
    feat0, pooled0 = conv3x3_relu(h, w2k, b2k, pool=True)   # MaxPool (features[4]) fused
    if 0 in feature_layers:
        loss = loss + l1_mean_split(feat0)
    if 0 in style_layers:
        loss = loss + l1_mean_split(gram(feat0))

    # block 1: [MaxPool fused above], Conv(64->128)+ReLU, Conv(128->128)+ReLU (features[4:9])
    h = conv3x3_relu(pooled0, w3k, b3k)
    feat1 = conv3x3_relu(h, w4k, b4k)
    if 1 in feature_layers:
        loss = loss + l1_mean_split(feat1)
    if 1 in style_layers:
        loss = loss + l1_mean_split(gram(feat1))

    num_blocks = 2
    # Pixel L1 of the *normalized* images == L1 of raw (resized) images scaled by 1/std.
    pixel_l1 = l1_mean_split(xy, channel_scale=inv_std)
    return loss / num_blocks * 0.5 + pixel_l1 * 0.5


if __name__ == "__main__":
    key = jax.random.PRNGKey(0)
    k_in, k_tg, k_p = jax.random.split(key, 3)
    # SMALL shapes; resize=False keeps spatial at 16x16 (resize path implemented above).
    inp = jax.random.uniform(k_in, (2, 3, 16, 16), jnp.float32)
    tgt = jax.random.uniform(k_tg, (2, 3, 16, 16), jnp.float32)
    params = init_params(k_p)

    loss_fn = jax.jit(functools.partial(vgg_perceptual_loss, resize=False))
    loss = loss_fn(inp, tgt, params)
    jax.block_until_ready(loss)
    assert loss.shape == () and bool(jnp.isfinite(loss))
    print("KERNEL_OK")
</pallas_src>

<mosaic_0001>
module attributes {stable_mosaic.version = 11 : i64} {
  func.func @kernel(%arg0: i32, %arg1: i32, %arg2: memref<1x1x16x3xf32, #tpu.memory_space<vmem>>, %arg3: memref<1x16x16x3xf32, #tpu.memory_space<vmem>>, %arg4: memref<1x1x16x3xf32, #tpu.memory_space<vmem>>, %arg5: memref<3x9x64xbf16, #tpu.memory_space<vmem>>, %arg6: memref<1x64xf32, #tpu.memory_space<vmem>>, %arg7: memref<1x16x16x64xf32, #tpu.memory_space<vmem>>) attributes {dimension_semantics = [#tpu.dimension_semantics<parallel>, #tpu.dimension_semantics<parallel>], iteration_bounds = array<i64: 4, 1>, scalar_prefetch = 0 : i64, scratch_operands = 0 : i64, tpu.core_type = #tpu.core_type<tc>, window_params = [{transform_indices = @transform_0, window_bounds = array<i64: 1, 1, 16, 3>}, {transform_indices = @transform_1, window_bounds = array<i64: 1, 16, 16, 3>}, {transform_indices = @transform_2, window_bounds = array<i64: 1, 1, 16, 3>}, {pipeline_mode = #tpu.pipeline_mode<synchronous>, transform_indices = @transform_3, window_bounds = array<i64: 3, 9, 64>}, {pipeline_mode = #tpu.pipeline_mode<synchronous>, transform_indices = @transform_4, window_bounds = array<i64: 1, 64>}, {transform_indices = @transform_5, window_bounds = array<i64: 1, 16, 16, 64>}]} {
    %c0_i32 = arith.constant 0 : i32
    %0 = arith.cmpi sgt, %arg1, %c0_i32 : i32
    %1 = arith.extui %0 : i1 to i32
    %2 = arith.sitofp %1 : i32 to f32
    %c0_i32_0 = arith.constant 0 : i32
    %3 = arith.cmpi slt, %arg1, %c0_i32_0 : i32
    %4 = arith.extui %3 : i1 to i32
    %5 = arith.sitofp %4 : i32 to f32
    %c0 = arith.constant 0 : index
    %c0_1 = arith.constant 0 : index
    %c0_2 = arith.constant 0 : index
    %c0_3 = arith.constant 0 : index
    %6 = vector.load %arg3[%c0, %c0_1, %c0_2, %c0_3] : memref<1x16x16x3xf32, #tpu.memory_space<vmem>>, vector<1x16x16x3xf32>
    %7 = vector.shape_cast %6 : vector<1x16x16x3xf32> to vector<16x16x3xf32>
    %8 = arith.truncf %7 : vector<16x16x3xf32> to vector<16x16x3xbf16>
    %c0_4 = arith.constant 0 : index
    %c0_5 = arith.constant 0 : index
    %c0_6 = arith.constant 0 : index
    %c0_7 = arith.constant 0 : index
    %9 = vector.load %arg2[%c0_4, %c0_5, %c0_6, %c0_7] : memref<1x1x16x3xf32, #tpu.memory_space<vmem>>, vector<1x1x16x3xf32>
    %10 = vector.shape_cast %9 : vector<1x1x16x3xf32> to vector<1x16x3xf32>
    %11 = vector.broadcast %2 : f32 to vector<1x16x3xf32>
    %12 = arith.mulf %10, %11 : vector<1x16x3xf32>
    %13 = arith.truncf %12 : vector<1x16x3xf32> to vector<1x16x3xbf16>
    %c0_8 = arith.constant 0 : index
    %c0_9 = arith.constant 0 : index
    %c0_10 = arith.constant 0 : index
    %c0_11 = arith.constant 0 : index
    %14 = vector.load %arg4[%c0_8, %c0_9, %c0_10, %c0_11] : memref<1x1x16x3xf32, #tpu.memory_space<vmem>>, vector<1x1x16x3xf32>
    %15 = vector.shape_cast %14 : vector<1x1x16x3xf32> to vector<1x16x3xf32>
    %16 = vector.broadcast %5 : f32 to vector<1x16x3xf32>
    %17 = arith.mulf %15, %16 : vector<1x16x3xf32>
    %18 = arith.truncf %17 : vector<1x16x3xf32> to vector<1x16x3xbf16>
    %cst = arith.constant 0.000000e+00 : bf16
    %19 = vector.broadcast %cst : bf16 to vector<18x1x3xbf16>
    %20 = tpu.concatenate %13, %8, %18 in 0 : vector<1x16x3xbf16>, vector<16x16x3xbf16>, vector<1x16x3xbf16> -> vector<18x16x3xbf16>
    %21 = tpu.concatenate %19, %20, %19 in 1 : vector<18x1x3xbf16>, vector<18x16x3xbf16>, vector<18x1x3xbf16> -> vector<18x18x3xbf16>
    %c0_12 = arith.constant 0 : index
    %c0_13 = arith.constant 0 : index
    %c0_14 = arith.constant 0 : index
    %22 = vector.load %arg5[%c0_12, %c0_13, %c0_14] : memref<3x9x64xbf16, #tpu.memory_space<vmem>>, vector<3x9x64xbf16>
    %23 = vector.extract_strided_slice %21 {offsets = [0, 0, 0], sizes = [16, 16, 3], strides = [1, 1, 1]} : vector<18x18x3xbf16> to vector<16x16x3xbf16>
    %24 = vector.extract_strided_slice %21 {offsets = [0, 1, 0], sizes = [16, 16, 3], strides = [1, 1, 1]} : vector<18x18x3xbf16> to vector<16x16x3xbf16>
    %25 = vector.extract_strided_slice %21 {offsets = [0, 2, 0], sizes = [16, 16, 3], strides = [1, 1, 1]} : vector<18x18x3xbf16> to vector<16x16x3xbf16>
    %26 = vector.extract_strided_slice %21 {offsets = [1, 0, 0], sizes = [16, 16, 3], strides = [1, 1, 1]} : vector<18x18x3xbf16> to vector<16x16x3xbf16>
    %27 = vector.extract_strided_slice %21 {offsets = [1, 1, 0], sizes = [16, 16, 3], strides = [1, 1, 1]} : vector<18x18x3xbf16> to vector<16x16x3xbf16>
    %28 = vector.extract_strided_slice %21 {offsets = [1, 2, 0], sizes = [16, 16, 3], strides = [1, 1, 1]} : vector<18x18x3xbf16> to vector<16x16x3xbf16>
    %29 = vector.extract_strided_slice %21 {offsets = [2, 0, 0], sizes = [16, 16, 3], strides = [1, 1, 1]} : vector<18x18x3xbf16> to vector<16x16x3xbf16>
    %30 = vector.extract_strided_slice %21 {offsets = [2, 1, 0], sizes = [16, 16, 3], strides = [1, 1, 1]} : vector<18x18x3xbf16> to vector<16x16x3xbf16>
    %31 = vector.extract_strided_slice %21 {offsets = [2, 2, 0], sizes = [16, 16, 3], strides = [1, 1, 1]} : vector<18x18x3xbf16> to vector<16x16x3xbf16>
    %32 = tpu.concatenate %23, %24, %25, %26, %27, %28, %29, %30, %31 in 2 : vector<16x16x3xbf16>, vector<16x16x3xbf16>, vector<16x16x3xbf16>, vector<16x16x3xbf16>, vector<16x16x3xbf16>, vector<16x16x3xbf16>, vector<16x16x3xbf16>, vector<16x16x3xbf16>, vector<16x16x3xbf16> -> vector<16x16x27xbf16>
    %33 = vector.shape_cast %32 : vector<16x16x27xbf16> to vector<256x27xbf16>
    %34 = vector.shape_cast %22 : vector<3x9x64xbf16> to vector<27x64xbf16>
    %cst_15 = arith.constant dense<0.000000e+00> : vector<256x64xf32>
    %35 = tpu.matmul %33, %34, %cst_15 {dimension_numbers = #tpu.dot_dimension_numbers<[1], [0], [0], [1], [0, 0, 1, 1], [], []>} : vector<256x27xbf16>, vector<27x64xbf16>, vector<256x64xf32> -> vector<256x64xf32>
    %c0_16 = arith.constant 0 : index
    %c0_17 = arith.constant 0 : index
    %36 = vector.load %arg6[%c0_16, %c0_17] : memref<1x64xf32, #tpu.memory_space<vmem>>, vector<1x64xf32>
    %37 = vector.broadcast %36 : vector<1x64xf32> to vector<256x64xf32>
    %38 = arith.addf %35, %37 : vector<256x64xf32>
    %cst_18 = arith.constant 0.000000e+00 : f32
    %39 = vector.broadcast %cst_18 : f32 to vector<256x64xf32>
    %40 = arith.maximumf %38, %39 : vector<256x64xf32>
    %41 = vector.shape_cast %40 : vector<256x64xf32> to vector<16x16x64xf32>
    %c0_19 = arith.constant 0 : index
    %c0_20 = arith.constant 0 : index
    %c0_21 = arith.constant 0 : index
    %c0_22 = arith.constant 0 : index
    %42 = vector.load %arg7[%c0_19, %c0_20, %c0_21, %c0_22] : memref<1x16x16x64xf32, #tpu.memory_space<vmem>>, vector<1x16x16x64xf32>
    %43 = vector.shape_cast %42 : vector<1x16x16x64xf32> to vector<16x16x64xf32>
    %44 = vector.shape_cast %41 : vector<16x16x64xf32> to vector<1x16x16x64xf32>
    tpu.vector_store %arg7[%c0_19, %c0_20, %c0_21, %c0_22], %44 {strides = array<i32>} : memref<1x16x16x64xf32, #tpu.memory_space<vmem>>, vector<1x16x16x64xf32>,
    return
  }
  func.func @transform_0(%arg0: i32, %arg1: i32) -> (i32, i32, i32, i32) {
    %c16_i32 = arith.constant 16 : i32
    %0 = arith.muli %arg1, %c16_i32 : i32
    %c1_i32 = arith.constant 1 : i32
    %1 = arith.subi %0, %c1_i32 : i32
    %c0_i32 = arith.constant 0 : i32
    %2 = arith.maxsi %1, %c0_i32 : i32
    %c0_i32_0 = arith.constant 0 : i32
    %c0_i32_1 = arith.constant 0 : i32
    %c0_i32_2 = arith.constant 0 : i32
    return %arg0, %2, %c0_i32_0, %c0_i32_1 : i32, i32, i32, i32
  }
  func.func @transform_1(%arg0: i32, %arg1: i32) -> (i32, i32, i32, i32) {
    %c0_i32 = arith.constant 0 : i32
    %c0_i32_0 = arith.constant 0 : i32
    %c0_i32_1 = arith.constant 0 : i32
    return %arg0, %arg1, %c0_i32, %c0_i32_0 : i32, i32, i32, i32
  }
  func.func @transform_2(%arg0: i32, %arg1: i32) -> (i32, i32, i32, i32) {
    %c16_i32 = arith.constant 16 : i32
    %0 = arith.muli %arg1, %c16_i32 : i32
    %c16_i32_0 = arith.constant 16 : i32
    %1 = arith.addi %0, %c16_i32_0 : i32
    %c15_i32 = arith.constant 15 : i32
    %2 = arith.minsi %1, %c15_i32 : i32
    %c0_i32 = arith.constant 0 : i32
    %c0_i32_1 = arith.constant 0 : i32
    %c0_i32_2 = arith.constant 0 : i32
    return %arg0, %2, %c0_i32, %c0_i32_1 : i32, i32, i32, i32
  }
  func.func @transform_3(%arg0: i32, %arg1: i32) -> (i32, i32, i32) {
    %c0_i32 = arith.constant 0 : i32
    %c0_i32_0 = arith.constant 0 : i32
    %c0_i32_1 = arith.constant 0 : i32
    %c0_i32_2 = arith.constant 0 : i32
    return %c0_i32, %c0_i32_0, %c0_i32_1 : i32, i32, i32
  }
  func.func @transform_4(%arg0: i32, %arg1: i32) -> (i32, i32) {
    %c0_i32 = arith.constant 0 : i32
    %c0_i32_0 = arith.constant 0 : i32
    %c0_i32_1 = arith.constant 0 : i32
    return %c0_i32, %c0_i32_0 : i32, i32
  }
  func.func @transform_5(%arg0: i32, %arg1: i32) -> (i32, i32, i32, i32) {
    %c0_i32 = arith.constant 0 : i32
    %c0_i32_0 = arith.constant 0 : i32
    %c0_i32_1 = arith.constant 0 : i32
    return %arg0, %arg1, %c0_i32, %c0_i32_0 : i32, i32, i32, i32
  }
}

module attributes {stable_mosaic.version = 11 : i64} {
  func.func @kernel(%arg0: i32, %arg1: i32, %arg2: memref<1x1x16x64xf32, #tpu.memory_space<vmem>>, %arg3: memref<1x16x16x64xf32, #tpu.memory_space<vmem>>, %arg4: memref<1x1x16x64xf32, #tpu.memory_space<vmem>>, %arg5: memref<3x192x64xbf16, #tpu.memory_space<vmem>>, %arg6: memref<1x64xf32, #tpu.memory_space<vmem>>, %arg7: memref<1x16x16x64xf32, #tpu.memory_space<vmem>>, %arg8: memref<1x8x8x64xf32, #tpu.memory_space<vmem>>) attributes {dimension_semantics = [#tpu.dimension_semantics<parallel>, #tpu.dimension_semantics<parallel>], iteration_bounds = array<i64: 4, 1>, scalar_prefetch = 0 : i64, scratch_operands = 0 : i64, tpu.core_type = #tpu.core_type<tc>, window_params = [{transform_indices = @transform_0, window_bounds = array<i64: 1, 1, 16, 64>}, {transform_indices = @transform_1, window_bounds = array<i64: 1, 16, 16, 64>}, {transform_indices = @transform_2, window_bounds = array<i64: 1, 1, 16, 64>}, {pipeline_mode = #tpu.pipeline_mode<synchronous>, transform_indices = @transform_3, window_bounds = array<i64: 3, 192, 64>}, {pipeline_mode = #tpu.pipeline_mode<synchronous>, transform_indices = @transform_4, window_bounds = array<i64: 1, 64>}, {transform_indices = @transform_5, window_bounds = array<i64: 1, 16, 16, 64>}, {transform_indices = @transform_6, window_bounds = array<i64: 1, 8, 8, 64>}]} {
    %c0_i32 = arith.constant 0 : i32
    %0 = arith.cmpi sgt, %arg1, %c0_i32 : i32
    %1 = arith.extui %0 : i1 to i32
    %2 = arith.sitofp %1 : i32 to f32
    %c0_i32_0 = arith.constant 0 : i32
    %3 = arith.cmpi slt, %arg1, %c0_i32_0 : i32
    %4 = arith.extui %3 : i1 to i32
    %5 = arith.sitofp %4 : i32 to f32
    %c0 = arith.constant 0 : index
    %c0_1 = arith.constant 0 : index
    %c0_2 = arith.constant 0 : index
    %c0_3 = arith.constant 0 : index
    %6 = vector.load %arg3[%c0, %c0_1, %c0_2, %c0_3] : memref<1x16x16x64xf32, #tpu.memory_space<vmem>>, vector<1x16x16x64xf32>
    %7 = vector.shape_cast %6 : vector<1x16x16x64xf32> to vector<16x16x64xf32>
    %8 = arith.truncf %7 : vector<16x16x64xf32> to vector<16x16x64xbf16>
    %c0_4 = arith.constant 0 : index
    %c0_5 = arith.constant 0 : index
    %c0_6 = arith.constant 0 : index
    %c0_7 = arith.constant 0 : index
    %9 = vector.load %arg2[%c0_4, %c0_5, %c0_6, %c0_7] : memref<1x1x16x64xf32, #tpu.memory_space<vmem>>, vector<1x1x16x64xf32>
    %10 = vector.shape_cast %9 : vector<1x1x16x64xf32> to vector<1x16x64xf32>
    %11 = vector.broadcast %2 : f32 to vector<1x16x64xf32>
    %12 = arith.mulf %10, %11 : vector<1x16x64xf32>
    %13 = arith.truncf %12 : vector<1x16x64xf32> to vector<1x16x64xbf16>
    %c0_8 = arith.constant 0 : index
    %c0_9 = arith.constant 0 : index
    %c0_10 = arith.constant 0 : index
    %c0_11 = arith.constant 0 : index
    %14 = vector.load %arg4[%c0_8, %c0_9, %c0_10, %c0_11] : memref<1x1x16x64xf32, #tpu.memory_space<vmem>>, vector<1x1x16x64xf32>
    %15 = vector.shape_cast %14 : vector<1x1x16x64xf32> to vector<1x16x64xf32>
    %16 = vector.broadcast %5 : f32 to vector<1x16x64xf32>
    %17 = arith.mulf %15, %16 : vector<1x16x64xf32>
    %18 = arith.truncf %17 : vector<1x16x64xf32> to vector<1x16x64xbf16>
    %cst = arith.constant 0.000000e+00 : bf16
    %19 = vector.broadcast %cst : bf16 to vector<18x1x64xbf16>
    %20 = tpu.concatenate %13, %8, %18 in 0 : vector<1x16x64xbf16>, vector<16x16x64xbf16>, vector<1x16x64xbf16> -> vector<18x16x64xbf16>
    %21 = tpu.concatenate %19, %20, %19 in 1 : vector<18x1x64xbf16>, vector<18x16x64xbf16>, vector<18x1x64xbf16> -> vector<18x18x64xbf16>
    %c0_12 = arith.constant 0 : index
    %c0_13 = arith.constant 0 : index
    %c0_14 = arith.constant 0 : index
    %22 = vector.load %arg5[%c0_12, %c0_13, %c0_14] : memref<3x192x64xbf16, #tpu.memory_space<vmem>>, vector<3x192x64xbf16>
    %cst_15 = arith.constant 0.000000e+00 : f32
    %23 = vector.broadcast %cst_15 : f32 to vector<256x64xf32>
    %24 = vector.extract_strided_slice %21 {offsets = [0, 0, 0], sizes = [16, 16, 64], strides = [1, 1, 1]} : vector<18x18x64xbf16> to vector<16x16x64xbf16>
    %25 = vector.extract_strided_slice %21 {offsets = [0, 1, 0], sizes = [16, 16, 64], strides = [1, 1, 1]} : vector<18x18x64xbf16> to vector<16x16x64xbf16>
    %26 = vector.extract_strided_slice %21 {offsets = [0, 2, 0], sizes = [16, 16, 64], strides = [1, 1, 1]} : vector<18x18x64xbf16> to vector<16x16x64xbf16>
    %27 = tpu.concatenate %24, %25, %26 in 2 : vector<16x16x64xbf16>, vector<16x16x64xbf16>, vector<16x16x64xbf16> -> vector<16x16x192xbf16>
    %28 = vector.shape_cast %27 : vector<16x16x192xbf16> to vector<256x192xbf16>
    %29 = vector.extract_strided_slice %22 {offsets = [0, 0, 0], sizes = [1, 192, 64], strides = [1, 1, 1]} : vector<3x192x64xbf16> to vector<1x192x64xbf16>
    %30 = vector.shape_cast %29 : vector<1x192x64xbf16> to vector<192x64xbf16>
    %cst_16 = arith.constant dense<0.000000e+00> : vector<256x64xf32>
    %31 = tpu.matmul %28, %30, %cst_16 {dimension_numbers = #tpu.dot_dimension_numbers<[1], [0], [0], [1], [0, 0, 1, 1], [], []>} : vector<256x192xbf16>, vector<192x64xbf16>, vector<256x64xf32> -> vector<256x64xf32>
    %32 = arith.addf %23, %31 : vector<256x64xf32>
    %33 = vector.extract_strided_slice %21 {offsets = [1, 0, 0], sizes = [16, 16, 64], strides = [1, 1, 1]} : vector<18x18x64xbf16> to vector<16x16x64xbf16>
    %34 = vector.extract_strided_slice %21 {offsets = [1, 1, 0], sizes = [16, 16, 64], strides = [1, 1, 1]} : vector<18x18x64xbf16> to vector<16x16x64xbf16>
    %35 = vector.extract_strided_slice %21 {offsets = [1, 2, 0], sizes = [16, 16, 64], strides = [1, 1, 1]} : vector<18x18x64xbf16> to vector<16x16x64xbf16>
    %36 = tpu.concatenate %33, %34, %35 in 2 : vector<16x16x64xbf16>, vector<16x16x64xbf16>, vector<16x16x64xbf16> -> vector<16x16x192xbf16>
    %37 = vector.shape_cast %36 : vector<16x16x192xbf16> to vector<256x192xbf16>
    %38 = vector.extract_strided_slice %22 {offsets = [1, 0, 0], sizes = [1, 192, 64], strides = [1, 1, 1]} : vector<3x192x64xbf16> to vector<1x192x64xbf16>
    %39 = vector.shape_cast %38 : vector<1x192x64xbf16> to vector<192x64xbf16>
    %cst_17 = arith.constant dense<0.000000e+00> : vector<256x64xf32>
    %40 = tpu.matmul %37, %39, %cst_17 {dimension_numbers = #tpu.dot_dimension_numbers<[1], [0], [0], [1], [0, 0, 1, 1], [], []>} : vector<256x192xbf16>, vector<192x64xbf16>, vector<256x64xf32> -> vector<256x64xf32>
    %41 = arith.addf %32, %40 : vector<256x64xf32>
    %42 = vector.extract_strided_slice %21 {offsets = [2, 0, 0], sizes = [16, 16, 64], strides = [1, 1, 1]} : vector<18x18x64xbf16> to vector<16x16x64xbf16>
    %43 = vector.extract_strided_slice %21 {offsets = [2, 1, 0], sizes = [16, 16, 64], strides = [1, 1, 1]} : vector<18x18x64xbf16> to vector<16x16x64xbf16>
    %44 = vector.extract_strided_slice %21 {offsets = [2, 2, 0], sizes = [16, 16, 64], strides = [1, 1, 1]} : vector<18x18x64xbf16> to vector<16x16x64xbf16>
    %45 = tpu.concatenate %42, %43, %44 in 2 : vector<16x16x64xbf16>, vector<16x16x64xbf16>, vector<16x16x64xbf16> -> vector<16x16x192xbf16>
    %46 = vector.shape_cast %45 : vector<16x16x192xbf16> to vector<256x192xbf16>
    %47 = vector.extract_strided_slice %22 {offsets = [2, 0, 0], sizes = [1, 192, 64], strides = [1, 1, 1]} : vector<3x192x64xbf16> to vector<1x192x64xbf16>
    %48 = vector.shape_cast %47 : vector<1x192x64xbf16> to vector<192x64xbf16>
    %cst_18 = arith.constant dense<0.000000e+00> : vector<256x64xf32>
    %49 = tpu.matmul %46, %48, %cst_18 {dimension_numbers = #tpu.dot_dimension_numbers<[1], [0], [0], [1], [0, 0, 1, 1], [], []>} : vector<256x192xbf16>, vector<192x64xbf16>, vector<256x64xf32> -> vector<256x64xf32>
    %50 = arith.addf %41, %49 : vector<256x64xf32>
    %c0_19 = arith.constant 0 : index
    %c0_20 = arith.constant 0 : index
    %51 = vector.load %arg6[%c0_19, %c0_20] : memref<1x64xf32, #tpu.memory_space<vmem>>, vector<1x64xf32>
    %52 = vector.broadcast %51 : vector<1x64xf32> to vector<256x64xf32>
    %53 = arith.addf %50, %52 : vector<256x64xf32>
    %cst_21 = arith.constant 0.000000e+00 : f32
    %54 = vector.broadcast %cst_21 : f32 to vector<256x64xf32>
    %55 = arith.maximumf %53, %54 : vector<256x64xf32>
    %56 = vector.shape_cast %55 : vector<256x64xf32> to vector<16x16x64xf32>
    %c0_22 = arith.constant 0 : index
    %c0_23 = arith.constant 0 : index
    %c0_24 = arith.constant 0 : index
    %c0_25 = arith.constant 0 : index
    %57 = vector.load %arg7[%c0_22, %c0_23, %c0_24, %c0_25] : memref<1x16x16x64xf32, #tpu.memory_space<vmem>>, vector<1x16x16x64xf32>
    %58 = vector.shape_cast %57 : vector<1x16x16x64xf32> to vector<16x16x64xf32>
    %59 = vector.shape_cast %56 : vector<16x16x64xf32> to vector<1x16x16x64xf32>
    tpu.vector_store %arg7[%c0_22, %c0_23, %c0_24, %c0_25], %59 {strides = array<i32>} : memref<1x16x16x64xf32, #tpu.memory_space<vmem>>, vector<1x16x16x64xf32>,
    %60 = vector.shape_cast %56 : vector<16x16x64xf32> to vector<16x8x2x64xf32>
    %cst_26 = arith.constant dense<0xFF800000> : vector<16x8x64xf32>
    %61 = vector.multi_reduction <maximumf>, %60, %cst_26 [2] : vector<16x8x2x64xf32> to vector<16x8x64xf32>
    %62 = vector.shape_cast %61 : vector<16x8x64xf32> to vector<8x2x8x64xf32>
    %cst_27 = arith.constant dense<0xFF800000> : vector<8x8x64xf32>
    %63 = vector.multi_reduction <maximumf>, %62, %cst_27 [1] : vector<8x2x8x64xf32> to vector<8x8x64xf32>
    %c0_28 = arith.constant 0 : index
    %c0_29 = arith.constant 0 : index
    %c0_30 = arith.constant 0 : index
    %c0_31 = arith.constant 0 : index
    %64 = vector.load %arg8[%c0_28, %c0_29, %c0_30, %c0_31] : memref<1x8x8x64xf32, #tpu.memory_space<vmem>>, vector<1x8x8x64xf32>
    %65 = vector.shape_cast %64 : vector<1x8x8x64xf32> to vector<8x8x64xf32>
    %66 = vector.shape_cast %63 : vector<8x8x64xf32> to vector<1x8x8x64xf32>
    tpu.vector_store %arg8[%c0_28, %c0_29, %c0_30, %c0_31], %66 {strides = array<i32>} : memref<1x8x8x64xf32, #tpu.memory_space<vmem>>, vector<1x8x8x64xf32>,
    return
  }
  func.func @transform_0(%arg0: i32, %arg1: i32) -> (i32, i32, i32, i32) {
    %c16_i32 = arith.constant 16 : i32
    %0 = arith.muli %arg1, %c16_i32 : i32
    %c1_i32 = arith.constant 1 : i32
    %1 = arith.subi %0, %c1_i32 : i32
    %c0_i32 = arith.constant 0 : i32
    %2 = arith.maxsi %1, %c0_i32 : i32
    %c0_i32_0 = arith.constant 0 : i32
    %c0_i32_1 = arith.constant 0 : i32
    %c0_i32_2 = arith.constant 0 : i32
    return %arg0, %2, %c0_i32_0, %c0_i32_1 : i32, i32, i32, i32
  }
  func.func @transform_1(%arg0: i32, %arg1: i32) -> (i32, i32, i32, i32) {
    %c0_i32 = arith.constant 0 : i32
    %c0_i32_0 = arith.constant 0 : i32
    %c0_i32_1 = arith.constant 0 : i32
    return %arg0, %arg1, %c0_i32, %c0_i32_0 : i32, i32, i32, i32
  }
  func.func @transform_2(%arg0: i32, %arg1: i32) -> (i32, i32, i32, i32) {
    %c16_i32 = arith.constant 16 : i32
    %0 = arith.muli %arg1, %c16_i32 : i32
    %c16_i32_0 = arith.constant 16 : i32
    %1 = arith.addi %0, %c16_i32_0 : i32
    %c15_i32 = arith.constant 15 : i32
    %2 = arith.minsi %1, %c15_i32 : i32
    %c0_i32 = arith.constant 0 : i32
    %c0_i32_1 = arith.constant 0 : i32
    %c0_i32_2 = arith.constant 0 : i32
    return %arg0, %2, %c0_i32, %c0_i32_1 : i32, i32, i32, i32
  }
  func.func @transform_3(%arg0: i32, %arg1: i32) -> (i32, i32, i32) {
    %c0_i32 = arith.constant 0 : i32
    %c0_i32_0 = arith.constant 0 : i32
    %c0_i32_1 = arith.constant 0 : i32
    %c0_i32_2 = arith.constant 0 : i32
    return %c0_i32, %c0_i32_0, %c0_i32_1 : i32, i32, i32
  }
  func.func @transform_4(%arg0: i32, %arg1: i32) -> (i32, i32) {
    %c0_i32 = arith.constant 0 : i32
    %c0_i32_0 = arith.constant 0 : i32
    %c0_i32_1 = arith.constant 0 : i32
    return %c0_i32, %c0_i32_0 : i32, i32
  }
  func.func @transform_5(%arg0: i32, %arg1: i32) -> (i32, i32, i32, i32) {
    %c0_i32 = arith.constant 0 : i32
    %c0_i32_0 = arith.constant 0 : i32
    %c0_i32_1 = arith.constant 0 : i32
    return %arg0, %arg1, %c0_i32, %c0_i32_0 : i32, i32, i32, i32
  }
  func.func @transform_6(%arg0: i32, %arg1: i32) -> (i32, i32, i32, i32) {
    %c0_i32 = arith.constant 0 : i32
    %c0_i32_0 = arith.constant 0 : i32
    %c0_i32_1 = arith.constant 0 : i32
    return %arg0, %arg1, %c0_i32, %c0_i32_0 : i32, i32, i32, i32
  }
}

module attributes {stable_mosaic.version = 11 : i64} {
  func.func @kernel(%arg0: i32, %arg1: i32, %arg2: memref<1x1x8x64xf32, #tpu.memory_space<vmem>>, %arg3: memref<1x8x8x64xf32, #tpu.memory_space<vmem>>, %arg4: memref<1x1x8x64xf32, #tpu.memory_space<vmem>>, %arg5: memref<3x192x128xbf16, #tpu.memory_space<vmem>>, %arg6: memref<1x128xf32, #tpu.memory_space<vmem>>, %arg7: memref<1x8x8x128xf32, #tpu.memory_space<vmem>>) attributes {dimension_semantics = [#tpu.dimension_semantics<parallel>, #tpu.dimension_semantics<parallel>], iteration_bounds = array<i64: 4, 1>, scalar_prefetch = 0 : i64, scratch_operands = 0 : i64, tpu.core_type = #tpu.core_type<tc>, window_params = [{transform_indices = @transform_0, window_bounds = array<i64: 1, 1, 8, 64>}, {transform_indices = @transform_1, window_bounds = array<i64: 1, 8, 8, 64>}, {transform_indices = @transform_2, window_bounds = array<i64: 1, 1, 8, 64>}, {pipeline_mode = #tpu.pipeline_mode<synchronous>, transform_indices = @transform_3, window_bounds = array<i64: 3, 192, 128>}, {pipeline_mode = #tpu.pipeline_mode<synchronous>, transform_indices = @transform_4, window_bounds = array<i64: 1, 128>}, {transform_indices = @transform_5, window_bounds = array<i64: 1, 8, 8, 128>}]} {
    %c0_i32 = arith.constant 0 : i32
    %0 = arith.cmpi sgt, %arg1, %c0_i32 : i32
    %1 = arith.extui %0 : i1 to i32
    %2 = arith.sitofp %1 : i32 to f32
    %c0_i32_0 = arith.constant 0 : i32
    %3 = arith.cmpi slt, %arg1, %c0_i32_0 : i32
    %4 = arith.extui %3 : i1 to i32
    %5 = arith.sitofp %4 : i32 to f32
    %c0 = arith.constant 0 : index
    %c0_1 = arith.constant 0 : index
    %c0_2 = arith.constant 0 : index
    %c0_3 = arith.constant 0 : index
    %6 = vector.load %arg3[%c0, %c0_1, %c0_2, %c0_3] : memref<1x8x8x64xf32, #tpu.memory_space<vmem>>, vector<1x8x8x64xf32>
    %7 = vector.shape_cast %6 : vector<1x8x8x64xf32> to vector<8x8x64xf32>
    %8 = arith.truncf %7 : vector<8x8x64xf32> to vector<8x8x64xbf16>
    %c0_4 = arith.constant 0 : index
    %c0_5 = arith.constant 0 : index
    %c0_6 = arith.constant 0 : index
    %c0_7 = arith.constant 0 : index
    %9 = vector.load %arg2[%c0_4, %c0_5, %c0_6, %c0_7] : memref<1x1x8x64xf32, #tpu.memory_space<vmem>>, vector<1x1x8x64xf32>
    %10 = vector.shape_cast %9 : vector<1x1x8x64xf32> to vector<1x8x64xf32>
    %11 = vector.broadcast %2 : f32 to vector<1x8x64xf32>
    %12 = arith.mulf %10, %11 : vector<1x8x64xf32>
    %13 = arith.truncf %12 : vector<1x8x64xf32> to vector<1x8x64xbf16>
    %c0_8 = arith.constant 0 : index
    %c0_9 = arith.constant 0 : index
    %c0_10 = arith.constant 0 : index
    %c0_11 = arith.constant 0 : index
    %14 = vector.load %arg4[%c0_8, %c0_9, %c0_10, %c0_11] : memref<1x1x8x64xf32, #tpu.memory_space<vmem>>, vector<1x1x8x64xf32>
    %15 = vector.shape_cast %14 : vector<1x1x8x64xf32> to vector<1x8x64xf32>
    %16 = vector.broadcast %5 : f32 to vector<1x8x64xf32>
    %17 = arith.mulf %15, %16 : vector<1x8x64xf32>
    %18 = arith.truncf %17 : vector<1x8x64xf32> to vector<1x8x64xbf16>
    %cst = arith.constant 0.000000e+00 : bf16
    %19 = vector.broadcast %cst : bf16 to vector<10x1x64xbf16>
    %20 = tpu.concatenate %13, %8, %18 in 0 : vector<1x8x64xbf16>, vector<8x8x64xbf16>, vector<1x8x64xbf16> -> vector<10x8x64xbf16>
    %21 = tpu.concatenate %19, %20, %19 in 1 : vector<10x1x64xbf16>, vector<10x8x64xbf16>, vector<10x1x64xbf16> -> vector<10x10x64xbf16>
    %c0_12 = arith.constant 0 : index
    %c0_13 = arith.constant 0 : index
    %c0_14 = arith.constant 0 : index
    %22 = vector.load %arg5[%c0_12, %c0_13, %c0_14] : memref<3x192x128xbf16, #tpu.memory_space<vmem>>, vector<3x192x128xbf16>
    %cst_15 = arith.constant 0.000000e+00 : f32
    %23 = vector.broadcast %cst_15 : f32 to vector<64x128xf32>
    %24 = vector.extract_strided_slice %21 {offsets = [0, 0, 0], sizes = [8, 8, 64], strides = [1, 1, 1]} : vector<10x10x64xbf16> to vector<8x8x64xbf16>
    %25 = vector.extract_strided_slice %21 {offsets = [0, 1, 0], sizes = [8, 8, 64], strides = [1, 1, 1]} : vector<10x10x64xbf16> to vector<8x8x64xbf16>
    %26 = vector.extract_strided_slice %21 {offsets = [0, 2, 0], sizes = [8, 8, 64], strides = [1, 1, 1]} : vector<10x10x64xbf16> to vector<8x8x64xbf16>
    %27 = tpu.concatenate %24, %25, %26 in 2 : vector<8x8x64xbf16>, vector<8x8x64xbf16>, vector<8x8x64xbf16> -> vector<8x8x192xbf16>
    %28 = vector.shape_cast %27 : vector<8x8x192xbf16> to vector<64x192xbf16>
    %29 = vector.extract_strided_slice %22 {offsets = [0, 0, 0], sizes = [1, 192, 128], strides = [1, 1, 1]} : vector<3x192x128xbf16> to vector<1x192x128xbf16>
    %30 = vector.shape_cast %29 : vector<1x192x128xbf16> to vector<192x128xbf16>
    %cst_16 = arith.constant dense<0.000000e+00> : vector<64x128xf32>
    %31 = tpu.matmul %28, %30, %cst_16 {dimension_numbers = #tpu.dot_dimension_numbers<[1], [0], [0], [1], [0, 0, 1, 1], [], []>} : vector<64x192xbf16>, vector<192x128xbf16>, vector<64x128xf32> -> vector<64x128xf32>
    %32 = arith.addf %23, %31 : vector<64x128xf32>
    %33 = vector.extract_strided_slice %21 {offsets = [1, 0, 0], sizes = [8, 8, 64], strides = [1, 1, 1]} : vector<10x10x64xbf16> to vector<8x8x64xbf16>
    %34 = vector.extract_strided_slice %21 {offsets = [1, 1, 0], sizes = [8, 8, 64], strides = [1, 1, 1]} : vector<10x10x64xbf16> to vector<8x8x64xbf16>
    %35 = vector.extract_strided_slice %21 {offsets = [1, 2, 0], sizes = [8, 8, 64], strides = [1, 1, 1]} : vector<10x10x64xbf16> to vector<8x8x64xbf16>
    %36 = tpu.concatenate %33, %34, %35 in 2 : vector<8x8x64xbf16>, vector<8x8x64xbf16>, vector<8x8x64xbf16> -> vector<8x8x192xbf16>
    %37 = vector.shape_cast %36 : vector<8x8x192xbf16> to vector<64x192xbf16>
    %38 = vector.extract_strided_slice %22 {offsets = [1, 0, 0], sizes = [1, 192, 128], strides = [1, 1, 1]} : vector<3x192x128xbf16> to vector<1x192x128xbf16>
    %39 = vector.shape_cast %38 : vector<1x192x128xbf16> to vector<192x128xbf16>
    %cst_17 = arith.constant dense<0.000000e+00> : vector<64x128xf32>
    %40 = tpu.matmul %37, %39, %cst_17 {dimension_numbers = #tpu.dot_dimension_numbers<[1], [0], [0], [1], [0, 0, 1, 1], [], []>} : vector<64x192xbf16>, vector<192x128xbf16>, vector<64x128xf32> -> vector<64x128xf32>
    %41 = arith.addf %32, %40 : vector<64x128xf32>
    %42 = vector.extract_strided_slice %21 {offsets = [2, 0, 0], sizes = [8, 8, 64], strides = [1, 1, 1]} : vector<10x10x64xbf16> to vector<8x8x64xbf16>
    %43 = vector.extract_strided_slice %21 {offsets = [2, 1, 0], sizes = [8, 8, 64], strides = [1, 1, 1]} : vector<10x10x64xbf16> to vector<8x8x64xbf16>
    %44 = vector.extract_strided_slice %21 {offsets = [2, 2, 0], sizes = [8, 8, 64], strides = [1, 1, 1]} : vector<10x10x64xbf16> to vector<8x8x64xbf16>
    %45 = tpu.concatenate %42, %43, %44 in 2 : vector<8x8x64xbf16>, vector<8x8x64xbf16>, vector<8x8x64xbf16> -> vector<8x8x192xbf16>
    %46 = vector.shape_cast %45 : vector<8x8x192xbf16> to vector<64x192xbf16>
    %47 = vector.extract_strided_slice %22 {offsets = [2, 0, 0], sizes = [1, 192, 128], strides = [1, 1, 1]} : vector<3x192x128xbf16> to vector<1x192x128xbf16>
    %48 = vector.shape_cast %47 : vector<1x192x128xbf16> to vector<192x128xbf16>
    %cst_18 = arith.constant dense<0.000000e+00> : vector<64x128xf32>
    %49 = tpu.matmul %46, %48, %cst_18 {dimension_numbers = #tpu.dot_dimension_numbers<[1], [0], [0], [1], [0, 0, 1, 1], [], []>} : vector<64x192xbf16>, vector<192x128xbf16>, vector<64x128xf32> -> vector<64x128xf32>
    %50 = arith.addf %41, %49 : vector<64x128xf32>
    %c0_19 = arith.constant 0 : index
    %c0_20 = arith.constant 0 : index
    %51 = vector.load %arg6[%c0_19, %c0_20] : memref<1x128xf32, #tpu.memory_space<vmem>>, vector<1x128xf32>
    %52 = vector.broadcast %51 : vector<1x128xf32> to vector<64x128xf32>
    %53 = arith.addf %50, %52 : vector<64x128xf32>
    %cst_21 = arith.constant 0.000000e+00 : f32
    %54 = vector.broadcast %cst_21 : f32 to vector<64x128xf32>
    %55 = arith.maximumf %53, %54 : vector<64x128xf32>
    %56 = vector.shape_cast %55 : vector<64x128xf32> to vector<8x8x128xf32>
    %c0_22 = arith.constant 0 : index
    %c0_23 = arith.constant 0 : index
    %c0_24 = arith.constant 0 : index
    %c0_25 = arith.constant 0 : index
    %57 = vector.load %arg7[%c0_22, %c0_23, %c0_24, %c0_25] : memref<1x8x8x128xf32, #tpu.memory_space<vmem>>, vector<1x8x8x128xf32>
    %58 = vector.shape_cast %57 : vector<1x8x8x128xf32> to vector<8x8x128xf32>
    %59 = vector.shape_cast %56 : vector<8x8x128xf32> to vector<1x8x8x128xf32>
    tpu.vector_store %arg7[%c0_22, %c0_23, %c0_24, %c0_25], %59 {strides = array<i32>} : memref<1x8x8x128xf32, #tpu.memory_space<vmem>>, vector<1x8x8x128xf32>,
    return
  }
  func.func @transform_0(%arg0: i32, %arg1: i32) -> (i32, i32, i32, i32) {
    %c8_i32 = arith.constant 8 : i32
    %0 = arith.muli %arg1, %c8_i32 : i32
    %c1_i32 = arith.constant 1 : i32
    %1 = arith.subi %0, %c1_i32 : i32
    %c0_i32 = arith.constant 0 : i32
    %2 = arith.maxsi %1, %c0_i32 : i32
    %c0_i32_0 = arith.constant 0 : i32
    %c0_i32_1 = arith.constant 0 : i32
    %c0_i32_2 = arith.constant 0 : i32
    return %arg0, %2, %c0_i32_0, %c0_i32_1 : i32, i32, i32, i32
  }
  func.func @transform_1(%arg0: i32, %arg1: i32) -> (i32, i32, i32, i32) {
    %c0_i32 = arith.constant 0 : i32
    %c0_i32_0 = arith.constant 0 : i32
    %c0_i32_1 = arith.constant 0 : i32
    return %arg0, %arg1, %c0_i32, %c0_i32_0 : i32, i32, i32, i32
  }
  func.func @transform_2(%arg0: i32, %arg1: i32) -> (i32, i32, i32, i32) {
    %c8_i32 = arith.constant 8 : i32
    %0 = arith.muli %arg1, %c8_i32 : i32
    %c8_i32_0 = arith.constant 8 : i32
    %1 = arith.addi %0, %c8_i32_0 : i32
    %c7_i32 = arith.constant 7 : i32
    %2 = arith.minsi %1, %c7_i32 : i32
    %c0_i32 = arith.constant 0 : i32
    %c0_i32_1 = arith.constant 0 : i32
    %c0_i32_2 = arith.constant 0 : i32
    return %arg0, %2, %c0_i32, %c0_i32_1 : i32, i32, i32, i32
  }
  func.func @transform_3(%arg0: i32, %arg1: i32) -> (i32, i32, i32) {
    %c0_i32 = arith.constant 0 : i32
    %c0_i32_0 = arith.constant 0 : i32
    %c0_i32_1 = arith.constant 0 : i32
    %c0_i32_2 = arith.constant 0 : i32
    return %c0_i32, %c0_i32_0, %c0_i32_1 : i32, i32, i32
  }
  func.func @transform_4(%arg0: i32, %arg1: i32) -> (i32, i32) {
    %c0_i32 = arith.constant 0 : i32
    %c0_i32_0 = arith.constant 0 : i32
    %c0_i32_1 = arith.constant 0 : i32
    return %c0_i32, %c0_i32_0 : i32, i32
  }
  func.func @transform_5(%arg0: i32, %arg1: i32) -> (i32, i32, i32, i32) {
    %c0_i32 = arith.constant 0 : i32
    %c0_i32_0 = arith.constant 0 : i32
    %c0_i32_1 = arith.constant 0 : i32
    return %arg0, %arg1, %c0_i32, %c0_i32_0 : i32, i32, i32, i32
  }
}

module attributes {stable_mosaic.version = 11 : i64} {
  func.func @kernel(%arg0: i32, %arg1: i32, %arg2: memref<1x1x8x128xf32, #tpu.memory_space<vmem>>, %arg3: memref<1x8x8x128xf32, #tpu.memory_space<vmem>>, %arg4: memref<1x1x8x128xf32, #tpu.memory_space<vmem>>, %arg5: memref<3x384x128xbf16, #tpu.memory_space<vmem>>, %arg6: memref<1x128xf32, #tpu.memory_space<vmem>>, %arg7: memref<1x8x8x128xf32, #tpu.memory_space<vmem>>) attributes {dimension_semantics = [#tpu.dimension_semantics<parallel>, #tpu.dimension_semantics<parallel>], iteration_bounds = array<i64: 4, 1>, scalar_prefetch = 0 : i64, scratch_operands = 0 : i64, tpu.core_type = #tpu.core_type<tc>, window_params = [{transform_indices = @transform_0, window_bounds = array<i64: 1, 1, 8, 128>}, {transform_indices = @transform_1, window_bounds = array<i64: 1, 8, 8, 128>}, {transform_indices = @transform_2, window_bounds = array<i64: 1, 1, 8, 128>}, {pipeline_mode = #tpu.pipeline_mode<synchronous>, transform_indices = @transform_3, window_bounds = array<i64: 3, 384, 128>}, {pipeline_mode = #tpu.pipeline_mode<synchronous>, transform_indices = @transform_4, window_bounds = array<i64: 1, 128>}, {transform_indices = @transform_5, window_bounds = array<i64: 1, 8, 8, 128>}]} {
    %c0_i32 = arith.constant 0 : i32
    %0 = arith.cmpi sgt, %arg1, %c0_i32 : i32
    %1 = arith.extui %0 : i1 to i32
    %2 = arith.sitofp %1 : i32 to f32
    %c0_i32_0 = arith.constant 0 : i32
    %3 = arith.cmpi slt, %arg1, %c0_i32_0 : i32
    %4 = arith.extui %3 : i1 to i32
    %5 = arith.sitofp %4 : i32 to f32
    %c0 = arith.constant 0 : index
    %c0_1 = arith.constant 0 : index
    %c0_2 = arith.constant 0 : index
    %c0_3 = arith.constant 0 : index
    %6 = vector.load %arg3[%c0, %c0_1, %c0_2, %c0_3] : memref<1x8x8x128xf32, #tpu.memory_space<vmem>>, vector<1x8x8x128xf32>
    %7 = vector.shape_cast %6 : vector<1x8x8x128xf32> to vector<8x8x128xf32>
    %8 = arith.truncf %7 : vector<8x8x128xf32> to vector<8x8x128xbf16>
    %c0_4 = arith.constant 0 : index
    %c0_5 = arith.constant 0 : index
    %c0_6 = arith.constant 0 : index
    %c0_7 = arith.constant 0 : index
    %9 = vector.load %arg2[%c0_4, %c0_5, %c0_6, %c0_7] : memref<1x1x8x128xf32, #tpu.memory_space<vmem>>, vector<1x1x8x128xf32>
    %10 = vector.shape_cast %9 : vector<1x1x8x128xf32> to vector<1x8x128xf32>
    %11 = vector.broadcast %2 : f32 to vector<1x8x128xf32>
    %12 = arith.mulf %10, %11 : vector<1x8x128xf32>
    %13 = arith.truncf %12 : vector<1x8x128xf32> to vector<1x8x128xbf16>
    %c0_8 = arith.constant 0 : index
    %c0_9 = arith.constant 0 : index
    %c0_10 = arith.constant 0 : index
    %c0_11 = arith.constant 0 : index
    %14 = vector.load %arg4[%c0_8, %c0_9, %c0_10, %c0_11] : memref<1x1x8x128xf32, #tpu.memory_space<vmem>>, vector<1x1x8x128xf32>
    %15 = vector.shape_cast %14 : vector<1x1x8x128xf32> to vector<1x8x128xf32>
    %16 = vector.broadcast %5 : f32 to vector<1x8x128xf32>
    %17 = arith.mulf %15, %16 : vector<1x8x128xf32>
    %18 = arith.truncf %17 : vector<1x8x128xf32> to vector<1x8x128xbf16>
    %cst = arith.constant 0.000000e+00 : bf16
    %19 = vector.broadcast %cst : bf16 to vector<10x1x128xbf16>
    %20 = tpu.concatenate %13, %8, %18 in 0 : vector<1x8x128xbf16>, vector<8x8x128xbf16>, vector<1x8x128xbf16> -> vector<10x8x128xbf16>
    %21 = tpu.concatenate %19, %20, %19 in 1 : vector<10x1x128xbf16>, vector<10x8x128xbf16>, vector<10x1x128xbf16> -> vector<10x10x128xbf16>
    %c0_12 = arith.constant 0 : index
    %c0_13 = arith.constant 0 : index
    %c0_14 = arith.constant 0 : index
    %22 = vector.load %arg5[%c0_12, %c0_13, %c0_14] : memref<3x384x128xbf16, #tpu.memory_space<vmem>>, vector<3x384x128xbf16>
    %cst_15 = arith.constant 0.000000e+00 : f32
    %23 = vector.broadcast %cst_15 : f32 to vector<64x128xf32>
    %24 = vector.extract_strided_slice %21 {offsets = [0, 0, 0], sizes = [8, 8, 128], strides = [1, 1, 1]} : vector<10x10x128xbf16> to vector<8x8x128xbf16>
    %25 = vector.extract_strided_slice %21 {offsets = [0, 1, 0], sizes = [8, 8, 128], strides = [1, 1, 1]} : vector<10x10x128xbf16> to vector<8x8x128xbf16>
    %26 = vector.extract_strided_slice %21 {offsets = [0, 2, 0], sizes = [8, 8, 128], strides = [1, 1, 1]} : vector<10x10x128xbf16> to vector<8x8x128xbf16>
    %27 = tpu.concatenate %24, %25, %26 in 2 : vector<8x8x128xbf16>, vector<8x8x128xbf16>, vector<8x8x128xbf16> -> vector<8x8x384xbf16>
    %28 = vector.shape_cast %27 : vector<8x8x384xbf16> to vector<64x384xbf16>
    %29 = vector.extract_strided_slice %22 {offsets = [0, 0, 0], sizes = [1, 384, 128], strides = [1, 1, 1]} : vector<3x384x128xbf16> to vector<1x384x128xbf16>
    %30 = vector.shape_cast %29 : vector<1x384x128xbf16> to vector<384x128xbf16>
    %cst_16 = arith.constant dense<0.000000e+00> : vector<64x128xf32>
    %31 = tpu.matmul %28, %30, %cst_16 {dimension_numbers = #tpu.dot_dimension_numbers<[1], [0], [0], [1], [0, 0, 1, 1], [], []>} : vector<64x384xbf16>, vector<384x128xbf16>, vector<64x128xf32> -> vector<64x128xf32>
    %32 = arith.addf %23, %31 : vector<64x128xf32>
    %33 = vector.extract_strided_slice %21 {offsets = [1, 0, 0], sizes = [8, 8, 128], strides = [1, 1, 1]} : vector<10x10x128xbf16> to vector<8x8x128xbf16>
    %34 = vector.extract_strided_slice %21 {offsets = [1, 1, 0], sizes = [8, 8, 128], strides = [1, 1, 1]} : vector<10x10x128xbf16> to vector<8x8x128xbf16>
    %35 = vector.extract_strided_slice %21 {offsets = [1, 2, 0], sizes = [8, 8, 128], strides = [1, 1, 1]} : vector<10x10x128xbf16> to vector<8x8x128xbf16>
    %36 = tpu.concatenate %33, %34, %35 in 2 : vector<8x8x128xbf16>, vector<8x8x128xbf16>, vector<8x8x128xbf16> -> vector<8x8x384xbf16>
    %37 = vector.shape_cast %36 : vector<8x8x384xbf16> to vector<64x384xbf16>
    %38 = vector.extract_strided_slice %22 {offsets = [1, 0, 0], sizes = [1, 384, 128], strides = [1, 1, 1]} : vector<3x384x128xbf16> to vector<1x384x128xbf16>
    %39 = vector.shape_cast %38 : vector<1x384x128xbf16> to vector<384x128xbf16>
    %cst_17 = arith.constant dense<0.000000e+00> : vector<64x128xf32>
    %40 = tpu.matmul %37, %39, %cst_17 {dimension_numbers = #tpu.dot_dimension_numbers<[1], [0], [0], [1], [0, 0, 1, 1], [], []>} : vector<64x384xbf16>, vector<384x128xbf16>, vector<64x128xf32> -> vector<64x128xf32>
    %41 = arith.addf %32, %40 : vector<64x128xf32>
    %42 = vector.extract_strided_slice %21 {offsets = [2, 0, 0], sizes = [8, 8, 128], strides = [1, 1, 1]} : vector<10x10x128xbf16> to vector<8x8x128xbf16>
    %43 = vector.extract_strided_slice %21 {offsets = [2, 1, 0], sizes = [8, 8, 128], strides = [1, 1, 1]} : vector<10x10x128xbf16> to vector<8x8x128xbf16>
    %44 = vector.extract_strided_slice %21 {offsets = [2, 2, 0], sizes = [8, 8, 128], strides = [1, 1, 1]} : vector<10x10x128xbf16> to vector<8x8x128xbf16>
    %45 = tpu.concatenate %42, %43, %44 in 2 : vector<8x8x128xbf16>, vector<8x8x128xbf16>, vector<8x8x128xbf16> -> vector<8x8x384xbf16>
    %46 = vector.shape_cast %45 : vector<8x8x384xbf16> to vector<64x384xbf16>
    %47 = vector.extract_strided_slice %22 {offsets = [2, 0, 0], sizes = [1, 384, 128], strides = [1, 1, 1]} : vector<3x384x128xbf16> to vector<1x384x128xbf16>
    %48 = vector.shape_cast %47 : vector<1x384x128xbf16> to vector<384x128xbf16>
    %cst_18 = arith.constant dense<0.000000e+00> : vector<64x128xf32>
    %49 = tpu.matmul %46, %48, %cst_18 {dimension_numbers = #tpu.dot_dimension_numbers<[1], [0], [0], [1], [0, 0, 1, 1], [], []>} : vector<64x384xbf16>, vector<384x128xbf16>, vector<64x128xf32> -> vector<64x128xf32>
    %50 = arith.addf %41, %49 : vector<64x128xf32>
    %c0_19 = arith.constant 0 : index
    %c0_20 = arith.constant 0 : index
    %51 = vector.load %arg6[%c0_19, %c0_20] : memref<1x128xf32, #tpu.memory_space<vmem>>, vector<1x128xf32>
    %52 = vector.broadcast %51 : vector<1x128xf32> to vector<64x128xf32>
    %53 = arith.addf %50, %52 : vector<64x128xf32>
    %cst_21 = arith.constant 0.000000e+00 : f32
    %54 = vector.broadcast %cst_21 : f32 to vector<64x128xf32>
    %55 = arith.maximumf %53, %54 : vector<64x128xf32>
    %56 = vector.shape_cast %55 : vector<64x128xf32> to vector<8x8x128xf32>
    %c0_22 = arith.constant 0 : index
    %c0_23 = arith.constant 0 : index
    %c0_24 = arith.constant 0 : index
    %c0_25 = arith.constant 0 : index
    %57 = vector.load %arg7[%c0_22, %c0_23, %c0_24, %c0_25] : memref<1x8x8x128xf32, #tpu.memory_space<vmem>>, vector<1x8x8x128xf32>
    %58 = vector.shape_cast %57 : vector<1x8x8x128xf32> to vector<8x8x128xf32>
    %59 = vector.shape_cast %56 : vector<8x8x128xf32> to vector<1x8x8x128xf32>
    tpu.vector_store %arg7[%c0_22, %c0_23, %c0_24, %c0_25], %59 {strides = array<i32>} : memref<1x8x8x128xf32, #tpu.memory_space<vmem>>, vector<1x8x8x128xf32>,
    return
  }
  func.func @transform_0(%arg0: i32, %arg1: i32) -> (i32, i32, i32, i32) {
    %c8_i32 = arith.constant 8 : i32
    %0 = arith.muli %arg1, %c8_i32 : i32
    %c1_i32 = arith.constant 1 : i32
    %1 = arith.subi %0, %c1_i32 : i32
    %c0_i32 = arith.constant 0 : i32
    %2 = arith.maxsi %1, %c0_i32 : i32
    %c0_i32_0 = arith.constant 0 : i32
    %c0_i32_1 = arith.constant 0 : i32
    %c0_i32_2 = arith.constant 0 : i32
    return %arg0, %2, %c0_i32_0, %c0_i32_1 : i32, i32, i32, i32
  }
  func.func @transform_1(%arg0: i32, %arg1: i32) -> (i32, i32, i32, i32) {
    %c0_i32 = arith.constant 0 : i32
    %c0_i32_0 = arith.constant 0 : i32
    %c0_i32_1 = arith.constant 0 : i32
    return %arg0, %arg1, %c0_i32, %c0_i32_0 : i32, i32, i32, i32
  }
  func.func @transform_2(%arg0: i32, %arg1: i32) -> (i32, i32, i32, i32) {
    %c8_i32 = arith.constant 8 : i32
    %0 = arith.muli %arg1, %c8_i32 : i32
    %c8_i32_0 = arith.constant 8 : i32
    %1 = arith.addi %0, %c8_i32_0 : i32
    %c7_i32 = arith.constant 7 : i32
    %2 = arith.minsi %1, %c7_i32 : i32
    %c0_i32 = arith.constant 0 : i32
    %c0_i32_1 = arith.constant 0 : i32
    %c0_i32_2 = arith.constant 0 : i32
    return %arg0, %2, %c0_i32, %c0_i32_1 : i32, i32, i32, i32
  }
  func.func @transform_3(%arg0: i32, %arg1: i32) -> (i32, i32, i32) {
    %c0_i32 = arith.constant 0 : i32
    %c0_i32_0 = arith.constant 0 : i32
    %c0_i32_1 = arith.constant 0 : i32
    %c0_i32_2 = arith.constant 0 : i32
    return %c0_i32, %c0_i32_0, %c0_i32_1 : i32, i32, i32
  }
  func.func @transform_4(%arg0: i32, %arg1: i32) -> (i32, i32) {
    %c0_i32 = arith.constant 0 : i32
    %c0_i32_0 = arith.constant 0 : i32
    %c0_i32_1 = arith.constant 0 : i32
    return %c0_i32, %c0_i32_0 : i32, i32
  }
  func.func @transform_5(%arg0: i32, %arg1: i32) -> (i32, i32, i32, i32) {
    %c0_i32 = arith.constant 0 : i32
    %c0_i32_0 = arith.constant 0 : i32
    %c0_i32_1 = arith.constant 0 : i32
    return %arg0, %arg1, %c0_i32, %c0_i32_0 : i32, i32, i32, i32
  }
}

module attributes {stable_mosaic.version = 11 : i64} {
  func.func @kernel(%arg0: i32, %arg1: memref<16x1024xf32, #tpu.memory_space<vmem>>, %arg2: memref<16x1024xf32, #tpu.memory_space<vmem>>, %arg3: memref<1x1024xf32, #tpu.memory_space<vmem>>, %arg4: memref<1x1xf32, #tpu.memory_space<vmem>>, %arg5: memref<1x1024xf32, #tpu.memory_space<vmem>>) attributes {dimension_semantics = [#tpu.dimension_semantics<arbitrary>], iteration_bounds = array<i64: 1>, scalar_prefetch = 0 : i64, scratch_operands = 1 : i64, tpu.core_type = #tpu.core_type<tc>, window_params = [{transform_indices = @transform_0, window_bounds = array<i64: 16, 1024>}, {transform_indices = @transform_1, window_bounds = array<i64: 16, 1024>}, {pipeline_mode = #tpu.pipeline_mode<synchronous>, transform_indices = @transform_2, window_bounds = array<i64: 1, 1024>}, {pipeline_mode = #tpu.pipeline_mode<synchronous>, transform_indices = @transform_3, window_bounds = array<i64: 1, 1>}]} {
    %c0_i32 = arith.constant 0 : i32
    %0 = arith.cmpi eq, %arg0, %c0_i32 : i32
    %1 = arith.extui %0 : i1 to i32
    %c0_i32_0 = arith.constant 0 : i32
    %2 = arith.cmpi ne, %1, %c0_i32_0 : i32
    scf.if %2 {
      %cst_12 = arith.constant 0.000000e+00 : f32
      %18 = vector.broadcast %cst_12 : f32 to vector<1x1024xf32>
      %c0_13 = arith.constant 0 : index
      %c0_14 = arith.constant 0 : index
      %19 = vector.load %arg5[%c0_13, %c0_14] : memref<1x1024xf32, #tpu.memory_space<vmem>>, vector<1x1024xf32>
      tpu.vector_store %arg5[%c0_13, %c0_14], %18 {strides = array<i32>} : memref<1x1024xf32, #tpu.memory_space<vmem>>, vector<1x1024xf32>,
    } else {
    }
    %c0 = arith.constant 0 : index
    %c0_1 = arith.constant 0 : index
    %3 = vector.load %arg1[%c0, %c0_1] : memref<16x1024xf32, #tpu.memory_space<vmem>>, vector<16x1024xf32>
    %c0_2 = arith.constant 0 : index
    %c0_3 = arith.constant 0 : index
    %4 = vector.load %arg2[%c0_2, %c0_3] : memref<16x1024xf32, #tpu.memory_space<vmem>>, vector<16x1024xf32>
    %5 = arith.subf %3, %4 : vector<16x1024xf32>
    %6 = math.absf %5 : vector<16x1024xf32>
    %c0_4 = arith.constant 0 : index
    %c0_5 = arith.constant 0 : index
    %7 = vector.load %arg3[%c0_4, %c0_5] : memref<1x1024xf32, #tpu.memory_space<vmem>>, vector<1x1024xf32>
    %8 = vector.broadcast %7 : vector<1x1024xf32> to vector<16x1024xf32>
    %9 = arith.mulf %6, %8 : vector<16x1024xf32>
    %c0_6 = arith.constant 0 : index
    %c0_7 = arith.constant 0 : index
    %10 = vector.load %arg5[%c0_6, %c0_7] : memref<1x1024xf32, #tpu.memory_space<vmem>>, vector<1x1024xf32>
    %cst = arith.constant dense<0.000000e+00> : vector<1024xf32>
    %11 = vector.multi_reduction <add>, %9, %cst [0] : vector<16x1024xf32> to vector<1024xf32>
    %12 = vector.shape_cast %11 : vector<1024xf32> to vector<1x1024xf32>
    %13 = arith.addf %10, %12 : vector<1x1024xf32>
    %c0_8 = arith.constant 0 : index
    %c0_9 = arith.constant 0 : index
    %14 = vector.load %arg5[%c0_8, %c0_9] : memref<1x1024xf32, #tpu.memory_space<vmem>>, vector<1x1024xf32>
    tpu.vector_store %arg5[%c0_8, %c0_9], %13 {strides = array<i32>} : memref<1x1024xf32, #tpu.memory_space<vmem>>, vector<1x1024xf32>,
    %c0_i32_10 = arith.constant 0 : i32
    %15 = arith.cmpi eq, %arg0, %c0_i32_10 : i32
    %16 = arith.extui %15 : i1 to i32
    %c0_i32_11 = arith.constant 0 : i32
    %17 = arith.cmpi ne, %16, %c0_i32_11 : i32
    scf.if %17 {
      %c0_12 = arith.constant 0 : index
      %c0_13 = arith.constant 0 : index
      %18 = vector.load %arg5[%c0_12, %c0_13] : memref<1x1024xf32, #tpu.memory_space<vmem>>, vector<1x1024xf32>
      %19 = vector.shape_cast %18 : vector<1x1024xf32> to vector<1x1x1024xf32>
      %cst_14 = arith.constant dense<0.000000e+00> : vector<1xf32>
      %20 = vector.multi_reduction <add>, %19, %cst_14 [1, 2] : vector<1x1x1024xf32> to vector<1xf32>
      %21 = vector.shape_cast %20 : vector<1xf32> to vector<1x1x1xf32>
      %22 = vector.extract %21[0, 0, 0] : f32 from vector<1x1x1xf32>
      %23 = vector.broadcast %22 : f32 to vector<1x1xf32>
      %c0_15 = arith.constant 0 : index
      %c0_16 = arith.constant 0 : index
      %24 = vector.load %arg4[%c0_15, %c0_16] : memref<1x1xf32, #tpu.memory_space<vmem>>, vector<1x1xf32>
      tpu.vector_store %arg4[%c0_15, %c0_16], %23 {strides = array<i32>} : memref<1x1xf32, #tpu.memory_space<vmem>>, vector<1x1xf32>,
    } else {
    }
    return
  }
  func.func @transform_0(%arg0: i32) -> (i32, i32) {
    %c0_i32 = arith.constant 0 : i32
    %c0_i32_0 = arith.constant 0 : i32
    return %arg0, %c0_i32 : i32, i32
  }
  func.func @transform_1(%arg0: i32) -> (i32, i32) {
    %c1_i32 = arith.constant 1 : i32
    %0 = arith.addi %arg0, %c1_i32 : i32
    %c0_i32 = arith.constant 0 : i32
    %c0_i32_0 = arith.constant 0 : i32
    return %0, %c0_i32 : i32, i32
  }
  func.func @transform_2(%arg0: i32) -> (i32, i32) {
    %c0_i32 = arith.constant 0 : i32
    %c0_i32_0 = arith.constant 0 : i32
    %c0_i32_1 = arith.constant 0 : i32
    return %c0_i32, %c0_i32_0 : i32, i32
  }
  func.func @transform_3(%arg0: i32) -> (i32, i32) {
    %c0_i32 = arith.constant 0 : i32
    %c0_i32_0 = arith.constant 0 : i32
    %c0_i32_1 = arith.constant 0 : i32
    return %c0_i32, %c0_i32_0 : i32, i32
  }
}

module attributes {stable_mosaic.version = 11 : i64} {
  func.func @kernel(%arg0: i32, %arg1: memref<32x1024xf32, #tpu.memory_space<vmem>>, %arg2: memref<32x1024xf32, #tpu.memory_space<vmem>>, %arg3: memref<1x1024xf32, #tpu.memory_space<vmem>>, %arg4: memref<1x1xf32, #tpu.memory_space<vmem>>, %arg5: memref<1x1024xf32, #tpu.memory_space<vmem>>) attributes {dimension_semantics = [#tpu.dimension_semantics<arbitrary>], iteration_bounds = array<i64: 1>, scalar_prefetch = 0 : i64, scratch_operands = 1 : i64, tpu.core_type = #tpu.core_type<tc>, window_params = [{transform_indices = @transform_0, window_bounds = array<i64: 32, 1024>}, {transform_indices = @transform_1, window_bounds = array<i64: 32, 1024>}, {pipeline_mode = #tpu.pipeline_mode<synchronous>, transform_indices = @transform_2, window_bounds = array<i64: 1, 1024>}, {pipeline_mode = #tpu.pipeline_mode<synchronous>, transform_indices = @transform_3, window_bounds = array<i64: 1, 1>}]} {
    %c0_i32 = arith.constant 0 : i32
    %0 = arith.cmpi eq, %arg0, %c0_i32 : i32
    %1 = arith.extui %0 : i1 to i32
    %c0_i32_0 = arith.constant 0 : i32
    %2 = arith.cmpi ne, %1, %c0_i32_0 : i32
    scf.if %2 {
      %cst_12 = arith.constant 0.000000e+00 : f32
      %18 = vector.broadcast %cst_12 : f32 to vector<1x1024xf32>
      %c0_13 = arith.constant 0 : index
      %c0_14 = arith.constant 0 : index
      %19 = vector.load %arg5[%c0_13, %c0_14] : memref<1x1024xf32, #tpu.memory_space<vmem>>, vector<1x1024xf32>
      tpu.vector_store %arg5[%c0_13, %c0_14], %18 {strides = array<i32>} : memref<1x1024xf32, #tpu.memory_space<vmem>>, vector<1x1024xf32>,
    } else {
    }
    %c0 = arith.constant 0 : index
    %c0_1 = arith.constant 0 : index
    %3 = vector.load %arg1[%c0, %c0_1] : memref<32x1024xf32, #tpu.memory_space<vmem>>, vector<32x1024xf32>
    %c0_2 = arith.constant 0 : index
    %c0_3 = arith.constant 0 : index
    %4 = vector.load %arg2[%c0_2, %c0_3] : memref<32x1024xf32, #tpu.memory_space<vmem>>, vector<32x1024xf32>
    %5 = arith.subf %3, %4 : vector<32x1024xf32>
    %6 = math.absf %5 : vector<32x1024xf32>
    %c0_4 = arith.constant 0 : index
    %c0_5 = arith.constant 0 : index
    %7 = vector.load %arg3[%c0_4, %c0_5] : memref<1x1024xf32, #tpu.memory_space<vmem>>, vector<1x1024xf32>
    %8 = vector.broadcast %7 : vector<1x1024xf32> to vector<32x1024xf32>
    %9 = arith.mulf %6, %8 : vector<32x1024xf32>
    %c0_6 = arith.constant 0 : index
    %c0_7 = arith.constant 0 : index
    %10 = vector.load %arg5[%c0_6, %c0_7] : memref<1x1024xf32, #tpu.memory_space<vmem>>, vector<1x1024xf32>
    %cst = arith.constant dense<0.000000e+00> : vector<1024xf32>
    %11 = vector.multi_reduction <add>, %9, %cst [0] : vector<32x1024xf32> to vector<1024xf32>
    %12 = vector.shape_cast %11 : vector<1024xf32> to vector<1x1024xf32>
    %13 = arith.addf %10, %12 : vector<1x1024xf32>
    %c0_8 = arith.constant 0 : index
    %c0_9 = arith.constant 0 : index
    %14 = vector.load %arg5[%c0_8, %c0_9] : memref<1x1024xf32, #tpu.memory_space<vmem>>, vector<1x1024xf32>
    tpu.vector_store %arg5[%c0_8, %c0_9], %13 {strides = array<i32>} : memref<1x1024xf32, #tpu.memory_space<vmem>>, vector<1x1024xf32>,
    %c0_i32_10 = arith.constant 0 : i32
    %15 = arith.cmpi eq, %arg0, %c0_i32_10 : i32
    %16 = arith.extui %15 : i1 to i32
    %c0_i32_11 = arith.constant 0 : i32
    %17 = arith.cmpi ne, %16, %c0_i32_11 : i32
    scf.if %17 {
      %c0_12 = arith.constant 0 : index
      %c0_13 = arith.constant 0 : index
      %18 = vector.load %arg5[%c0_12, %c0_13] : memref<1x1024xf32, #tpu.memory_space<vmem>>, vector<1x1024xf32>
      %19 = vector.shape_cast %18 : vector<1x1024xf32> to vector<1x1x1024xf32>
      %cst_14 = arith.constant dense<0.000000e+00> : vector<1xf32>
      %20 = vector.multi_reduction <add>, %19, %cst_14 [1, 2] : vector<1x1x1024xf32> to vector<1xf32>
      %21 = vector.shape_cast %20 : vector<1xf32> to vector<1x1x1xf32>
      %22 = vector.extract %21[0, 0, 0] : f32 from vector<1x1x1xf32>
      %23 = vector.broadcast %22 : f32 to vector<1x1xf32>
      %c0_15 = arith.constant 0 : index
      %c0_16 = arith.constant 0 : index
      %24 = vector.load %arg4[%c0_15, %c0_16] : memref<1x1xf32, #tpu.memory_space<vmem>>, vector<1x1xf32>
      tpu.vector_store %arg4[%c0_15, %c0_16], %23 {strides = array<i32>} : memref<1x1xf32, #tpu.memory_space<vmem>>, vector<1x1xf32>,
    } else {
    }
    return
  }
  func.func @transform_0(%arg0: i32) -> (i32, i32) {
    %c0_i32 = arith.constant 0 : i32
    %c0_i32_0 = arith.constant 0 : i32
    return %arg0, %c0_i32 : i32, i32
  }
  func.func @transform_1(%arg0: i32) -> (i32, i32) {
    %c1_i32 = arith.constant 1 : i32
    %0 = arith.addi %arg0, %c1_i32 : i32
    %c0_i32 = arith.constant 0 : i32
    %c0_i32_0 = arith.constant 0 : i32
    return %0, %c0_i32 : i32, i32
  }
  func.func @transform_2(%arg0: i32) -> (i32, i32) {
    %c0_i32 = arith.constant 0 : i32
    %c0_i32_0 = arith.constant 0 : i32
    %c0_i32_1 = arith.constant 0 : i32
    return %c0_i32, %c0_i32_0 : i32, i32
  }
  func.func @transform_3(%arg0: i32) -> (i32, i32) {
    %c0_i32 = arith.constant 0 : i32
    %c0_i32_0 = arith.constant 0 : i32
    %c0_i32_1 = arith.constant 0 : i32
    return %c0_i32, %c0_i32_0 : i32, i32
  }
}

module attributes {stable_mosaic.version = 11 : i64} {
  func.func @kernel(%arg0: i32, %arg1: memref<32x48xf32, #tpu.memory_space<vmem>>, %arg2: memref<32x48xf32, #tpu.memory_space<vmem>>, %arg3: memref<1x48xf32, #tpu.memory_space<vmem>>, %arg4: memref<1x1xf32, #tpu.memory_space<vmem>>, %arg5: memref<1x48xf32, #tpu.memory_space<vmem>>) attributes {dimension_semantics = [#tpu.dimension_semantics<arbitrary>], iteration_bounds = array<i64: 1>, scalar_prefetch = 0 : i64, scratch_operands = 1 : i64, tpu.core_type = #tpu.core_type<tc>, window_params = [{transform_indices = @transform_0, window_bounds = array<i64: 32, 48>}, {transform_indices = @transform_1, window_bounds = array<i64: 32, 48>}, {pipeline_mode = #tpu.pipeline_mode<synchronous>, transform_indices = @transform_2, window_bounds = array<i64: 1, 48>}, {pipeline_mode = #tpu.pipeline_mode<synchronous>, transform_indices = @transform_3, window_bounds = array<i64: 1, 1>}]} {
    %c0_i32 = arith.constant 0 : i32
    %0 = arith.cmpi eq, %arg0, %c0_i32 : i32
    %1 = arith.extui %0 : i1 to i32
    %c0_i32_0 = arith.constant 0 : i32
    %2 = arith.cmpi ne, %1, %c0_i32_0 : i32
    scf.if %2 {
      %cst_12 = arith.constant 0.000000e+00 : f32
      %18 = vector.broadcast %cst_12 : f32 to vector<1x48xf32>
      %c0_13 = arith.constant 0 : index
      %c0_14 = arith.constant 0 : index
      %19 = vector.load %arg5[%c0_13, %c0_14] : memref<1x48xf32, #tpu.memory_space<vmem>>, vector<1x48xf32>
      tpu.vector_store %arg5[%c0_13, %c0_14], %18 {strides = array<i32>} : memref<1x48xf32, #tpu.memory_space<vmem>>, vector<1x48xf32>,
    } else {
    }
    %c0 = arith.constant 0 : index
    %c0_1 = arith.constant 0 : index
    %3 = vector.load %arg1[%c0, %c0_1] : memref<32x48xf32, #tpu.memory_space<vmem>>, vector<32x48xf32>
    %c0_2 = arith.constant 0 : index
    %c0_3 = arith.constant 0 : index
    %4 = vector.load %arg2[%c0_2, %c0_3] : memref<32x48xf32, #tpu.memory_space<vmem>>, vector<32x48xf32>
    %5 = arith.subf %3, %4 : vector<32x48xf32>
    %6 = math.absf %5 : vector<32x48xf32>
    %c0_4 = arith.constant 0 : index
    %c0_5 = arith.constant 0 : index
    %7 = vector.load %arg3[%c0_4, %c0_5] : memref<1x48xf32, #tpu.memory_space<vmem>>, vector<1x48xf32>
    %8 = vector.broadcast %7 : vector<1x48xf32> to vector<32x48xf32>
    %9 = arith.mulf %6, %8 : vector<32x48xf32>
    %c0_6 = arith.constant 0 : index
    %c0_7 = arith.constant 0 : index
    %10 = vector.load %arg5[%c0_6, %c0_7] : memref<1x48xf32, #tpu.memory_space<vmem>>, vector<1x48xf32>
    %cst = arith.constant dense<0.000000e+00> : vector<48xf32>
    %11 = vector.multi_reduction <add>, %9, %cst [0] : vector<32x48xf32> to vector<48xf32>
    %12 = vector.shape_cast %11 : vector<48xf32> to vector<1x48xf32>
    %13 = arith.addf %10, %12 : vector<1x48xf32>
    %c0_8 = arith.constant 0 : index
    %c0_9 = arith.constant 0 : index
    %14 = vector.load %arg5[%c0_8, %c0_9] : memref<1x48xf32, #tpu.memory_space<vmem>>, vector<1x48xf32>
    tpu.vector_store %arg5[%c0_8, %c0_9], %13 {strides = array<i32>} : memref<1x48xf32, #tpu.memory_space<vmem>>, vector<1x48xf32>,
    %c0_i32_10 = arith.constant 0 : i32
    %15 = arith.cmpi eq, %arg0, %c0_i32_10 : i32
    %16 = arith.extui %15 : i1 to i32
    %c0_i32_11 = arith.constant 0 : i32
    %17 = arith.cmpi ne, %16, %c0_i32_11 : i32
    scf.if %17 {
      %c0_12 = arith.constant 0 : index
      %c0_13 = arith.constant 0 : index
      %18 = vector.load %arg5[%c0_12, %c0_13] : memref<1x48xf32, #tpu.memory_space<vmem>>, vector<1x48xf32>
      %19 = vector.shape_cast %18 : vector<1x48xf32> to vector<1x1x48xf32>
      %cst_14 = arith.constant dense<0.000000e+00> : vector<1xf32>
      %20 = vector.multi_reduction <add>, %19, %cst_14 [1, 2] : vector<1x1x48xf32> to vector<1xf32>
      %21 = vector.shape_cast %20 : vector<1xf32> to vector<1x1x1xf32>
      %22 = vector.extract %21[0, 0, 0] : f32 from vector<1x1x1xf32>
      %23 = vector.broadcast %22 : f32 to vector<1x1xf32>
      %c0_15 = arith.constant 0 : index
      %c0_16 = arith.constant 0 : index
      %24 = vector.load %arg4[%c0_15, %c0_16] : memref<1x1xf32, #tpu.memory_space<vmem>>, vector<1x1xf32>
      tpu.vector_store %arg4[%c0_15, %c0_16], %23 {strides = array<i32>} : memref<1x1xf32, #tpu.memory_space<vmem>>, vector<1x1xf32>,
    } else {
    }
    return
  }
  func.func @transform_0(%arg0: i32) -> (i32, i32) {
    %c0_i32 = arith.constant 0 : i32
    %c0_i32_0 = arith.constant 0 : i32
    return %arg0, %c0_i32 : i32, i32
  }
  func.func @transform_1(%arg0: i32) -> (i32, i32) {
    %c1_i32 = arith.constant 1 : i32
    %0 = arith.addi %arg0, %c1_i32 : i32
    %c0_i32 = arith.constant 0 : i32
    %c0_i32_0 = arith.constant 0 : i32
    return %0, %c0_i32 : i32, i32
  }
  func.func @transform_2(%arg0: i32) -> (i32, i32) {
    %c0_i32 = arith.constant 0 : i32
    %c0_i32_0 = arith.constant 0 : i32
    %c0_i32_1 = arith.constant 0 : i32
    return %c0_i32, %c0_i32_0 : i32, i32
  }
  func.func @transform_3(%arg0: i32) -> (i32, i32) {
    %c0_i32 = arith.constant 0 : i32
    %c0_i32_0 = arith.constant 0 : i32
    %c0_i32_1 = arith.constant 0 : i32
    return %c0_i32, %c0_i32_0 : i32, i32
  }
}

</mosaic_0001>

<bundles_post_ra>
// kernel: vgg_perceptual_loss.10
= control target key start
LH: loop header
LB: loop body
LE: loop exit
PB: predicated region body
PF: predicated region fallthrough
CT: control target
= control target key end

     0   :  { %s1609_s18 = smov 0   ;;  %s1611_s19 = smov 0   ;;  %s2007_s0 = inlined_call_operand.vmem [shape: f32[4,8,8,64], index: 0, kind: input, shape index: {}, may-alias: {0,1,2}]   ;;  %s2008_s1 = inlined_call_operand.vmem [shape: f32[4,8,8,64], index: 1, kind: input, shape index: {}, may-alias: {0,1,2}]   ;;  %s2009_s2 = inlined_call_operand.vmem [shape: f32[4,8,8,64], index: 2, kind: input, shape index: {}, may-alias: {0,1,2}]   ;;  %s2010_s3 = inlined_call_operand.vmem [shape: bf16[3,192,128], index: 3, kind: input, shape index: {}]   ;;  %s2011_s4 = inlined_call_operand.vmem [shape: f32[1,128], index: 4, kind: input, shape index: {}]   ;;  %s2012_s5 = inlined_call_operand.vmem [shape: f32[4,8,8,128], index: 5, kind: output, shape index: {}]  }
   0x1   :  { %s1613_s20 = smov 0  }
   0x2 LB: > { %s27_s21 = sadd.s32 1, %s1571_s19  ;;  %p1383_p0 = scmp.ge.s32.totalorder %s1575_s20, 1  ;;  %s1575_s20 = sphi %s1613_s20, %s15_s20   ;;  %s1571_s19 = sphi %s1611_s19, %s2018_s19   ;;  %s1567_s18 = sphi %s1609_s18, %s2017_s18  }
   0x3   : > { %p29_p1 = scmp.ge.s32.totalorder %s27_s21, 4  ;;  %p270_p2 = scmp.lt.s32.totalorder %s1575_s20, 5 }
   0x5   : > { %s2020_s21 = smov (%p29_p1, %s27_s21), 0  ;;  %p271_p3 = pnand %p1383_p0, %p270_p2 }
   0x6   : > { %p334_p4 = scmp.lt.s32.totalorder (!%p271_p3), %s1567_s18, 3  ;;  %v1517_v0 = vld [vmem:[%s2010_s3 + $0x60] sm:$0xff] (!%p271_p3)   ;;  %v1577_v1 = vmov (!%p271_p3), 0   ;;  %v1519_v3 = vld [vmem:[%s2010_s3 + $0x68] sm:$0xff] (!%p271_p3)   ;;  %vm493_vm0 = vcmask (!%p271_p3), 1040384   ;;  %vm506_vm2 = vcmask (!%p271_p3), 1044480  }
   0x7   : > { %274 = sbr.rel (%p271_p3) target bundleno = 436 (0x1b4), region = 40  ;;  %832 = vmatprep.subr.bf16.mxu0 (!%p271_p3), %v1577_v1  ;;  %993 = vmatprep.subr.bf16.mxu1 (!%p271_p3), %v1577_v1  ;;  %v1518_v2 = vld [vmem:[%s2010_s3] sm:$0xff] (!%p271_p3)   ;;  %v1520_v4 = vld [vmem:[%s2010_s3 + $0x8] sm:$0xff] (!%p271_p3)   ;;  %vm494_vm1 = vsmask.f32 (!%p271_p3), 256  ;;  %v1521_v27 = vld [vmem:[%s2010_s3 + $0x70] sm:$0xff] (!%p271_p3)  }
   0x8   : > { %833 = vmatpush1.bf16.msra.mxu0 (!%p271_p3), %v1517_v0  ;;  %994 = vmatpush1.bf16.msra.mxu1 (!%p271_p3), %v1518_v2  ;;  %vm507_vm3 = vsmask.f32 (!%p271_p3), 4352  ;;  %v1522_v28 = vld [vmem:[%s2010_s3 + $0x10] sm:$0xff] (!%p271_p3)   ;;  %vm1675_vm4 = vmand (!%p271_p3), %vm493_vm0, %vm494_vm1  ;;  %v1523_v47 = vld [vmem:[%s2010_s3 + $0x78] sm:$0xff] (!%p271_p3)   ;;  %vm679_vm6 = vcmask (!%p271_p3), 523264  }
   0x9   : > { %834 = vmatprep.subr.bf16.mxu0 (!%p271_p3), %v1577_v1  ;;  %995 = vmatprep.subr.bf16.mxu1 (!%p271_p3), %v1577_v1  ;;  %vm1682_vm5 = vmand (!%p271_p3), %vm506_vm2, %vm507_vm3  ;;  %v1524_v52 = vld [vmem:[%s2010_s3 + $0x18] sm:$0xff] (!%p271_p3)   ;;  %v1525_v53 = vld [vmem:[%s2010_s3 + $0x80] sm:$0xff] (!%p271_p3)  }
   0xc   : > { %835 = vmatpush1.bf16.msra.mxu0 (!%p271_p3), %v1519_v3  ;;  %996 = vmatpush1.bf16.msra.mxu1 (!%p271_p3), %v1520_v4 }
   0xd   : > { %836 = vmatprep.subr.bf16.mxu0 (!%p271_p3), %v1577_v1  ;;  %997 = vmatprep.subr.bf16.mxu1 (!%p271_p3), %v1577_v1 }
   0xe   : > { %s2022_s18 = smov (!%p334_p4, %s1567_s18), 3 }
   0xf   : > { %s1635_s26 = sshll.u32 %s2022_s18, 6 }
  0x10   : > { %s1645_s6 = scalar_lea.vmem %s2008_s1, %s1635_s26  ;;  %s341_s9 = scalar_lea.vmem %s2007_s0, %s1635_s26  ;;  %837 = vmatpush1.bf16.msra.mxu0 %v1521_v27  ;;  %998 = vmatpush1.bf16.msra.mxu1 %v1522_v28  ;;  %v1529_v28 = vld [vmem:[%s2010_s3 + $0x90] sm:$0xff]  }
  0x11   : > { %v390_v5 = vld [vmem:[%s1645_s6 + $0x8] sm:$0xff]  ;;  %v405_v6 = vld [vmem:[%s341_s9] sm:$0xff]  ;;  %v391_v7 = vld [vmem:[%s1645_s6 + $0x10] sm:$0xff]  ;;  %s1464_s12 = sadd.s32 56, %s1635_s26  ;;  %838 = vmatprep.subr.bf16.mxu0 %v1577_v1  ;;  %999 = vmatprep.subr.bf16.mxu1 %v1577_v1  ;;  %s1988_s25 = scalar_lea.vmem %s2012_s5, %s1635_s26 }
  0x12   : > { %v398_v8 = vpack.c.bf16 %v390_v5, %v390_v5  ;;  %v407_v9 = vmul.f32 0.0, %v405_v6  ;;  %v399_v10 = vpack.c.bf16 %v391_v7, %v391_v7  ;;  %v389_v11 = vld [vmem:[%s1645_s6] sm:$0xff]  ;;  %v392_v12 = vld [vmem:[%s1645_s6 + $0x18] sm:$0xff]  ;;  %v394_v21 = vld [vmem:[%s1645_s6 + $0x28] sm:$0xff]  ;;  %s367_s29 = scalar_lea.vmem %s2009_s2, %s1464_s12  ;;  %s1578_s12 = smov 64  }
  0x13   : > { %v393_v13 = vld [vmem:[%s1645_s6 + $0x20] sm:$0xff]  ;;  %v397_v14 = vpack.c.bf16 %v389_v11, %v389_v11  ;;  %v400_v15 = vpack.c.bf16 %v392_v12, %v392_v12  ;;  %v395_v26 = vld [vmem:[%s1645_s6 + $0x30] sm:$0xff]  ;;  %v1688_v46 = vpack.c.bf16 %v394_v21, %v394_v21 }
  0x14   : > { %v1660_v16 = vpack.c.bf16 %v393_v13, %v393_v13  ;;  %v428_v17 = vshrl.u32 %v398_v8, 16  ;;  %v431_v18 = vshll.u32 %v398_v8, 16  ;;  %v408_v19 = vpack.c.bf16 %v407_v9, %v407_v9  ;;  %839 = vmatpush1.bf16.msra.mxu0 %v1523_v47  ;;  %1000 = vmatpush1.bf16.msra.mxu1 %v1524_v52  ;;  %v1526_v7 = vld [vmem:[%s2010_s3 + $0x20] sm:$0xff]   ;;  %v1527_v8 = vld [vmem:[%s2010_s3 + $0x88] sm:$0xff]  }
  0x15   : > { %v435_v20 = vshrl.u32 %v399_v10, 16  ;;  %v438_v22 = vshll.u32 %v399_v10, 16  ;;  %v421_v23 = vshrl.u32 %v397_v14, 16  ;;  %v424_v24 = vshll.u32 %v397_v14, 16  ;;  %840 = vmatprep.subr.bf16.mxu0 %v1577_v1  ;;  %1001 = vmatprep.subr.bf16.mxu1 %v1577_v1 }
  0x16   : > { %v442_v25 = vshrl.u32 %v400_v15, 16  ;;  %v430_v29 = vrot.slane %v428_v17, 7  ;;  %v414_v30 = vshrl.u32 %v408_v19, 16  ;;  %v417_v31 = vshll.u32 %v408_v19, 16  ;;  %v396_v17 = vld [vmem:[%s1645_s6 + $0x38] sm:$0xff] }
  0x17   : > { %v437_v32 = vrot.slane %v435_v20, 7  ;;  %v423_v34 = vrot.slane %v421_v23, 7  ;;  %v445_v36 = vshll.u32 %v400_v15, 16  ;;  %v449_v37 = vshrl.u32 %v1660_v16, 16  ;;  %v1528_v23 = vld [vmem:[%s2010_s3 + $0x28] sm:$0xff]  }
  0x18   : > { %v444_v35 = vrot.slane %v442_v25, 7  ;;  %v433_v38 = vor.u32 %v431_v18, %v430_v29  ;;  %v416_v40 = vrot.slane %v414_v30, 7  ;;  %v452_v42 = vshll.u32 %v1660_v16, 16  ;;  %841 = vmatpush1.bf16.msra.mxu0 %v1525_v53  ;;  %v409_v18 = vld [vmem:[%s367_s29] sm:$0xff]  ;;  %1002 = vmatpush1.bf16.msra.mxu1 %v1526_v7 }
  0x19   : > { %v440_v41 = vor.u32 %v438_v22, %v437_v32  ;;  %v426_v43 = vor.u32 %v424_v24, %v423_v34  ;;  %v451_v45 = vrot.slane %v449_v37, 7  ;;  %v1698_v51 = vpack.c.bf16 %v395_v26, %v395_v26  ;;  %842 = vmatprep.subr.bf16.mxu0 %v1577_v1  ;;  %1003 = vmatprep.subr.bf16.mxu1 %v1577_v1  ;;  %v1530_v37 = vld [vmem:[%s2010_s3 + $0x30] sm:$0xff]  }
  0x1a   : > { %v447_v44 = vor.u32 %v445_v36, %v444_v35  ;;  %v498_v48 = vsel %vm1675_vm4, 0, %v433_v38  ;;  %v419_v49 = vor.u32 %v417_v31, %v416_v40  ;;  %v456_v16 = vshrl.u32 %v1688_v46, 16 }
  0x1b   : > { %v499_v50 = vsel %vm1675_vm4, 0, %v440_v41  ;;  %v1708_v54 = vsel %vm1682_vm5, %v498_v48, 0  ;;  %v497_v56 = vsel %vm1675_vm4, 0, %v426_v43  ;;  %v454_v15 = vor.u32 %v452_v42, %v451_v45 }
  0x1c   : > { %v1712_v55 = vsel %vm1682_vm5, %v499_v50, 0  ;;  %v500_v57 = vsel %vm1675_vm4, 0, %v447_v44  ;;  %v606_v58 = vshrl.u32 %v1708_v54, 16  ;;  %v608_v59 = vshll.u32 %v1708_v54, 16  ;;  %843 = vmatpush1.bf16.msra.mxu0 %v1527_v8  ;;  %1004 = vmatpush1.bf16.msra.mxu1 %v1528_v23 }
  0x1d   : > { %v496_v60 = vsel %vm1675_vm4, 0, %v419_v49  ;;  %v613_v61 = vshrl.u32 %v1712_v55, 16  ;;  %v615_v63 = vshll.u32 %v1712_v55, 16  ;;  %v1731_v0 = vsel %vm1682_vm5, %v497_v56, 0  ;;  %844 = vmatprep.subr.bf16.mxu0 %v1577_v1  ;;  %1005 = vmatprep.subr.bf16.mxu1 %v1577_v1  ;;  %v1531_v49 = vld [vmem:[%s2010_s3 + $0x98] sm:$0xff]  }
  0x1e   : > { %v1726_v62 = vsel %vm1682_vm5, %v496_v60, 0  ;;  %v1735_v2 = vsel %vm1682_vm5, %v500_v57, 0  ;;  %v610_v3 = vrot.slane %v608_v59, 1  ;;  %v599_v6 = vshrl.u32 %v1731_v0, 16  ;;  %v1532_v56 = vld [vmem:[%s2010_s3 + $0x38] sm:$0xff]  }
  0x1f   : > { %v592_v4 = vshrl.u32 %v1726_v62, 16  ;;  %v594_v5 = vshll.u32 %v1726_v62, 16  ;;  %v617_v9 = vrot.slane %v615_v63, 1  ;;  %v601_v10 = vshll.u32 %v1731_v0, 16 }
  0x20   : > { %v620_v11 = vshrl.u32 %v1735_v2, 16  ;;  %v622_v12 = vshll.u32 %v1735_v2, 16  ;;  %v611_v13 = vor.u32 %v610_v3, %v606_v58  ;;  %v459_v22 = vshll.u32 %v1688_v46, 16  ;;  %845 = vmatpush1.bf16.msra.mxu0 %v1529_v28  ;;  %1006 = vmatpush1.bf16.msra.mxu1 %v1530_v37 }
  0x21   : > { %v596_v14 = vrot.slane %v594_v5, 1  ;;  %v618_v19 = vor.u32 %v617_v9, %v613_v61  ;;  %v603_v20 = vrot.slane %v601_v10, 1  ;;  %v501_v25 = vsel %vm1675_vm4, 0, %v454_v15  ;;  %846 = vmatprep.subr.bf16.mxu0 %v1577_v1  ;;  %1007 = vmatprep.subr.bf16.mxu1 %v1577_v1 }
  0x22   : > { %v624_v21 = vrot.slane %v622_v12, 1  ;;  %651 = vrot.lane.b32.xlu1 %v611_v13, %s1578_s12  ;;  %v458_v26 = vrot.slane %v456_v16, 7  ;;  %v463_v27 = vshrl.u32 %v1698_v51, 16  ;;  %v1772_v30 = vsel %vm1682_vm5, %v501_v25, 0 }
  0x23   : > { %v597_v24 = vor.u32 %v596_v14, %v592_v4  ;;  %v604_v29 = vor.u32 %v603_v20, %v599_v6  ;;  %v466_v31 = vshll.u32 %v1698_v51, 16  ;;  %v627_v32 = vshrl.u32 %v1772_v30, 16  ;;  %v1533_v6 = vld [vmem:[%s2010_s3 + $0xa0] sm:$0xff]  }
  0x24   : > { %v629_v34 = vshll.u32 %v1772_v30, 16  ;;  %v461_v35 = vor.u32 %v459_v22, %v458_v26  ;;  %v465_v36 = vrot.slane %v463_v27, 7  ;;  %v404_v38 = vpack.c.bf16 %v396_v17, %v396_v17  ;;  %847 = vmatpush1.bf16.msra.mxu0 %v1531_v49  ;;  %1008 = vmatpush1.bf16.msra.mxu1 %v1532_v56  ;;  %v1535_v17 = vld [vmem:[%s2010_s3 + $0xa8] sm:$0xff]   ;;  %v1537_v26 = vld [vmem:[%s2010_s3 + $0xb0] sm:$0xff]  }
  0x25   : > { %647 = vrot.lane.b32.xlu0 %v597_v24, %s1578_s12  ;;  %v411_v40 = vmul.f32 0.0, %v409_v18  ;;  %v625_v41 = vor.u32 %v624_v21, %v620_v11  ;;  %848 = vmatprep.subr.bf16.mxu0 %v1577_v1  ;;  %v1534_v11 = vld [vmem:[%s2010_s3 + $0x40] sm:$0xff]   ;;  %v1536_v22 = vld [vmem:[%s2010_s3 + $0x48] sm:$0xff]   ;;  %v673_v39 = vrot.slane %v1708_v54, 1  ;;  %v671_v23 = vrot.slane %v1726_v62, 1  ;;  %v1538_v27 = vld [vmem:[%s2010_s3 + $0x50] sm:$0xff]  }
  0x26   : > { %653 = vrot.lane.b32.xlu1 %v618_v19, %s1578_s12  ;;  %v631_v42 = vrot.slane %v629_v34, 1  ;;  %v502_v43 = vsel %vm1675_vm4, 0, %v461_v35  ;;  %v468_v44 = vor.u32 %v466_v31, %v465_v36  ;;  %v470_v46 = vshrl.u32 %v404_v38, 16  ;;  %1009 = vmatprep.subr.bf16.mxu1 %v1577_v1  ;;  %v1540_v34 = vld [vmem:[%s2010_s3 + $0x58] sm:$0xff]  }
  0x27   : > { %v1788_v45 = vsel %vm1682_vm5, %v502_v43, 0  ;;  %v473_v47 = vshll.u32 %v404_v38, 16  ;;  %v412_v48 = vpack.c.bf16 %v411_v40, %v411_v40  ;;  %v672_v19 = vrot.slane %v1731_v0, 1 }
  0x28   : > { %v632_v50 = vor.u32 %v631_v42, %v627_v32  ;;  %v634_v51 = vshrl.u32 %v1788_v45, 16  ;;  %v636_v52 = vshll.u32 %v1788_v45, 16  ;;  %v503_v53 = vsel %vm1675_vm4, 0, %v468_v44  ;;  %849 = vmatpush1.bf16.msra.mxu0 %v1533_v6  ;;  %1010 = vmatpush1.bf16.msra.mxu1 %v1534_v11  ;;  %v1539_v32 = vld [vmem:[%s2010_s3 + $0xb8] sm:$0xff]   ;;  %v1541_v44 = vld [vmem:[%s2010_s3 + $0xc0] sm:$0xff]  }
  0x29   : > { %649 = vrot.lane.b32.xlu0 %v604_v29, %s1578_s12  ;;  %v1803_v57 = vsel %vm1682_vm5, %v503_v53, 0  ;;  %v472_v58 = vrot.slane %v470_v46, 7  ;;  %v477_v59 = vshrl.u32 %v412_v48, 16  ;;  %v480_v60 = vshll.u32 %v412_v48, 16  ;;  %850 = vmatprep.subr.bf16.mxu0 %v1577_v1 }
  0x2a   : > { %657 = vrot.lane.b32.xlu1 %v632_v50, %s1578_s12  ;;  %v638_v61 = vrot.slane %v636_v52, 1  ;;  %v641_v63 = vshrl.u32 %v1803_v57, 16  ;;  %v643_v3 = vshll.u32 %v1803_v57, 16  ;;  %1011 = vmatprep.subr.bf16.mxu1 %v1577_v1  ;;  %v1393_v28 = vcombine.low %v672_v19, %v673_v39 }
  0x2b   : > { %v475_v4 = vor.u32 %v473_v47, %v472_v58  ;;  %v479_v5 = vrot.slane %v477_v59, 7  ;;  %v1417_v29 = vcombine.low %v671_v23, %v672_v19  ;;  %v674_v38 = vrot.slane %v1712_v55, 1  ;;  %v1547_v19 = vld [vmem:[%s2010_s3 + $0xf0] sm:$0xff]  }
  0x2c   : > { %v639_v7 = vor.u32 %v638_v61, %v634_v51  ;;  %v645_v8 = vrot.slane %v643_v3, 1  ;;  %851 = vmatpush1.bf16.msra.mxu0 %v1535_v17  ;;  %1012 = vmatpush1.bf16.msra.mxu1 %v1536_v22  ;;  %v675_v40 = vrot.slane %v1735_v2, 1  ;;  %v676_v52 = vrot.slane %v1772_v30, 1 }
  0x2d   : > { %655 = vrot.lane.b32.xlu0 %v625_v41, %s1578_s12  ;;  %v504_v9 = vsel %vm1675_vm4, 0, %v475_v4  ;;  %v482_v10 = vor.u32 %v480_v60, %v479_v5  ;;  %852 = vmatprep.subr.bf16.mxu0 %v1577_v1  ;;  %v1881_v48 = vcombine.low %v673_v39, %v674_v38  ;;  %v677_v53 = vrot.slane %v1788_v45, 1 }
  0x2e   : > { %v646_v12 = vor.u32 %v645_v8, %v641_v63  ;;  %v1823_v13 = vsel %vm1682_vm5, %v504_v9, 0  ;;  %1013 = vmatprep.subr.bf16.mxu1 %v1577_v1  ;;  %1412 = vmatprep.mubr.msk.bf16.mxu0 %vm679_vm6, %v1393_v28  ;;  %v1904_v60 = vcombine.low %v675_v40, %v676_v52  ;;  %v1544_v63 = vld [vmem:[%s2010_s3 + $0xd8] sm:$0xff]   ;;  %v678_v5 = vrot.slane %v1803_v57, 1 }
  0x2f   : > { %v721_v14 = vshrl.u32 %v1823_v13, 16  ;;  %v723_v15 = vshll.u32 %v1823_v13, 16  ;;  %v505_v16 = vsel %vm1675_vm4, 0, %v482_v10  ;;  %1436 = vmatprep.mubr.msk.bf16.mxu1 %vm679_vm6, %v1417_v29  ;;  %v1397_v61 = vcombine.low %v676_v52, %v677_v53 }
  0x30   : > { %661 = vrot.lane.b32.xlu1 %v646_v12, %s1578_s12  ;;  %v1836_v18 = vsel %vm1682_vm5, %v505_v16, 0  ;;  %853 = vmatpush1.bf16.msra.mxu0 %v1537_v26  ;;  %v730_v6 = vrot.slane %v1823_v13, 1  ;;  %v1423_v10 = vcombine.low %v677_v53, %v678_v5  ;;  %v1546_v12 = vld [vmem:[%s2010_s3 + $0xe8] sm:$0xff]  }
  0x31   : > { %659 = vrot.lane.b32.xlu0 %v639_v7, %s1578_s12  ;;  %v725_v20 = vrot.slane %v723_v15, 1  ;;  %v1059_v21 = vshrl.u32 %v1836_v18, 16  ;;  %v1061_v33 = vshll.u32 %v1836_v18, 16  ;;  %854 = vmatprep.subr.bf16.mxu0 %v1577_v1  ;;  %v1068_v22 = vrot.slane %v1836_v18, 1 }
  0x32   : > { %1014 = vmatpush1.bf16.msra.mxu1 %v1538_v27  ;;  %v1399_v11 = vcombine.low %v678_v5, %v730_v6 }
  0x33   : > { %v726_v24 = vor.u32 %v725_v20, %v721_v14  ;;  %v1063_v25 = vrot.slane %v1061_v33, 1  ;;  %1015 = vmatprep.subr.bf16.mxu1 %v1577_v1  ;;  %v1550_v20 = vld [vmem:[%s2010_s3 + $0x108] sm:$0xff]   ;;  %v1552_v33 = vld [vmem:[%s2010_s3 + $0x118] sm:$0xff]   ;;  %v1441_v39 = vcombine.low %v730_v6, %v1068_v22 }
  0x34   : > { %855 = vmatpush1.bf16.msra.mxu0 %v1539_v32 }
  0x35   : > { %727 = vrot.lane.b32.xlu0 %v726_v24, %s1578_s12  ;;  %v1064_v31 = vor.u32 %v1063_v25, %v1059_v21  ;;  %1152 = vmatprep.subr.bf16.mxu0 %v1577_v1  ;;  %v1551_v21 = vld [vmem:[%s2010_s3 + $0x110] sm:$0xff]  }
  0x36   : > { %1016 = vmatpush1.bf16.msra.mxu1 %v1540_v34 }
  0x37   : > { %1065 = vrot.lane.b32.xlu1 %v1064_v31, %s1578_s12  ;;  %1467 = vmatprep.subr.bf16.mxu1 %v1577_v1 }
  0x94   : > { %v652_v36 = vpop.permute.xlu1 %651 }
  0x95   : > { %v685_v37 = vsel %vm679_vm6, %v1708_v54, %v652_v36  ;;  %v1395_v54 = vcombine.low %v674_v38, %v675_v40 }
  0x97   : > { %v648_v35 = vpop.permute.xlu0 %647 }
  0x98   : > { %v681_v42 = vsel %vm679_vm6, %v1726_v62, %v648_v35  ;;  %v654_v49 = vpop.permute.xlu1 %653  ;;  %v1542_v62 = vld [vmem:[%s2010_s3 + $0xc8] sm:$0xff]  }
  0x99   : > { %v687_v51 = vsel %vm679_vm6, %v1712_v55, %v654_v49 }
  0x9a   : > { %v1900_v58 = vcombine.low %v685_v37, %v687_v51 }
  0x9b   : > { %v650_v41 = vpop.permute.xlu0 %649 }
  0x9c   : > { %v683_v43 = vsel %vm679_vm6, %v1731_v0, %v650_v41  ;;  %v658_v55 = vpop.permute.xlu1 %657 }
  0x9d   : > { %v1392_v46 = vcombine.low %v683_v43, %v685_v37  ;;  %v1416_v47 = vcombine.low %v681_v42, %v683_v43  ;;  %v691_v3 = vsel %vm679_vm6, %v1772_v30, %v658_v55  ;;  %v1545_v30 = vld [vmem:[%s2010_s3 + $0xe0] sm:$0xff]  }
  0x9f   : > { %865 = vmatmul.mubr.bf16.vlgmr.msra.gmra.mrb[0].mxu0 %v1392_v46  ;;  %1026 = vmatmul.mubr.bf16.vlgmr.msra.gmra.mrb[0].mxu1 %v1416_v47  ;;  %v656_v50 = vpop.permute.xlu0 %655 }
  0xa0   : > { %1153 = vmatpush1.bf16.msra.mxu0 %v1541_v44  ;;  %1479 = vmatpush1.bf16.msra.mxu1 %v1541_v44  ;;  %v689_v0 = vsel %vm679_vm6, %v1735_v2, %v656_v50  ;;  %v1543_v2 = vld [vmem:[%s2010_s3 + $0xd0] sm:$0xff]  }
  0xa1   : > { %1154 = vmatprep.subr.bf16.mxu0 %v1577_v1  ;;  %1468 = vmatprep.subr.bf16.mxu1 %v1577_v1  ;;  %v1394_v56 = vcombine.low %v687_v51, %v689_v0  ;;  %v1921_v7 = vcombine.low %v689_v0, %v691_v3 }
  0xa2   : > { %1413 = vmatprep.mubr.msk.bf16.mxu0 %vm679_vm6, %v1395_v54  ;;  %1437 = vmatprep.mubr.msk.bf16.mxu1 %vm679_vm6, %v1881_v48 }
  0xa3   : > { %v660_v59 = vpop.permute.xlu0 %659 }
  0xa4   : > { %1155 = vmatpush1.bf16.msra.mxu0 %v1542_v62  ;;  %1480 = vmatpush1.bf16.msra.mxu1 %v1542_v62  ;;  %v693_v4 = vsel %vm679_vm6, %v1788_v45, %v660_v59  ;;  %v662_v45 = vpop.permute.xlu1 %661 }
  0xa5   : > { %1156 = vmatprep.subr.bf16.mxu0 %v1577_v1  ;;  %1469 = vmatprep.subr.bf16.mxu1 %v1577_v1  ;;  %v1396_v8 = vcombine.low %v691_v3, %v693_v4  ;;  %v695_v14 = vsel %vm679_vm6, %v1803_v57, %v662_v45  ;;  %v1548_v57 = vld [vmem:[%s2010_s3 + $0xf8] sm:$0xff]  }
  0xa6   : > { %v1422_v16 = vcombine.low %v693_v4, %v695_v14 }
  0xa7   : > { %873 = vmatmul.mubr.bf16.gmra.mrb[4].mxu0 %v1394_v56  ;;  %1034 = vmatmul.mubr.bf16.gmra.mrb[4].mxu1 %v1900_v58  ;;  %v728_v9 = vpop.permute.xlu0 %727 }
  0xa8   : > { %1157 = vmatpush1.bf16.msra.mxu0 %v1543_v2  ;;  %1481 = vmatpush1.bf16.msra.mxu1 %v1543_v2  ;;  %v732_v15 = vsel %vm679_vm6, %v1823_v13, %v728_v9  ;;  %v1549_v13 = vld [vmem:[%s2010_s3 + $0x100] sm:$0xff]  }
  0xa9   : > { %1158 = vmatprep.subr.bf16.mxu0 %v1577_v1  ;;  %1470 = vmatprep.subr.bf16.mxu1 %v1577_v1  ;;  %v1398_v17 = vcombine.low %v695_v14, %v732_v15  ;;  %v1066_v23 = vpop.permute.xlu1 %1065 }
  0xaa   : > { %1438 = vmatprep.mubr.msk.bf16.mxu1 %vm679_vm6, %v1904_v60  ;;  %1414 = vmatprep.mubr.msk.bf16.mxu0 %vm679_vm6, %v1397_v61  ;;  %v1070_v24 = vsel %vm679_vm6, %v1836_v18, %v1066_v23 }
  0xab   : > { %v1440_v25 = vcombine.low %v732_v15, %v1070_v24 }
  0xac   : > { %1159 = vmatpush1.bf16.msra.mxu0 %v1544_v63  ;;  %1482 = vmatpush1.bf16.msra.mxu1 %v1544_v63 }
  0xad   : > { %1160 = vmatprep.subr.bf16.mxu0 %v1577_v1  ;;  %1471 = vmatprep.subr.bf16.mxu1 %v1577_v1 }
  0xaf   : > { %1042 = vmatmul.mubr.bf16.gmra.mrb[8].mxu1 %v1921_v7  ;;  %881 = vmatmul.mubr.bf16.gmra.mrb[8].mxu0 %v1396_v8 }
  0xb0   : > { %1161 = vmatpush1.bf16.msra.mxu0 %v1545_v30  ;;  %1483 = vmatpush1.bf16.msra.mxu1 %v1545_v30 }
  0xb1   : > { %1162 = vmatprep.subr.bf16.mxu0 %v1577_v1  ;;  %1472 = vmatprep.subr.bf16.mxu1 %v1577_v1 }
  0xb2   : > { %1439 = vmatprep.mubr.msk.bf16.mxu1 %vm679_vm6, %v1423_v10  ;;  %1415 = vmatprep.mubr.msk.bf16.mxu0 %vm679_vm6, %v1399_v11 }
  0xb4   : > { %1163 = vmatpush1.bf16.msra.mxu0 %v1546_v12  ;;  %1484 = vmatpush1.bf16.msra.mxu1 %v1546_v12 }
  0xb5   : > { %1164 = vmatprep.subr.bf16.mxu0 %v1577_v1  ;;  %1473 = vmatprep.subr.bf16.mxu1 %v1577_v1 }
  0xb7   : > { %1050 = vmatmul.mubr.bf16.gmra.mrb[12].mxu1 %v1422_v16  ;;  %889 = vmatmul.mubr.bf16.gmra.mrb[12].mxu0 %v1398_v17 }
  0xb8   : > { %1165 = vmatpush1.bf16.msra.mxu0 %v1547_v19  ;;  %1485 = vmatpush1.bf16.msra.mxu1 %v1547_v19 }
  0xb9   : > { %1166 = vmatprep.subr.bf16.mxu0 %v1577_v1  ;;  %1474 = vmatprep.subr.bf16.mxu1 %v1577_v1 }
  0xba   : > { %1454 = vmatprep.mubr.msk.bf16.mxu0 %vm679_vm6, %v1881_v48  ;;  %1456 = vmatprep.mubr.msk.bf16.mxu1 %vm679_vm6, %v1423_v10 }
  0xbc   : > { %1167 = vmatpush1.bf16.msra.mxu0 %v1548_v57  ;;  %1486 = vmatpush1.bf16.msra.mxu1 %v1548_v57 }
  0xbd   : > { %1168 = vmatprep.subr.bf16.mxu0 %v1577_v1  ;;  %1475 = vmatprep.subr.bf16.mxu1 %v1577_v1 }
  0xc0   : > { %1169 = vmatpush1.bf16.msra.mxu0 %v1549_v13  ;;  %1487 = vmatpush1.bf16.msra.mxu1 %v1549_v13 }
  0xc1   : > { %1170 = vmatprep.subr.bf16.mxu0 %v1577_v1  ;;  %1476 = vmatprep.subr.bf16.mxu1 %v1577_v1 }
  0xc4   : > { %1171 = vmatpush1.bf16.msra.mxu0 %v1550_v20  ;;  %1488 = vmatpush1.bf16.msra.mxu1 %v1550_v20 }
  0xc5   : > { %1172 = vmatprep.subr.bf16.mxu0 %v1577_v1  ;;  %1477 = vmatprep.subr.bf16.mxu1 %v1577_v1 }
  0xc8   : > { %1173 = vmatpush1.bf16.msra.mxu0 %v1551_v21  ;;  %1489 = vmatpush1.bf16.msra.mxu1 %v1551_v21 }
  0xc9   : > { %1174 = vmatprep.subr.bf16.mxu0 %v1577_v1  ;;  %1478 = vmatprep.subr.bf16.mxu1 %v1577_v1 }
  0xcc   : > { %1175 = vmatpush1.bf16.msra.mxu0 %v1552_v33  ;;  %1490 = vmatpush1.bf16.msra.mxu1 %v1552_v33 }
  0xcf   : > { %1185 = vmatmul.mubr.bf16.vlgmr.msra.gmra.mrb[16].mxu0 %v1900_v58  ;;  %1201 = vmatmul.mubr.bf16.vlgmr.msra.gmra.mrb[16].mxu1 %v1422_v16 }
  0xd0   : > { %1455 = vmatprep.mubr.msk.bf16.mxu0 %vm679_vm6, %v1904_v60  ;;  %1457 = vmatprep.mubr.msk.bf16.mxu1 %vm679_vm6, %v1441_v39 }
  0xd7   : > { %1193 = vmatmul.mubr.bf16.gmra.mrb[20].mxu0 %v1921_v7  ;;  %1209 = vmatmul.mubr.bf16.gmra.mrb[20].mxu1 %v1440_v25  ;;  %v1458_v7 = vld [vmem:[%s2011_s4] ss:$0 sm:$0xff] }
 0x172   : > { %v866_v1 = vpop.f32.mrb[0].mxu0  ;;  %v1027_v26 = vpop.f32.mrb[0].mxu1 }
 0x173   : > { %v1028_v27 = vadd.f32 %v1027_v26, %v866_v1  ;;  %v868_v28 = vpop.f32.mrb[1].mxu0  ;;  %v1029_v29 = vpop.f32.mrb[1].mxu1 }
 0x174   : > { %v869_v31 = vpop.f32.mrb[2].mxu0  ;;  %v1030_v32 = vpop.f32.mrb[2].mxu1 }
 0x175   : > { %v1031_v34 = vadd.f32 %v1030_v32, %v869_v31  ;;  %v871_v35 = vpop.f32.mrb[3].mxu0  ;;  %v1032_v36 = vpop.f32.mrb[3].mxu1 }
 0x17a   : > { %v874_v37 = vpop.f32.mrb[4].mxu0  ;;  %v1035_v38 = vpop.f32.mrb[4].mxu1 }
 0x17b   : > { %v1036_v40 = vadd.f32 %v1035_v38, %v874_v37  ;;  %v876_v41 = vpop.f32.mrb[5].mxu0  ;;  %v1037_v42 = vpop.f32.mrb[5].mxu1 }
 0x17c   : > { %v877_v18 = vpop.f32.mrb[6].mxu0  ;;  %v1038_v43 = vpop.f32.mrb[6].mxu1 }
 0x17d   : > { %v1039_v44 = vadd.f32 %v1038_v43, %v877_v18  ;;  %v1040_v46 = vpop.f32.mrb[7].mxu1  ;;  %v879_v47 = vpop.f32.mrb[7].mxu0 }
 0x182   : > { %v1043_v48 = vpop.f32.mrb[8].mxu1  ;;  %v882_v54 = vpop.f32.mrb[8].mxu0 }
 0x183   : > { %v1044_v49 = vadd.f32 %v1043_v48, %v882_v54  ;;  %v1045_v50 = vpop.f32.mrb[9].mxu1  ;;  %v884_v62 = vpop.f32.mrb[9].mxu0 }
 0x184   : > { %v1046_v0 = vpop.f32.mrb[10].mxu1  ;;  %v885_v51 = vpop.f32.mrb[10].mxu0 }
 0x185   : > { %v1047_v52 = vadd.f32 %v1046_v0, %v885_v51  ;;  %v1048_v53 = vpop.f32.mrb[11].mxu1  ;;  %v887_v56 = vpop.f32.mrb[11].mxu0 }
 0x18a   : > { %v1051_v2 = vpop.f32.mrb[12].mxu1  ;;  %v890_v58 = vpop.f32.mrb[12].mxu0 }
 0x18b   : > { %v1052_v55 = vadd.f32 %v1051_v2, %v890_v58  ;;  %v1053_v59 = vpop.f32.mrb[13].mxu1  ;;  %v892_v60 = vpop.f32.mrb[13].mxu0 }
 0x18c   : > { %v1054_v61 = vpop.f32.mrb[14].mxu1  ;;  %v893_v63 = vpop.f32.mrb[14].mxu0 }
 0x18d   : > { %v1055_v3 = vadd.f32 %v1054_v61, %v893_v63  ;;  %v1056_v4 = vpop.f32.mrb[15].mxu1  ;;  %v895_v5 = vpop.f32.mrb[15].mxu0 }
 0x1a2   : > { %v1186_v6 = vpop.f32.mrb[16].mxu0  ;;  %v1202_v8 = vpop.f32.mrb[16].mxu1 }
 0x1a3   : > { %v1217_v30 = vadd.f32 %v1186_v6, %v1028_v27  ;;  %v1221_v45 = vadd.f32 %v1202_v8, %v1044_v49  ;;  %v1188_v9 = vpop.f32.mrb[17].mxu0  ;;  %v1204_v10 = vpop.f32.mrb[17].mxu1 }
 0x1a4   : > { %v1189_v11 = vpop.f32.mrb[18].mxu0  ;;  %v1205_v12 = vpop.f32.mrb[18].mxu1 }
 0x1a5   : > { %v1232_v14 = vadd.f32 %v1458_v7, %v1217_v30  ;;  %v1236_v15 = vadd.f32 %v1458_v7, %v1221_v45  ;;  %v1218_v16 = vadd.f32 %v1189_v11, %v1031_v34  ;;  %v1222_v17 = vadd.f32 %v1205_v12, %v1047_v52  ;;  %v1191_v19 = vpop.f32.mrb[19].mxu0  ;;  %v1207_v57 = vpop.f32.mrb[19].mxu1 }
 0x1a7   : > { %v1240_v13 = vmax.f32 %v1232_v14, 0.0  ;;  %v1244_v20 = vmax.f32 %v1236_v15, 0.0  ;;  %v1233_v21 = vadd.f32 %v1458_v7, %v1218_v16  ;;  %v1237_v33 = vadd.f32 %v1458_v7, %v1222_v17 }
 0x1a9   : > { %1248 = vst [vmem:[%s1988_s25] sm:$0xff] %v1240_v13  ;;  %1252 = vst [vmem:[%s1988_s25 + $0x20] sm:$0xff] %v1244_v20  ;;  %v1241_v22 = vmax.f32 %v1233_v21, 0.0  ;;  %v1245_v39 = vmax.f32 %v1237_v33, 0.0 }
 0x1aa   : > { %v1194_v23 = vpop.f32.mrb[20].mxu0  ;;  %v1210_v24 = vpop.f32.mrb[20].mxu1 }
 0x1ab   : > { %1249 = vst [vmem:[%s1988_s25 + $0x8] sm:$0xff] %v1241_v22  ;;  %1253 = vst [vmem:[%s1988_s25 + $0x28] sm:$0xff] %v1245_v39  ;;  %v1219_v25 = vadd.f32 %v1194_v23, %v1036_v40  ;;  %v1223_v1 = vadd.f32 %v1210_v24, %v1052_v55  ;;  %v1196_v26 = vpop.f32.mrb[21].mxu0  ;;  %v1212_v27 = vpop.f32.mrb[21].mxu1 }
 0x1ac   : > { %v1197_v28 = vpop.f32.mrb[22].mxu0  ;;  %v1213_v29 = vpop.f32.mrb[22].mxu1 }
 0x1ad   : > { %v1234_v31 = vadd.f32 %v1458_v7, %v1219_v25  ;;  %v1238_v32 = vadd.f32 %v1458_v7, %v1223_v1  ;;  %v1220_v34 = vadd.f32 %v1197_v28, %v1039_v44  ;;  %v1224_v35 = vadd.f32 %v1213_v29, %v1055_v3  ;;  %v1199_v36 = vpop.f32.mrb[23].mxu0  ;;  %v1215_v37 = vpop.f32.mrb[23].mxu1 }
 0x1af   : > { %v1242_v38 = vmax.f32 %v1234_v31, 0.0  ;;  %v1246_v41 = vmax.f32 %v1238_v32, 0.0  ;;  %v1235_v42 = vadd.f32 %v1458_v7, %v1220_v34  ;;  %v1239_v18 = vadd.f32 %v1458_v7, %v1224_v35 }
 0x1b1   : > { %1250 = vst [vmem:[%s1988_s25 + $0x10] sm:$0xff] %v1242_v38  ;;  %1254 = vst [vmem:[%s1988_s25 + $0x30] sm:$0xff] %v1246_v41  ;;  %v1243_v40 = vmax.f32 %v1235_v42, 0.0  ;;  %v1247_v43 = vmax.f32 %v1239_v18, 0.0 }
 0x1b3   : > { %1251 = vst [vmem:[%s1988_s25 + $0x18] sm:$0xff] %v1243_v40  ;;  %1255 = vst [vmem:[%s1988_s25 + $0x38] sm:$0xff] %v1247_v43 }
 0x1b4 PF: > { %s15_s20 = sadd.s32 1, %s1575_s20   ;;  %s2017_s18 = smov %s1571_s19 }
 0x1b5   : > { %p12_p5 = scmp.ge.s32.totalorder %s15_s20, 6   ;;  %s2018_s19 = smov %s2020_s21 }
 0x1b7   :  { %14 = sbr.rel (!%p12_p5) target bundleno = 2 (0x2), region = 76 }

// kernel: vgg_perceptual_loss.7
= control target key start
LH: loop header
LB: loop body
LE: loop exit
PB: predicated region body
PF: predicated region fallthrough
CT: control target
= control target key end

     0   :  { %s2363_s18 = smov 0   ;;  %s2365_s19 = smov 0   ;;  %s3378_s0 = inlined_call_operand.vmem [shape: f32[4,16,16,3], index: 0, kind: input, shape index: {}, may-alias: {0,1,2}]   ;;  %s3379_s1 = inlined_call_operand.vmem [shape: f32[4,16,16,3], index: 1, kind: input, shape index: {}, may-alias: {0,1,2}]   ;;  %s3380_s2 = inlined_call_operand.vmem [shape: f32[4,16,16,3], index: 2, kind: input, shape index: {}, may-alias: {0,1,2}]   ;;  %s3381_s3 = inlined_call_operand.vmem [shape: bf16[3,9,64], index: 3, kind: input, shape index: {}]   ;;  %s3382_s4 = inlined_call_operand.vmem [shape: f32[1,64], index: 4, kind: input, shape index: {}]   ;;  %s3383_s5 = inlined_call_operand.vmem [shape: f32[4,16,16,64], index: 5, kind: output, shape index: {}]  }
   0x1   :  { %s2367_s20 = smov 0  }
   0x2 LB: > { %s27_s21 = sadd.s32 1, %s2317_s19  ;;  %p2161_p0 = scmp.ge.s32.totalorder %s2321_s20, 1  ;;  %s2321_s20 = sphi %s2367_s20, %s15_s20   ;;  %s2317_s19 = sphi %s2365_s19, %s3387_s19   ;;  %s2313_s18 = sphi %s2363_s18, %s3386_s18  }
   0x3   : > { %p29_p1 = scmp.ge.s32.totalorder %s27_s21, 4  ;;  %p273_p2 = scmp.lt.s32.totalorder %s2321_s20, 5 }
   0x5   : > { %s3389_s21 = smov (%p29_p1, %s27_s21), 0  ;;  %p274_p3 = pnand %p2161_p0, %p273_p2 }
   0x6   : > { %p341_p4 = scmp.lt.s32.totalorder (!%p274_p3), %s2313_s18, 3  ;;  %vm622_vm0 = vcmask (!%p274_p3), 1040384   ;;  %vm623_vm1 = vsmask.f32 (!%p274_p3), 256  ;;  %s2323_s29 = smov (!%p274_p3), 9   ;;  %vm924_vm3 = vcmask (!%p274_p3), 1046528  }
   0x7   : > { %277 = sbr.rel (%p274_p3) target bundleno = 616 (0x268), region = 40  ;;  %vm2404_vm2 = vmand (!%p274_p3), %vm622_vm0, %vm623_vm1  ;;  %vm667_vm4 = vsmask.f32 (!%p274_p3), 7424  ;;  %s2324_s30 = smov (!%p274_p3), 6   ;;  %vm1786_vm5 = vcmask (!%p274_p3), 1044480   ;;  %vm1787_vm6 = vcmask (!%p274_p3), 1045504  }
   0x8   : > { %s2325_s6 = smov (!%p274_p3), 3   ;;  %s2326_s7 = smov (!%p274_p3), 12   ;;  %vm1231_vm7 = vcmask (!%p274_p3), 23552   ;;  %vm1264_vm8 = vcmask (!%p274_p3), 48128   ;;  %vm1297_vm9 = vcmask (!%p274_p3), 72704   ;;  %vm1330_vm10 = vcmask (!%p274_p3), 97280  }
   0x9   : > { %s2327_s8 = smov (!%p274_p3), 15   ;;  %s2328_s9 = smov (!%p274_p3), 18   ;;  %vm1363_vm11 = vcmask (!%p274_p3), 121856   ;;  %vm1396_vm12 = vcmask (!%p274_p3), 146432   ;;  %vm1429_vm13 = vcmask (!%p274_p3), 171008   ;;  %vm1462_vm14 = vcmask (!%p274_p3), 195584  }
   0xa   : > { %s2329_s10 = smov (!%p274_p3), 21   ;;  %s2331_s15 = smov (!%p274_p3), 24   ;;  %vm1753_vm15 = vcmask (!%p274_p3), 220160   ;;  %vm1986_vm0 = vcmask (!%p274_p3), 523264  }
   0xe   : > { %s3391_s18 = smov (!%p341_p4, %s2313_s18), 3 }
   0xf   : > { %s2381_s22 = sshll.u32 %s3391_s18, 8 }
  0x10   : > { %s2387_s25 = scalar_lea.vmem %s3379_s1, %s2381_s22  ;;  %s349_s28 = scalar_lea.vmem %s3378_s0, %s2381_s22 }
  0x11   : > { %v416_v0 = vld [vmem:[%s2387_s25 + $0x80] sm:$0xff]  ;;  %v417_v1 = vld [vmem:[%s2387_s25 + $0x88] sm:$0xff]  ;;  %v418_v5 = vld [vmem:[%s2387_s25 + $0x90] sm:$0xff] }
  0x12   : > { %v400_v2 = vld [vmem:[%s2387_s25] sm:$0xff]  ;;  %v440_v3 = vpack.c.bf16 %v417_v1, %v416_v0  ;;  %v401_v4 = vld [vmem:[%s2387_s25 + $0x8] sm:$0xff]  ;;  %v419_v6 = vld [vmem:[%s2387_s25 + $0x98] sm:$0xff] }
  0x13   : > { %v432_v7 = vpack.c.bf16 %v401_v4, %v400_v2  ;;  %v441_v8 = vpack.c.bf16 %v419_v6, %v418_v5  ;;  %v402_v9 = vld [vmem:[%s2387_s25 + $0x10] sm:$0xff]  ;;  %v403_v10 = vld [vmem:[%s2387_s25 + $0x18] sm:$0xff]  ;;  %v448_v16 = vld [vmem:[%s349_s28] sm:$0xff] }
  0x14   : > { %v414_v11 = vld [vmem:[%s2387_s25 + $0x70] sm:$0xff]  ;;  %v524_v12 = vshrl.u32 %v440_v3, 16  ;;  %v527_v13 = vshll.u32 %v440_v3, 16  ;;  %v433_v14 = vpack.c.bf16 %v403_v10, %v402_v9  ;;  %v415_v15 = vld [vmem:[%s2387_s25 + $0x78] sm:$0xff]  ;;  %v449_v25 = vld [vmem:[%s349_s28 + $0x8] sm:$0xff]  ;;  %v451_v29 = vmul.f32 0.0, %v448_v16 }
  0x15   : > { %v468_v17 = vshrl.u32 %v432_v7, 16  ;;  %v471_v18 = vshll.u32 %v432_v7, 16  ;;  %v531_v19 = vshrl.u32 %v441_v8, 16  ;;  %v534_v20 = vshll.u32 %v441_v8, 16 }
  0x16   : > { %v526_v21 = vrot.slane %v524_v12, 7  ;;  %v475_v22 = vshrl.u32 %v433_v14, 16  ;;  %v478_v23 = vshll.u32 %v433_v14, 16  ;;  %v439_v24 = vpack.c.bf16 %v415_v15, %v414_v11 }
  0x17   : > { %v470_v27 = vrot.slane %v468_v17, 7  ;;  %v2408_v28 = vrot.slane %v531_v19, 7  ;;  %v452_v37 = vmul.f32 0.0, %v449_v25 }
  0x18   : > { %v529_v30 = vor.u32 %v527_v13, %v526_v21  ;;  %v2410_v31 = vrot.slane %v475_v22, 7  ;;  %v517_v32 = vshrl.u32 %v439_v24, 16  ;;  %v520_v33 = vshll.u32 %v439_v24, 16 }
  0x19   : > { %v473_v34 = vor.u32 %v471_v18, %v470_v27  ;;  %v536_v35 = vor.u32 %v534_v20, %v2408_v28  ;;  %v644_v36 = vsel %vm2404_vm2, %v470_v27, 0  ;;  %v652_v43 = vsel %vm2404_vm2, %v526_v21, 0 }
  0x1a   : > { %v2417_v38 = vsel %vm2404_vm2, 0, %v529_v30  ;;  %v480_v39 = vor.u32 %v478_v23, %v2410_v31  ;;  %v519_v40 = vrot.slane %v517_v32, 7  ;;  %v929_v42 = vrot.slane %v644_v36, 1 }
  0x1b   : > { %1022 = vrot.lane.b32.xlu1 %v2417_v38, %s2323_s29  ;;  %v2424_v41 = vsel %vm2404_vm2, 0, %v473_v34  ;;  %v2432_v44 = vsel %vm2404_vm2, 0, %v536_v35  ;;  %v952_v47 = vrot.slane %v2417_v38, 1  ;;  %v453_v51 = vpack.c.bf16 %v452_v37, %v451_v29  ;;  %v421_v34 = vld [vmem:[%s2387_s25 + $0xa8] sm:$0xff] }
  0x1c   : > { %1006 = vrot.lane.b32.xlu0 %v2424_v41, %s2323_s29  ;;  %v522_v45 = vor.u32 %v520_v33, %v519_v40  ;;  %v651_v46 = vsel %vm2404_vm2, %v519_v40, 0  ;;  %v2439_v48 = vsel %vm2404_vm2, 0, %v480_v39  ;;  %v928_v50 = vrot.slane %v2424_v41, 1  ;;  %v420_v33 = vld [vmem:[%s2387_s25 + $0xa0] sm:$0xff] }
  0x1d   : > { %v950_v49 = vrot.slane %v651_v46, 1  ;;  %v953_v53 = vrot.slane %v652_v43, 1  ;;  %v681_v54 = vshrl.u32 %v2424_v41, 16  ;;  %v683_v55 = vshll.u32 %v2424_v41, 16  ;;  %v404_v40 = vld [vmem:[%s2387_s25 + $0x20] sm:$0xff] }
  0x1e   : > { %v2444_v52 = vsel %vm2404_vm2, 0, %v522_v45  ;;  %v461_v57 = vshrl.u32 %v453_v51, 16  ;;  %v464_v58 = vshll.u32 %v453_v51, 16  ;;  %v688_v59 = vshll.u32 %v644_v36, 16 }
  0x1f   : > { %1024 = vrot.lane.b32.xlu1 %v2432_v44, %s2323_s29  ;;  %v949_v56 = vrot.slane %v2444_v52, 1  ;;  %v685_v60 = vrot.slane %v683_v55, 1  ;;  %v767_v61 = vshll.u32 %v2444_v52, 16  ;;  %v2458_v63 = vsel %vm924_vm3, %v928_v50, %v929_v42  ;;  %v405_v42 = vld [vmem:[%s2387_s25 + $0x28] sm:$0xff] }
  0x20   : > { %1008 = vrot.lane.b32.xlu0 %v2439_v48, %s2323_s29  ;;  %v463_v0 = vrot.slane %v461_v57, 7  ;;  %v779_v1 = vshll.u32 %v2417_v38, 16  ;;  %v2462_v2 = vsel %vm924_vm3, %v952_v47, %v953_v53  ;;  %v765_v3 = vshrl.u32 %v2444_v52, 16 }
  0x21   : > { %v2455_v62 = vsel %vm924_vm3, %v949_v56, %v950_v49  ;;  %v769_v4 = vrot.slane %v767_v61, 1  ;;  %v772_v5 = vshll.u32 %v651_v46, 16  ;;  %v686_v8 = vor.u32 %v685_v60, %v681_v54 }
  0x22   : > { %v466_v6 = vor.u32 %v464_v58, %v463_v0  ;;  %v643_v7 = vsel %vm2404_vm2, %v463_v0, 0  ;;  %v690_v9 = vrot.slane %v688_v59, 1  ;;  %v777_v11 = vshrl.u32 %v2417_v38, 16 }
  0x23   : > { %989 = vrot.lane.b32.xlu1 %v2455_v62, %s2324_s30  ;;  %v926_v10 = vrot.slane %v643_v7, 1  ;;  %v781_v12 = vrot.slane %v779_v1, 1  ;;  %v784_v13 = vshll.u32 %v652_v43, 16  ;;  %v770_v16 = vor.u32 %v769_v4, %v765_v3 }
  0x24   : > { %975 = vrot.lane.b32.xlu0 %v2458_v63, %s2324_s30  ;;  %v2474_v14 = vsel %vm2404_vm2, 0, %v466_v6  ;;  %v774_v17 = vrot.slane %v772_v5, 1  ;;  %v691_v19 = vsel %vm667_vm4, %v686_v8, %v690_v9  ;;  %v791_v23 = vshll.u32 %v2432_v44, 16 }
  0x25   : > { %v925_v15 = vrot.slane %v2474_v14, 1  ;;  %v671_v18 = vshll.u32 %v2474_v14, 16  ;;  %v782_v21 = vor.u32 %v781_v12, %v777_v11  ;;  %v786_v22 = vrot.slane %v784_v13, 1 }
  0x26   : > { %v676_v24 = vshll.u32 %v643_v7, 16  ;;  %v653_v25 = vsel %vm2404_vm2, %v2408_v28, 0  ;;  %v2488_v27 = vsel %vm667_vm4, %v770_v16, %v774_v17  ;;  %v669_v29 = vshrl.u32 %v2474_v14, 16 }
  0x27   : > { %991 = vrot.lane.b32.xlu1 %v2462_v2, %s2324_s30  ;;  %v927_v20 = vsel %vm924_vm3, %v925_v15, %v926_v10  ;;  %v673_v30 = vrot.slane %v671_v18, 1  ;;  %v695_v32 = vshll.u32 %v2439_v48, 16  ;;  %v645_v35 = vsel %vm2404_vm2, %v2410_v31, 0 }
  0x28   : > { %973 = vrot.lane.b32.xlu0 %v927_v20, %s2324_s30  ;;  %v2499_v36 = vsel %vm667_vm4, %v782_v21, %v786_v22  ;;  %v789_v28 = vshrl.u32 %v2432_v44, 16  ;;  %v793_v37 = vrot.slane %v791_v23, 1  ;;  %v796_v39 = vshll.u32 %v653_v25, 16 }
  0x29   : > { %v678_v43 = vrot.slane %v676_v24, 1  ;;  %v442_v45 = vpack.c.bf16 %v421_v34, %v420_v33  ;;  %v674_v46 = vor.u32 %v673_v30, %v669_v29  ;;  %v693_v47 = vshrl.u32 %v2439_v48, 16  ;;  %v422_v34 = vld [vmem:[%s2387_s25 + $0xb0] sm:$0xff] }
  0x2a   : > { %v697_v49 = vrot.slane %v695_v32, 1  ;;  %v700_v50 = vshll.u32 %v645_v35, 16  ;;  %v434_v31 = vpack.c.bf16 %v405_v42, %v404_v40  ;;  %v794_v51 = vor.u32 %v793_v37, %v789_v28  ;;  %v2170_v28 = vld.sshfl [vmem:[%s3381_s3] sm:$0x33 pattern:$0x75316420] }
  0x2b   : > { %862 = vrot.lane.b32.xlu1 %v691_v19, %s2325_s6  ;;  %v798_v53 = vrot.slane %v796_v39, 1  ;;  %v538_v54 = vshrl.u32 %v442_v45, 16  ;;  %v679_v55 = vsel %vm667_vm4, %v674_v46, %v678_v43  ;;  %v541_v61 = vshll.u32 %v442_v45, 16  ;;  %v406_v45 = vld [vmem:[%s2387_s25 + $0x30] sm:$0xff]  ;;  %v407_v46 = vld [vmem:[%s2387_s25 + $0x38] sm:$0xff] }
  0x2c   : > { %876 = vrot.lane.b32.xlu0 %v2488_v27, %s2325_s6  ;;  %v698_v56 = vor.u32 %v697_v49, %v693_v47  ;;  %v702_v57 = vrot.slane %v700_v50, 1  ;;  %v482_v58 = vshrl.u32 %v434_v31, 16  ;;  %v485_v3 = vshll.u32 %v434_v31, 16 }
  0x2d   : > { %v2514_v59 = vsel %vm667_vm4, %v794_v51, %v798_v53  ;;  %v540_v60 = vrot.slane %v538_v54, 7  ;;  %v955_v4 = vrot.slane %v2432_v44, 1  ;;  %v956_v5 = vrot.slane %v653_v25, 1 }
  0x2e   : > { %v2518_v0 = vsel %vm667_vm4, %v698_v56, %v702_v57  ;;  %v484_v1 = vrot.slane %v482_v58, 7  ;;  %v931_v7 = vrot.slane %v2439_v48, 1  ;;  %v932_v8 = vrot.slane %v645_v35, 1  ;;  %v423_v35 = vld [vmem:[%s2387_s25 + $0xb8] sm:$0xff] }
  0x2f   : > { %878 = vrot.lane.b32.xlu1 %v2499_v36, %s2325_s6  ;;  %v543_v6 = vor.u32 %v541_v61, %v540_v60  ;;  %v2529_v10 = vsel %vm924_vm3, %v955_v4, %v956_v5  ;;  %v2172_v37 = vld.sshfl [vmem:[%s3381_s3 + $0x8] sm:$0x33 pattern:$0x75316420]  ;;  %v2330_v39 = vmov 1966171168   ;;  %v1512_v42 = vlaneseq }
  0x30   : > { %1050 = vrot.lane.b32.xlu0 %v691_v19, %s2326_s7  ;;  %v487_v9 = vor.u32 %v485_v3, %v484_v1  ;;  %v2538_v12 = vsel %vm924_vm3, %v931_v7, %v932_v8  ;;  %v2556_v17 = vsel %vm2404_vm2, %v484_v1, 0  ;;  %v1510_v40 = vunpack.c.l.s4 %v2330_v39  ;;  %v2171_v53 = vld.sshfl [vmem:[%s3381_s3 + $0x4] sm:$0x1 pattern:$0x75316420] }
  0x31   : > { %v2535_v11 = vsel %vm2404_vm2, 0, %v543_v6  ;;  %v712_v23 = vshll.u32 %v2556_v17, 16  ;;  %v2589_v43 = vpack.c.bf16 %v423_v35, %v422_v34  ;;  %v1508_v47 = vcombine.high %v2170_v28, %v2170_v28  ;;  %v2174_v56 = vld.sshfl [vmem:[%s3381_s3 + $0x10] sm:$0x33 pattern:$0x75316420] }
  0x32   : > { %v2544_v13 = vsel %vm2404_vm2, 0, %v487_v9  ;;  %v803_v15 = vshll.u32 %v2535_v11, 16  ;;  %v801_v18 = vshrl.u32 %v2535_v11, 16  ;;  %v1511_v49 = vunpack.c.0.s8 %v1510_v40 }
  0x33   : > { %1066 = vrot.lane.b32.xlu1 %v2499_v36, %s2326_s7  ;;  %v707_v16 = vshll.u32 %v2544_v13, 16  ;;  %v705_v21 = vshrl.u32 %v2544_v13, 16  ;;  %v714_v30 = vrot.slane %v712_v23, 1  ;;  %v1513_v50 = vshrl.u32 %v1512_v42, 7 }
  0x34   : > { %860 = vrot.lane.b32.xlu0 %v679_v55, %s2325_s6  ;;  %v805_v19 = vrot.slane %v803_v15, 1  ;;  %v958_v31 = vrot.slane %v2535_v11, 1  ;;  %v1546_v54 = vcombine.high %v2172_v37, %v2172_v37  ;;  %v934_v57 = vrot.slane %v2544_v13, 1 }
  0x35   : > { %v709_v22 = vrot.slane %v707_v16, 1  ;;  %v2599_v55 = vsub.s32 %v1511_v49, %v1513_v50  ;;  %v935_v58 = vrot.slane %v2556_v17, 1  ;;  %v435_v61 = vpack.c.bf16 %v407_v46, %v406_v45 }
  0x36   : > { %v806_v24 = vor.u32 %v805_v19, %v801_v18  ;;  %v548_v7 = vshll.u32 %v2589_v43, 16  ;;  %v1584_v9 = vcombine.high %v2174_v56, %v2174_v56  ;;  %v2173_v18 = vld.sshfl [vmem:[%s3381_s3 + $0xc] sm:$0x1 pattern:$0x75316420] }
  0x37   : > { %1068 = vrot.lane.b32.xlu1 %v2514_v59, %s2326_s7  ;;  %v710_v29 = vor.u32 %v709_v22, %v705_v21  ;;  %v1515_v1 = vrot.slane %v2170_v28, %v2599_v55  ;;  %v1522_v3 = vrot.slane %v1508_v47, %v2599_v55  ;;  %v1538_v4 = vrot.slane %v2171_v53, %v2599_v55 }
  0x38   : > { %1052 = vrot.lane.b32.xlu0 %v2518_v0, %s2326_s7  ;;  %v1553_v5 = vrot.slane %v2172_v37, %v2599_v55  ;;  %v1560_v8 = vrot.slane %v1546_v54, %v2599_v55  ;;  %v2626_v22 = vsel %vm924_vm3, %v934_v57, %v935_v58  ;;  %v1576_v34 = vrot.slane %v2173_v18, %v2599_v55 }
  0x39   : > { %v2575_v33 = vsel %vm667_vm4, %v710_v29, %v714_v30  ;;  %v1663_v17 = vcombine.low %v1515_v1, %v1522_v3  ;;  %v2182_v21 = vcombine.high %v1515_v1, %v1522_v3  ;;  %v2175_v29 = vld.sshfl [vmem:[%s3381_s3 + $0x14] sm:$0x1 pattern:$0x75316420]  ;;  %v1591_v35 = vrot.slane %v2174_v56, %v2599_v55 }
  0x3a   : > { %v1561_v15 = vcombine.high %v1553_v5, %v1553_v5  ;;  %v2177_v16 = vpack.i.b16 %v1553_v5, %v1538_v4  ;;  %v1562_v19 = vcombine.high %v1560_v8, %v1560_v8  ;;  %v1598_v40 = vrot.slane %v1584_v9, %v2599_v55 }
  0x3b   : > { %1102 = vrot.lane.b32.xlu1 %v2462_v2, %s2327_s8  ;;  %v492_v42 = vshll.u32 %v435_v61, 16  ;;  %v1614_v45 = vrot.slane %v2175_v29, %v2599_v55  ;;  %v425_v29 = vld [vmem:[%s2387_s25 + $0xc8] sm:$0xff] }
  0x3c   : > { %1086 = vrot.lane.b32.xlu0 %v2458_v63, %s2327_s8  ;;  %v654_v63 = vsel %vm2404_vm2, %v540_v60, 0  ;;  %v545_v60 = vshrl.u32 %v2589_v43, 16  ;;  %v1629_v23 = vunpack.i.h.s16 %v1561_v15  ;;  %v1599_v43 = vcombine.high %v1591_v35, %v1591_v35 }
  0x3d   : > { %v808_v20 = vshll.u32 %v654_v63, 16  ;;  %v959_v51 = vrot.slane %v654_v63, 1  ;;  %v1625_v63 = vunpack.i.h.s16 %v1553_v5  ;;  %v1631_v46 = vunpack.i.h.s16 %v1562_v19 }
  0x3e   : > { %v547_v28 = vrot.slane %v545_v60, 7  ;;  %v2180_v37 = vpack.i.b16 %v1562_v19, %v1629_v23  ;;  %v1641_v53 = vunpack.i.l.s16 %v1614_v45  ;;  %v1713_v56 = vcombine.low %v1598_v40, %v1599_v43 }
  0x3f   : > { %1104 = vrot.lane.b32.xlu1 %v2529_v10, %s2327_s8  ;;  %v810_v25 = vrot.slane %v808_v20, 1  ;;  %v2616_v6 = vsel %vm924_vm3, %v958_v31, %v959_v51  ;;  %v1627_v20 = vunpack.i.h.s16 %v1560_v8  ;;  %v1600_v31 = vcombine.high %v1598_v40, %v1598_v40 }
  0x40   : > { %1088 = vrot.lane.b32.xlu0 %v2538_v12, %s2327_s8  ;;  %v2181_v54 = vpack.i.b16 %v1576_v34, %v1631_v46  ;;  %v550_v57 = vor.u32 %v548_v7, %v547_v28  ;;  %v1728_v1 = vrot.slane %v1713_v56, %v2599_v55 }
  0x41   : > { %v2570_v32 = vsel %vm667_vm4, %v806_v24, %v810_v25  ;;  %v2178_v24 = vpack.i.b16 %v1560_v8, %v1625_v63  ;;  %v1673_v25 = vrot.slane %v1663_v17, %v2599_v55  ;;  %v2179_v30 = vpack.i.b16 %v1561_v15, %v1627_v20 }
  0x42   : > { %v1712_v60 = vcombine.low %v2181_v54, %v1591_v35  ;;  %v2655_v9 = vsel %vm2404_vm2, 0, %v550_v57 }
  0x43   : > { %1135 = vrot.lane.b32.xlu1 %v2432_v44, %s2328_s9  ;;  %v1665_v39 = vcombine.low %v2177_v16, %v2178_v24  ;;  %v1666_v47 = vcombine.low %v2179_v30, %v2180_v37  ;;  %v408_v37 = vld [vmem:[%s2387_s25 + $0x40] sm:$0xff] }
  0x44   : > { %1119 = vrot.lane.b32.xlu0 %v2439_v48, %s2328_s9  ;;  %v1721_v8 = vrot.slane %v1712_v60, %v2599_v55 }
  0x45   : > { %v1687_v49 = vrot.slane %v1665_v39, %v2599_v55  ;;  %v1694_v58 = vrot.slane %v1666_v47, %v2599_v55 }
  0x46   : > { %v1736_v63 = vcombine.low %v1721_v8, %v1728_v1 }
  0x47   : > { %1137 = vrot.lane.b32.xlu1 %v2535_v11, %s2328_s9  ;;  %v1696_v3 = vcombine.low %v1687_v49, %v1694_v58 }
  0x48   : > { %1121 = vrot.lane.b32.xlu0 %v2544_v13, %s2328_s9  ;;  %v1743_v19 = vrot.slane %v1736_v63, %v2599_v55 }
  0x49   : > { %v1710_v15 = vrot.slane %v1696_v3, %v2599_v55 }
  0x4b   : > { %1179 = vrot.lane.b32.xlu1 %v2514_v59, %s2329_s10 }
  0x4c   : > { %1163 = vrot.lane.b32.xlu0 %v2518_v0, %s2329_s10 }
  0x4f   : > { %1181 = vrot.lane.b32.xlu1 %v2570_v32, %s2329_s10 }
  0x50   : > { %1165 = vrot.lane.b32.xlu0 %v2575_v33, %s2329_s10 }
  0x53   : > { %1215 = vrot.lane.b32.xlu1 %v2529_v10, %s2331_s15 }
  0x54   : > { %1199 = vrot.lane.b32.xlu0 %v2538_v12, %s2331_s15 }
  0x57   : > { %880 = vrot.lane.b32.xlu1 %v2514_v59, %s2325_s6  ;;  %v489_v59 = vshrl.u32 %v435_v61, 16  ;;  %v1714_v61 = vcombine.low %v1600_v31, %v1641_v53 }
  0x58   : > { %864 = vrot.lane.b32.xlu0 %v2518_v0, %s2325_s6  ;;  %v1680_v0 = vrot.slane %v2182_v21, %v2599_v55  ;;  %v655_v21 = vsel %vm2404_vm2, %v547_v28, 0  ;;  %v409_v28 = vld [vmem:[%s2387_s25 + $0x48] sm:$0xff] }
  0x59   : > { %v491_v51 = vrot.slane %v489_v59, 7  ;;  %v1735_v7 = vrot.slane %v1714_v61, %v2599_v55  ;;  %v820_v35 = vshll.u32 %v655_v21, 16  ;;  %v436_v45 = vpack.c.bf16 %v409_v28, %v408_v37  ;;  %v426_v37 = vld [vmem:[%s2387_s25 + $0xd0] sm:$0xff]  ;;  %v427_v28 = vld [vmem:[%s2387_s25 + $0xd8] sm:$0xff] }
  0x5a   : > { %v1695_v50 = vcombine.low %v1673_v25, %v1680_v0  ;;  %v424_v25 = vld [vmem:[%s2387_s25 + $0xc0] sm:$0xff]  ;;  %v813_v0 = vshrl.u32 %v2655_v9, 16  ;;  %v961_v61 = vrot.slane %v2655_v9, 1 }
  0x5b   : > { %1217 = vrot.lane.b32.xlu1 %v2616_v6, %s2331_s15  ;;  %v494_v5 = vor.u32 %v492_v42, %v491_v51  ;;  %v1750_v16 = vrot.slane %v1735_v7, %v2599_v55  ;;  %v444_v39 = vpack.c.bf16 %v425_v29, %v424_v25  ;;  %v822_v47 = vrot.slane %v820_v35, 1 }
  0x5c   : > { %1201 = vrot.lane.b32.xlu0 %v2626_v22, %s2331_s15  ;;  %v1703_v4 = vrot.slane %v1695_v50, %v2599_v55  ;;  %v647_v55 = vsel %vm2404_vm2, %v491_v51, 0  ;;  %v496_v51 = vshrl.u32 %v436_v45, 16  ;;  %v499_v60 = vshll.u32 %v436_v45, 16 }
  0x5d   : > { %v2665_v59 = vsel %vm2404_vm2, 0, %v494_v5  ;;  %v1751_v23 = vcombine.low %v1743_v19, %v1750_v16  ;;  %v724_v43 = vshll.u32 %v647_v55, 16  ;;  %v552_v49 = vshrl.u32 %v444_v39, 16 }
  0x5e   : > { %v1711_v18 = vcombine.low %v1703_v4, %v1710_v15  ;;  %v719_v24 = vshll.u32 %v2665_v59, 16  ;;  %v717_v40 = vshrl.u32 %v2665_v59, 16  ;;  %v555_v56 = vshll.u32 %v444_v39, 16 }
  0x5f   : > { %882 = vrot.lane.b32.xlu1 %v2570_v32, %s2325_s6  ;;  %v726_v31 = vrot.slane %v724_v43, 1  ;;  %v554_v54 = vrot.slane %v552_v49, 7  ;;  %v498_v58 = vrot.slane %v496_v51, 7  ;;  %v937_v3 = vrot.slane %v2665_v59, 1  ;;  %v411_v43 = vld [vmem:[%s2387_s25 + $0x58] sm:$0xff] }
  0x60   : > { %866 = vrot.lane.b32.xlu0 %v2575_v33, %s2325_s6  ;;  %2225 = vmatprep.subr.bf16.mxu0 %v1711_v18  ;;  %v721_v42 = vrot.slane %v719_v24, 1 }
  0x61   : > { %2261 = vmatprep.subr.bf16.mxu1 %v1711_v18  ;;  %2226 = vmatpush3.bf16.msra.mxu0 %v1711_v18  ;;  %v557_v1 = vor.u32 %v555_v56, %v554_v54  ;;  %v501_v4 = vor.u32 %v499_v60, %v498_v58  ;;  %v648_v16 = vsel %vm2404_vm2, %v498_v58, 0 }
  0x62   : > { %2263 = vmatpush3.bf16.msra.mxu1 %v1711_v18  ;;  %v722_v50 = vor.u32 %v721_v42, %v717_v40  ;;  %v410_v42 = vld [vmem:[%s2387_s25 + $0x50] sm:$0xff] }
  0x63   : > { %993 = vrot.lane.b32.xlu1 %v2529_v10, %s2324_s30  ;;  %v2332_v10 = vmov 65535   ;;  %v2715_v8 = vsel %vm2404_vm2, 0, %v557_v1 }
  0x64   : > { %977 = vrot.lane.b32.xlu0 %v2538_v12, %s2324_s30  ;;  %v1788_v17 = vsel %vm1786_vm5, 4294967295, %v2332_v10  ;;  %v815_v12 = vshll.u32 %v2655_v9, 16  ;;  %v2698_v57 = vsel %vm667_vm4, %v722_v50, %v726_v31  ;;  %v827_v15 = vshll.u32 %v2715_v8, 16 }
  0x65   : > { %v1789_v20 = vsel %vm1787_vm6, %v1788_v17, 0  ;;  %v825_v10 = vshrl.u32 %v2715_v8, 16  ;;  %v964_v39 = vrot.slane %v2715_v8, 1  ;;  %v941_v50 = vrot.slane %v648_v16, 1 }
  0x66   : > { %v1791_v30 = vand.u32 %v1789_v20, %v1751_v23  ;;  %v817_v34 = vrot.slane %v815_v12, 1  ;;  %v829_v17 = vrot.slane %v827_v15, 1  ;;  %v736_v20 = vshll.u32 %v648_v16, 16 }
  0x67   : > { %995 = vrot.lane.b32.xlu1 %v2616_v6, %s2324_s30  ;;  %v437_v31 = vpack.c.bf16 %v411_v43, %v410_v42 }
  0x68   : > { %979 = vrot.lane.b32.xlu0 %v2626_v22, %s2324_s30  ;;  %2227 = vmatprep.subr.bf16.mxu0 %v1791_v30  ;;  %v818_v46 = vor.u32 %v817_v34, %v813_v0  ;;  %v738_v25 = vrot.slane %v736_v20, 1  ;;  %v428_v20 = vld [vmem:[%s2387_s25 + $0xe0] sm:$0xff] }
  0x69   : > { %2262 = vmatprep.subr.bf16.mxu1 %v1791_v30  ;;  %2228 = vmatpush3.bf16.msra.mxu0 %v1791_v30 }
  0x6a   : > { %2264 = vmatpush3.bf16.msra.mxu1 %v1791_v30  ;;  %v2693_v53 = vsel %vm667_vm4, %v818_v46, %v822_v47  ;;  %v445_v46 = vpack.c.bf16 %v427_v28, %v426_v37 }
  0x6b   : > { %1026 = vrot.lane.b32.xlu1 %v2535_v11, %s2323_s29 }
  0x6c   : > { %1010 = vrot.lane.b32.xlu0 %v2544_v13, %s2323_s29  ;;  %v559_v56 = vshrl.u32 %v445_v46, 16  ;;  %v562_v1 = vshll.u32 %v445_v46, 16 }
  0x6f   : > { %1028 = vrot.lane.b32.xlu1 %v2655_v9, %s2323_s29 }
  0x70   : > { %1012 = vrot.lane.b32.xlu0 %v2665_v59, %s2323_s29 }
  0x73   : > { %1070 = vrot.lane.b32.xlu1 %v2570_v32, %s2326_s7  ;;  %v962_v32 = vrot.slane %v655_v21, 1  ;;  %v830_v21 = vor.u32 %v829_v17, %v825_v10 }
  0x74   : > { %1054 = vrot.lane.b32.xlu0 %v2575_v33, %s2326_s7  ;;  %v938_v33 = vrot.slane %v647_v55, 1 }
  0x75   : > { %v2709_v5 = vsel %vm924_vm3, %v961_v61, %v962_v32  ;;  %v503_v61 = vshrl.u32 %v437_v31, 16  ;;  %v561_v32 = vrot.slane %v559_v56, 7 }
  0x76   : > { %v2718_v7 = vsel %vm924_vm3, %v937_v3, %v938_v33  ;;  %v506_v33 = vshll.u32 %v437_v31, 16 }
  0x77   : > { %1072 = vrot.lane.b32.xlu1 %v2693_v53, %s2326_s7  ;;  %v505_v3 = vrot.slane %v503_v61, 7  ;;  %v564_v15 = vor.u32 %v562_v1, %v561_v32 }
  0x78   : > { %1056 = vrot.lane.b32.xlu0 %v2698_v57, %s2326_s7 }
  0x79   : > { %v2818_v10 = vsel %vm2404_vm2, 0, %v564_v15 }
  0x7b   : > { %1106 = vrot.lane.b32.xlu1 %v2616_v6, %s2327_s8  ;;  %v2724_v6 = vsel %vm2404_vm2, 0, %v501_v4 }
  0x7c   : > { %1090 = vrot.lane.b32.xlu0 %v2626_v22, %s2327_s8  ;;  %v656_v22 = vsel %vm2404_vm2, %v554_v54, 0  ;;  %v731_v63 = vshll.u32 %v2724_v6, 16  ;;  %v729_v19 = vshrl.u32 %v2724_v6, 16  ;;  %v940_v49 = vrot.slane %v2724_v6, 1 }
  0x7d   : > { %v832_v18 = vshll.u32 %v656_v22, 16  ;;  %v965_v40 = vrot.slane %v656_v22, 1 }
  0x7e   : > { %v733_v12 = vrot.slane %v731_v63, 1  ;;  %v2790_v58 = vsel %vm924_vm3, %v940_v49, %v941_v50  ;;  %v508_v63 = vor.u32 %v506_v33, %v505_v3 }
  0x7f   : > { %1108 = vrot.lane.b32.xlu1 %v2709_v5, %s2327_s8  ;;  %v834_v23 = vrot.slane %v832_v18, 1  ;;  %v2783_v51 = vsel %vm924_vm3, %v964_v39, %v965_v40  ;;  %v412_v39 = vld [vmem:[%s2387_s25 + $0x60] sm:$0xff]  ;;  %v413_v40 = vld [vmem:[%s2387_s25 + $0x68] sm:$0xff] }
  0x80   : > { %1092 = vrot.lane.b32.xlu0 %v2718_v7, %s2327_s8  ;;  %v734_v24 = vor.u32 %v733_v12, %v729_v19  ;;  %v2824_v18 = vsel %vm2404_vm2, 0, %v508_v63  ;;  %v657_v19 = vsel %vm2404_vm2, %v561_v32, 0  ;;  %v438_v56 = vpack.c.bf16 %v413_v40, %v412_v39 }
  0x81   : > { %v2747_v29 = vsel %vm667_vm4, %v830_v21, %v834_v23  ;;  %v743_v12 = vshll.u32 %v2824_v18, 16  ;;  %v429_v21 = vld [vmem:[%s2387_s25 + $0xe8] sm:$0xff]  ;;  %v844_v28 = vshll.u32 %v657_v19, 16  ;;  %v741_v46 = vshrl.u32 %v2824_v18, 16 }
  0x82   : > { %v2756_v0 = vsel %vm667_vm4, %v734_v24, %v738_v25  ;;  %v649_v24 = vsel %vm2404_vm2, %v505_v3, 0  ;;  %v837_v25 = vshrl.u32 %v2818_v10, 16  ;;  %v446_v43 = vpack.c.bf16 %v429_v21, %v428_v20 }
  0x83   : > { %1139 = vrot.lane.b32.xlu1 %v2655_v9, %s2328_s9  ;;  %v745_v49 = vrot.slane %v743_v12, 1  ;;  %v748_v50 = vshll.u32 %v649_v24, 16  ;;  %v846_v32 = vrot.slane %v844_v28, 1  ;;  %v513_v40 = vshll.u32 %v438_v56, 16 }
  0x84   : > { %1123 = vrot.lane.b32.xlu0 %v2665_v59, %s2328_s9  ;;  %v566_v3 = vshrl.u32 %v446_v43, 16 }
  0x85   : > { %v746_v33 = vor.u32 %v745_v49, %v741_v46  ;;  %v750_v15 = vrot.slane %v748_v50, 1  ;;  %v968_v46 = vrot.slane %v657_v19, 1  ;;  %v944_v50 = vrot.slane %v649_v24, 1 }
  0x86   : > { %v568_v21 = vrot.slane %v566_v3, 7 }
  0x87   : > { %1141 = vrot.lane.b32.xlu1 %v2715_v8, %s2328_s9 }
  0x88   : > { %1125 = vrot.lane.b32.xlu0 %v2724_v6, %s2328_s9 }
  0x8b   : > { %1183 = vrot.lane.b32.xlu1 %v2693_v53, %s2329_s10 }
  0x8c   : > { %1167 = vrot.lane.b32.xlu0 %v2698_v57, %s2329_s10 }
  0x8d   : > { %v2751_v55 = vpop.permute.xlu1 %1022 }
  0x8e   : > { %v2753_v30 = vpop.permute.xlu0 %1006 }
  0x8f   : > { %1185 = vrot.lane.b32.xlu1 %v2747_v29, %s2329_s10 }
  0x90   : > { %1169 = vrot.lane.b32.xlu0 %v2756_v0, %s2329_s10 }
  0x91   : > { %v2762_v34 = vpop.permute.xlu1 %1024 }
  0x92   : > { %v2764_v35 = vpop.permute.xlu0 %1008 }
  0x93   : > { %1219 = vrot.lane.b32.xlu1 %v2709_v5, %s2331_s15 }
  0x94   : > { %1203 = vrot.lane.b32.xlu0 %v2718_v7, %s2331_s15 }
  0x95   : > { %v2775_v45 = vpop.permute.xlu1 %989 }
  0x96   : > { %v2777_v47 = vpop.permute.xlu0 %975 }
  0x97   : > { %884 = vrot.lane.b32.xlu1 %v2693_v53, %s2325_s6 }
  0x98   : > { %868 = vrot.lane.b32.xlu0 %v2698_v57, %s2325_s6 }
  0x99   : > { %v2787_v54 = vpop.permute.xlu1 %991 }
  0x9a   : > { %v2792_v60 = vpop.permute.xlu0 %973 }
  0x9b   : > { %1221 = vrot.lane.b32.xlu1 %v2783_v51, %s2331_s15 }
  0x9c   : > { %1205 = vrot.lane.b32.xlu0 %v2790_v58, %s2331_s15 }
  0x9d   : > { %v2798_v53 = vpop.permute.xlu1 %862 }
  0x9e   : > { %v2800_v57 = vpop.permute.xlu0 %876 }
  0x9f   : > { %886 = vrot.lane.b32.xlu1 %v2747_v29, %s2325_s6 }
  0xa0   : > { %870 = vrot.lane.b32.xlu0 %v2756_v0, %s2325_s6 }
  0xa1   : > { %v2806_v4 = vpop.permute.xlu1 %878 }
  0xa2   : > { %v2808_v22 = vpop.permute.xlu0 %1050 }
  0xa3   : > { %997 = vrot.lane.b32.xlu1 %v2709_v5, %s2324_s30  ;;  %v839_v5 = vshll.u32 %v2818_v10, 16 }
  0xa4   : > { %981 = vrot.lane.b32.xlu0 %v2718_v7, %s2324_s30 }
  0xa5   : > { %v2814_v16 = vpop.permute.xlu1 %1066  ;;  %v841_v37 = vrot.slane %v839_v5, 1  ;;  %v510_v5 = vshrl.u32 %v438_v56, 16 }
  0xa6   : > { %v861_v17 = vpop.permute.xlu0 %860 }
  0xa7   : > { %999 = vrot.lane.b32.xlu1 %v2783_v51, %s2324_s30  ;;  %v842_v61 = vor.u32 %v841_v37, %v837_v25  ;;  %v569_v25 = vshll.u32 %v446_v43, 16  ;;  %v2868_v37 = vsel %vm667_vm4, %v746_v33, %v750_v15  ;;  %v512_v39 = vrot.slane %v510_v5, 7 }
  0xa8   : > { %983 = vrot.lane.b32.xlu0 %v2790_v58, %s2324_s30  ;;  %v943_v43 = vrot.slane %v2824_v18, 1  ;;  %v1233_v56 = vsel %vm1231_vm7, %v2474_v14, %v861_v17 }
  0xa9   : > { %v2829_v7 = vpop.permute.xlu1 %1068  ;;  %v2863_v12 = vsel %vm667_vm4, %v842_v61, %v846_v32  ;;  %v571_v49 = vor.u32 %v569_v25, %v568_v21  ;;  %v1249_v61 = vsel %vm1231_vm7, %v2444_v52, %v2800_v57  ;;  %v515_v19 = vor.u32 %v513_v40, %v512_v39 }
  0xaa   : > { %v2836_v23 = vpop.permute.xlu0 %1052  ;;  %v1282_v14 = vsel %vm1264_vm8, %v1249_v61, %v2775_v45  ;;  %v1266_v57 = vsel %vm1264_vm8, %v1233_v56, %v2792_v60  ;;  %v2911_v45 = vsel %vm2404_vm2, %v568_v21, 0  ;;  %v2924_v21 = vsel %vm2404_vm2, %v512_v39, 0 }
  0xab   : > { %1030 = vrot.lane.b32.xlu1 %v2715_v8, %s2323_s29  ;;  %v2894_v33 = vsel %vm2404_vm2, 0, %v571_v49  ;;  %v1315_v15 = vsel %vm1297_vm9, %v1282_v14, %v2751_v55  ;;  %v1299_v5 = vsel %vm1297_vm9, %v1266_v57, %v2753_v30  ;;  %v1251_v55 = vsel %vm1231_vm7, %v2417_v38, %v2806_v4 }
  0xac   : > { %1014 = vrot.lane.b32.xlu0 %v2724_v6, %s2323_s29  ;;  %v851_v60 = vshll.u32 %v2894_v33, 16  ;;  %v1348_v40 = vsel %vm1330_vm10, %v1315_v15, %v2814_v16  ;;  %v849_v16 = vshrl.u32 %v2894_v33, 16  ;;  %v856_v49 = vshll.u32 %v2911_v45, 16 }
  0xad   : > { %v2847_v42 = vpop.permute.xlu1 %1102  ;;  %v1332_v39 = vsel %vm1330_vm10, %v1299_v5, %v2808_v22  ;;  %v1235_v4 = vsel %vm1231_vm7, %v2424_v41, %v2798_v53  ;;  %v760_v22 = vshll.u32 %v2924_v21, 16 }
  0xae   : > { %v2850_v31 = vpop.permute.xlu0 %1086  ;;  %v1381_v30 = vsel %vm1363_vm11, %v1348_v40, %v2847_v42 }
  0xaf   : > { %1032 = vrot.lane.b32.xlu1 %v2818_v10, %s2323_s29  ;;  %v1365_v42 = vsel %vm1363_vm11, %v1332_v39, %v2850_v31  ;;  %v1268_v31 = vsel %vm1264_vm8, %v1235_v4, %v2777_v47 }
  0xb0   : > { %1016 = vrot.lane.b32.xlu0 %v2824_v18, %s2323_s29  ;;  %v1301_v47 = vsel %vm1297_vm9, %v1268_v31, %v2764_v35 }
  0xb1   : > { %v2856_v1 = vpop.permute.xlu1 %1104 }
  0xb2   : > { %v2858_v63 = vpop.permute.xlu0 %1088 }
  0xb3   : > { %1074 = vrot.lane.b32.xlu1 %v2747_v29, %s2326_s7  ;;  %v967_v29 = vrot.slane %v2818_v10, 1 }
  0xb4   : > { %1058 = vrot.lane.b32.xlu0 %v2756_v0, %s2326_s7 }
  0xb5   : > { %v1136_v20 = vpop.permute.xlu1 %1135  ;;  %v2888_v3 = vsel %vm924_vm3, %v967_v29, %v968_v46 }
  0xb6   : > { %v1120_v28 = vpop.permute.xlu0 %1119 }
  0xb7   : > { %1076 = vrot.lane.b32.xlu1 %v2863_v12, %s2326_s7  ;;  %v1398_v14 = vsel %vm1396_vm12, %v1365_v42, %v1120_v28  ;;  %v971_v42 = vrot.slane %v2911_v45, 1 }
  0xb8   : > { %1060 = vrot.lane.b32.xlu0 %v2868_v37, %s2326_s7 }
  0xb9   : > { %v2875_v0 = vpop.permute.xlu1 %1137 }
  0xba   : > { %v2883_v32 = vpop.permute.xlu0 %1121 }
  0xbb   : > { %1110 = vrot.lane.b32.xlu1 %v2783_v51, %s2327_s8  ;;  %v2901_v51 = vsel %vm924_vm3, %v943_v43, %v944_v50  ;;  %v1414_v43 = vsel %vm1396_vm12, %v1381_v30, %v1136_v20  ;;  %v853_v50 = vrot.slane %v851_v60, 1  ;;  %v1284_v20 = vsel %vm1264_vm8, %v1251_v55, %v2787_v54 }
  0xbc   : > { %1094 = vrot.lane.b32.xlu0 %v2790_v58, %s2327_s8  ;;  %v2907_v58 = vsel %vm2404_vm2, 0, %v515_v19  ;;  %v858_v54 = vrot.slane %v856_v49, 1  ;;  %v1317_v28 = vsel %vm1297_vm9, %v1284_v20, %v2762_v34  ;;  %v1334_v34 = vsel %vm1330_vm10, %v1301_v47, %v2836_v23 }
  0xbd   : > { %v1180_v24 = vpop.permute.xlu1 %1179  ;;  %v755_v29 = vshll.u32 %v2907_v58, 16  ;;  %v753_v61 = vshrl.u32 %v2907_v58, 16  ;;  %v854_v15 = vor.u32 %v853_v50, %v849_v16  ;;  %v1350_v5 = vsel %vm1330_vm10, %v1317_v28, %v2829_v7 }
  0xbe   : > { %v1164_v17 = vpop.permute.xlu0 %1163  ;;  %v1447_v56 = vsel %vm1429_vm13, %v1414_v43, %v1180_v24  ;;  %v1383_v55 = vsel %vm1363_vm11, %v1350_v5, %v2856_v1  ;;  %v1367_v35 = vsel %vm1363_vm11, %v1334_v34, %v2858_v63  ;;  %v947_v20 = vrot.slane %v2924_v21, 1 }
  0xbf   : > { %1112 = vrot.lane.b32.xlu1 %v2888_v3, %s2327_s8  ;;  %v757_v60 = vrot.slane %v755_v29, 1  ;;  %v1431_v41 = vsel %vm1429_vm13, %v1398_v14, %v1164_v17  ;;  %v762_v29 = vrot.slane %v760_v22, 1  ;;  %v1416_v16 = vsel %vm1396_vm12, %v1383_v55, %v2875_v0 }
  0xc0   : > { %1096 = vrot.lane.b32.xlu0 %v2901_v51, %s2327_s8  ;;  %v2982_v7 = vsel %vm667_vm4, %v854_v15, %v858_v54  ;;  %v1400_v23 = vsel %vm1396_vm12, %v1367_v35, %v2883_v32  ;;  %v946_v22 = vrot.slane %v2907_v58, 1 }
  0xc1   : > { %v1182_v25 = vpop.permute.xlu1 %1181  ;;  %v758_v40 = vor.u32 %v757_v60, %v753_v61  ;;  %v431_v61 = vld [vmem:[%s2387_s25 + $0xf8] sm:$0xff] }
  0xc2   : > { %v1166_v46 = vpop.permute.xlu0 %1165  ;;  %v1449_v1 = vsel %vm1429_vm13, %v1416_v16, %v1182_v25  ;;  %v430_v25 = vld [vmem:[%s2387_s25 + $0xf0] sm:$0xff]  ;;  %s2204_s25 = sadd.s32 240, %s2381_s22 }
  0xc3   : > { %1143 = vrot.lane.b32.xlu1 %v2818_v10, %s2328_s9  ;;  %v2993_v0 = vsel %vm667_vm4, %v758_v40, %v762_v29  ;;  %v1433_v43 = vsel %vm1429_vm13, %v1400_v23, %v1166_v46  ;;  %v970_v46 = vrot.slane %v2894_v33, 1  ;;  %s377_s13 = scalar_lea.vmem %s3380_s2, %s2204_s25 }
  0xc4   : > { %1127 = vrot.lane.b32.xlu0 %v2824_v18, %s2328_s9  ;;  %v454_v40 = vld [vmem:[%s377_s13] sm:$0xff]  ;;  %v455_v29 = vld [vmem:[%s377_s13 + $0x8] sm:$0xff] }
  0xc5   : > { %v1216_v19 = vpop.permute.xlu1 %1215  ;;  %v457_v16 = vmul.f32 0.0, %v454_v40  ;;  %v458_v35 = vmul.f32 0.0, %v455_v29 }
  0xc6   : > { %v1480_v57 = vsel %vm1462_vm14, %v1447_v56, %v1216_v19  ;;  %v1200_v53 = vpop.permute.xlu0 %1199  ;;  %v447_v19 = vpack.c.bf16 %v431_v61, %v430_v25 }
  0xc7   : > { %1145 = vrot.lane.b32.xlu1 %v2894_v33, %s2328_s9  ;;  %2245 = vmatprep.mubr.msk.bf16.mxu1 %vm1753_vm15, %v1480_v57  ;;  %v1464_v24 = vsel %vm1462_vm14, %v1431_v41, %v1200_v53  ;;  %v972_v57 = vsel %vm924_vm3, %v970_v46, %v971_v42  ;;  %v948_v41 = vsel %vm924_vm3, %v946_v22, %v947_v20 }
  0xc8   : > { %1129 = vrot.lane.b32.xlu0 %v2907_v58, %s2328_s9  ;;  %2229 = vmatprep.mubr.msk.bf16.mxu0 %vm1753_vm15, %v1464_v24  ;;  %v573_v60 = vshrl.u32 %v447_v19, 16 }
  0xc9   : > { %v2965_v17 = vpop.permute.xlu1 %880 }
  0xca   : > { %v2973_v30 = vpop.permute.xlu0 %864  ;;  %v575_v31 = vrot.slane %v573_v60, 7 }
  0xcb   : > { %1187 = vrot.lane.b32.xlu1 %v2863_v12, %s2329_s10 }
  0xcc   : > { %1171 = vrot.lane.b32.xlu0 %v2868_v37, %s2329_s10  ;;  %v659_v34 = vsel %vm2404_vm2, %v575_v31, 0 }
  0xcd   : > { %v1218_v49 = vpop.permute.xlu1 %1217  ;;  %v1046_v23 = vshll.u32 %v659_v34, 16 }
  0xce   : > { %v1482_v39 = vsel %vm1462_vm14, %v1449_v1, %v1218_v49  ;;  %v1202_v50 = vpop.permute.xlu0 %1201 }
  0xcf   : > { %1189 = vrot.lane.b32.xlu1 %v2982_v7, %s2329_s10  ;;  %2246 = vmatmul.mubr.msk.bf16.vlgmr.msra.gmra.mrb[0].mxu1 %vm1753_vm15, %v1482_v39  ;;  %v1466_v63 = vsel %vm1462_vm14, %v1433_v43, %v1202_v50  ;;  %v459_v43 = vpack.c.bf16 %v458_v35, %v457_v16  ;;  %v1048_v25 = vrot.slane %v1046_v23, 1 }
  0xd0   : > { %1173 = vrot.lane.b32.xlu0 %v2993_v0, %s2329_s10  ;;  %2230 = vmatmul.mubr.msk.bf16.vlgmr.msra.gmra.mrb[0].mxu0 %vm1753_vm15, %v1466_v63 }
  0xd1   : > { %v3003_v32 = vpop.permute.xlu1 %882  ;;  %v580_v46 = vshrl.u32 %v459_v43, 16  ;;  %v583_v60 = vshll.u32 %v459_v43, 16 }
  0xd2   : > { %v3007_v4 = vpop.permute.xlu0 %866 }
  0xd3   : > { %1223 = vrot.lane.b32.xlu1 %v2888_v3, %s2331_s15  ;;  %v582_v20 = vrot.slane %v580_v46, 7 }
  0xd4   : > { %1207 = vrot.lane.b32.xlu0 %v2901_v51, %s2331_s15 }
  0xd5   : > { %v3015_v56 = vpop.permute.xlu1 %993 }
  0xd6   : > { %v3019_v14 = vpop.permute.xlu0 %977 }
  0xd7   : > { %888 = vrot.lane.b32.xlu1 %v2863_v12, %s2325_s6  ;;  %v576_v12 = vshll.u32 %v447_v19, 16 }
  0xd8   : > { %872 = vrot.lane.b32.xlu0 %v2868_v37, %s2325_s6 }
  0xd9   : > { %v3026_v45 = vpop.permute.xlu1 %995  ;;  %v578_v15 = vor.u32 %v576_v12, %v575_v31 }
  0xda   : > { %v3029_v53 = vpop.permute.xlu0 %979 }
  0xdb   : > { %1225 = vrot.lane.b32.xlu1 %v972_v57, %s2331_s15  ;;  %v641_v5 = vsel %vm2404_vm2, 0, %v578_v15  ;;  %v1084_v15 = vrot.slane %v659_v34, 1  ;;  %v1253_v34 = vsel %vm1231_vm7, %v2432_v44, %v2965_v17  ;;  %v660_v17 = vsel %vm2404_vm2, %v582_v20, 0 }
  0xdc   : > { %1209 = vrot.lane.b32.xlu0 %v948_v41, %s2331_s15  ;;  %v1041_v55 = vshll.u32 %v641_v5, 16  ;;  %v1039_v1 = vshrl.u32 %v641_v5, 16  ;;  %v1083_v12 = vrot.slane %v641_v5, 1  ;;  %v1159_v46 = vshll.u32 %v660_v17, 16 }
  0xdd   : > { %v3033_v21 = vpop.permute.xlu1 %1026 }
  0xde   : > { %v3035_v24 = vpop.permute.xlu0 %1010  ;;  %v1043_v49 = vrot.slane %v1041_v55, 1  ;;  %v3087_v55 = vsel %vm924_vm3, %v1083_v12, %v1084_v15  ;;  %v1239_v12 = vsel %vm1231_vm7, %v2544_v13, %v3007_v4 }
  0xdf   : > { %890 = vrot.lane.b32.xlu1 %v2982_v7, %s2325_s6 }
  0xe0   : > { %874 = vrot.lane.b32.xlu0 %v2993_v0, %s2325_s6  ;;  %v1044_v63 = vor.u32 %v1043_v49, %v1039_v1 }
  0xe1   : > { %v3042_v37 = vpop.permute.xlu1 %1028 }
  0xe2   : > { %v3044_v54 = vpop.permute.xlu0 %1012  ;;  %v3077_v19 = vsel %vm667_vm4, %v1044_v63, %v1048_v25 }
  0xe3   : > { %1001 = vrot.lane.b32.xlu1 %v2888_v3, %s2324_s30 }
  0xe4   : > { %985 = vrot.lane.b32.xlu0 %v2901_v51, %s2324_s30 }
  0xe5   : > { %v1071_v28 = vpop.permute.xlu1 %1070 }
  0xe6   : > { %v1055_v47 = vpop.permute.xlu0 %1054 }
  0xe7   : > { %1003 = vrot.lane.b32.xlu1 %v972_v57, %s2324_s30 }
  0xe8   : > { %987 = vrot.lane.b32.xlu0 %v948_v41, %s2324_s30 }
  0xe9   : > { %v3057_v3 = vpop.permute.xlu1 %1072 }
  0xea   : > { %v3061_v51 = vpop.permute.xlu0 %1056 }
  0xeb   : > { %1034 = vrot.lane.b32.xlu1 %v2894_v33, %s2323_s29 }
  0xec   : > { %1018 = vrot.lane.b32.xlu0 %v2907_v58, %s2323_s29 }
  0xed   : > { %v1107_v39 = vpop.permute.xlu1 %1106 }
  0xee   : > { %v1091_v50 = vpop.permute.xlu0 %1090 }
  0xef   : > { %1036 = vrot.lane.b32.xlu1 %v641_v5, %s2323_s29 }
  0xf0   : > { %1020 = vrot.lane.b32.xlu0 %v2444_v52, %s2323_s29 }
  0xf1   : > { %v3070_v61 = vpop.permute.xlu1 %1108 }
  0xf2   : > { %v3072_v42 = vpop.permute.xlu0 %1092 }
  0xf3   : > { %1078 = vrot.lane.b32.xlu1 %v2982_v7, %s2326_s7  ;;  %v585_v7 = vor.u32 %v583_v60, %v582_v20 }
  0xf4   : > { %1062 = vrot.lane.b32.xlu0 %v2993_v0, %s2326_s7 }
  0xf5   : > { %v1140_v22 = vpop.permute.xlu1 %1139  ;;  %v3092_v16 = vsel %vm2404_vm2, 0, %v585_v7 }
  0xf6   : > { %v1124_v31 = vpop.permute.xlu0 %1123  ;;  %v1154_v1 = vshll.u32 %v3092_v16, 16 }
  0xf7   : > { %1080 = vrot.lane.b32.xlu1 %v3077_v19, %s2326_s7 }
  0xf8   : > { %1064 = vrot.lane.b32.xlu0 %v2488_v27, %s2326_s7  ;;  %v1156_v25 = vrot.slane %v1154_v1, 1 }
  0xf9   : > { %v1142_v40 = vpop.permute.xlu1 %1141 }
  0xfa   : > { %v1126_v29 = vpop.permute.xlu0 %1125 }
  0xfb   : > { %1114 = vrot.lane.b32.xlu1 %v972_v57, %s2327_s8  ;;  %v1286_v57 = vsel %vm1264_vm8, %v1253_v34, %v3015_v56 }
  0xfc   : > { %1098 = vrot.lane.b32.xlu0 %v948_v41, %s2327_s8  ;;  %v1237_v41 = vsel %vm1231_vm7, %v2439_v48, %v2973_v30  ;;  %v1319_v49 = vsel %vm1297_vm9, %v1286_v57, %v3033_v21  ;;  %v1152_v21 = vshrl.u32 %v3092_v16, 16 }
  0xfd   : > { %v1184_v0 = vpop.permute.xlu1 %1183  ;;  %v1270_v23 = vsel %vm1264_vm8, %v1237_v41, %v3019_v14  ;;  %v1352_v56 = vsel %vm1330_vm10, %v1319_v49, %v1071_v28 }
  0xfe   : > { %v1168_v35 = vpop.permute.xlu0 %1167  ;;  %v1303_v43 = vsel %vm1297_vm9, %v1270_v23, %v3035_v24  ;;  %v1385_v48 = vsel %vm1363_vm11, %v1352_v56, %v1107_v39  ;;  %v1157_v60 = vor.u32 %v1156_v25, %v1152_v21 }
  0xff   : > { %1116 = vrot.lane.b32.xlu1 %v3087_v55, %s2327_s8  ;;  %v1336_v63 = vsel %vm1330_vm10, %v1303_v43, %v1055_v47  ;;  %v1418_v26 = vsel %vm1396_vm12, %v1385_v48, %v1140_v22  ;;  %v1255_v47 = vsel %vm1231_vm7, %v2535_v11, %v3003_v32 }
 0x100   : > { %1100 = vrot.lane.b32.xlu0 %v2455_v62, %s2327_s8  ;;  %v1369_v14 = vsel %vm1363_vm11, %v1336_v63, %v1091_v50  ;;  %v1451_v28 = vsel %vm1429_vm13, %v1418_v26, %v1184_v0  ;;  %s3272_s8 = scalar_lea.vmem %s3383_s5, %s2381_s22 }
 0x101   : > { %v1186_v44 = vpop.permute.xlu1 %1185  ;;  %v1402_v39 = vsel %vm1396_vm12, %v1369_v14, %v1124_v31  ;;  %v1161_v31 = vrot.slane %v1159_v46, 1 }
 0x102   : > { %v1170_v30 = vpop.permute.xlu0 %1169  ;;  %v1435_v22 = vsel %vm1429_vm13, %v1402_v39, %v1168_v35  ;;  %v1197_v35 = vrot.slane %v660_v17, 1 }
 0x103   : > { %1147 = vrot.lane.b32.xlu1 %v641_v5, %s2328_s9 }
 0x104   : > { %1131 = vrot.lane.b32.xlu0 %v2444_v52, %s2328_s9  ;;  %v1288_v52 = vsel %vm1264_vm8, %v1255_v47, %v3026_v45  ;;  %v1272_v45 = vsel %vm1264_vm8, %v1239_v12, %v3029_v53  ;;  %v1162_v53 = vsel %vm667_vm4, %v1157_v60, %v1161_v31 }
 0x105   : > { %v1220_v24 = vpop.permute.xlu1 %1219  ;;  %v1321_v11 = vsel %vm1297_vm9, %v1288_v52, %v3042_v37  ;;  %v1305_v7 = vsel %vm1297_vm9, %v1272_v45, %v3044_v54 }
 0x106   : > { %v1484_v5 = vsel %vm1462_vm14, %v1451_v28, %v1220_v24  ;;  %v1204_v20 = vpop.permute.xlu0 %1203  ;;  %v1354_v15 = vsel %vm1330_vm10, %v1321_v11, %v3057_v3 }
 0x107   : > { %1149 = vrot.lane.b32.xlu1 %v3092_v16, %s2328_s9  ;;  %2249 = vmatprep.mubr.msk.bf16.mxu1 %vm1753_vm15, %v1484_v5  ;;  %v1468_v50 = vsel %vm1462_vm14, %v1435_v22, %v1204_v20  ;;  %v1387_v13 = vsel %vm1363_vm11, %v1354_v15, %v3070_v61 }
 0x108   : > { %1133 = vrot.lane.b32.xlu0 %v2417_v38, %s2328_s9  ;;  %2233 = vmatprep.mubr.msk.bf16.mxu0 %vm1753_vm15, %v1468_v50  ;;  %v1338_v38 = vsel %vm1330_vm10, %v1305_v7, %v3061_v51  ;;  %v1420_v37 = vsel %vm1396_vm12, %v1387_v13, %v1142_v40  ;;  %v1196_v40 = vrot.slane %v3092_v16, 1 }
 0x109   : > { %v885_v32 = vpop.permute.xlu1 %884  ;;  %v1371_v3 = vsel %vm1363_vm11, %v1338_v38, %v3072_v42  ;;  %v1453_v0 = vsel %vm1429_vm13, %v1420_v37, %v1186_v44 }
 0x10a   : > { %v869_v4 = vpop.permute.xlu0 %868  ;;  %v1404_v61 = vsel %vm1396_vm12, %v1371_v3, %v1126_v29  ;;  %v1198_v57 = vsel %vm924_vm3, %v1196_v40, %v1197_v35 }
 0x10b   : > { %1191 = vrot.lane.b32.xlu1 %v3077_v19, %s2329_s10  ;;  %v1437_v34 = vsel %vm1429_vm13, %v1404_v61, %v1170_v30  ;;  %v1241_v5 = vsel %vm1231_vm7, %v2665_v59, %v869_v4 }
 0x10c   : > { %1175 = vrot.lane.b32.xlu0 %v2488_v27, %s2329_s10 }
 0x10d   : > { %v1222_v54 = vpop.permute.xlu1 %1221 }
 0x10e   : > { %v1486_v19 = vsel %vm1462_vm14, %v1453_v0, %v1222_v54  ;;  %v1206_v51 = vpop.permute.xlu0 %1205 }
 0x10f   : > { %1193 = vrot.lane.b32.xlu1 %v1162_v53, %s2329_s10  ;;  %2250 = vmatmul.mubr.msk.bf16.gmra.mrb[4].mxu1 %vm1753_vm15, %v1486_v19  ;;  %v1470_v42 = vsel %vm1462_vm14, %v1437_v34, %v1206_v51 }
 0x110   : > { %1177 = vrot.lane.b32.xlu0 %v2499_v36, %s2329_s10  ;;  %2234 = vmatmul.mubr.msk.bf16.gmra.mrb[4].mxu0 %vm1753_vm15, %v1470_v42 }
 0x111   : > { %v887_v27 = vpop.permute.xlu1 %886 }
 0x112   : > { %v871_v29 = vpop.permute.xlu0 %870  ;;  %v1259_v7 = vsel %vm1231_vm7, %v2715_v8, %v887_v27 }
 0x113   : > { %1227 = vrot.lane.b32.xlu1 %v3087_v55, %s2331_s15  ;;  %v1243_v53 = vsel %vm1231_vm7, %v2724_v6, %v871_v29 }
 0x114   : > { %1211 = vrot.lane.b32.xlu0 %v2455_v62, %s2331_s15 }
 0x115   : > { %v998_v1 = vpop.permute.xlu1 %997 }
 0x116   : > { %v982_v16 = vpop.permute.xlu0 %981 }
 0x117   : > { %1229 = vrot.lane.b32.xlu1 %v1198_v57, %s2331_s15  ;;  %v1274_v20 = vsel %vm1264_vm8, %v1241_v5, %v982_v16 }
 0x118   : > { %1213 = vrot.lane.b32.xlu0 %v2462_v2, %s2331_s15  ;;  %v1257_v2 = vsel %vm1231_vm7, %v2655_v9, %v885_v32 }
 0x119   : > { %v1000_v36 = vpop.permute.xlu1 %999  ;;  %v1290_v39 = vsel %vm1264_vm8, %v1257_v2, %v998_v1 }
 0x11a   : > { %v984_v41 = vpop.permute.xlu0 %983  ;;  %v1292_v38 = vsel %vm1264_vm8, %v1259_v7, %v1000_v36 }
 0x11b   : > { %v1276_v54 = vsel %vm1264_vm8, %v1243_v53, %v984_v41 }
 0x11d   : > { %v1031_v49 = vpop.permute.xlu1 %1030 }
 0x11e   : > { %v1015_v44 = vpop.permute.xlu0 %1014  ;;  %v1323_v47 = vsel %vm1297_vm9, %v1290_v39, %v1031_v49 }
 0x11f   : > { %v1307_v50 = vsel %vm1297_vm9, %v1274_v20, %v1015_v44 }
 0x121   : > { %v1033_v17 = vpop.permute.xlu1 %1032 }
 0x122   : > { %v1017_v23 = vpop.permute.xlu0 %1016  ;;  %v1325_v3 = vsel %vm1297_vm9, %v1292_v38, %v1033_v17 }
 0x123   : > { %v1309_v61 = vsel %vm1297_vm9, %v1276_v54, %v1017_v23 }
 0x125   : > { %v1075_v56 = vpop.permute.xlu1 %1074 }
 0x126   : > { %v1059_v55 = vpop.permute.xlu0 %1058  ;;  %v1356_v52 = vsel %vm1330_vm10, %v1323_v47, %v1075_v56 }
 0x127   : > { %v1340_v9 = vsel %vm1330_vm10, %v1307_v50, %v1059_v55 }
 0x129   : > { %v1077_v43 = vpop.permute.xlu1 %1076 }
 0x12a   : > { %v1061_v48 = vpop.permute.xlu0 %1060  ;;  %v1358_v8 = vsel %vm1330_vm10, %v1325_v3, %v1077_v43 }
 0x12b   : > { %v1342_v51 = vsel %vm1330_vm10, %v1309_v61, %v1061_v48 }
 0x12d   : > { %v1111_v30 = vpop.permute.xlu1 %1110 }
 0x12e   : > { %v1095_v21 = vpop.permute.xlu0 %1094  ;;  %v1389_v60 = vsel %vm1363_vm11, %v1356_v52, %v1111_v30 }
 0x12f   : > { %v1373_v11 = vsel %vm1363_vm11, %v1340_v9, %v1095_v21 }
 0x131   : > { %v1113_v62 = vpop.permute.xlu1 %1112 }
 0x132   : > { %v1097_v63 = vpop.permute.xlu0 %1096  ;;  %v1391_v19 = vsel %vm1363_vm11, %v1358_v8, %v1113_v62 }
 0x133   : > { %v1375_v6 = vsel %vm1363_vm11, %v1342_v51, %v1097_v63 }
 0x135   : > { %v1144_v26 = vpop.permute.xlu1 %1143 }
 0x136   : > { %v1128_v25 = vpop.permute.xlu0 %1127  ;;  %v1422_v12 = vsel %vm1396_vm12, %v1389_v60, %v1144_v26 }
 0x137   : > { %v1406_v45 = vsel %vm1396_vm12, %v1373_v11, %v1128_v25 }
 0x139   : > { %v1146_v46 = vpop.permute.xlu1 %1145 }
 0x13a   : > { %v1130_v14 = vpop.permute.xlu0 %1129  ;;  %v1424_v40 = vsel %vm1396_vm12, %v1391_v19, %v1146_v46 }
 0x13b   : > { %v1408_v27 = vsel %vm1396_vm12, %v1375_v6, %v1130_v14 }
 0x13d   : > { %v1188_v28 = vpop.permute.xlu1 %1187 }
 0x13e   : > { %v1172_v24 = vpop.permute.xlu0 %1171  ;;  %v1455_v59 = vsel %vm1429_vm13, %v1422_v12, %v1188_v28 }
 0x13f   : > { %v1439_v13 = vsel %vm1429_vm13, %v1406_v45, %v1172_v24 }
 0x141   : > { %v1190_v22 = vpop.permute.xlu1 %1189 }
 0x142   : > { %v1174_v31 = vpop.permute.xlu0 %1173  ;;  %v1457_v42 = vsel %vm1429_vm13, %v1424_v40, %v1190_v22 }
 0x143   : > { %v1441_v57 = vsel %vm1429_vm13, %v1408_v27, %v1174_v31 }
 0x145   : > { %v1224_v32 = vpop.permute.xlu1 %1223 }
 0x146   : > { %v1488_v15 = vsel %vm1462_vm14, %v1455_v59, %v1224_v32  ;;  %v1208_v4 = vpop.permute.xlu0 %1207 }
 0x147   : > { %2253 = vmatprep.mubr.msk.bf16.mxu1 %vm1753_vm15, %v1488_v15  ;;  %v1472_v37 = vsel %vm1462_vm14, %v1439_v13, %v1208_v4 }
 0x148   : > { %2237 = vmatprep.mubr.msk.bf16.mxu0 %vm1753_vm15, %v1472_v37 }
 0x149   : > { %v889_v0 = vpop.permute.xlu1 %888 }
 0x14a   : > { %v873_v34 = vpop.permute.xlu0 %872  ;;  %v1261_v47 = vsel %vm1231_vm7, %v2818_v10, %v889_v0 }
 0x14b   : > { %v1245_v52 = vsel %vm1231_vm7, %v2824_v18, %v873_v34 }
 0x14d   : > { %v1226_v35 = vpop.permute.xlu1 %1225 }
 0x14e   : > { %v1490_v29 = vsel %vm1462_vm14, %v1457_v42, %v1226_v35  ;;  %v1210_v1 = vpop.permute.xlu0 %1209 }
 0x14f   : > { %2254 = vmatmul.mubr.msk.bf16.gmra.mrb[8].mxu1 %vm1753_vm15, %v1490_v29  ;;  %v1474_v16 = vsel %vm1462_vm14, %v1441_v57, %v1210_v1  ;;  %v3265_v1 = vld [vmem:[%s3382_s4] ss:$0 sm:$0xff] }
 0x150   : > { %2238 = vmatmul.mubr.msk.bf16.gmra.mrb[8].mxu0 %vm1753_vm15, %v1474_v16 }
 0x151   : > { %v891_v36 = vpop.permute.xlu1 %890 }
 0x152   : > { %v875_v41 = vpop.permute.xlu0 %874  ;;  %v1263_v12 = vsel %vm1231_vm7, %v2894_v33, %v891_v36 }
 0x153   : > { %v1247_v15 = vsel %vm1231_vm7, %v2907_v58, %v875_v41 }
 0x155   : > { %v1002_v49 = vpop.permute.xlu1 %1001 }
 0x156   : > { %v986_v44 = vpop.permute.xlu0 %985  ;;  %v1294_v20 = vsel %vm1264_vm8, %v1261_v47, %v1002_v49 }
 0x157   : > { %v1278_v31 = vsel %vm1264_vm8, %v1245_v52, %v986_v44 }
 0x159   : > { %v1004_v17 = vpop.permute.xlu1 %1003 }
 0x15a   : > { %v988_v23 = vpop.permute.xlu0 %987  ;;  %v1296_v32 = vsel %vm1264_vm8, %v1263_v12, %v1004_v17 }
 0x15b   : > { %v1280_v38 = vsel %vm1264_vm8, %v1247_v15, %v988_v23 }
 0x15d   : > { %v1035_v56 = vpop.permute.xlu1 %1034 }
 0x15e   : > { %v1019_v55 = vpop.permute.xlu0 %1018  ;;  %v1327_v50 = vsel %vm1297_vm9, %v1294_v20, %v1035_v56 }
 0x15f   : > { %v1311_v11 = vsel %vm1297_vm9, %v1278_v31, %v1019_v55 }
 0x161   : > { %v1037_v43 = vpop.permute.xlu1 %1036 }
 0x162   : > { %v1021_v48 = vpop.permute.xlu0 %1020  ;;  %v1329_v7 = vsel %vm1297_vm9, %v1296_v32, %v1037_v43 }
 0x163   : > { %v1313_v0 = vsel %vm1297_vm9, %v1280_v38, %v1021_v48 }
 0x165   : > { %v1079_v30 = vpop.permute.xlu1 %1078 }
 0x166   : > { %v1063_v21 = vpop.permute.xlu0 %1062  ;;  %v1360_v9 = vsel %vm1330_vm10, %v1327_v50, %v1079_v30 }
 0x167   : > { %v1344_v45 = vsel %vm1330_vm10, %v1311_v11, %v1063_v21 }
 0x169   : > { %v1081_v62 = vpop.permute.xlu1 %1080 }
 0x16a   : > { %v1065_v63 = vpop.permute.xlu0 %1064  ;;  %v1362_v37 = vsel %vm1330_vm10, %v1329_v7, %v1081_v62 }
 0x16b   : > { %v1346_v61 = vsel %vm1330_vm10, %v1313_v0, %v1065_v63 }
 0x16d   : > { %v1115_v26 = vpop.permute.xlu1 %1114 }
 0x16e   : > { %v1099_v25 = vpop.permute.xlu0 %1098  ;;  %v1393_v10 = vsel %vm1363_vm11, %v1360_v9, %v1115_v26 }
 0x16f   : > { %v1377_v13 = vsel %vm1363_vm11, %v1344_v45, %v1099_v25 }
 0x171   : > { %v1117_v46 = vpop.permute.xlu1 %1116 }
 0x172   : > { %v1101_v14 = vpop.permute.xlu0 %1100  ;;  %v1395_v54 = vsel %vm1363_vm11, %v1362_v37, %v1117_v46 }
 0x173   : > { %v1379_v51 = vsel %vm1363_vm11, %v1346_v61, %v1101_v14 }
 0x175   : > { %v1148_v28 = vpop.permute.xlu1 %1147 }
 0x176   : > { %v1132_v2 = vpop.permute.xlu0 %1131  ;;  %v1426_v18 = vsel %vm1396_vm12, %v1393_v10, %v1148_v28 }
 0x177   : > { %v1410_v53 = vsel %vm1396_vm12, %v1377_v13, %v1132_v2 }
 0x179   : > { %v1150_v24 = vpop.permute.xlu1 %1149 }
 0x17a   : > { %v1134_v39 = vpop.permute.xlu0 %1133  ;;  %v1428_v19 = vsel %vm1396_vm12, %v1395_v54, %v1150_v24 }
 0x17b   : > { %v1412_v42 = vsel %vm1396_vm12, %v1379_v51, %v1134_v39 }
 0x17d   : > { %v1192_v5 = vpop.permute.xlu1 %1191 }
 0x17e   : > { %v1176_v22 = vpop.permute.xlu0 %1175  ;;  %v1459_v33 = vsel %vm1429_vm13, %v1426_v18, %v1192_v5 }
 0x17f   : > { %v1443_v58 = vsel %vm1429_vm13, %v1410_v53, %v1176_v22 }
 0x181   : > { %v1194_v60 = vpop.permute.xlu1 %1193 }
 0x182   : > { %v1178_v59 = vpop.permute.xlu0 %1177  ;;  %v1461_v40 = vsel %vm1429_vm13, %v1428_v19, %v1194_v60 }
 0x183   : > { %v1445_v27 = vsel %vm1429_vm13, %v1412_v42, %v1178_v59 }
 0x185   : > { %v1228_v4 = vpop.permute.xlu1 %1227 }
 0x186   : > { %v1492_v3 = vsel %vm1462_vm14, %v1459_v33, %v1228_v4  ;;  %v1212_v8 = vpop.permute.xlu0 %1211 }
 0x187   : > { %2257 = vmatprep.mubr.msk.bf16.mxu1 %vm1753_vm15, %v1492_v3  ;;  %v1476_v34 = vsel %vm1462_vm14, %v1443_v58, %v1212_v8 }
 0x188   : > { %2241 = vmatprep.mubr.msk.bf16.mxu0 %vm1753_vm15, %v1476_v34 }
 0x189   : > { %v1230_v6 = vpop.permute.xlu1 %1229 }
 0x18a   : > { %v1494_v35 = vsel %vm1462_vm14, %v1461_v40, %v1230_v6  ;;  %v1214_v29 = vpop.permute.xlu0 %1213 }
 0x18b   : > { %2258 = vmatmul.mubr.msk.bf16.gmra.mrb[12].mxu1 %vm1753_vm15, %v1494_v35  ;;  %v1478_v57 = vsel %vm1462_vm14, %v1445_v27, %v1214_v29 }
 0x18c   : > { %2242 = vmatmul.mubr.msk.bf16.gmra.mrb[12].mxu0 %vm1753_vm15, %v1478_v57 }
 0x1a2   : > { %v2247_v16 = vpop.f32.mrb[0].mxu1 }
 0x1a3   : > { %v1900_v36 = vadd.f32 %v2247_v16, %v3265_v1  ;;  %v1891_v41 = vpop.f32.mrb[1].mxu1  ;;  %v2231_v49 = vpop.f32.mrb[0].mxu0 }
 0x1a4   : > { %v1892_v44 = vadd.f32 %v3265_v1, %v1891_v41  ;;  %v2248_v17 = vpop.f32.mrb[2].mxu1  ;;  %v1836_v23 = vadd.f32 %v2231_v49, %v3265_v1  ;;  %v1827_v55 = vpop.f32.mrb[1].mxu0 }
 0x1a5   : > { %v1972_v56 = vmax.f32 %v1900_v36, 0.0  ;;  %v1903_v43 = vadd.f32 %v2248_v17, %v3265_v1  ;;  %v1894_v48 = vpop.f32.mrb[3].mxu1  ;;  %v1828_v30 = vadd.f32 %v3265_v1, %v1827_v55  ;;  %v2232_v62 = vpop.f32.mrb[2].mxu0 }
 0x1a6   : > { %v1970_v21 = vmax.f32 %v1892_v44, 0.0  ;;  %v1895_v63 = vadd.f32 %v3265_v1, %v1894_v48  ;;  %v1956_v26 = vmax.f32 %v1836_v23, 0.0  ;;  %v1839_v25 = vadd.f32 %v2232_v62, %v3265_v1  ;;  %v1830_v14 = vpop.f32.mrb[3].mxu0 }
 0x1a7   : > { %2005 = vst.msk [vmem:[%s3272_s8 + $0x90] sm:$0xff] %vm1986_vm0, %v1972_v56  ;;  %v1973_v46 = vmax.f32 %v1903_v43, 0.0  ;;  %v1954_v28 = vmax.f32 %v1828_v30, 0.0  ;;  %v1831_v2 = vadd.f32 %v3265_v1, %v1830_v14 }
 0x1a8   : > { %2003 = vst.msk [vmem:[%s3272_s8 + $0x80] sm:$0xff] %vm1986_vm0, %v1970_v21  ;;  %v1971_v24 = vmax.f32 %v1895_v63, 0.0  ;;  %1989 = vst.msk [vmem:[%s3272_s8 + $0x10] sm:$0xff] %vm1986_vm0, %v1956_v26  ;;  %v1957_v39 = vmax.f32 %v1839_v25, 0.0 }
 0x1a9   : > { %2006 = vst.msk [vmem:[%s3272_s8 + $0x98] sm:$0xff] %vm1986_vm0, %v1973_v46  ;;  %1987 = vst.msk [vmem:[%s3272_s8] sm:$0xff] %vm1986_vm0, %v1954_v28  ;;  %v1955_v5 = vmax.f32 %v1831_v2, 0.0 }
 0x1aa   : > { %2004 = vst.msk [vmem:[%s3272_s8 + $0x88] sm:$0xff] %vm1986_vm0, %v1971_v24  ;;  %1990 = vst.msk [vmem:[%s3272_s8 + $0x18] sm:$0xff] %vm1986_vm0, %v1957_v39 }
 0x1ab   : > { %1988 = vst.msk [vmem:[%s3272_s8 + $0x8] sm:$0xff] %vm1986_vm0, %v1955_v5 }
 0x1e2   : > { %v2251_v47 = vpop.f32.mrb[4].mxu1 }
 0x1e3   : > { %v1916_v22 = vadd.f32 %v2251_v47, %v3265_v1  ;;  %v1907_v20 = vpop.f32.mrb[5].mxu1  ;;  %v2235_v52 = vpop.f32.mrb[4].mxu0 }
 0x1e4   : > { %v1908_v50 = vadd.f32 %v3265_v1, %v1907_v20  ;;  %v2252_v60 = vpop.f32.mrb[6].mxu1  ;;  %v1852_v31 = vadd.f32 %v2235_v52, %v3265_v1  ;;  %v1843_v12 = vpop.f32.mrb[5].mxu0 }
 0x1e5   : > { %v1976_v9 = vmax.f32 %v1916_v22, 0.0  ;;  %v1919_v11 = vadd.f32 %v2252_v60, %v3265_v1  ;;  %v1910_v10 = vpop.f32.mrb[7].mxu1  ;;  %v1844_v59 = vadd.f32 %v3265_v1, %v1843_v12  ;;  %v2236_v45 = vpop.f32.mrb[6].mxu0 }
 0x1e6   : > { %v1974_v32 = vmax.f32 %v1908_v50, 0.0  ;;  %v1911_v18 = vadd.f32 %v3265_v1, %v1910_v10  ;;  %v1960_v15 = vmax.f32 %v1852_v31, 0.0  ;;  %v1855_v7 = vadd.f32 %v2236_v45, %v3265_v1  ;;  %v1846_v33 = vpop.f32.mrb[7].mxu0 }
 0x1e7   : > { %2009 = vst.msk [vmem:[%s3272_s8 + $0xb0] sm:$0xff] %vm1986_vm0, %v1976_v9  ;;  %v1977_v13 = vmax.f32 %v1919_v11, 0.0  ;;  %v1958_v4 = vmax.f32 %v1844_v59, 0.0  ;;  %v1847_v38 = vadd.f32 %v3265_v1, %v1846_v33 }
 0x1e8   : > { %2007 = vst.msk [vmem:[%s3272_s8 + $0xa0] sm:$0xff] %vm1986_vm0, %v1974_v32  ;;  %v1975_v37 = vmax.f32 %v1911_v18, 0.0  ;;  %1993 = vst.msk [vmem:[%s3272_s8 + $0x30] sm:$0xff] %vm1986_vm0, %v1960_v15  ;;  %v1961_v53 = vmax.f32 %v1855_v7, 0.0 }
 0x1e9   : > { %2010 = vst.msk [vmem:[%s3272_s8 + $0xb8] sm:$0xff] %vm1986_vm0, %v1977_v13  ;;  %1991 = vst.msk [vmem:[%s3272_s8 + $0x20] sm:$0xff] %vm1986_vm0, %v1958_v4  ;;  %v1959_v3 = vmax.f32 %v1847_v38, 0.0 }
 0x1ea   : > { %2008 = vst.msk [vmem:[%s3272_s8 + $0xa8] sm:$0xff] %vm1986_vm0, %v1975_v37  ;;  %1994 = vst.msk [vmem:[%s3272_s8 + $0x38] sm:$0xff] %vm1986_vm0, %v1961_v53 }
 0x1eb   : > { %1992 = vst.msk [vmem:[%s3272_s8 + $0x28] sm:$0xff] %vm1986_vm0, %v1959_v3 }
 0x222   : > { %v2255_v0 = vpop.f32.mrb[8].mxu1 }
 0x223   : > { %v1932_v54 = vadd.f32 %v2255_v0, %v3265_v1  ;;  %v1923_v58 = vpop.f32.mrb[9].mxu1  ;;  %v2239_v8 = vpop.f32.mrb[8].mxu0 }
 0x224   : > { %v1924_v61 = vadd.f32 %v3265_v1, %v1923_v58  ;;  %v2256_v19 = vpop.f32.mrb[10].mxu1  ;;  %v1868_v34 = vadd.f32 %v2239_v8, %v3265_v1  ;;  %v1859_v40 = vpop.f32.mrb[9].mxu0 }
 0x225   : > { %v1980_v51 = vmax.f32 %v1932_v54, 0.0  ;;  %v1935_v6 = vadd.f32 %v2256_v19, %v3265_v1  ;;  %v1926_v42 = vpop.f32.mrb[11].mxu1  ;;  %v1860_v35 = vadd.f32 %v3265_v1, %v1859_v40  ;;  %v2240_v29 = vpop.f32.mrb[10].mxu0 }
 0x226   : > { %v1978_v27 = vmax.f32 %v1924_v61, 0.0  ;;  %v1927_v57 = vadd.f32 %v3265_v1, %v1926_v42  ;;  %v1964_v16 = vmax.f32 %v1868_v34, 0.0  ;;  %v1871_v36 = vadd.f32 %v2240_v29, %v3265_v1  ;;  %v1862_v49 = vpop.f32.mrb[11].mxu0 }
 0x227   : > { %2013 = vst.msk [vmem:[%s3272_s8 + $0xd0] sm:$0xff] %vm1986_vm0, %v1980_v51  ;;  %v1981_v41 = vmax.f32 %v1935_v6, 0.0  ;;  %v1962_v44 = vmax.f32 %v1860_v35, 0.0  ;;  %v1863_v17 = vadd.f32 %v3265_v1, %v1862_v49 }
 0x228   : > { %2011 = vst.msk [vmem:[%s3272_s8 + $0xc0] sm:$0xff] %vm1986_vm0, %v1978_v27  ;;  %v1979_v23 = vmax.f32 %v1927_v57, 0.0  ;;  %1997 = vst.msk [vmem:[%s3272_s8 + $0x50] sm:$0xff] %vm1986_vm0, %v1964_v16  ;;  %v1965_v56 = vmax.f32 %v1871_v36, 0.0 }
 0x229   : > { %2014 = vst.msk [vmem:[%s3272_s8 + $0xd8] sm:$0xff] %vm1986_vm0, %v1981_v41  ;;  %1995 = vst.msk [vmem:[%s3272_s8 + $0x40] sm:$0xff] %vm1986_vm0, %v1962_v44  ;;  %v1963_v55 = vmax.f32 %v1863_v17, 0.0 }
 0x22a   : > { %2012 = vst.msk [vmem:[%s3272_s8 + $0xc8] sm:$0xff] %vm1986_vm0, %v1979_v23  ;;  %1998 = vst.msk [vmem:[%s3272_s8 + $0x58] sm:$0xff] %vm1986_vm0, %v1965_v56 }
 0x22b   : > { %1996 = vst.msk [vmem:[%s3272_s8 + $0x48] sm:$0xff] %vm1986_vm0, %v1963_v55 }
 0x25e   : > { %v2259_v43 = vpop.f32.mrb[12].mxu1 }
 0x25f   : > { %v1948_v48 = vadd.f32 %v2259_v43, %v3265_v1  ;;  %v1939_v30 = vpop.f32.mrb[13].mxu1  ;;  %v2243_v21 = vpop.f32.mrb[12].mxu0 }
 0x260   : > { %v1940_v62 = vadd.f32 %v3265_v1, %v1939_v30  ;;  %v2260_v63 = vpop.f32.mrb[14].mxu1  ;;  %v1884_v26 = vadd.f32 %v2243_v21, %v3265_v1  ;;  %v1875_v46 = vpop.f32.mrb[13].mxu0 }
 0x261   : > { %v1984_v25 = vmax.f32 %v1948_v48, 0.0  ;;  %v1951_v14 = vadd.f32 %v2260_v63, %v3265_v1  ;;  %v1942_v28 = vpop.f32.mrb[15].mxu1  ;;  %v1876_v2 = vadd.f32 %v3265_v1, %v1875_v46  ;;  %v2244_v39 = vpop.f32.mrb[14].mxu0 }
 0x262   : > { %v1982_v24 = vmax.f32 %v1940_v62, 0.0  ;;  %v1943_v5 = vadd.f32 %v3265_v1, %v1942_v28  ;;  %v1968_v47 = vmax.f32 %v1884_v26, 0.0  ;;  %v1887_v22 = vadd.f32 %v2244_v39, %v3265_v1  ;;  %v1878_v52 = vpop.f32.mrb[15].mxu0 }
 0x263   : > { %2017 = vst.msk [vmem:[%s3272_s8 + $0xf0] sm:$0xff] %vm1986_vm0, %v1984_v25  ;;  %v1985_v20 = vmax.f32 %v1951_v14, 0.0  ;;  %v1966_v50 = vmax.f32 %v1876_v2, 0.0  ;;  %v1879_v60 = vadd.f32 %v3265_v1, %v1878_v52 }
 0x264   : > { %2015 = vst.msk [vmem:[%s3272_s8 + $0xe0] sm:$0xff] %vm1986_vm0, %v1982_v24  ;;  %v1983_v31 = vmax.f32 %v1943_v5, 0.0  ;;  %2001 = vst.msk [vmem:[%s3272_s8 + $0x70] sm:$0xff] %vm1986_vm0, %v1968_v47  ;;  %v1969_v9 = vmax.f32 %v1887_v22, 0.0 }
 0x265   : > { %2018 = vst.msk [vmem:[%s3272_s8 + $0xf8] sm:$0xff] %vm1986_vm0, %v1985_v20  ;;  %1999 = vst.msk [vmem:[%s3272_s8 + $0x60] sm:$0xff] %vm1986_vm0, %v1966_v50  ;;  %v1967_v12 = vmax.f32 %v1879_v60, 0.0 }
 0x266   : > { %2016 = vst.msk [vmem:[%s3272_s8 + $0xe8] sm:$0xff] %vm1986_vm0, %v1983_v31  ;;  %2002 = vst.msk [vmem:[%s3272_s8 + $0x78] sm:$0xff] %vm1986_vm0, %v1969_v9 }
 0x267   : > { %2000 = vst.msk [vmem:[%s3272_s8 + $0x68] sm:$0xff] %vm1986_vm0, %v1967_v12 }
 0x268 PF: > { %s15_s20 = sadd.s32 1, %s2321_s20   ;;  %s3386_s18 = smov %s2317_s19 }
 0x269   : > { %p12_p5 = scmp.ge.s32.totalorder %s15_s20, 6   ;;  %s3387_s19 = smov %s3389_s21 }
 0x26b   :  { %14 = sbr.rel (!%p12_p5) target bundleno = 2 (0x2), region = 76 }

// kernel: vgg_perceptual_loss.11
= control target key start
LH: loop header
LB: loop body
LE: loop exit
PB: predicated region body
PF: predicated region fallthrough
CT: control target
= control target key end

     0   :  { %s2360_s18 = smov 0   ;;  %s2362_s19 = smov 0   ;;  %s2846_s0 = inlined_call_operand.vmem [shape: f32[4,8,8,128], index: 0, kind: input, shape index: {}, may-alias: {0,1,2}]   ;;  %s2847_s1 = inlined_call_operand.vmem [shape: f32[4,8,8,128], index: 1, kind: input, shape index: {}, may-alias: {0,1,2}]   ;;  %s2848_s2 = inlined_call_operand.vmem [shape: f32[4,8,8,128], index: 2, kind: input, shape index: {}, may-alias: {0,1,2}]   ;;  %s2849_s3 = inlined_call_operand.vmem [shape: bf16[3,384,128], index: 3, kind: input, shape index: {}]   ;;  %s2850_s4 = inlined_call_operand.vmem [shape: f32[1,128], index: 4, kind: input, shape index: {}]   ;;  %s2851_s5 = inlined_call_operand.vmem [shape: f32[4,8,8,128], index: 5, kind: output, shape index: {}]  }
   0x1   :  { %s2364_s20 = smov 0  }
   0x2 LB: > { %s27_s21 = sadd.s32 1, %s2324_s19  ;;  %p1825_p0 = scmp.ge.s32.totalorder %s2328_s20, 1  ;;  %s2328_s20 = sphi %s2364_s20, %s15_s20   ;;  %s2324_s19 = sphi %s2362_s19, %s2857_s19   ;;  %s2320_s18 = sphi %s2360_s18, %s2856_s18  }
   0x3   : > { %p29_p1 = scmp.ge.s32.totalorder %s27_s21, 4  ;;  %p270_p2 = scmp.lt.s32.totalorder %s2328_s20, 5 }
   0x5   : > { %s2859_s21 = smov (%p29_p1, %s27_s21), 0  ;;  %p271_p3 = pnand %p1825_p0, %p270_p2 }
   0x6   : > { %v2234_v0 = vld [vmem:[%s2849_s3 + $0x100] sm:$0xff] (!%p271_p3)   ;;  %v2237_v3 = vld [vmem:[%s2849_s3 + $0x108] sm:$0xff] (!%p271_p3)   ;;  %v2240_v6 = vld [vmem:[%s2849_s3 + $0x110] sm:$0xff] (!%p271_p3)   ;;  %p334_p4 = scmp.lt.s32.totalorder (!%p271_p3), %s2320_s18, 3  ;;  %vm493_vm0 = vcmask (!%p271_p3), 1040384   ;;  %vm506_vm1 = vcmask (!%p271_p3), 1044480  }
   0x7   : > { %274 = sbr.rel (%p271_p3) target bundleno = 355 (0x163), region = 40  ;;  %v2235_v1 = vld [vmem:[%s2849_s3 + $0x140] sm:$0xff] (!%p271_p3)   ;;  %1942 = vmatprep.subr.bf16.mxu0 (!%p271_p3), %v2234_v0  ;;  %v2238_v4 = vld [vmem:[%s2849_s3 + $0x148] sm:$0xff] (!%p271_p3)   ;;  %v2241_v7 = vld [vmem:[%s2849_s3 + $0x150] sm:$0xff] (!%p271_p3)   ;;  %vm494_vm2 = vsmask.f32 (!%p271_p3), 256 }
   0x8   : > { %v2236_v2 = vld [vmem:[%s2849_s3 + $0xc0] sm:$0xff] (!%p271_p3)   ;;  %2098 = vmatprep.subr.bf16.mxu1 (!%p271_p3), %v2235_v1  ;;  %v2239_v5 = vld [vmem:[%s2849_s3 + $0xc8] sm:$0xff] (!%p271_p3)   ;;  %v2242_v8 = vld [vmem:[%s2849_s3 + $0xd0] sm:$0xff] (!%p271_p3)   ;;  %vm507_vm3 = vsmask.f32 (!%p271_p3), 4352 }
   0x9   : > { %1943 = vmatpush3.bf16.msra.mxu0 (!%p271_p3), %v2236_v2  ;;  %2099 = vmatpush3.bf16.msra.mxu1 (!%p271_p3), %v2235_v1  ;;  %v2243_v9 = vld [vmem:[%s2849_s3 + $0x118] sm:$0xff] (!%p271_p3)   ;;  %v2246_v12 = vld [vmem:[%s2849_s3 + $0x120] sm:$0xff] (!%p271_p3)   ;;  %v2249_v15 = vld [vmem:[%s2849_s3 + $0x128] sm:$0xff] (!%p271_p3)  }
   0xa   : > { %1944 = vmatprep.subr.bf16.mxu0 (!%p271_p3), %v2237_v3  ;;  %2100 = vmatprep.subr.bf16.mxu1 (!%p271_p3), %v2238_v4  ;;  %v2244_v10 = vld [vmem:[%s2849_s3 + $0x158] sm:$0xff] (!%p271_p3)   ;;  %v2247_v13 = vld [vmem:[%s2849_s3 + $0x160] sm:$0xff] (!%p271_p3)   ;;  %v2250_v16 = vld [vmem:[%s2849_s3 + $0x168] sm:$0xff] (!%p271_p3)  }
   0xb   : > { %v2245_v11 = vld [vmem:[%s2849_s3 + $0xd8] sm:$0xff] (!%p271_p3)   ;;  %v2248_v14 = vld [vmem:[%s2849_s3 + $0xe0] sm:$0xff] (!%p271_p3)   ;;  %v2251_v17 = vld [vmem:[%s2849_s3 + $0xe8] sm:$0xff] (!%p271_p3)  }
   0xc   : > { %v2252_v18 = vld [vmem:[%s2849_s3 + $0x130] sm:$0xff] (!%p271_p3)   ;;  %v2255_v21 = vld [vmem:[%s2849_s3 + $0x138] sm:$0xff] (!%p271_p3)   ;;  %v2258_v34 = vld [vmem:[%s2849_s3 + $0x40] sm:$0xff] (!%p271_p3)  }
   0xd   : > { %1945 = vmatpush3.bf16.msra.mxu0 (!%p271_p3), %v2239_v5  ;;  %2101 = vmatpush3.bf16.msra.mxu1 (!%p271_p3), %v2238_v4  ;;  %v2253_v19 = vld [vmem:[%s2849_s3 + $0x170] sm:$0xff] (!%p271_p3)   ;;  %v2256_v24 = vld [vmem:[%s2849_s3 + $0x178] sm:$0xff] (!%p271_p3)   ;;  %v2471_v37 = vld [vmem:[%s2849_s3 + $0x80] sm:$0xff] (!%p271_p3)  }
   0xe   : > { %1946 = vmatprep.subr.bf16.mxu0 %v2240_v6  ;;  %2102 = vmatprep.subr.bf16.mxu1 %v2241_v7  ;;  %s2861_s18 = smov (!%p334_p4, %s2320_s18), 3  ;;  %v2254_v20 = vld [vmem:[%s2849_s3 + $0xf0] sm:$0xff]   ;;  %v2257_v28 = vld [vmem:[%s2849_s3 + $0xf8] sm:$0xff]   ;;  %vm2476_vm4 = vmand %vm493_vm0, %vm494_vm2 }
   0xf   : > { %s2433_s10 = sshll.u32 %s2861_s18, 6  ;;  %vm2482_vm5 = vmand %vm506_vm1, %vm507_vm3  ;;  %v2300_v42 = vld [vmem:[%s2849_s3 + $0x1f0] sm:$0xff]   ;;  %v2304_v46 = vld [vmem:[%s2849_s3 + $0x238] sm:$0xff]  }
  0x10   : > { %s2448_s22 = scalar_lea.vmem %s2847_s1, %s2433_s10  ;;  %s341_s14 = scalar_lea.vmem %s2846_s0, %s2433_s10 }
  0x11   : > { %1947 = vmatpush3.bf16.msra.mxu0 %v2242_v8  ;;  %2103 = vmatpush3.bf16.msra.mxu1 %v2241_v7  ;;  %v389_v22 = vld [vmem:[%s2448_s22] sm:$0xff]  ;;  %v390_v23 = vld [vmem:[%s2448_s22 + $0x8] sm:$0xff]  ;;  %v391_v27 = vld [vmem:[%s2448_s22 + $0x10] sm:$0xff]  ;;  %s1939_s28 = sadd.s32 56, %s2433_s10  ;;  %s2825_s9 = scalar_lea.vmem %s2851_s5, %s2433_s10 }
  0x12   : > { %1948 = vmatprep.subr.bf16.mxu0 %v2243_v9  ;;  %2104 = vmatprep.subr.bf16.mxu1 %v2244_v10  ;;  %v397_v25 = vpack.c.bf16 %v389_v22, %v389_v22  ;;  %v398_v26 = vpack.c.bf16 %v390_v23, %v390_v23  ;;  %v399_v29 = vpack.c.bf16 %v391_v27, %v391_v27  ;;  %v392_v38 = vld [vmem:[%s2448_s22 + $0x18] sm:$0xff]  ;;  %v2262_v22 = vld [vmem:[%s2849_s3 + $0x88] sm:$0xff]  }
  0x13   : > { %v400_v41 = vpack.c.bf16 %v392_v38, %v392_v38 }
  0x14   : > { %v421_v30 = vshrl.u32 %v397_v25, 16  ;;  %v424_v31 = vshll.u32 %v397_v25, 16  ;;  %v428_v32 = vshrl.u32 %v398_v26, 16  ;;  %v431_v33 = vshll.u32 %v398_v26, 16  ;;  %v2263_v26 = vld [vmem:[%s2849_s3 + $0x8] sm:$0xff]  }
  0x15   : > { %1949 = vmatpush3.bf16.msra.mxu0 %v2245_v11  ;;  %2105 = vmatpush3.bf16.msra.mxu1 %v2244_v10  ;;  %v435_v35 = vshrl.u32 %v399_v29, 16  ;;  %v438_v36 = vshll.u32 %v399_v29, 16  ;;  %v442_v47 = vshrl.u32 %v400_v41, 16  ;;  %v445_v52 = vshll.u32 %v400_v41, 16  ;;  %v2260_v11 = vld [vmem:[%s2849_s3] sm:$0xff]   ;;  %v395_v41 = vld [vmem:[%s2448_s22 + $0x30] sm:$0xff] }
  0x16   : > { %1950 = vmatprep.subr.bf16.mxu0 %v2246_v12  ;;  %2106 = vmatprep.subr.bf16.mxu1 %v2247_v13  ;;  %v423_v39 = vrot.slane %v421_v30, 7  ;;  %v430_v40 = vrot.slane %v428_v32, 7  ;;  %v2261_v12 = vld [vmem:[%s2849_s3 + $0x48] sm:$0xff]   ;;  %v2264_v32 = vld [vmem:[%s2849_s3 + $0x50] sm:$0xff]  }
  0x17   : > { %v437_v43 = vrot.slane %v435_v35, 7  ;;  %v444_v51 = vrot.slane %v442_v47, 7  ;;  %v2265_v35 = vld [vmem:[%s2849_s3 + $0x90] sm:$0xff]   ;;  %v403_v47 = vpack.c.bf16 %v395_v41, %v395_v41 }
  0x18   : > { %v426_v44 = vor.u32 %v424_v31, %v423_v39  ;;  %v433_v45 = vor.u32 %v431_v33, %v430_v40 }
  0x19   : > { %1951 = vmatpush3.bf16.msra.mxu0 %v2248_v14  ;;  %2107 = vmatpush3.bf16.msra.mxu1 %v2247_v13  ;;  %v440_v48 = vor.u32 %v438_v36, %v437_v43  ;;  %v447_v1 = vor.u32 %v445_v52, %v444_v51  ;;  %v396_v43 = vld [vmem:[%s2448_s22 + $0x38] sm:$0xff] }
  0x1a   : > { %1952 = vmatprep.subr.bf16.mxu0 %v2249_v15  ;;  %2108 = vmatprep.subr.bf16.mxu1 %v2250_v16  ;;  %v497_v49 = vsel %vm2476_vm4, 0, %v426_v44  ;;  %v498_v50 = vsel %vm2476_vm4, 0, %v433_v45  ;;  %v2267_v44 = vld [vmem:[%s2849_s3 + $0x58] sm:$0xff]  }
  0x1b   : > { %v2493_v53 = vsel %vm2482_vm5, %v497_v49, 0  ;;  %v2497_v54 = vsel %vm2482_vm5, %v498_v50, 0  ;;  %v499_v55 = vsel %vm2476_vm4, 0, %v440_v48  ;;  %v500_v7 = vsel %vm2476_vm4, 0, %v447_v1  ;;  %v2268_v49 = vld [vmem:[%s2849_s3 + $0x98] sm:$0xff]  }
  0x1c   : > { %v671_v56 = vshrl.u32 %v2493_v53, 16  ;;  %v673_v57 = vshll.u32 %v2493_v53, 16  ;;  %v678_v58 = vshrl.u32 %v2497_v54, 16  ;;  %v680_v59 = vshll.u32 %v2497_v54, 16  ;;  %v2269_v50 = vld [vmem:[%s2849_s3 + $0x18] sm:$0xff]  }
  0x1d   : > { %1953 = vmatpush3.bf16.msra.mxu0 %v2251_v17  ;;  %2109 = vmatpush3.bf16.msra.mxu1 %v2250_v16  ;;  %v2507_v60 = vsel %vm2482_vm5, %v499_v55, 0  ;;  %v728_v61 = vrot.slane %v2493_v53, 1  ;;  %v729_v62 = vrot.slane %v2497_v54, 1  ;;  %v1834_v9 = vcombine.low %v2493_v53, %v2497_v54 }
  0x1e   : > { %1954 = vmatprep.subr.bf16.mxu0 %v2252_v18  ;;  %2110 = vmatprep.subr.bf16.mxu1 %v2253_v19  ;;  %v675_v63 = vrot.slane %v673_v57, 1  ;;  %v682_v0 = vrot.slane %v680_v59, 1  ;;  %v730_v2 = vrot.slane %v2507_v60, 1  ;;  %v687_v4 = vshll.u32 %v2507_v60, 16  ;;  %v393_v18 = vld [vmem:[%s2448_s22 + $0x20] sm:$0xff] }
  0x1f   : > { %v1836_v3 = vcombine.low %v728_v61, %v729_v62  ;;  %v685_v8 = vshrl.u32 %v2507_v60, 16  ;;  %v2528_v10 = vsel %vm2482_vm5, %v500_v7, 0  ;;  %v404_v48 = vpack.c.bf16 %v396_v43, %v396_v43  ;;  %v2276_v43 = vld [vmem:[%s2849_s3 + $0x70] sm:$0xff]  }
  0x20   : > { %v2517_v5 = vor.u32 %v675_v63, %v671_v56  ;;  %v2519_v6 = vor.u32 %v682_v0, %v678_v58  ;;  %v689_v13 = vrot.slane %v687_v4, 1  ;;  %v731_v15 = vrot.slane %v2528_v10, 1  ;;  %v2270_v0 = vld [vmem:[%s2849_s3 + $0x60] sm:$0xff]  }
  0x21   : > { %1955 = vmatpush3.bf16.msra.mxu0 %v2254_v20  ;;  %2111 = vmatpush3.bf16.msra.mxu1 %v2253_v19  ;;  %v692_v16 = vshrl.u32 %v2528_v10, 16  ;;  %v694_v17 = vshll.u32 %v2528_v10, 16  ;;  %v394_v19 = vld [vmem:[%s2448_s22 + $0x28] sm:$0xff]  ;;  %v401_v20 = vpack.c.bf16 %v393_v18, %v393_v18  ;;  %v1837_v38 = vcombine.low %v2507_v60, %v2528_v10  ;;  %s367_s22 = scalar_lea.vmem %s2848_s2, %s1939_s28 }
  0x22   : > { %1956 = vmatprep.subr.bf16.mxu0 %v2255_v21  ;;  %2112 = vmatprep.subr.bf16.mxu1 %v2256_v24  ;;  %v1835_v14 = vcombine.low %v2517_v5, %v2519_v6  ;;  %v1839_v21 = vcombine.low %v730_v2, %v731_v15  ;;  %v2550_v23 = vor.u32 %v689_v13, %v685_v8  ;;  %v463_v58 = vshrl.u32 %v403_v47, 16 }
  0x23   : > { %2114 = vmatprep.mubr.bf16.mxu1 %v1836_v3  ;;  %v402_v25 = vpack.c.bf16 %v394_v19, %v394_v19  ;;  %v449_v27 = vshrl.u32 %v401_v20, 16  ;;  %v466_v1 = vshll.u32 %v403_v47, 16  ;;  %v470_v7 = vshrl.u32 %v404_v48, 16 }
  0x24   : > { %971 = vmatprep.mubr.bf16.mxu0 %v1835_v14  ;;  %v465_v4 = vrot.slane %v463_v58, 7  ;;  %v473_v8 = vshll.u32 %v404_v48, 16 }
  0x25   : > { %1957 = vmatpush3.bf16.msra.mxu0 %v2257_v28  ;;  %2113 = vmatpush3.bf16.msra.mxu1 %v2256_v24  ;;  %v696_v24 = vrot.slane %v694_v17, 1  ;;  %v452_v28 = vshll.u32 %v401_v20, 16  ;;  %v456_v30 = vshrl.u32 %v402_v25, 16  ;;  %v459_v31 = vshll.u32 %v402_v25, 16  ;;  %v2273_v20 = vld [vmem:[%s2849_s3 + $0x68] sm:$0xff]  }
  0x26   : > { %1994 = vmatprep.subr.bf16.mxu0 %v2258_v34  ;;  %2122 = vmatprep.subr.bf16.mxu1 %v2471_v37  ;;  %v451_v33 = vrot.slane %v449_v27, 7  ;;  %v468_v17 = vor.u32 %v466_v1, %v465_v4  ;;  %v472_v18 = vrot.slane %v470_v7, 7  ;;  %v2281_v4 = vld [vmem:[%s2849_s3 + $0x38] sm:$0xff]  }
  0x27   : > { %v2555_v29 = vor.u32 %v696_v24, %v692_v16  ;;  %v458_v36 = vrot.slane %v456_v30, 7  ;;  %v2272_v16 = vld [vmem:[%s2849_s3 + $0x20] sm:$0xff]   ;;  %v2274_v30 = vld [vmem:[%s2849_s3 + $0xa8] sm:$0xff]  }
  0x28   : > { %972 = vmatmul.mubr.bf16.vlgmr.msra.gmra.mrb[0].mxu0 %v1834_v9  ;;  %2115 = vmatmul.mubr.bf16.vlgmr.msra.gmra.mrb[0].mxu1 %v1839_v21  ;;  %v454_v39 = vor.u32 %v452_v28, %v451_v33  ;;  %v475_v25 = vor.u32 %v473_v8, %v472_v18  ;;  %v2283_v18 = vld [vmem:[%s2849_s3 + $0x200] sm:$0xff]  }
  0x29   : > { %1995 = vmatpush3.bf16.msra.mxu0 %v2260_v11  ;;  %2123 = vmatpush3.bf16.msra.mxu1 %v2471_v37  ;;  %v1838_v34 = vcombine.low %v2550_v23, %v2555_v29  ;;  %v2266_v37 = vld [vmem:[%s2849_s3 + $0x10] sm:$0xff]   ;;  %v461_v40 = vor.u32 %v459_v31, %v458_v36  ;;  %v2271_v11 = vld [vmem:[%s2849_s3 + $0xa0] sm:$0xff]  }
  0x2a   : > { %1996 = vmatprep.subr.bf16.mxu0 %v2261_v12  ;;  %2124 = vmatprep.subr.bf16.mxu1 %v2262_v22  ;;  %v501_v45 = vsel %vm2476_vm4, 0, %v454_v39  ;;  %v504_v33 = vsel %vm2476_vm4, 0, %v475_v25 }
  0x2b   : > { %979 = vmatprep.mubr.bf16.mxu0 %v1838_v34  ;;  %v502_v51 = vsel %vm2476_vm4, 0, %v461_v40  ;;  %v2588_v52 = vsel %vm2482_vm5, %v501_v45, 0  ;;  %v2646_v36 = vsel %vm2482_vm5, %v504_v33, 0 }
  0x2c   : > { %v2592_v55 = vsel %vm2482_vm5, %v502_v51, 0  ;;  %v699_v56 = vshrl.u32 %v2588_v52, 16  ;;  %v701_v57 = vshll.u32 %v2588_v52, 16  ;;  %v732_v12 = vrot.slane %v2588_v52, 1  ;;  %v2278_v51 = vld [vmem:[%s2849_s3 + $0x30] sm:$0xff]  }
  0x2d   : > { %1997 = vmatpush3.bf16.msra.mxu0 %v2263_v26  ;;  %2125 = vmatpush3.bf16.msra.mxu1 %v2262_v22  ;;  %v706_v59 = vshrl.u32 %v2592_v55, 16  ;;  %v708_v63 = vshll.u32 %v2592_v55, 16  ;;  %v733_v13 = vrot.slane %v2592_v55, 1  ;;  %v405_v22 = vld [vmem:[%s341_s14] sm:$0xff]  ;;  %v1840_v24 = vcombine.low %v2588_v52, %v2592_v55 }
  0x2e   : > { %1998 = vmatprep.subr.bf16.mxu0 %v2264_v32  ;;  %2126 = vmatprep.subr.bf16.mxu1 %v2265_v35  ;;  %v703_v3 = vrot.slane %v701_v57, 1  ;;  %v503_v26 = vsel %vm2476_vm4, 0, %v468_v17  ;;  %v407_v27 = vmul.f32 0.0, %v405_v22  ;;  %v2275_v32 = vld [vmem:[%s2849_s3 + $0x28] sm:$0xff]   ;;  %v760_v40 = vshrl.u32 %v2646_v36, 16  ;;  %v2279_v57 = vld [vmem:[%s2849_s3 + $0x78] sm:$0xff]  }
  0x2f   : > { %v710_v9 = vrot.slane %v708_v63, 1  ;;  %v1842_v21 = vcombine.low %v732_v12, %v733_v13  ;;  %v2635_v31 = vsel %vm2482_vm5, %v503_v26, 0  ;;  %v762_v41 = vshll.u32 %v2646_v36, 16 }
  0x30   : > { %980 = vmatmul.mubr.bf16.gmra.mrb[4].mxu0 %v1837_v38  ;;  %v2610_v14 = vor.u32 %v703_v3, %v699_v56  ;;  %v713_v34 = vshrl.u32 %v2635_v31, 16  ;;  %v734_v38 = vrot.slane %v2635_v31, 1  ;;  %v767_v45 = vrot.slane %v2646_v36, 1  ;;  %v2280_v3 = vld [vmem:[%s2849_s3 + $0xb8] sm:$0xff]  }
  0x31   : > { %1999 = vmatpush3.bf16.msra.mxu0 %v2266_v37  ;;  %2127 = vmatpush3.bf16.msra.mxu1 %v2265_v35  ;;  %v2615_v19 = vor.u32 %v710_v9, %v706_v59  ;;  %v715_v35 = vshll.u32 %v2635_v31, 16  ;;  %v408_v37 = vpack.c.bf16 %v407_v27, %v407_v27  ;;  %v1843_v63 = vcombine.low %v2635_v31, %v2646_v36  ;;  %v2282_v9 = vld [vmem:[%s2849_s3 + $0x1c0] sm:$0xff]   ;;  %v2292_v27 = vld [vmem:[%s2849_s3 + $0x218] sm:$0xff]  }
  0x32   : > { %2000 = vmatprep.subr.bf16.mxu0 %v2267_v44  ;;  %2128 = vmatprep.subr.bf16.mxu1 %v2268_v49  ;;  %v2277_v44 = vld [vmem:[%s2849_s3 + $0xb0] sm:$0xff]   ;;  %v1845_v56 = vcombine.low %v734_v38, %v767_v45  ;;  %v1877_v33 = vcombine.low %v2555_v29, %v2610_v14  ;;  %v2293_v29 = vld [vmem:[%s2849_s3 + $0x198] sm:$0xff]  }
  0x33   : > { %v1841_v28 = vcombine.low %v2610_v14, %v2615_v19  ;;  %2118 = vmatprep.mubr.bf16.mxu1 %v1842_v21  ;;  %v717_v39 = vrot.slane %v715_v35, 1  ;;  %v414_v47 = vshrl.u32 %v408_v37, 16  ;;  %v417_v48 = vshll.u32 %v408_v37, 16  ;;  %v2294_v14 = vld [vmem:[%s2849_s3 + $0x1e0] sm:$0xff]  }
  0x34   : > { %2119 = vmatmul.mubr.bf16.gmra.mrb[4].mxu1 %v1845_v56  ;;  %v2303_v56 = vld [vmem:[%s2849_s3 + $0x1f8] sm:$0xff]  }
  0x35   : > { %2001 = vmatpush3.bf16.msra.mxu0 %v2269_v50  ;;  %2129 = vmatpush3.bf16.msra.mxu1 %v2268_v49  ;;  %v2658_v49 = vor.u32 %v717_v39, %v713_v34  ;;  %v764_v50 = vrot.slane %v762_v41, 1  ;;  %v416_v58 = vrot.slane %v414_v47, 7  ;;  %v2291_v34 = vld [vmem:[%s2849_s3 + $0x1d8] sm:$0xff]   ;;  %v2298_v39 = vld [vmem:[%s2849_s3 + $0x228] sm:$0xff]  }
  0x36   : > { %2002 = vmatprep.subr.bf16.mxu0 %v2270_v0  ;;  %2130 = vmatprep.subr.bf16.mxu1 %v2271_v11  ;;  %v2297_v47 = vld [vmem:[%s2849_s3 + $0x1e8] sm:$0xff]  }
  0x37   : > { %987 = vmatprep.mubr.bf16.mxu0 %v1841_v28  ;;  %v2670_v59 = vor.u32 %v764_v50, %v760_v40  ;;  %v419_v0 = vor.u32 %v417_v48, %v416_v58  ;;  %v409_v28 = vld [vmem:[%s367_s22] sm:$0xff]  ;;  %v1876_v40 = vcombine.low %v2528_v10, %v2588_v52  ;;  %v2301_v10 = vld [vmem:[%s2849_s3 + $0x230] sm:$0xff]   ;;  %v1879_v50 = vcombine.low %v2592_v55, %v2635_v31 }
  0x38   : > { %988 = vmatmul.mubr.bf16.gmra.mrb[8].mxu0 %v1840_v24  ;;  %v2702_v24 = vcombine.low %v731_v15, %v732_v12  ;;  %v2714_v15 = vcombine.low %v2519_v6, %v2550_v23  ;;  %v2285_v12 = vld [vmem:[%s2849_s3 + $0x1c8] sm:$0xff]   ;;  %v2735_v6 = vcombine.low %v733_v13, %v734_v38  ;;  %v2288_v23 = vld [vmem:[%s2849_s3 + $0x1d0] sm:$0xff]  }
  0x39   : > { %2003 = vmatpush3.bf16.msra.mxu0 %v2272_v16  ;;  %2131 = vmatpush3.bf16.msra.mxu1 %v2271_v11  ;;  %v1844_v1 = vcombine.low %v2658_v49, %v2670_v59  ;;  %v496_v7 = vsel %vm2476_vm4, 0, %v419_v0  ;;  %v2290_v13 = vld [vmem:[%s2849_s3 + $0x190] sm:$0xff]  }
  0x3a   : > { %2004 = vmatprep.subr.bf16.mxu0 %v2273_v20  ;;  %2132 = vmatprep.subr.bf16.mxu1 %v2274_v30  ;;  %v509_v8 = vsel %vm2482_vm5, %v496_v7, 0  ;;  %v1875_v20 = vcombine.low %v729_v62, %v730_v2  ;;  %v2286_v62 = vld [vmem:[%s2849_s3 + $0x208] sm:$0xff]  }
  0x3b   : > { %995 = vmatprep.mubr.bf16.mxu0 %v1844_v1  ;;  %v664_v11 = vshrl.u32 %v509_v8, 16  ;;  %v666_v16 = vshll.u32 %v509_v8, 16  ;;  %v727_v17 = vrot.slane %v509_v8, 1  ;;  %v1870_v2 = vcombine.low %v509_v8, %v2493_v53  ;;  %v2289_v53 = vld [vmem:[%s2849_s3 + $0x210] sm:$0xff]  }
  0x3d   : > { %2005 = vmatpush3.bf16.msra.mxu0 %v2275_v32  ;;  %2133 = vmatpush3.bf16.msra.mxu1 %v2274_v30  ;;  %v668_v21 = vrot.slane %v666_v16, 1  ;;  %v1872_v22 = vcombine.low %v727_v17, %v728_v61  ;;  %v2284_v61 = vld [vmem:[%s2849_s3 + $0x180] sm:$0xff]   ;;  %v2745_v30 = vcombine.low %v2497_v54, %v2507_v60  ;;  %v411_v32 = vmul.f32 0.0, %v409_v28 }
  0x3e   : > { %2006 = vmatprep.subr.bf16.mxu0 %v2276_v43  ;;  %2134 = vmatprep.subr.bf16.mxu1 %v2277_v44  ;;  %v2295_v54 = vld [vmem:[%s2849_s3 + $0x220] sm:$0xff]  }
  0x3f   : > { %v669_v25 = vor.u32 %v668_v21, %v664_v11  ;;  %2138 = vmatprep.mubr.bf16.mxu1 %v1872_v22  ;;  %v412_v35 = vpack.c.bf16 %v411_v32, %v411_v32  ;;  %v2296_v43 = vld [vmem:[%s2849_s3 + $0x1a0] sm:$0xff]  }
  0x40   : > { %996 = vmatmul.mubr.bf16.gmra.mrb[12].mxu0 %v1843_v63 }
  0x41   : > { %2007 = vmatpush3.bf16.msra.mxu0 %v2278_v51  ;;  %2135 = vmatpush3.bf16.msra.mxu1 %v2277_v44  ;;  %v1871_v26 = vcombine.low %v669_v25, %v2517_v5  ;;  %v2287_v5 = vld [vmem:[%s2849_s3 + $0x188] sm:$0xff]   ;;  %v477_v60 = vshrl.u32 %v412_v35, 16  ;;  %v480_v38 = vshll.u32 %v412_v35, 16  ;;  %v1880_v44 = vcombine.low %v2615_v19, %v2658_v49  ;;  %v2302_v51 = vld [vmem:[%s2849_s3 + $0x1b0] sm:$0xff]  }
  0x42   : > { %2008 = vmatprep.subr.bf16.mxu0 %v2279_v57  ;;  %2136 = vmatprep.subr.bf16.mxu1 %v2280_v3  ;;  %v2299_v49 = vld [vmem:[%s2849_s3 + $0x1a8] sm:$0xff]   ;;  %v2305_v57 = vld [vmem:[%s2849_s3 + $0x1b8] sm:$0xff]  }
  0x43   : > { %1269 = vmatprep.mubr.bf16.mxu0 %v1871_v26  ;;  %v479_v37 = vrot.slane %v477_v60, 7 }
  0x45   : > { %2009 = vmatpush3.bf16.msra.mxu0 %v2281_v4  ;;  %2137 = vmatpush3.bf16.msra.mxu1 %v2280_v3  ;;  %v482_v41 = vor.u32 %v480_v38, %v479_v37 }
  0x46   : > { %2046 = vmatprep.subr.bf16.mxu0 %v2282_v9  ;;  %2146 = vmatprep.subr.bf16.mxu1 %v2283_v18 }
  0x47   : > { %v505_v48 = vsel %vm2476_vm4, 0, %v482_v41 }
  0x48   : > { %2139 = vmatmul.mubr.bf16.vlgmr.msra.gmra.mrb[0].mxu1 %v1875_v20  ;;  %1270 = vmatmul.mubr.bf16.vlgmr.msra.gmra.mrb[16].mxu0 %v1870_v2  ;;  %v518_v52 = vsel %vm2482_vm5, %v505_v48, 0 }
  0x49   : > { %2147 = vmatpush3.bf16.msra.mxu1 %v2283_v18  ;;  %2142 = vmatprep.mubr.bf16.mxu1 %v2702_v24  ;;  %v1906_v19 = vcombine.low %v2646_v36, %v518_v52  ;;  %v1375_v55 = vrot.slane %v518_v52, 1  ;;  %v1370_v58 = vshll.u32 %v518_v52, 16  ;;  %v1368_v63 = vshrl.u32 %v518_v52, 16 }
  0x4a   : > { %2148 = vmatprep.subr.bf16.mxu1 %v2286_v62  ;;  %2047 = vmatpush3.bf16.msra.mxu0 %v2284_v61 }
  0x4b   : > { %1277 = vmatprep.mubr.bf16.mxu0 %v2714_v15  ;;  %2048 = vmatprep.subr.bf16.mxu0 %v2285_v12  ;;  %v1908_v31 = vcombine.low %v767_v45, %v1375_v55  ;;  %v1372_v0 = vrot.slane %v1370_v58, 1 }
  0x4d   : > { %2149 = vmatpush3.bf16.msra.mxu1 %v2286_v62  ;;  %v1373_v1 = vor.u32 %v1372_v0, %v1368_v63 }
  0x4e   : > { %2150 = vmatprep.subr.bf16.mxu1 %v2289_v53  ;;  %2049 = vmatpush3.bf16.msra.mxu0 %v2287_v5 }
  0x4f   : > { %2050 = vmatprep.subr.bf16.mxu0 %v2288_v23  ;;  %v1907_v3 = vcombine.low %v2670_v59, %v1373_v1 }
  0x50   : > { %2143 = vmatmul.mubr.bf16.gmra.mrb[4].mxu1 %v2735_v6  ;;  %1278 = vmatmul.mubr.bf16.gmra.mrb[20].mxu0 %v2745_v30 }
  0x51   : > { %2151 = vmatpush3.bf16.msra.mxu1 %v2289_v53  ;;  %2162 = vmatprep.mubr.bf16.mxu1 %v1875_v20 }
  0x52   : > { %2152 = vmatprep.subr.bf16.mxu1 %v2292_v27  ;;  %2051 = vmatpush3.bf16.msra.mxu0 %v2290_v13 }
  0x53   : > { %1285 = vmatprep.mubr.bf16.mxu0 %v1877_v33  ;;  %2052 = vmatprep.subr.bf16.mxu0 %v2291_v34 }
  0x55   : > { %2153 = vmatpush3.bf16.msra.mxu1 %v2292_v27 }
  0x56   : > { %2154 = vmatprep.subr.bf16.mxu1 %v2295_v54  ;;  %2053 = vmatpush3.bf16.msra.mxu0 %v2293_v29 }
  0x57   : > { %2054 = vmatprep.subr.bf16.mxu0 %v2294_v14 }
  0x58   : > { %1286 = vmatmul.mubr.bf16.gmra.mrb[24].mxu0 %v1876_v40 }
  0x59   : > { %2155 = vmatpush3.bf16.msra.mxu1 %v2295_v54  ;;  %1293 = vmatprep.mubr.bf16.mxu0 %v1880_v44 }
  0x5a   : > { %2156 = vmatprep.subr.bf16.mxu1 %v2298_v39  ;;  %2055 = vmatpush3.bf16.msra.mxu0 %v2296_v43 }
  0x5b   : > { %2056 = vmatprep.subr.bf16.mxu0 %v2297_v47 }
  0x5d   : > { %2157 = vmatpush3.bf16.msra.mxu1 %v2298_v39 }
  0x5e   : > { %2158 = vmatprep.subr.bf16.mxu1 %v2301_v10  ;;  %2057 = vmatpush3.bf16.msra.mxu0 %v2299_v49 }
  0x5f   : > { %2058 = vmatprep.subr.bf16.mxu0 %v2300_v42 }
  0x60   : > { %1294 = vmatmul.mubr.bf16.gmra.mrb[28].mxu0 %v1879_v50 }
  0x61   : > { %2159 = vmatpush3.bf16.msra.mxu1 %v2301_v10  ;;  %1561 = vmatprep.mubr.bf16.mxu0 %v2714_v15 }
  0x62   : > { %2160 = vmatprep.subr.bf16.mxu1 %v2304_v46  ;;  %2059 = vmatpush3.bf16.msra.mxu0 %v2302_v51 }
  0x63   : > { %2060 = vmatprep.subr.bf16.mxu0 %v2303_v56 }
  0x65   : > { %2161 = vmatpush3.bf16.msra.mxu1 %v2304_v46 }
  0x66   : > { %2061 = vmatpush3.bf16.msra.mxu0 %v2305_v57 }
  0x68   : > { %2163 = vmatmul.mubr.bf16.vlgmr.msra.gmra.mrb[0].mxu1 %v2702_v24 }
  0x69   : > { %2166 = vmatprep.mubr.bf16.mxu1 %v2735_v6  ;;  %1562 = vmatmul.mubr.bf16.vlgmr.msra.gmra.mrb[32].mxu0 %v2745_v30 }
  0x6a   : > { %1569 = vmatprep.mubr.bf16.mxu0 %v1877_v33 }
  0x70   : > { %2167 = vmatmul.mubr.bf16.gmra.mrb[4].mxu1 %v1908_v31 }
  0x71   : > { %1570 = vmatmul.mubr.bf16.gmra.mrb[36].mxu0 %v1876_v40 }
  0x72   : > { %1577 = vmatprep.mubr.bf16.mxu0 %v1880_v44 }
  0x79   : > { %1578 = vmatmul.mubr.bf16.gmra.mrb[40].mxu0 %v1879_v50 }
  0x7a   : > { %1585 = vmatprep.mubr.bf16.mxu0 %v1907_v3 }
  0x81   : > { %1586 = vmatmul.mubr.bf16.gmra.mrb[44].mxu0 %v1906_v19 }
  0xfb   : > { %v1958_v4 = vpop.f32.mrb[0].mxu0 }
  0xfc   : > { %v1959_v7 = vpop.f32.mrb[1].mxu0 }
  0xfd   : > { %v1960_v8 = vadd.f32 %v1959_v7, %v1958_v4  ;;  %v1961_v9 = vpop.f32.mrb[2].mxu0 }
  0xfe   : > { %v1962_v11 = vpop.f32.mrb[3].mxu0 }
  0xff   : > { %v1963_v16 = vadd.f32 %v1962_v11, %v1961_v9  ;;  %v1933_v9 = vld [vmem:[%s2850_s4] ss:$0 sm:$0xff] }
 0x103   : > { %v1964_v36 = vpop.f32.mrb[4].mxu0 }
 0x104   : > { %v1965_v45 = vpop.f32.mrb[5].mxu0 }
 0x105   : > { %v1966_v17 = vadd.f32 %v1965_v45, %v1964_v36  ;;  %v1967_v18 = vpop.f32.mrb[6].mxu0 }
 0x106   : > { %v1968_v20 = vpop.f32.mrb[7].mxu0 }
 0x107   : > { %v1969_v21 = vadd.f32 %v1968_v20, %v1967_v18 }
 0x10b   : > { %v1970_v22 = vpop.f32.mrb[8].mxu0 }
 0x10c   : > { %v1971_v24 = vpop.f32.mrb[9].mxu0 }
 0x10d   : > { %v1972_v25 = vadd.f32 %v1971_v24, %v1970_v22  ;;  %v1973_v62 = vpop.f32.mrb[10].mxu0 }
 0x10e   : > { %v1974_v59 = vpop.f32.mrb[11].mxu0 }
 0x10f   : > { %v1975_v2 = vadd.f32 %v1974_v59, %v1973_v62 }
 0x113   : > { %v1976_v26 = vpop.f32.mrb[12].mxu0 }
 0x114   : > { %v1977_v61 = vpop.f32.mrb[13].mxu0 }
 0x115   : > { %v1978_v15 = vadd.f32 %v1977_v61, %v1976_v26  ;;  %v1979_v12 = vpop.f32.mrb[14].mxu0 }
 0x116   : > { %v1980_v53 = vpop.f32.mrb[15].mxu0 }
 0x117   : > { %v1981_v5 = vadd.f32 %v1980_v53, %v1979_v12 }
 0x11b   : > { %v2010_v6 = vpop.f32.mrb[16].mxu0 }
 0x11c   : > { %v2011_v23 = vpop.f32.mrb[17].mxu0 }
 0x11d   : > { %v2012_v27 = vadd.f32 %v2011_v23, %v2010_v6  ;;  %v2013_v28 = vpop.f32.mrb[18].mxu0 }
 0x11e   : > { %v2014_v30 = vpop.f32.mrb[19].mxu0 }
 0x11f   : > { %v2173_v32 = vadd.f32 %v2012_v27, %v1960_v8  ;;  %v2015_v13 = vadd.f32 %v2014_v30, %v2013_v28 }
 0x121   : > { %v2179_v33 = vadd.f32 %v2015_v13, %v1963_v16 }
 0x123   : > { %v2016_v34 = vpop.f32.mrb[20].mxu0 }
 0x124   : > { %v2017_v35 = vpop.f32.mrb[21].mxu0 }
 0x125   : > { %v2018_v54 = vadd.f32 %v2017_v35, %v2016_v34  ;;  %v2019_v60 = vpop.f32.mrb[22].mxu0 }
 0x126   : > { %v2020_v38 = vpop.f32.mrb[23].mxu0 }
 0x127   : > { %v2170_v29 = vadd.f32 %v2018_v54, %v1966_v17  ;;  %v2021_v14 = vadd.f32 %v2020_v38, %v2019_v60 }
 0x129   : > { %v2176_v37 = vadd.f32 %v2021_v14, %v1969_v21 }
 0x12b   : > { %v2022_v39 = vpop.f32.mrb[24].mxu0 }
 0x12c   : > { %v2023_v40 = vpop.f32.mrb[25].mxu0 }
 0x12d   : > { %v2024_v41 = vadd.f32 %v2023_v40, %v2022_v39  ;;  %v2025_v43 = vpop.f32.mrb[26].mxu0 }
 0x12e   : > { %v2026_v44 = vpop.f32.mrb[27].mxu0 }
 0x12f   : > { %v2185_v47 = vadd.f32 %v2024_v41, %v1972_v25  ;;  %v2027_v48 = vadd.f32 %v2026_v44, %v2025_v43 }
 0x131   : > { %v2191_v10 = vadd.f32 %v2027_v48, %v1975_v2 }
 0x133   : > { %v2028_v52 = vpop.f32.mrb[28].mxu0 }
 0x134   : > { %v2029_v19 = vpop.f32.mrb[29].mxu0 }
 0x135   : > { %v2030_v49 = vadd.f32 %v2029_v19, %v2028_v52  ;;  %v2031_v42 = vpop.f32.mrb[30].mxu0 }
 0x136   : > { %v2032_v46 = vpop.f32.mrb[31].mxu0 }
 0x137   : > { %v2814_v50 = vadd.f32 %v2030_v49, %v1978_v15  ;;  %v2033_v51 = vadd.f32 %v2032_v46, %v2031_v42 }
 0x139   : > { %v2816_v57 = vadd.f32 %v2033_v51, %v1981_v5 }
 0x13b   : > { %v2164_v56 = vpop.f32.mrb[0].mxu1 }
 0x13c   : > { %v1628_v55 = vpop.f32.mrb[1].mxu1  ;;  %v2062_v58 = vpop.f32.mrb[32].mxu0 }
 0x13d   : > { %v2165_v31 = vpop.f32.mrb[2].mxu1  ;;  %v2063_v0 = vpop.f32.mrb[33].mxu0 }
 0x13e   : > { %v1631_v63 = vpop.f32.mrb[3].mxu1  ;;  %v2064_v1 = vadd.f32 %v2063_v0, %v2062_v58  ;;  %v2065_v3 = vpop.f32.mrb[34].mxu0 }
 0x13f   : > { %v2066_v4 = vpop.f32.mrb[35].mxu0 }
 0x140   : > { %v2174_v7 = vadd.f32 %v2173_v32, %v2064_v1  ;;  %v2067_v8 = vadd.f32 %v2066_v4, %v2065_v3 }
 0x142   : > { %v2175_v16 = vadd.f32 %v2174_v7, %v1628_v55  ;;  %v2180_v36 = vadd.f32 %v2179_v33, %v2067_v8 }
 0x143   : > { %v2168_v11 = vpop.f32.mrb[4].mxu1 }
 0x144   : > { %v1644_v45 = vpop.f32.mrb[5].mxu1  ;;  %v1674_v18 = vadd.f32 %v2175_v16, %v1933_v9  ;;  %v2181_v20 = vadd.f32 %v2180_v36, %v1631_v63  ;;  %v2068_v21 = vpop.f32.mrb[36].mxu0 }
 0x145   : > { %v2169_v17 = vpop.f32.mrb[6].mxu1  ;;  %v2069_v24 = vpop.f32.mrb[37].mxu0 }
 0x146   : > { %v1647_v22 = vpop.f32.mrb[7].mxu1  ;;  %v1682_v25 = vmax.f32 %v1674_v18, 0.0  ;;  %v1675_v62 = vadd.f32 %v2181_v20, %v1933_v9  ;;  %v2070_v59 = vadd.f32 %v2069_v24, %v2068_v21  ;;  %v2071_v2 = vpop.f32.mrb[38].mxu0 }
 0x147   : > { %v2072_v26 = vpop.f32.mrb[39].mxu0 }
 0x148   : > { %1690 = vst [vmem:[%s2825_s9] sm:$0xff] %v1682_v25  ;;  %v1683_v61 = vmax.f32 %v1675_v62, 0.0  ;;  %v2171_v15 = vadd.f32 %v2170_v29, %v2070_v59  ;;  %v2073_v12 = vadd.f32 %v2072_v26, %v2071_v2 }
 0x14a   : > { %1691 = vst [vmem:[%s2825_s9 + $0x8] sm:$0xff] %v1683_v61  ;;  %v2172_v53 = vadd.f32 %v2171_v15, %v2164_v56  ;;  %v2177_v5 = vadd.f32 %v2176_v37, %v2073_v12 }
 0x14c   : > { %v1676_v6 = vadd.f32 %v2172_v53, %v1933_v9  ;;  %v2178_v23 = vadd.f32 %v2177_v5, %v2165_v31  ;;  %v2074_v27 = vpop.f32.mrb[40].mxu0 }
 0x14d   : > { %v2075_v28 = vpop.f32.mrb[41].mxu0 }
 0x14e   : > { %v1684_v30 = vmax.f32 %v1676_v6, 0.0  ;;  %v1677_v32 = vadd.f32 %v2178_v23, %v1933_v9  ;;  %v2076_v13 = vadd.f32 %v2075_v28, %v2074_v27  ;;  %v2077_v33 = vpop.f32.mrb[42].mxu0 }
 0x14f   : > { %v2078_v34 = vpop.f32.mrb[43].mxu0 }
 0x150   : > { %1692 = vst [vmem:[%s2825_s9 + $0x10] sm:$0xff] %v1684_v30  ;;  %v1685_v35 = vmax.f32 %v1677_v32, 0.0  ;;  %v2186_v54 = vadd.f32 %v2185_v47, %v2076_v13  ;;  %v2079_v60 = vadd.f32 %v2078_v34, %v2077_v33 }
 0x152   : > { %1693 = vst [vmem:[%s2825_s9 + $0x18] sm:$0xff] %v1685_v35  ;;  %v2187_v38 = vadd.f32 %v2186_v54, %v1644_v45  ;;  %v2192_v29 = vadd.f32 %v2191_v10, %v2079_v60 }
 0x154   : > { %v1678_v14 = vadd.f32 %v2187_v38, %v1933_v9  ;;  %v2193_v37 = vadd.f32 %v2192_v29, %v1647_v22  ;;  %v2080_v39 = vpop.f32.mrb[44].mxu0 }
 0x155   : > { %v2081_v40 = vpop.f32.mrb[45].mxu0 }
 0x156   : > { %v1686_v41 = vmax.f32 %v1678_v14, 0.0  ;;  %v1679_v43 = vadd.f32 %v2193_v37, %v1933_v9  ;;  %v2082_v44 = vadd.f32 %v2081_v40, %v2080_v39  ;;  %v2083_v48 = vpop.f32.mrb[46].mxu0 }
 0x157   : > { %v2084_v52 = vpop.f32.mrb[47].mxu0 }
 0x158   : > { %1694 = vst [vmem:[%s2825_s9 + $0x20] sm:$0xff] %v1686_v41  ;;  %v1687_v19 = vmax.f32 %v1679_v43, 0.0  ;;  %v2183_v47 = vadd.f32 %v2814_v50, %v2082_v44  ;;  %v2085_v49 = vadd.f32 %v2084_v52, %v2083_v48 }
 0x15a   : > { %1695 = vst [vmem:[%s2825_s9 + $0x28] sm:$0xff] %v1687_v19  ;;  %v2184_v42 = vadd.f32 %v2183_v47, %v2168_v11  ;;  %v2189_v10 = vadd.f32 %v2816_v57, %v2085_v49 }
 0x15c   : > { %v1680_v46 = vadd.f32 %v2184_v42, %v1933_v9  ;;  %v2190_v51 = vadd.f32 %v2189_v10, %v2169_v17 }
 0x15e   : > { %v1688_v56 = vmax.f32 %v1680_v46, 0.0  ;;  %v1681_v55 = vadd.f32 %v2190_v51, %v1933_v9 }
 0x160   : > { %1696 = vst [vmem:[%s2825_s9 + $0x30] sm:$0xff] %v1688_v56  ;;  %v1689_v31 = vmax.f32 %v1681_v55, 0.0 }
 0x162   : > { %1697 = vst [vmem:[%s2825_s9 + $0x38] sm:$0xff] %v1689_v31 }
 0x163 PF: > { %s15_s20 = sadd.s32 1, %s2328_s20   ;;  %s2856_s18 = smov %s2324_s19 }
 0x164   : > { %p12_p5 = scmp.ge.s32.totalorder %s15_s20, 6   ;;  %s2857_s19 = smov %s2859_s21 }
 0x166   :  { %14 = sbr.rel (!%p12_p5) target bundleno = 2 (0x2), region = 76 }

// kernel: vgg_perceptual_loss.8
= control target key start
LH: loop header
LB: loop body
LE: loop exit
PB: predicated region body
PF: predicated region fallthrough
CT: control target
= control target key end

     0   :  { %s4455_s21 = smov 0   ;;  %s4457_s22 = smov 0   ;;  %s6260_s0 = inlined_call_operand.vmem [shape: f32[4,16,16,64], index: 0, kind: input, shape index: {}, may-alias: {0,1,2}]   ;;  %s6261_s1 = inlined_call_operand.vmem [shape: f32[4,16,16,64], index: 1, kind: input, shape index: {}, may-alias: {0,1,2}]   ;;  %s6262_s2 = inlined_call_operand.vmem [shape: f32[4,16,16,64], index: 2, kind: input, shape index: {}, may-alias: {0,1,2}]   ;;  %s6263_s3 = inlined_call_operand.vmem [shape: bf16[3,192,64], index: 3, kind: input, shape index: {}]   ;;  %s6264_s4 = inlined_call_operand.vmem [shape: f32[1,64], index: 4, kind: input, shape index: {}]   ;;  %s6265_s5 = inlined_call_operand.vmem [shape: f32[4,16,16,64], index: 5, kind: output, shape index: {0}]   ;;  %s6266_s6 = inlined_call_operand.vmem [shape: f32[4,8,8,64], index: 6, kind: output, shape index: {1}]  }
   0x1   :  { %s4459_s23 = smov 0  }
   0x2 LB: > { %s29_s24 = sadd.s32 1, %s4411_s22  ;;  %p4199_p0 = scmp.ge.s32.totalorder %s4415_s23, 1  ;;  %s4415_s23 = sphi %s4459_s23, %s17_s23   ;;  %s4411_s22 = sphi %s4457_s22, %s6308_s22   ;;  %s4407_s21 = sphi %s4455_s21, %s6307_s21  }
   0x3   : > { %p31_p1 = scmp.ge.s32.totalorder %s29_s24, 4  ;;  %p303_p2 = scmp.lt.s32.totalorder %s4415_s23, 5 }
   0x5   : > { %s6310_s24 = smov (%p31_p1, %s29_s24), 0  ;;  %p304_p3 = pnand %p4199_p0, %p303_p2 }
   0x7   : > { %307 = sbr.rel (%p304_p3) target bundleno = 803 (0x323), region = 40 }
   0xe   : > { %p382_p4 = scmp.lt.s32.totalorder %s4407_s21, 3  ;;  %v4417_v0 = vmov 0   ;;  %v4355_v1 = vld [vmem:[%s6263_s3 + $0x60] sm:$0xff]   ;;  %v4356_v2 = vld [vmem:[%s6263_s3 + $0x68] sm:$0xff]   ;;  %v4357_v6 = vld [vmem:[%s6263_s3 + $0x70] sm:$0xff]   ;;  %vm673_vm1 = vcmask 1040384  }
   0xf   : > { %4304 = vmatprep.subr.bf16.mxu1 %v4417_v0  ;;  %1281 = vmatprep.subr.bf16.mxu0 %v4417_v0  ;;  %vm674_vm0 = vsmask.f32 256  ;;  %vm784_vm2 = vsmask.f32 7424  ;;  %v4358_v36 = vld [vmem:[%s6263_s3 + $0x78] sm:$0xff]   ;;  %v4359_v61 = vld [vmem:[%s6263_s3 + $0x80] sm:$0xff]  }
  0x10   : > { %s6312_s21 = smov (!%p382_p4, %s4407_s21), 3  ;;  %4316 = vmatpush1.bf16.msra.mxu1 %v4355_v1  ;;  %1282 = vmatpush1.bf16.msra.mxu0 %v4355_v1  ;;  %vm4515_vm3 = vmand %vm673_vm1, %vm674_vm0  ;;  %s4418_s17 = smov 64   ;;  %vm1041_vm4 = vcmask 1046528   ;;  %vm1090_vm5 = vcmask 523264   ;;  %v4367_v31 = vld [vmem:[%s6263_s3] sm:$0xff]   ;;  %vm2775_vm6 = vcmask 517120  }
  0x11   : > { %s4481_s27 = sshll.u32 %s6312_s21, 8  ;;  %4305 = vmatprep.subr.bf16.mxu1 %v4417_v0  ;;  %1283 = vmatprep.subr.bf16.mxu0 %v4417_v0  ;;  %vm3928_vm7 = vcmask 1041409   ;;  %vm3930_vm8 = vcmask 1042434   ;;  %vm3932_vm9 = vcmask 1043459   ;;  %vm3934_vm10 = vcmask 1044484  }
  0x12   : > { %s4490_s8 = scalar_lea.vmem %s6261_s1, %s4481_s27  ;;  %s390_s13 = scalar_lea.vmem %s6260_s0, %s4481_s27  ;;  %vm3936_vm11 = vcmask 1045509   ;;  %vm3938_vm12 = vcmask 1046534   ;;  %vm3940_vm13 = vcmask 1047559  }
  0x13   : > { %v467_v3 = vld [vmem:[%s4490_s8 + $0x80] sm:$0xff]  ;;  %v468_v4 = vld [vmem:[%s4490_s8 + $0x88] sm:$0xff]  ;;  %v469_v9 = vld [vmem:[%s4490_s8 + $0x90] sm:$0xff]  ;;  %s4300_s14 = sadd.s32 240, %s4481_s27 }
  0x14   : > { %v451_v5 = vld [vmem:[%s4490_s8] sm:$0xff]  ;;  %v491_v7 = vpack.c.bf16 %v468_v4, %v467_v3  ;;  %v452_v8 = vld [vmem:[%s4490_s8 + $0x8] sm:$0xff]  ;;  %v470_v10 = vld [vmem:[%s4490_s8 + $0x98] sm:$0xff]  ;;  %4317 = vmatpush1.bf16.msra.mxu1 %v4356_v2  ;;  %1284 = vmatpush1.bf16.msra.mxu0 %v4356_v2  ;;  %s418_s18 = scalar_lea.vmem %s6262_s2, %s4300_s14 }
  0x15   : > { %v483_v11 = vpack.c.bf16 %v452_v8, %v451_v5  ;;  %v492_v12 = vpack.c.bf16 %v470_v10, %v469_v9  ;;  %v453_v13 = vld [vmem:[%s4490_s8 + $0x10] sm:$0xff]  ;;  %v454_v14 = vld [vmem:[%s4490_s8 + $0x18] sm:$0xff]  ;;  %v471_v15 = vld [vmem:[%s4490_s8 + $0xa0] sm:$0xff]  ;;  %4306 = vmatprep.subr.bf16.mxu1 %v4417_v0  ;;  %1285 = vmatprep.subr.bf16.mxu0 %v4417_v0 }
  0x16   : > { %v575_v16 = vshrl.u32 %v491_v7, 16  ;;  %v578_v17 = vshll.u32 %v491_v7, 16  ;;  %v484_v18 = vpack.c.bf16 %v454_v14, %v453_v13  ;;  %v472_v19 = vld [vmem:[%s4490_s8 + $0xa8] sm:$0xff]  ;;  %v455_v20 = vld [vmem:[%s4490_s8 + $0x20] sm:$0xff]  ;;  %v473_v26 = vld [vmem:[%s4490_s8 + $0xb0] sm:$0xff] }
  0x17   : > { %v456_v21 = vld [vmem:[%s4490_s8 + $0x28] sm:$0xff]  ;;  %v519_v22 = vshrl.u32 %v483_v11, 16  ;;  %v522_v23 = vshll.u32 %v483_v11, 16  ;;  %v582_v24 = vshrl.u32 %v492_v12, 16  ;;  %v585_v25 = vshll.u32 %v492_v12, 16  ;;  %v474_v27 = vld [vmem:[%s4490_s8 + $0xb8] sm:$0xff] }
  0x18   : > { %v577_v28 = vrot.slane %v575_v16, 7  ;;  %v526_v29 = vshrl.u32 %v484_v18, 16  ;;  %v529_v30 = vshll.u32 %v484_v18, 16  ;;  %v4519_v34 = vpack.c.bf16 %v472_v19, %v471_v15  ;;  %4318 = vmatpush1.bf16.msra.mxu1 %v4357_v6  ;;  %1286 = vmatpush1.bf16.msra.mxu0 %v4357_v6  ;;  %v4360_v7 = vld [vmem:[%s6263_s3 + $0x88] sm:$0xff]   ;;  %v457_v12 = vld [vmem:[%s4490_s8 + $0x30] sm:$0xff]  ;;  %v458_v13 = vld [vmem:[%s4490_s8 + $0x38] sm:$0xff] }
  0x19   : > { %v521_v32 = vrot.slane %v519_v22, 7  ;;  %v584_v33 = vrot.slane %v582_v24, 7  ;;  %v4521_v35 = vpack.c.bf16 %v456_v21, %v455_v20  ;;  %v4530_v40 = vpack.c.bf16 %v474_v27, %v473_v26  ;;  %4307 = vmatprep.subr.bf16.mxu1 %v4417_v0  ;;  %1287 = vmatprep.subr.bf16.mxu0 %v4417_v0  ;;  %v4361_v22 = vld [vmem:[%s6263_s3 + $0x90] sm:$0xff]   ;;  %v475_v27 = vld [vmem:[%s4490_s8 + $0xc0] sm:$0xff] }
  0x1a   : > { %v580_v37 = vor.u32 %v578_v17, %v577_v28  ;;  %v4528_v38 = vsel %vm4515_vm3, %v577_v28, 0  ;;  %v528_v39 = vrot.slane %v526_v29, 7  ;;  %v589_v52 = vshrl.u32 %v4519_v34, 16  ;;  %v476_v28 = vld [vmem:[%s4490_s8 + $0xc8] sm:$0xff] }
  0x1b   : > { %v901_v41 = vshll.u32 %v4528_v38, 16  ;;  %v524_v42 = vor.u32 %v522_v23, %v521_v32  ;;  %v4537_v43 = vsel %vm4515_vm3, %v521_v32, 0  ;;  %v587_v44 = vor.u32 %v585_v25, %v584_v33 }
  0x1c   : > { %v4541_v45 = vsel %vm4515_vm3, 0, %v580_v37  ;;  %v805_v46 = vshll.u32 %v4537_v43, 16  ;;  %v4546_v47 = vsel %vm4515_vm3, %v584_v33, 0  ;;  %v531_v48 = vor.u32 %v529_v30, %v528_v39  ;;  %4319 = vmatpush1.bf16.msra.mxu1 %v4358_v36  ;;  %1288 = vmatpush1.bf16.msra.mxu0 %v4358_v36 }
  0x1d   : > { %v894_v49 = vshrl.u32 %v4541_v45, 16  ;;  %v896_v50 = vshll.u32 %v4541_v45, 16  ;;  %v4552_v51 = vsel %vm4515_vm3, 0, %v524_v42  ;;  %v903_v53 = vrot.slane %v901_v41, 1  ;;  %4308 = vmatprep.subr.bf16.mxu1 %v4417_v0  ;;  %1289 = vmatprep.subr.bf16.mxu0 %v4417_v0  ;;  %v460_v42 = vld [vmem:[%s4490_s8 + $0x48] sm:$0xff] }
  0x1e   : > { %v798_v54 = vshrl.u32 %v4552_v51, 16  ;;  %v800_v55 = vshll.u32 %v4552_v51, 16  ;;  %v4559_v56 = vsel %vm4515_vm3, 0, %v587_v44  ;;  %v913_v60 = vshll.u32 %v4546_v47, 16 }
  0x1f   : > { %v898_v57 = vrot.slane %v896_v50, 1  ;;  %v906_v58 = vshrl.u32 %v4559_v56, 16  ;;  %v908_v59 = vshll.u32 %v4559_v56, 16  ;;  %v807_v63 = vrot.slane %v805_v46, 1 }
  0x20   : > { %v802_v62 = vrot.slane %v800_v55, 1  ;;  %v4571_v1 = vsel %vm4515_vm3, 0, %v531_v48  ;;  %v4575_v2 = vsel %vm4515_vm3, %v528_v39, 0  ;;  %v915_v5 = vrot.slane %v913_v60, 1  ;;  %4320 = vmatpush1.bf16.msra.mxu1 %v4359_v61  ;;  %1290 = vmatpush1.bf16.msra.mxu0 %v4359_v61 }
  0x21   : > { %v899_v3 = vor.u32 %v898_v57, %v894_v49  ;;  %v910_v4 = vrot.slane %v908_v59, 1  ;;  %v810_v6 = vshrl.u32 %v4571_v1, 16  ;;  %v812_v9 = vshll.u32 %v4571_v1, 16  ;;  %4309 = vmatprep.subr.bf16.mxu1 %v4417_v0  ;;  %1291 = vmatprep.subr.bf16.mxu0 %v4417_v0 }
  0x22   : > { %v803_v8 = vor.u32 %v802_v62, %v798_v54  ;;  %v817_v10 = vshll.u32 %v4575_v2, 16  ;;  %v591_v11 = vrot.slane %v589_v52, 7  ;;  %v592_v16 = vshll.u32 %v4519_v34, 16  ;;  %v459_v34 = vld [vmem:[%s4490_s8 + $0x40] sm:$0xff] }
  0x23   : > { %v904_v14 = vsel %vm784_vm2, %v899_v3, %v903_v53  ;;  %v911_v15 = vor.u32 %v910_v4, %v906_v58  ;;  %v533_v17 = vshrl.u32 %v4521_v35, 16  ;;  %v814_v19 = vrot.slane %v812_v9, 1  ;;  %v4362_v53 = vld [vmem:[%s6263_s3 + $0x98] sm:$0xff]  }
  0x24   : > { %995 = vrot.lane.b32.xlu0 %v904_v14, %s4418_s17  ;;  %v808_v18 = vsel %vm784_vm2, %v803_v8, %v807_v63  ;;  %v819_v20 = vrot.slane %v817_v10, 1  ;;  %v4594_v21 = vsel %vm4515_vm3, %v591_v11, 0  ;;  %v594_v24 = vor.u32 %v592_v16, %v591_v11  ;;  %4321 = vmatpush1.bf16.msra.mxu1 %v4360_v7 }
  0x25   : > { %v916_v23 = vsel %vm784_vm2, %v911_v15, %v915_v5  ;;  %v925_v25 = vshll.u32 %v4594_v21, 16  ;;  %v535_v26 = vrot.slane %v533_v17, 7  ;;  %1292 = vmatpush1.bf16.msra.mxu0 %v4360_v7  ;;  %v815_v29 = vor.u32 %v814_v19, %v810_v6  ;;  %4310 = vmatprep.subr.bf16.mxu1 %v4417_v0  ;;  %v4363_v6 = vld [vmem:[%s6263_s3 + $0xa0] sm:$0xff]  }
  0x26   : > { %997 = vrot.lane.b32.xlu1 %v916_v23, %s4418_s17  ;;  %v536_v30 = vshll.u32 %v4521_v35, 16  ;;  %v596_v32 = vshrl.u32 %v4530_v40, 16  ;;  %v599_v33 = vshll.u32 %v4530_v40, 16  ;;  %v4611_v36 = vsel %vm4515_vm3, 0, %v594_v24  ;;  %1293 = vmatprep.subr.bf16.mxu0 %v4417_v0 }
  0x27   : > { %v927_v37 = vrot.slane %v925_v25, 1  ;;  %v4615_v39 = vsel %vm4515_vm3, %v535_v26, 0  ;;  %v486_v41 = vpack.c.bf16 %v458_v13, %v457_v12  ;;  %v820_v35 = vsel %vm784_vm2, %v815_v29, %v819_v20  ;;  %v478_v29 = vld [vmem:[%s4490_s8 + $0xd8] sm:$0xff] }
  0x28   : > { %979 = vrot.lane.b32.xlu0 %v808_v18, %s4418_s17  ;;  %v918_v40 = vshrl.u32 %v4611_v36, 16  ;;  %v920_v44 = vshll.u32 %v4611_v36, 16  ;;  %v538_v46 = vor.u32 %v536_v30, %v535_v26  ;;  %v829_v48 = vshll.u32 %v4615_v39, 16  ;;  %4322 = vmatpush1.bf16.msra.mxu1 %v4361_v22  ;;  %v461_v30 = vld [vmem:[%s4490_s8 + $0x50] sm:$0xff] }
  0x29   : > { %v598_v49 = vrot.slane %v596_v32, 7  ;;  %v540_v50 = vshrl.u32 %v486_v41, 16  ;;  %v543_v52 = vshll.u32 %v486_v41, 16  ;;  %1294 = vmatpush1.bf16.msra.mxu0 %v4361_v22  ;;  %v495_v57 = vpack.c.bf16 %v476_v28, %v475_v27  ;;  %4311 = vmatprep.subr.bf16.mxu1 %v4417_v0  ;;  %v477_v28 = vld [vmem:[%s4490_s8 + $0xd0] sm:$0xff]  ;;  %v462_v32 = vld [vmem:[%s4490_s8 + $0x58] sm:$0xff] }
  0x2a   : > { %981 = vrot.lane.b32.xlu1 %v820_v35, %s4418_s17  ;;  %v922_v54 = vrot.slane %v920_v44, 1  ;;  %v4630_v55 = vsel %vm4515_vm3, 0, %v538_v46  ;;  %v4632_v58 = vpack.c.bf16 %v460_v42, %v459_v34  ;;  %v831_v61 = vrot.slane %v829_v48, 1  ;;  %1295 = vmatprep.subr.bf16.mxu0 %v4417_v0  ;;  %v480_v34 = vld [vmem:[%s4490_s8 + $0xe8] sm:$0xff]  ;;  %v463_v44 = vld [vmem:[%s4490_s8 + $0x60] sm:$0xff] }
  0x2b   : > { %v822_v59 = vshrl.u32 %v4630_v55, 16  ;;  %v824_v60 = vshll.u32 %v4630_v55, 16  ;;  %v601_v62 = vor.u32 %v599_v33, %v598_v49  ;;  %v4640_v3 = vsel %vm4515_vm3, %v598_v49, 0  ;;  %v479_v33 = vld [vmem:[%s4490_s8 + $0xe0] sm:$0xff]  ;;  %v464_v46 = vld [vmem:[%s4490_s8 + $0x68] sm:$0xff] }
  0x2c   : > { %v923_v63 = vor.u32 %v922_v54, %v918_v40  ;;  %v542_v4 = vrot.slane %v540_v50, 7  ;;  %v603_v5 = vshrl.u32 %v495_v57, 16  ;;  %v937_v9 = vshll.u32 %v4640_v3, 16  ;;  %4323 = vmatpush1.bf16.msra.mxu1 %v4362_v53 }
  0x2d   : > { %v826_v7 = vrot.slane %v824_v60, 1  ;;  %v4647_v8 = vsel %vm4515_vm3, 0, %v601_v62  ;;  %v606_v10 = vshll.u32 %v495_v57, 16  ;;  %1296 = vmatpush1.bf16.msra.mxu0 %v4362_v53  ;;  %4312 = vmatprep.subr.bf16.mxu1 %v4417_v0  ;;  %v547_v23 = vshrl.u32 %v4632_v58, 16  ;;  %v4365_v60 = vld [vmem:[%s6263_s3 + $0xb0] sm:$0xff]  }
  0x2e   : > { %v928_v11 = vsel %vm784_vm2, %v923_v63, %v927_v37  ;;  %v930_v12 = vshrl.u32 %v4647_v8, 16  ;;  %v932_v13 = vshll.u32 %v4647_v8, 16  ;;  %v545_v14 = vor.u32 %v543_v52, %v542_v4  ;;  %1297 = vmatprep.subr.bf16.mxu0 %v4417_v0  ;;  %v4364_v37 = vld [vmem:[%s6263_s3 + $0xa8] sm:$0xff]  }
  0x2f   : > { %999 = vrot.lane.b32.xlu0 %v928_v11, %s4418_s17  ;;  %v827_v15 = vor.u32 %v826_v7, %v822_v59  ;;  %v939_v16 = vrot.slane %v937_v9, 1  ;;  %v4658_v17 = vsel %vm4515_vm3, %v542_v4, 0  ;;  %v605_v18 = vrot.slane %v603_v5, 7 }
  0x30   : > { %v934_v19 = vrot.slane %v932_v13, 1  ;;  %v4662_v20 = vsel %vm4515_vm3, 0, %v545_v14  ;;  %v841_v22 = vshll.u32 %v4658_v17, 16  ;;  %4324 = vmatpush1.bf16.msra.mxu1 %v4363_v6  ;;  %v549_v40 = vrot.slane %v547_v23, 7  ;;  %v481_v13 = vld [vmem:[%s4490_s8 + $0xf0] sm:$0xff]  ;;  %v482_v14 = vld [vmem:[%s4490_s8 + $0xf8] sm:$0xff] }
  0x31   : > { %v832_v24 = vsel %vm784_vm2, %v827_v15, %v831_v61  ;;  %v834_v25 = vshrl.u32 %v4662_v20, 16  ;;  %v836_v26 = vshll.u32 %v4662_v20, 16  ;;  %v608_v27 = vor.u32 %v606_v10, %v605_v18  ;;  %1298 = vmatpush1.bf16.msra.mxu0 %v4363_v6  ;;  %4313 = vmatprep.subr.bf16.mxu1 %v4417_v0 }
  0x32   : > { %983 = vrot.lane.b32.xlu1 %v832_v24, %s4418_s17  ;;  %v935_v41 = vor.u32 %v934_v19, %v930_v12  ;;  %v843_v42 = vrot.slane %v841_v22, 1  ;;  %v4681_v35 = vsel %vm4515_vm3, %v605_v18, 0  ;;  %v550_v52 = vshll.u32 %v4632_v58, 16  ;;  %1299 = vmatprep.subr.bf16.mxu0 %v4417_v0  ;;  %v4366_v22 = vld [vmem:[%s6263_s3 + $0xb8] sm:$0xff]  }
  0x33   : > { %v838_v48 = vrot.slane %v836_v26, 1  ;;  %v4688_v49 = vsel %vm4515_vm3, 0, %v608_v27  ;;  %v949_v50 = vshll.u32 %v4681_v35, 16  ;;  %v4698_v59 = vsel %vm4515_vm3, %v549_v40, 0 }
  0x34   : > { %v940_v53 = vsel %vm784_vm2, %v935_v41, %v939_v16  ;;  %v942_v54 = vshrl.u32 %v4688_v49, 16  ;;  %v944_v57 = vshll.u32 %v4688_v49, 16  ;;  %v552_v62 = vor.u32 %v550_v52, %v549_v40  ;;  %4325 = vmatpush1.bf16.msra.mxu1 %v4364_v37 }
  0x35   : > { %1001 = vrot.lane.b32.xlu0 %v940_v53, %s4418_s17  ;;  %v839_v58 = vor.u32 %v838_v48, %v834_v25  ;;  %v951_v61 = vrot.slane %v949_v50, 1  ;;  %v853_v63 = vshll.u32 %v4698_v59, 16  ;;  %v496_v5 = vpack.c.bf16 %v478_v29, %v477_v28  ;;  %1300 = vmatpush1.bf16.msra.mxu0 %v4364_v37 }
  0x36   : > { %v946_v4 = vrot.slane %v944_v57, 1  ;;  %v488_v6 = vpack.c.bf16 %v462_v32, %v461_v30  ;;  %v497_v7 = vpack.c.bf16 %v480_v34, %v479_v33  ;;  %4314 = vmatprep.subr.bf16.mxu1 %v4417_v0  ;;  %v4709_v10 = vsel %vm4515_vm3, 0, %v552_v62  ;;  %1301 = vmatprep.subr.bf16.mxu0 %v4417_v0 }
  0x37   : > { %v844_v9 = vsel %vm784_vm2, %v839_v58, %v843_v42  ;;  %v855_v11 = vrot.slane %v853_v63, 1  ;;  %v4711_v12 = vpack.c.bf16 %v464_v46, %v463_v44  ;;  %v846_v16 = vshrl.u32 %v4709_v10, 16  ;;  %v465_v58 = vld [vmem:[%s4490_s8 + $0x70] sm:$0xff] }
  0x38   : > { %985 = vrot.lane.b32.xlu1 %v844_v9, %s4418_s17  ;;  %v947_v15 = vor.u32 %v946_v4, %v942_v54  ;;  %v848_v18 = vshll.u32 %v4709_v10, 16  ;;  %v610_v19 = vshrl.u32 %v496_v5, 16  ;;  %v613_v23 = vshll.u32 %v496_v5, 16  ;;  %4326 = vmatpush1.bf16.msra.mxu1 %v4365_v60 }
  0x39   : > { %v554_v24 = vshrl.u32 %v488_v6, 16  ;;  %v557_v25 = vshll.u32 %v488_v6, 16  ;;  %v617_v26 = vshrl.u32 %v497_v7, 16  ;;  %v620_v30 = vshll.u32 %v497_v7, 16  ;;  %1302 = vmatpush1.bf16.msra.mxu0 %v4365_v60  ;;  %4315 = vmatprep.subr.bf16.mxu1 %v4417_v0 }
  0x3a   : > { %v952_v27 = vsel %vm784_vm2, %v947_v15, %v951_v61  ;;  %v850_v28 = vrot.slane %v848_v18, 1  ;;  %v612_v29 = vrot.slane %v610_v19, 7  ;;  %v561_v34 = vshrl.u32 %v4711_v12, 16  ;;  %1303 = vmatprep.subr.bf16.mxu0 %v4417_v0  ;;  %v466_v61 = vld [vmem:[%s4490_s8 + $0x78] sm:$0xff] }
  0x3b   : > { %1003 = vrot.lane.b32.xlu0 %v952_v27, %s4418_s17  ;;  %v556_v32 = vrot.slane %v554_v24, 7  ;;  %v619_v33 = vrot.slane %v617_v26, 7  ;;  %v564_v37 = vshll.u32 %v4711_v12, 16  ;;  %v498_v44 = vpack.c.bf16 %v482_v14, %v481_v13 }
  0x3c   : > { %v851_v41 = vor.u32 %v850_v28, %v846_v16  ;;  %v615_v42 = vor.u32 %v613_v23, %v612_v29  ;;  %v4730_v40 = vsel %vm4515_vm3, %v612_v29, 0  ;;  %4327 = vmatpush1.bf16.msra.mxu1 %v4366_v22  ;;  %v563_v18 = vrot.slane %v561_v34, 7 }
  0x3d   : > { %v961_v46 = vshll.u32 %v4730_v40, 16  ;;  %v559_v48 = vor.u32 %v557_v25, %v556_v32  ;;  %v4735_v50 = vsel %vm4515_vm3, %v556_v32, 0  ;;  %v622_v52 = vor.u32 %v620_v30, %v619_v33  ;;  %1304 = vmatpush1.bf16.msra.mxu0 %v4366_v22  ;;  %1517 = vmatprep.subr.bf16.mxu1 %v4417_v0 }
  0x3e   : > { %v856_v53 = vsel %vm784_vm2, %v851_v41, %v855_v11  ;;  %v4740_v54 = vsel %vm4515_vm3, 0, %v615_v42  ;;  %v865_v57 = vshll.u32 %v4735_v50, 16  ;;  %v4745_v60 = vsel %vm4515_vm3, %v619_v33, 0  ;;  %1775 = vmatprep.subr.bf16.mxu0 %v4417_v0 }
  0x3f   : > { %987 = vrot.lane.b32.xlu1 %v856_v53, %s4418_s17  ;;  %v954_v62 = vshrl.u32 %v4740_v54, 16  ;;  %v956_v63 = vshll.u32 %v4740_v54, 16  ;;  %v963_v4 = vrot.slane %v961_v46, 1  ;;  %v4755_v5 = vsel %vm4515_vm3, 0, %v559_v48  ;;  %v499_v48 = vld [vmem:[%s390_s13] sm:$0xff] }
  0x40   : > { %v858_v6 = vshrl.u32 %v4755_v5, 16  ;;  %v860_v7 = vshll.u32 %v4755_v5, 16  ;;  %v867_v9 = vrot.slane %v865_v57, 1  ;;  %v4762_v11 = vsel %vm4515_vm3, 0, %v622_v52 }
  0x41   : > { %v958_v12 = vrot.slane %v956_v63, 1  ;;  %v966_v13 = vshrl.u32 %v4762_v11, 16  ;;  %v968_v14 = vshll.u32 %v4762_v11, 16  ;;  %v973_v15 = vshll.u32 %v4745_v60, 16 }
  0x42   : > { %v862_v16 = vrot.slane %v860_v7, 1  ;;  %v624_v19 = vshrl.u32 %v498_v44, 16  ;;  %v627_v22 = vshll.u32 %v498_v44, 16  ;;  %v490_v26 = vpack.c.bf16 %v466_v61, %v465_v58  ;;  %v500_v61 = vld [vmem:[%s390_s13 + $0x8] sm:$0xff]  ;;  %s5297_s13 = scalar_lea.vmem %s6265_s5, %s4481_s27  ;;  %s4302_s27 = sshll.u32 %s6312_s21, 6 }
  0x43   : > { %v959_v23 = vor.u32 %v958_v12, %v954_v62  ;;  %v970_v24 = vrot.slane %v968_v14, 1  ;;  %v975_v25 = vrot.slane %v973_v15, 1  ;;  %v566_v28 = vor.u32 %v564_v37, %v563_v18  ;;  %s5463_s15 = scalar_lea.vmem %s6266_s6, %s4302_s27 }
  0x44   : > { %v863_v27 = vor.u32 %v862_v16, %v858_v6  ;;  %v4773_v29 = vsel %vm4515_vm3, %v563_v18, 0  ;;  %v626_v30 = vrot.slane %v624_v19, 7  ;;  %v568_v41 = vshrl.u32 %v490_v26, 16 }
  0x45   : > { %v964_v32 = vsel %vm784_vm2, %v959_v23, %v963_v4  ;;  %v971_v33 = vor.u32 %v970_v24, %v966_v13  ;;  %v877_v34 = vshll.u32 %v4773_v29, 16  ;;  %v4781_v44 = vsel %vm4515_vm3, 0, %v566_v28 }
  0x46   : > { %1005 = vrot.lane.b32.xlu0 %v964_v32, %s4418_s17  ;;  %v868_v42 = vsel %vm784_vm2, %v863_v27, %v867_v9  ;;  %v629_v37 = vor.u32 %v627_v22, %v626_v30  ;;  %v4785_v46 = vsel %vm4515_vm3, %v626_v30, 0  ;;  %v870_v53 = vshrl.u32 %v4781_v44, 16 }
  0x47   : > { %989 = vrot.lane.b32.xlu1 %v868_v42, %s4418_s17  ;;  %v976_v52 = vsel %vm784_vm2, %v971_v33, %v975_v25  ;;  %v872_v57 = vshll.u32 %v4781_v44, 16  ;;  %v879_v58 = vrot.slane %v877_v34, 1  ;;  %v1147_v63 = vshll.u32 %v4785_v46, 16 }
  0x48   : > { %v4793_v62 = vsel %vm4515_vm3, 0, %v629_v37  ;;  %v570_v4 = vrot.slane %v568_v41, 7  ;;  %v571_v6 = vshll.u32 %v490_v26, 16  ;;  %v502_v13 = vmul.f32 0.0, %v499_v48 }
  0x49   : > { %v874_v7 = vrot.slane %v872_v57, 1  ;;  %v1140_v9 = vshrl.u32 %v4793_v62, 16  ;;  %v1142_v12 = vshll.u32 %v4793_v62, 16  ;;  %v1149_v14 = vrot.slane %v1147_v63, 1 }
  0x4a   : > { %1007 = vrot.lane.b32.xlu0 %v976_v52, %s4418_s17  ;;  %v573_v15 = vor.u32 %v571_v6, %v570_v4  ;;  %v4801_v16 = vsel %vm4515_vm3, %v570_v4, 0  ;;  %v503_v18 = vmul.f32 0.0, %v500_v61  ;;  %v1069_v24 = vrot.slane %v4541_v45, 1 }
  0x4b   : > { %v875_v19 = vor.u32 %v874_v7, %v870_v53  ;;  %v1144_v22 = vrot.slane %v1142_v12, 1  ;;  %v889_v23 = vshll.u32 %v4801_v16, 16  ;;  %v1070_v27 = vrot.slane %v4528_v38, 1 }
  0x4c   : > { %v4807_v25 = vsel %vm4515_vm3, 0, %v573_v15  ;;  %v504_v26 = vpack.c.bf16 %v503_v18, %v502_v13  ;;  %v1045_v28 = vrot.slane %v4552_v51, 1  ;;  %v1046_v53 = vrot.slane %v4537_v43, 1  ;;  %v505_v18 = vld [vmem:[%s418_s18] sm:$0xff] }
  0x4d   : > { %v880_v30 = vsel %vm784_vm2, %v875_v19, %v879_v58  ;;  %v1145_v32 = vor.u32 %v1144_v22, %v1140_v9  ;;  %v882_v33 = vshrl.u32 %v4807_v25, 16  ;;  %v884_v34 = vshll.u32 %v4807_v25, 16  ;;  %v506_v22 = vld [vmem:[%s418_s18 + $0x8] sm:$0xff] }
  0x4e   : > { %991 = vrot.lane.b32.xlu1 %v880_v30, %s4418_s17  ;;  %v512_v41 = vshrl.u32 %v504_v26, 16  ;;  %v515_v42 = vshll.u32 %v504_v26, 16  ;;  %v4816_v37 = vsel %vm1041_vm4, %v1069_v24, %v1070_v27  ;;  %v891_v52 = vrot.slane %v889_v23, 1 }
  0x4f   : > { %v1150_v48 = vsel %vm784_vm2, %v1145_v32, %v1149_v14  ;;  %v886_v38 = vrot.slane %v884_v34, 1  ;;  %4230 = vmatprep.mubr.msk.bf16.mxu1 %vm1090_vm5, %v4816_v37  ;;  %v4824_v61 = vsel %vm1041_vm4, %v1045_v28, %v1046_v53  ;;  %v508_v23 = vmul.f32 0.0, %v505_v18 }
  0x50   : > { %1151 = vrot.lane.b32.xlu0 %v1150_v48, %s4418_s17  ;;  %v514_v57 = vrot.slane %v512_v41, 7  ;;  %4222 = vmatprep.mubr.msk.bf16.mxu0 %vm1090_vm5, %v4824_v61  ;;  %v509_v24 = vmul.f32 0.0, %v506_v22  ;;  %v1076_v22 = vrot.slane %v4594_v21, 1  ;;  %v1051_v21 = vrot.slane %v4630_v55, 1 }
  0x51   : > { %v887_v58 = vor.u32 %v886_v38, %v882_v33 }
  0x52   : > { %v517_v63 = vor.u32 %v515_v42, %v514_v57  ;;  %v4828_v4 = vsel %vm4515_vm3, %v514_v57, 0  ;;  %v510_v26 = vpack.c.bf16 %v509_v24, %v508_v23  ;;  %v4371_v24 = vld [vmem:[%s6263_s3 + $0x10] sm:$0xff]  }
  0x53   : > { %v892_v6 = vsel %vm784_vm2, %v887_v58, %v891_v52  ;;  %v793_v7 = vshll.u32 %v4828_v4, 16  ;;  %v1073_v58 = vrot.slane %v4546_v47, 1 }
  0x54   : > { %993 = vrot.lane.b32.xlu1 %v892_v6, %s4418_s17  ;;  %v4837_v43 = vsel %vm4515_vm3, 0, %v517_v63  ;;  %v631_v27 = vshrl.u32 %v510_v26, 16  ;;  %v634_v28 = vshll.u32 %v510_v26, 16  ;;  %v1072_v63 = vrot.slane %v4559_v56, 1 }
  0x55   : > { %v786_v9 = vshrl.u32 %v4837_v43, 16  ;;  %v788_v12 = vshll.u32 %v4837_v43, 16  ;;  %v795_v14 = vrot.slane %v793_v7, 1 }
  0x56   : > { %v633_v30 = vrot.slane %v631_v27, 7  ;;  %v4866_v7 = vsel %vm1041_vm4, %v1072_v63, %v1073_v58  ;;  %v1052_v27 = vrot.slane %v4615_v39, 1  ;;  %v1078_v39 = vrot.slane %v4647_v8, 1  ;;  %v4376_v63 = vld [vmem:[%s6263_s3 + $0xe0] sm:$0xff]  }
  0x57   : > { %v790_v13 = vrot.slane %v788_v12, 1  ;;  %v1048_v12 = vrot.slane %v4571_v1, 1 }
  0x58   : > { %v636_v32 = vor.u32 %v634_v28, %v633_v30  ;;  %v4849_v33 = vsel %vm4515_vm3, %v633_v30, 0  ;;  %v4372_v30 = vld [vmem:[%s6263_s3 + $0xd0] sm:$0xff]  }
  0x59   : > { %v791_v15 = vor.u32 %v790_v13, %v786_v9  ;;  %v1686_v34 = vshll.u32 %v4849_v33, 16  ;;  %v1049_v13 = vrot.slane %v4575_v2, 1 }
  0x5a   : > { %v4854_v41 = vsel %vm4515_vm3, 0, %v636_v32  ;;  %v4373_v32 = vld [vmem:[%s6263_s3 + $0x18] sm:$0xff]  }
  0x5b   : > { %v796_v19 = vsel %vm784_vm2, %v791_v15, %v795_v14  ;;  %v1679_v42 = vshrl.u32 %v4854_v41, 16  ;;  %v1681_v48 = vshll.u32 %v4854_v41, 16  ;;  %v1688_v52 = vrot.slane %v1686_v34, 1  ;;  %v4368_v14 = vld [vmem:[%s6263_s3 + $0xc0] sm:$0xff]  }
  0x5c   : > { %977 = vrot.lane.b32.xlu0 %v796_v19, %s4418_s17  ;;  %v4889_v18 = vsel %vm1041_vm4, %v1048_v12, %v1049_v13  ;;  %v1075_v19 = vrot.slane %v4611_v36, 1  ;;  %v1082_v12 = vrot.slane %v4681_v35, 1 }
  0x5d   : > { %v1683_v38 = vrot.slane %v1681_v48, 1 }
  0x5f   : > { %v1684_v53 = vor.u32 %v1683_v38, %v1679_v42  ;;  %v4931_v42 = vsel %vm1041_vm4, %v1051_v21, %v1052_v27  ;;  %v4374_v38 = vld [vmem:[%s6263_s3 + $0xd8] sm:$0xff]  }
  0x61   : > { %v1689_v57 = vsel %vm784_vm2, %v1684_v53, %v1688_v52  ;;  %v4375_v53 = vld [vmem:[%s6263_s3 + $0x20] sm:$0xff]  }
  0x62   : > { %1690 = vrot.lane.b32.xlu1 %v1689_v57, %s4418_s17  ;;  %v1055_v57 = vrot.slane %v4658_v17, 1 }
  0x96   : > { %v996_v6 = vpop.permute.xlu0 %995 }
  0x97   : > { %v4870_v9 = vsel %vm1090_vm5, %v4541_v45, %v996_v6  ;;  %v4369_v45 = vld [vmem:[%s6263_s3 + $0x8] sm:$0xff]   ;;  %v1081_v6 = vrot.slane %v4688_v49, 1 }
  0x98   : > { %1378 = vmatmul.mubr.bf16.vlgmr.msra.gmra.mrb[0].mxu1 %v4870_v9  ;;  %v998_v47 = vpop.permute.xlu1 %997 }
  0x99   : > { %1518 = vmatpush1.bf16.msra.mxu1 %v4367_v31  ;;  %4231 = vmatprep.mubr.msk.bf16.mxu1 %vm1090_vm5, %v4866_v7  ;;  %v4896_v23 = vsel %vm1090_vm5, %v4559_v56, %v998_v47  ;;  %v4909_v56 = vsel %vm1041_vm4, %v1075_v19, %v1076_v22  ;;  %v4378_v47 = vld [vmem:[%s6263_s3 + $0xe8] sm:$0xff]   ;;  %v4985_v35 = vsel %vm1041_vm4, %v1081_v6, %v1082_v12  ;;  %v4380_v22 = vld [vmem:[%s6263_s3 + $0xf0] sm:$0xff]  }
  0x9a   : > { %v980_v15 = vpop.permute.xlu0 %979  ;;  %1519 = vmatprep.subr.bf16.mxu1 %v4417_v0 }
  0x9b   : > { %v4886_v2 = vsel %vm1090_vm5, %v4552_v51, %v980_v15  ;;  %v4370_v51 = vld [vmem:[%s6263_s3 + $0xc8] sm:$0xff]   ;;  %v1058_v15 = vrot.slane %v4698_v59, 1 }
  0x9c   : > { %1314 = vmatmul.mubr.bf16.vlgmr.msra.gmra.mrb[0].mxu0 %v4886_v2  ;;  %v982_v26 = vpop.permute.xlu1 %981 }
  0x9d   : > { %1776 = vmatpush1.bf16.msra.mxu0 %v4368_v14  ;;  %1520 = vmatpush1.bf16.msra.mxu1 %v4369_v45  ;;  %v4916_v28 = vsel %vm1090_vm5, %v4571_v1, %v982_v26  ;;  %v1079_v1 = vrot.slane %v4640_v3, 1  ;;  %v1057_v45 = vrot.slane %v4709_v10, 1  ;;  %v4381_v26 = vld [vmem:[%s6263_s3 + $0x38] sm:$0xff]  }
  0x9e   : > { %1777 = vmatprep.subr.bf16.mxu0 %v4417_v0  ;;  %4223 = vmatprep.mubr.msk.bf16.mxu0 %vm1090_vm5, %v4889_v18 }
  0x9f   : > { %1521 = vmatprep.subr.bf16.mxu1 %v4417_v0  ;;  %v4945_v3 = vsel %vm1041_vm4, %v1078_v39, %v1079_v1  ;;  %v5004_v59 = vsel %vm1041_vm4, %v1057_v45, %v1058_v15 }
  0xa0   : > { %1386 = vmatmul.mubr.bf16.gmra.mrb[4].mxu1 %v4896_v23 }
  0xa1   : > { %1778 = vmatpush1.bf16.msra.mxu0 %v4370_v51  ;;  %1522 = vmatpush1.bf16.msra.mxu1 %v4371_v24  ;;  %v1000_v34 = vpop.permute.xlu0 %999  ;;  %v1084_v24 = vrot.slane %v4740_v54, 1 }
  0xa2   : > { %1779 = vmatprep.subr.bf16.mxu0 %v4417_v0  ;;  %4232 = vmatprep.mubr.msk.bf16.mxu1 %vm1090_vm5, %v4909_v56  ;;  %v4936_v48 = vsel %vm1090_vm5, %v4611_v36, %v1000_v34  ;;  %v1054_v36 = vrot.slane %v4662_v20, 1  ;;  %v4383_v34 = vld [vmem:[%s6263_s3 + $0x40] sm:$0xff]  }
  0xa3   : > { %1523 = vmatprep.subr.bf16.mxu1 %v4417_v0 }
  0xa4   : > { %1322 = vmatmul.mubr.bf16.gmra.mrb[4].mxu0 %v4916_v28  ;;  %v984_v52 = vpop.permute.xlu1 %983  ;;  %v4965_v17 = vsel %vm1041_vm4, %v1054_v36, %v1055_v57 }
  0xa5   : > { %1780 = vmatpush1.bf16.msra.mxu0 %v4372_v30  ;;  %1524 = vmatpush1.bf16.msra.mxu1 %v4373_v32  ;;  %v4956_v58 = vsel %vm1090_vm5, %v4630_v55, %v984_v52  ;;  %v4377_v55 = vld [vmem:[%s6263_s3 + $0x28] sm:$0xff]   ;;  %v1060_v32 = vrot.slane %v4755_v5, 1  ;;  %v1087_v52 = vrot.slane %v4762_v11, 1 }
  0xa6   : > { %4224 = vmatprep.mubr.msk.bf16.mxu0 %vm1090_vm5, %v4931_v42  ;;  %1781 = vmatprep.subr.bf16.mxu0 %v4417_v0 }
  0xa7   : > { %1525 = vmatprep.subr.bf16.mxu1 %v4417_v0  ;;  %v1002_v31 = vpop.permute.xlu0 %1001 }
  0xa8   : > { %1394 = vmatmul.mubr.bf16.gmra.mrb[8].mxu1 %v4936_v48  ;;  %v4976_v13 = vsel %vm1090_vm5, %v4647_v8, %v1002_v31  ;;  %v4379_v8 = vld [vmem:[%s6263_s3 + $0x30] sm:$0xff]   ;;  %v1063_v31 = vrot.slane %v4781_v44, 1 }
  0xa9   : > { %1782 = vmatpush1.bf16.msra.mxu0 %v4374_v38  ;;  %4233 = vmatprep.mubr.msk.bf16.mxu1 %vm1090_vm5, %v4945_v3 }
  0xaa   : > { %1526 = vmatpush1.bf16.msra.mxu1 %v4375_v53  ;;  %1783 = vmatprep.subr.bf16.mxu0 %v4417_v0  ;;  %v986_v14 = vpop.permute.xlu1 %985  ;;  %v4385_v53 = vld [vmem:[%s6263_s3 + $0x48] sm:$0xff]  }
  0xab   : > { %1527 = vmatprep.subr.bf16.mxu1 %v4417_v0  ;;  %v4996_v19 = vsel %vm1090_vm5, %v4662_v20, %v986_v14  ;;  %v1085_v20 = vrot.slane %v4730_v40, 1  ;;  %v4382_v40 = vld [vmem:[%s6263_s3 + $0xf8] sm:$0xff]   ;;  %v1155_v14 = vrot.slane %v4793_v62, 1 }
  0xac   : > { %1330 = vmatmul.mubr.bf16.gmra.mrb[8].mxu0 %v4956_v58 }
  0xad   : > { %1784 = vmatpush1.bf16.msra.mxu0 %v4376_v63  ;;  %4225 = vmatprep.mubr.msk.bf16.mxu0 %vm1090_vm5, %v4965_v17  ;;  %v1004_v51 = vpop.permute.xlu0 %1003  ;;  %v5024_v30 = vsel %vm1041_vm4, %v1084_v24, %v1085_v20  ;;  %v1067_v24 = vrot.slane %v4801_v16, 1 }
  0xae   : > { %1528 = vmatpush1.bf16.msra.mxu1 %v4377_v55  ;;  %1785 = vmatprep.subr.bf16.mxu0 %v4417_v0  ;;  %v5016_v21 = vsel %vm1090_vm5, %v4688_v49, %v1004_v51  ;;  %v1061_v49 = vrot.slane %v4735_v50, 1  ;;  %v4384_v50 = vld [vmem:[%s6263_s3 + $0x100] sm:$0xff]   ;;  %v1064_v55 = vrot.slane %v4773_v29, 1  ;;  %v4388_v29 = vld [vmem:[%s6263_s3 + $0x110] sm:$0xff]   ;;  %v1066_v51 = vrot.slane %v4807_v25, 1 }
  0xaf   : > { %1529 = vmatprep.subr.bf16.mxu1 %v4417_v0 }
  0xb0   : > { %1402 = vmatmul.mubr.bf16.gmra.mrb[12].mxu1 %v4976_v13  ;;  %v5044_v38 = vsel %vm1041_vm4, %v1060_v32, %v1061_v49 }
  0xb1   : > { %4234 = vmatprep.mubr.msk.bf16.mxu1 %vm1090_vm5, %v4985_v35  ;;  %1786 = vmatpush1.bf16.msra.mxu0 %v4378_v47  ;;  %v988_v27 = vpop.permute.xlu1 %987  ;;  %v5084_v47 = vsel %vm1041_vm4, %v1063_v31, %v1064_v55 }
  0xb2   : > { %1530 = vmatpush1.bf16.msra.mxu1 %v4379_v8  ;;  %1787 = vmatprep.subr.bf16.mxu0 %v4417_v0  ;;  %v5036_v39 = vsel %vm1090_vm5, %v4709_v10, %v988_v27  ;;  %v1088_v10 = vrot.slane %v4745_v60, 1  ;;  %v4386_v60 = vld [vmem:[%s6263_s3 + $0x108] sm:$0xff]   ;;  %v1156_v8 = vrot.slane %v4785_v46, 1  ;;  %v4390_v46 = vld [vmem:[%s6263_s3 + $0x118] sm:$0xff]   ;;  %v1043_v27 = vrot.slane %v4828_v4, 1 }
  0xb3   : > { %1531 = vmatprep.subr.bf16.mxu1 %v4417_v0 }
  0xb4   : > { %1338 = vmatmul.mubr.bf16.gmra.mrb[12].mxu0 %v4996_v19  ;;  %v5064_v63 = vsel %vm1041_vm4, %v1087_v52, %v1088_v10 }
  0xb5   : > { %4226 = vmatprep.mubr.msk.bf16.mxu0 %vm1090_vm5, %v5004_v59  ;;  %1788 = vmatpush1.bf16.msra.mxu0 %v4380_v22  ;;  %v5104_v22 = vsel %vm1041_vm4, %v1155_v14, %v1156_v8 }
  0xb6   : > { %1532 = vmatpush1.bf16.msra.mxu1 %v4381_v26  ;;  %1789 = vmatprep.subr.bf16.mxu0 %v4417_v0  ;;  %v1068_v26 = vsel %vm1041_vm4, %v1066_v51, %v1067_v24 }
  0xb7   : > { %1533 = vmatprep.subr.bf16.mxu1 %v4417_v0 }
  0xb8   : > { %1410 = vmatmul.mubr.bf16.gmra.mrb[16].mxu1 %v5016_v21  ;;  %v1006_v1 = vpop.permute.xlu0 %1005 }
  0xb9   : > { %4235 = vmatprep.mubr.msk.bf16.mxu1 %vm1090_vm5, %v5024_v30  ;;  %1790 = vmatpush1.bf16.msra.mxu0 %v4382_v40  ;;  %v5056_v36 = vsel %vm1090_vm5, %v4740_v54, %v1006_v1  ;;  %v990_v57 = vpop.permute.xlu1 %989  ;;  %v4387_v54 = vld [vmem:[%s6263_s3 + $0x50] sm:$0xff]   ;;  %v1042_v40 = vrot.slane %v4837_v43, 1 }
  0xba   : > { %1534 = vmatpush1.bf16.msra.mxu1 %v4383_v34  ;;  %1791 = vmatprep.subr.bf16.mxu0 %v4417_v0  ;;  %v5076_v6 = vsel %vm1090_vm5, %v4755_v5, %v990_v57  ;;  %v4389_v5 = vld [vmem:[%s6263_s3 + $0x58] sm:$0xff]  }
  0xbb   : > { %1535 = vmatprep.subr.bf16.mxu1 %v4417_v0 }
  0xbc   : > { %1346 = vmatmul.mubr.bf16.gmra.mrb[16].mxu0 %v5036_v39  ;;  %v1008_v12 = vpop.permute.xlu0 %1007 }
  0xbd   : > { %4227 = vmatprep.mubr.msk.bf16.mxu0 %vm1090_vm5, %v5044_v38  ;;  %1792 = vmatpush1.bf16.msra.mxu0 %v4384_v50  ;;  %v5096_v45 = vsel %vm1090_vm5, %v4762_v11, %v1008_v12 }
  0xbe   : > { %1536 = vmatpush1.bf16.msra.mxu1 %v4385_v53  ;;  %1793 = vmatprep.subr.bf16.mxu0 %v4417_v0 }
  0xbf   : > { %1537 = vmatprep.subr.bf16.mxu1 %v4417_v0 }
  0xc0   : > { %1418 = vmatmul.mubr.bf16.gmra.mrb[20].mxu1 %v5056_v36  ;;  %v992_v15 = vpop.permute.xlu1 %991 }
  0xc1   : > { %4236 = vmatprep.mubr.msk.bf16.mxu1 %vm1090_vm5, %v5064_v63  ;;  %1794 = vmatpush1.bf16.msra.mxu0 %v4386_v60  ;;  %v1113_v11 = vsel %vm1090_vm5, %v4781_v44, %v992_v15  ;;  %v1044_v44 = vsel %vm1041_vm4, %v1042_v40, %v1043_v27 }
  0xc2   : > { %1538 = vmatpush1.bf16.msra.mxu1 %v4387_v54  ;;  %1795 = vmatprep.subr.bf16.mxu0 %v4417_v0  ;;  %v1152_v20 = vpop.permute.xlu0 %1151 }
  0xc3   : > { %1539 = vmatprep.subr.bf16.mxu1 %v4417_v0 }
  0xc4   : > { %1354 = vmatmul.mubr.bf16.gmra.mrb[20].mxu0 %v5076_v6 }
  0xc5   : > { %4228 = vmatprep.mubr.msk.bf16.mxu0 %vm1090_vm5, %v5084_v47  ;;  %1796 = vmatpush1.bf16.msra.mxu0 %v4388_v29 }
  0xc6   : > { %1540 = vmatpush1.bf16.msra.mxu1 %v4389_v5  ;;  %1797 = vmatprep.subr.bf16.mxu0 %v4417_v0  ;;  %v5119_v0 = vsel %vm1090_vm5, %v4793_v62, %v1152_v20  ;;  %v994_v16 = vpop.permute.xlu1 %993  ;;  %v1694_v62 = vrot.slane %v4854_v41, 1 }
  0xc7   : > { %v1116_v32 = vsel %vm1090_vm5, %v4807_v25, %v994_v16  ;;  %v1695_v25 = vrot.slane %v4849_v33, 1 }
  0xc8   : > { %1426 = vmatmul.mubr.bf16.gmra.mrb[24].mxu1 %v5096_v45 }
  0xc9   : > { %4237 = vmatprep.mubr.msk.bf16.mxu1 %vm1090_vm5, %v5104_v22  ;;  %1798 = vmatpush1.bf16.msra.mxu0 %v4390_v46 }
  0xcc   : > { %1362 = vmatmul.mubr.bf16.gmra.mrb[24].mxu0 %v1113_v11 }
  0xcd   : > { %4229 = vmatprep.mubr.msk.bf16.mxu0 %vm1090_vm5, %v1068_v26 }
  0xce   : > { %v978_v49 = vpop.permute.xlu0 %977 }
  0xcf   : > { %v1092_v4 = vsel %vm1090_vm5, %v4837_v43, %v978_v49 }
  0xd0   : > { %1434 = vmatmul.mubr.bf16.gmra.mrb[28].mxu1 %v5119_v0 }
  0xd1   : > { %4250 = vmatprep.mubr.msk.bf16.mxu1 %vm1090_vm5, %v1044_v44 }
  0xd4   : > { %1370 = vmatmul.mubr.bf16.gmra.mrb[28].mxu0 %v1116_v32 }
  0xd5   : > { %4278 = vmatprep.mubr.msk.bf16.mxu0 %vm1090_vm5, %v4889_v18 }
  0xd8   : > { %1550 = vmatmul.mubr.bf16.vlgmr.msra.gmra.mrb[32].mxu1 %v1092_v4 }
  0xd9   : > { %4251 = vmatprep.mubr.msk.bf16.mxu1 %vm1090_vm5, %v4824_v61  ;;  %v1691_v61 = vpop.permute.xlu1 %1690 }
  0xda   : > { %v1698_v43 = vsel %vm1090_vm5, %v4854_v41, %v1691_v61 }
  0xdc   : > { %1808 = vmatmul.mubr.bf16.vlgmr.msra.gmra.mrb[32].mxu0 %v4916_v28 }
  0xdd   : > { %4279 = vmatprep.mubr.msk.bf16.mxu0 %vm1090_vm5, %v4931_v42 }
  0xe0   : > { %1558 = vmatmul.mubr.bf16.gmra.mrb[36].mxu1 %v4886_v2 }
  0xe1   : > { %4252 = vmatprep.mubr.msk.bf16.mxu1 %vm1090_vm5, %v4889_v18 }
  0xe4   : > { %1816 = vmatmul.mubr.bf16.gmra.mrb[36].mxu0 %v4956_v58 }
  0xe5   : > { %4280 = vmatprep.mubr.msk.bf16.mxu0 %vm1090_vm5, %v4965_v17 }
  0xe8   : > { %1566 = vmatmul.mubr.bf16.gmra.mrb[40].mxu1 %v4916_v28 }
  0xe9   : > { %4253 = vmatprep.mubr.msk.bf16.mxu1 %vm1090_vm5, %v4931_v42 }
  0xec   : > { %1824 = vmatmul.mubr.bf16.gmra.mrb[40].mxu0 %v4996_v19 }
  0xed   : > { %4281 = vmatprep.mubr.msk.bf16.mxu0 %vm1090_vm5, %v5004_v59 }
  0xf0   : > { %1574 = vmatmul.mubr.bf16.gmra.mrb[44].mxu1 %v4956_v58 }
  0xf1   : > { %4254 = vmatprep.mubr.msk.bf16.mxu1 %vm1090_vm5, %v4965_v17 }
  0xf4   : > { %1832 = vmatmul.mubr.bf16.gmra.mrb[44].mxu0 %v5036_v39 }
  0xf5   : > { %4282 = vmatprep.mubr.msk.bf16.mxu0 %vm1090_vm5, %v5044_v38 }
  0xf8   : > { %1582 = vmatmul.mubr.bf16.gmra.mrb[48].mxu1 %v4996_v19 }
  0xf9   : > { %4255 = vmatprep.mubr.msk.bf16.mxu1 %vm1090_vm5, %v5004_v59 }
  0xfc   : > { %1840 = vmatmul.mubr.bf16.gmra.mrb[48].mxu0 %v5076_v6 }
  0xfd   : > { %4283 = vmatprep.mubr.msk.bf16.mxu0 %vm1090_vm5, %v5084_v47 }
 0x100   : > { %1590 = vmatmul.mubr.bf16.gmra.mrb[52].mxu1 %v5036_v39 }
 0x101   : > { %4256 = vmatprep.mubr.msk.bf16.mxu1 %vm1090_vm5, %v5044_v38 }
 0x104   : > { %1848 = vmatmul.mubr.bf16.gmra.mrb[52].mxu0 %v1113_v11 }
 0x105   : > { %4284 = vmatprep.mubr.msk.bf16.mxu0 %vm1090_vm5, %v1068_v26 }
 0x108   : > { %1598 = vmatmul.mubr.bf16.gmra.mrb[56].mxu1 %v5076_v6 }
 0x109   : > { %4257 = vmatprep.mubr.msk.bf16.mxu1 %vm1090_vm5, %v5084_v47 }
 0x10c   : > { %1856 = vmatmul.mubr.bf16.gmra.mrb[56].mxu0 %v1116_v32 }
 0x10d   : > { %4285 = vmatprep.mubr.msk.bf16.mxu0 %vm1090_vm5, %v4816_v37 }
 0x110   : > { %1606 = vmatmul.mubr.bf16.gmra.mrb[60].mxu1 %v1113_v11 }
 0x111   : > { %4258 = vmatprep.mubr.msk.bf16.mxu1 %vm1090_vm5, %v1068_v26 }
 0x114   : > { %1864 = vmatmul.mubr.bf16.gmra.mrb[60].mxu0 %v4870_v9 }
 0x115   : > { %4286 = vmatprep.mubr.msk.bf16.mxu0 %vm1090_vm5, %v4866_v7 }
 0x118   : > { %1614 = vmatmul.mubr.bf16.gmra.mrb[64].mxu1 %v1116_v32 }
 0x119   : > { %4259 = vmatprep.mubr.msk.bf16.mxu1 %vm1090_vm5, %v4816_v37  ;;  %v1696_v37 = vsel %vm1041_vm4, %v1694_v62, %v1695_v25 }
 0x11c   : > { %1872 = vmatmul.mubr.bf16.gmra.mrb[64].mxu0 %v4896_v23 }
 0x11d   : > { %4287 = vmatprep.mubr.msk.bf16.mxu0 %vm1090_vm5, %v4909_v56 }
 0x120   : > { %1622 = vmatmul.mubr.bf16.gmra.mrb[68].mxu1 %v4870_v9 }
 0x121   : > { %4260 = vmatprep.mubr.msk.bf16.mxu1 %vm1090_vm5, %v4866_v7 }
 0x124   : > { %1880 = vmatmul.mubr.bf16.gmra.mrb[68].mxu0 %v4936_v48 }
 0x125   : > { %4288 = vmatprep.mubr.msk.bf16.mxu0 %vm1090_vm5, %v4945_v3 }
 0x128   : > { %1630 = vmatmul.mubr.bf16.gmra.mrb[72].mxu1 %v4896_v23 }
 0x129   : > { %4261 = vmatprep.mubr.msk.bf16.mxu1 %vm1090_vm5, %v4909_v56 }
 0x12c   : > { %1888 = vmatmul.mubr.bf16.gmra.mrb[72].mxu0 %v4976_v13 }
 0x12d   : > { %4289 = vmatprep.mubr.msk.bf16.mxu0 %vm1090_vm5, %v4985_v35 }
 0x130   : > { %1638 = vmatmul.mubr.bf16.gmra.mrb[76].mxu1 %v4936_v48 }
 0x131   : > { %4262 = vmatprep.mubr.msk.bf16.mxu1 %vm1090_vm5, %v4945_v3 }
 0x134   : > { %1896 = vmatmul.mubr.bf16.gmra.mrb[76].mxu0 %v5016_v21 }
 0x135   : > { %4290 = vmatprep.mubr.msk.bf16.mxu0 %vm1090_vm5, %v5024_v30 }
 0x138   : > { %1646 = vmatmul.mubr.bf16.gmra.mrb[80].mxu1 %v4976_v13 }
 0x139   : > { %4263 = vmatprep.mubr.msk.bf16.mxu1 %vm1090_vm5, %v4985_v35 }
 0x13c   : > { %1904 = vmatmul.mubr.bf16.gmra.mrb[80].mxu0 %v5056_v36 }
 0x13d   : > { %4291 = vmatprep.mubr.msk.bf16.mxu0 %vm1090_vm5, %v5064_v63 }
 0x140   : > { %1654 = vmatmul.mubr.bf16.gmra.mrb[84].mxu1 %v5016_v21 }
 0x141   : > { %4264 = vmatprep.mubr.msk.bf16.mxu1 %vm1090_vm5, %v5024_v30 }
 0x144   : > { %1912 = vmatmul.mubr.bf16.gmra.mrb[84].mxu0 %v5096_v45 }
 0x145   : > { %4292 = vmatprep.mubr.msk.bf16.mxu0 %vm1090_vm5, %v5104_v22 }
 0x148   : > { %1662 = vmatmul.mubr.bf16.gmra.mrb[88].mxu1 %v5056_v36 }
 0x149   : > { %4265 = vmatprep.mubr.msk.bf16.mxu1 %vm1090_vm5, %v5064_v63 }
 0x14c   : > { %1920 = vmatmul.mubr.bf16.gmra.mrb[88].mxu0 %v5119_v0 }
 0x14d   : > { %4293 = vmatprep.mubr.msk.bf16.mxu0 %vm1090_vm5, %v1696_v37 }
 0x150   : > { %1670 = vmatmul.mubr.bf16.gmra.mrb[92].mxu1 %v5096_v45 }
 0x154   : > { %1928 = vmatmul.mubr.bf16.gmra.mrb[92].mxu0 %v1698_v43 }
 0x16b   : > { %v5219_v7 = vpop.f32.mrb[0].mxu1 }
 0x16c   : > { %v1381_v33 = vpop.f32.mrb[1].mxu1 }
 0x16d   : > { %v5221_v9 = vpop.f32.mrb[2].mxu1  ;;  %v4419_v33 = vmov 1983009808  }
 0x16e   : > { %v1384_v2 = vpop.f32.mrb[3].mxu1 }
 0x16f   : > { %v5223_v18 = vpop.f32.mrb[0].mxu0  ;;  %v2105_v2 = vunpack.c.l.s4 %v4419_v33 }
 0x170   : > { %v1317_v23 = vpop.f32.mrb[1].mxu0 }
 0x171   : > { %v5225_v56 = vpop.f32.mrb[2].mxu0  ;;  %v2107_v23 = vlaneseq }
 0x172   : > { %v1320_v28 = vpop.f32.mrb[3].mxu0 }
 0x173   : > { %v5227_v42 = vpop.f32.mrb[4].mxu1 }
 0x174   : > { %6269 = vst [vmem:[#allocation2_spill] sm:$0xff] %v5227_v42  ;;  %v1389_v48 = vpop.f32.mrb[5].mxu1 }
 0x175   : > { %v5229_v3 = vpop.f32.mrb[6].mxu1 }
 0x176   : > { %6270 = vst [vmem:[#allocation3_spill] sm:$0xff] %v5229_v3  ;;  %v1392_v58 = vpop.f32.mrb[7].mxu1 }
 0x177   : > { %v5231_v41 = vpop.f32.mrb[4].mxu0 }
 0x178   : > { %v1325_v17 = vpop.f32.mrb[5].mxu0 }
 0x179   : > { %v5233_v13 = vpop.f32.mrb[6].mxu0 }
 0x17a   : > { %v1328_v35 = vpop.f32.mrb[7].mxu0 }
 0x17b   : > { %v5235_v19 = vpop.f32.mrb[8].mxu1 }
 0x17c   : > { %6271 = vst [vmem:[#allocation4_spill] sm:$0xff] %v5235_v19  ;;  %v1397_v59 = vpop.f32.mrb[9].mxu1 }
 0x17d   : > { %v5237_v21 = vpop.f32.mrb[10].mxu1 }
 0x17e   : > { %6272 = vst [vmem:[#allocation5_spill] sm:$0xff] %v5237_v21  ;;  %v1400_v30 = vpop.f32.mrb[11].mxu1 }
 0x17f   : > { %v5239_v34 = vpop.f32.mrb[8].mxu0  ;;  %v2106_v30 = vunpack.c.0.s8 %v2105_v2 }
 0x180   : > { %v1333_v39 = vpop.f32.mrb[9].mxu0 }
 0x181   : > { %v5241_v50 = vpop.f32.mrb[10].mxu0  ;;  %v2108_v39 = vshrl.u32 %v2107_v23, 7 }
 0x182   : > { %v1336_v1 = vpop.f32.mrb[11].mxu0 }
 0x183   : > { %v5243_v38 = vpop.f32.mrb[12].mxu1 }
 0x184   : > { %6273 = vst [vmem:[#allocation6_spill] sm:$0xff] %v5243_v38  ;;  %v1405_v52 = vpop.f32.mrb[13].mxu1 }
 0x185   : > { %v5245_v10 = vpop.f32.mrb[14].mxu1  ;;  %v5288_v52 = vld [vmem:[%s6264_s4] ss:$0 sm:$0xff] }
 0x186   : > { %6274 = vst [vmem:[#allocation7_spill] sm:$0xff] %v5245_v10  ;;  %v1408_v53 = vpop.f32.mrb[15].mxu1 }
 0x187   : > { %v5247_v36 = vpop.f32.mrb[12].mxu0 }
 0x188   : > { %v1341_v60 = vpop.f32.mrb[13].mxu0 }
 0x189   : > { %v5249_v57 = vpop.f32.mrb[14].mxu0 }
 0x18a   : > { %v1344_v63 = vpop.f32.mrb[15].mxu0 }
 0x18b   : > { %v5251_v31 = vpop.f32.mrb[16].mxu1 }
 0x18c   : > { %6275 = vst [vmem:[#allocation8_spill] sm:$0xff] %v5251_v31  ;;  %v1413_v55 = vpop.f32.mrb[17].mxu1 }
 0x18d   : > { %v5253_v54 = vpop.f32.mrb[18].mxu1 }
 0x18e   : > { %6276 = vst [vmem:[#allocation9_spill] sm:$0xff] %v5253_v54  ;;  %v1416_v6 = vpop.f32.mrb[19].mxu1 }
 0x18f   : > { %v5255_v29 = vpop.f32.mrb[16].mxu0 }
 0x190   : > { %v1349_v12 = vpop.f32.mrb[17].mxu0 }
 0x191   : > { %v5257_v47 = vpop.f32.mrb[18].mxu0 }
 0x192   : > { %v1352_v14 = vpop.f32.mrb[19].mxu0 }
 0x193   : > { %v5259_v8 = vpop.f32.mrb[20].mxu1 }
 0x194   : > { %6277 = vst [vmem:[#allocation10_spill] sm:$0xff] %v5259_v8  ;;  %v1421_v5 = vpop.f32.mrb[21].mxu1 }
 0x195   : > { %v5261_v45 = vpop.f32.mrb[22].mxu1 }
 0x196   : > { %6278 = vst [vmem:[#allocation11_spill] sm:$0xff] %v5261_v45  ;;  %v1424_v46 = vpop.f32.mrb[23].mxu1 }
 0x197   : > { %v5263_v15 = vpop.f32.mrb[20].mxu0 }
 0x198   : > { %v1357_v22 = vpop.f32.mrb[21].mxu0 }
 0x199   : > { %v5265_v51 = vpop.f32.mrb[22].mxu0 }
 0x19a   : > { %v1360_v24 = vpop.f32.mrb[23].mxu0 }
 0x19b   : > { %v5267_v11 = vpop.f32.mrb[24].mxu1 }
 0x19c   : > { %6279 = vst [vmem:[#allocation12_spill] sm:$0xff] %v5267_v11  ;;  %v1429_v20 = vpop.f32.mrb[25].mxu1 }
 0x19d   : > { %v5269_v26 = vpop.f32.mrb[26].mxu1 }
 0x19e   : > { %6280 = vst [vmem:[#allocation13_spill] sm:$0xff] %v5269_v26  ;;  %v1432_v40 = vpop.f32.mrb[27].mxu1 }
 0x19f   : > { %v5271_v27 = vpop.f32.mrb[24].mxu0 }
 0x1a0   : > { %v1365_v0 = vpop.f32.mrb[25].mxu0 }
 0x1a1   : > { %v5273_v16 = vpop.f32.mrb[26].mxu0 }
 0x1a2   : > { %v1368_v44 = vpop.f32.mrb[27].mxu0 }
 0x1a3   : > { %v5275_v32 = vpop.f32.mrb[28].mxu1 }
 0x1a4   : > { %6281 = vst [vmem:[#allocation14_spill] sm:$0xff] %v5275_v32  ;;  %v1437_v49 = vpop.f32.mrb[29].mxu1 }
 0x1a5   : > { %v5277_v4 = vpop.f32.mrb[30].mxu1 }
 0x1a6   : > { %6282 = vst [vmem:[#allocation15_spill] sm:$0xff] %v5277_v4  ;;  %v1440_v62 = vpop.f32.mrb[31].mxu1 }
 0x1a7   : > { %v5279_v25 = vpop.f32.mrb[28].mxu0 }
 0x1a8   : > { %v1373_v37 = vpop.f32.mrb[29].mxu0 }
 0x1a9   : > { %v5281_v61 = vpop.f32.mrb[30].mxu0 }
 0x1aa   : > { %v1376_v43 = vpop.f32.mrb[31].mxu0 }
 0x1ab   : > { %v1551_v28 = vpop.f32.mrb[32].mxu1 }
 0x1ac   : > { %v1552_v48 = vadd.f32 %v1551_v28, %v5223_v18  ;;  %v1553_v58 = vpop.f32.mrb[33].mxu1  ;;  %v5291_v18 = vsub.s32 %v2106_v30, %v2108_v39 }
 0x1ad   : > { %v1554_v17 = vpop.f32.mrb[34].mxu1 }
 0x1ae   : > { %v1555_v35 = vadd.f32 %v1554_v17, %v5225_v56  ;;  %v1556_v59 = vpop.f32.mrb[35].mxu1 }
 0x1af   : > { %v1809_v1 = vpop.f32.mrb[32].mxu0 }
 0x1b0   : > { %v1936_v53 = vadd.f32 %v1809_v1, %v1552_v48  ;;  %v1811_v60 = vpop.f32.mrb[33].mxu0 }
 0x1b1   : > { %v1812_v63 = vpop.f32.mrb[34].mxu0 }
 0x1b2   : > { %v1975_v55 = vadd.f32 %v5288_v52, %v1936_v53  ;;  %v1937_v6 = vadd.f32 %v1812_v63, %v1555_v35  ;;  %v1814_v12 = vpop.f32.mrb[35].mxu0 }
 0x1b3   : > { %v1559_v56 = vpop.f32.mrb[36].mxu1 }
 0x1b4   : > { %v2007_v14 = vmax.f32 %v1975_v55, 0.0  ;;  %v1976_v5 = vadd.f32 %v5288_v52, %v1937_v6  ;;  %v1560_v46 = vadd.f32 %v1559_v56, %v5231_v41  ;;  %v1561_v22 = vpop.f32.mrb[37].mxu1 }
 0x1b5   : > { %v1562_v24 = vpop.f32.mrb[38].mxu1 }
 0x1b6   : > { %2039 = vst.msk [vmem:[%s5297_s13] sm:$0xff] %vm1090_vm5, %v2007_v14  ;;  %v2103_v20 = vcombine.high %v2007_v14, %v2007_v14  ;;  %v2110_v40 = vrot.slane %v2007_v14, %v5291_v18  ;;  %v2008_v0 = vmax.f32 %v1976_v5, 0.0  ;;  %v5305_v44 = vadd.f32 %v1562_v24, %v5233_v13  ;;  %v1564_v49 = vpop.f32.mrb[39].mxu1 }
 0x1b7   : > { %v1817_v62 = vpop.f32.mrb[36].mxu0 }
 0x1b8   : > { %v2117_v37 = vrot.slane %v2103_v20, %v5291_v18  ;;  %v2118_v43 = vcombine.high %v2110_v40, %v2110_v40  ;;  %v2776_v33 = vsel %vm2775_vm6, %v2110_v40, -inf  ;;  %2040 = vst.msk [vmem:[%s5297_s13 + $0x8] sm:$0xff] %vm1090_vm5, %v2008_v0  ;;  %v2120_v41 = vcombine.high %v2008_v0, %v2008_v0  ;;  %v1819_v2 = vpop.f32.mrb[37].mxu0 }
 0x1b9   : > { %v2777_v23 = vrot.slane %v2776_v33, 4  ;;  %v2127_v28 = vrot.slane %v2008_v0, %v5291_v18  ;;  %v5312_v48 = vadd.f32 %v1817_v62, %v1560_v46  ;;  %v5314_v58 = vpop.f32.mrb[38].mxu0 }
 0x1ba   : > { %v2119_v13 = vcombine.high %v2117_v37, %v2117_v37  ;;  %v2783_v17 = vsel %vm2775_vm6, %v2118_v43, -inf  ;;  %v2790_v35 = vsel %vm2775_vm6, %v2117_v37, -inf  ;;  %v2134_v59 = vrot.slane %v2120_v41, %v5291_v18  ;;  %v1822_v30 = vpop.f32.mrb[39].mxu0 }
 0x1bb   : > { %v2778_v39 = vmax.f32 %v2776_v33, %v2777_v23  ;;  %v2784_v1 = vrot.slane %v2783_v17, 4  ;;  %v2791_v53 = vrot.slane %v2790_v35, 4  ;;  %v2135_v60 = vcombine.high %v2127_v28, %v2127_v28  ;;  %v5319_v63 = vpop.f32.mrb[40].mxu1 }
 0x1bc   : > { %v2797_v55 = vsel %vm2775_vm6, %v2119_v13, -inf  ;;  %v2136_v6 = vcombine.high %v2134_v59, %v2134_v59  ;;  %v2804_v12 = vsel %vm2775_vm6, %v2127_v28, -inf  ;;  %v2818_v56 = vsel %vm2775_vm6, %v2134_v59, -inf  ;;  %v1569_v14 = vpop.f32.mrb[41].mxu1 }
 0x1bd   : > { %v2779_v5 = vrot.slane %v2778_v39, 2  ;;  %v2785_v46 = vmax.f32 %v2783_v17, %v2784_v1  ;;  %v2792_v22 = vmax.f32 %v2790_v35, %v2791_v53  ;;  %v2798_v24 = vrot.slane %v2797_v55, 4  ;;  %v5324_v20 = vpop.f32.mrb[42].mxu1 }
 0x1be   : > { %v2805_v40 = vrot.slane %v2804_v12, 4  ;;  %v2811_v0 = vsel %vm2775_vm6, %v2135_v60, -inf  ;;  %v2819_v49 = vrot.slane %v2818_v56, 4  ;;  %v2825_v62 = vsel %vm2775_vm6, %v2136_v6, -inf  ;;  %v1572_v37 = vpop.f32.mrb[43].mxu1 }
 0x1bf   : > { %v2780_v43 = vmax.f32 %v2778_v39, %v2779_v5  ;;  %v2786_v33 = vrot.slane %v2785_v46, 2  ;;  %v2793_v41 = vrot.slane %v2792_v22, 2  ;;  %v2799_v2 = vmax.f32 %v2797_v55, %v2798_v24  ;;  %v5328_v23 = vpop.f32.mrb[40].mxu0 }
 0x1c0   : > { %v2806_v28 = vmax.f32 %v2804_v12, %v2805_v40  ;;  %v2812_v13 = vrot.slane %v2811_v0, 4  ;;  %v2820_v17 = vmax.f32 %v2818_v56, %v2819_v49  ;;  %v2826_v35 = vrot.slane %v2825_v62, 4  ;;  %v1827_v59 = vpop.f32.mrb[41].mxu0 }
 0x1c1   : > { %v2781_v30 = vrot.slane %v2780_v43, 1  ;;  %v2787_v1 = vmax.f32 %v2785_v46, %v2786_v33  ;;  %v2794_v53 = vmax.f32 %v2792_v22, %v2793_v41  ;;  %v2800_v14 = vrot.slane %v2799_v2, 2  ;;  %v5330_v60 = vpop.f32.mrb[42].mxu0 }
 0x1c2   : > { %v2807_v4 = vrot.slane %v2806_v28, 2  ;;  %v2813_v6 = vmax.f32 %v2811_v0, %v2812_v13  ;;  %v2821_v37 = vrot.slane %v2820_v17, 2  ;;  %v2827_v39 = vmax.f32 %v2825_v62, %v2826_v35  ;;  %v1830_v5 = vpop.f32.mrb[43].mxu0 }
 0x1c3   : > { %v2782_v32 = vmax.f32 %v2780_v43, %v2781_v30  ;;  %v2788_v55 = vrot.slane %v2787_v1, 1  ;;  %v2795_v24 = vrot.slane %v2794_v53, 1  ;;  %v2801_v26 = vmax.f32 %v2799_v2, %v2800_v14  ;;  %v1575_v12 = vpop.f32.mrb[44].mxu1 }
 0x1c4   : > { %v2808_v40 = vmax.f32 %v2806_v28, %v2807_v4  ;;  %v2814_v56 = vrot.slane %v2813_v6, 2  ;;  %v2822_v49 = vmax.f32 %v2820_v17, %v2821_v37  ;;  %v2828_v59 = vrot.slane %v2827_v39, 2  ;;  %v1577_v11 = vpop.f32.mrb[45].mxu1 }
 0x1c5   : > { %v2789_v46 = vmax.f32 %v2787_v1, %v2788_v55  ;;  %v2796_v22 = vmax.f32 %v2794_v53, %v2795_v24  ;;  %v2802_v33 = vrot.slane %v2801_v26, 1  ;;  %v5333_v41 = vsel %vm1090_vm5, %v2782_v32, -inf  ;;  %v1578_v0 = vpop.f32.mrb[46].mxu1 }
 0x1c6   : > { %v2809_v13 = vrot.slane %v2808_v40, 1  ;;  %v2815_v62 = vmax.f32 %v2813_v6, %v2814_v56  ;;  %v2823_v35 = vrot.slane %v2822_v49, 1  ;;  %v2829_v43 = vmax.f32 %v2827_v39, %v2828_v59  ;;  %v1580_v30 = vpop.f32.mrb[47].mxu1 }
 0x1c7   : > { %v2803_v5 = vmax.f32 %v2801_v26, %v2802_v33  ;;  %v5336_v2 = vsel %vm1090_vm5, %v2789_v46, -inf  ;;  %v5339_v4 = vsel %vm1090_vm5, %v2796_v22, -inf  ;;  %v1977_v11 = vadd.f32 %v5288_v52, %v5312_v48  ;;  %v5343_v28 = vpop.f32.mrb[44].mxu0 }
 0x1c8   : > { %v2810_v32 = vmax.f32 %v2808_v40, %v2809_v13  ;;  %v2816_v17 = vrot.slane %v2815_v62, 1  ;;  %v2824_v1 = vmax.f32 %v2822_v49, %v2823_v35  ;;  %v2830_v53 = vrot.slane %v2829_v43, 1  ;;  %v1835_v14 = vpop.f32.mrb[45].mxu0 }
 0x1c9   : > { %v5346_v6 = vsel %vm1090_vm5, %v2803_v5, -inf  ;;  %v2009_v26 = vmax.f32 %v1977_v11, 0.0  ;;  %v1939_v37 = vadd.f32 %v5314_v58, %v5305_v44  ;;  %v1568_v39 = vadd.f32 %v5319_v63, %v5239_v34  ;;  %v5352_v55 = vpop.f32.mrb[46].mxu0 }
 0x1ca   : > { %v2817_v48 = vmax.f32 %v2815_v62, %v2816_v17  ;;  %v2831_v24 = vmax.f32 %v2829_v43, %v2830_v53  ;;  %v5355_v40 = vsel %vm1090_vm5, %v2810_v32, -inf  ;;  %v5358_v56 = vsel %vm1090_vm5, %v2824_v1, -inf  ;;  %v1838_v49 = vpop.f32.mrb[47].mxu0 }
 0x1cb   : > { %2041 = vst.msk [vmem:[%s5297_s13 + $0x10] sm:$0xff] %vm1090_vm5, %v2009_v26  ;;  %v2137_v59 = vcombine.high %v2009_v26, %v2009_v26  ;;  %v2144_v46 = vrot.slane %v2009_v26, %v5291_v18  ;;  %v1978_v44 = vadd.f32 %v5288_v52, %v1939_v37  ;;  %v1571_v34 = vadd.f32 %v5324_v20, %v5241_v50  ;;  %v5366_v58 = vpop.f32.mrb[48].mxu1 }
 0x1cc   : > { %v5369_v63 = vsel %vm1090_vm5, %v2817_v48, -inf  ;;  %v5372_v22 = vsel %vm1090_vm5, %v2831_v24, -inf  ;;  %v1940_v33 = vadd.f32 %v5328_v23, %v1568_v39  ;;  %v5376_v13 = vadd.f32 %v1575_v12, %v5247_v36  ;;  %v1585_v62 = vpop.f32.mrb[49].mxu1 }
 0x1cd   : > { %v2151_v35 = vrot.slane %v2137_v59, %v5291_v18  ;;  %v2152_v43 = vcombine.high %v2144_v46, %v2144_v46  ;;  %v2832_v50 = vsel %vm2775_vm6, %v2144_v46, -inf  ;;  %v2010_v20 = vmax.f32 %v1978_v44, 0.0  ;;  %v5380_v30 = vpop.f32.mrb[50].mxu1 }
 0x1ce   : > { %v2833_v5 = vrot.slane %v2832_v50, 4  ;;  %v1979_v11 = vadd.f32 %v5288_v52, %v1940_v33  ;;  %v1941_v32 = vadd.f32 %v5330_v60, %v1571_v34  ;;  %v5385_v23 = vadd.f32 %v1578_v0, %v5249_v57  ;;  %v1588_v17 = vpop.f32.mrb[51].mxu1 }
 0x1cf   : > { %v2153_v36 = vcombine.high %v2151_v35, %v2151_v35  ;;  %v2839_v12 = vsel %vm2775_vm6, %v2152_v43, -inf  ;;  %v2846_v1 = vsel %vm2775_vm6, %v2151_v35, -inf  ;;  %2042 = vst.msk [vmem:[%s5297_s13 + $0x18] sm:$0xff] %vm1090_vm5, %v2010_v20  ;;  %v2154_v53 = vcombine.high %v2010_v20, %v2010_v20  ;;  %v5391_v14 = vpop.f32.mrb[48].mxu0 }
 0x1d0   : > { %v2834_v26 = vmax.f32 %v2832_v50, %v2833_v5  ;;  %v2840_v37 = vrot.slane %v2839_v12, 4  ;;  %v2847_v39 = vrot.slane %v2846_v1, 4  ;;  %v2161_v48 = vrot.slane %v2010_v20, %v5291_v18  ;;  %v1843_v60 = vpop.f32.mrb[49].mxu0 }
 0x1d1   : > { %v2853_v57 = vsel %vm2775_vm6, %v2153_v36, -inf  ;;  %v2168_v0 = vrot.slane %v2154_v53, %v5291_v18  ;;  %v5396_v24 = vmax.f32 %v1979_v11, 0.0  ;;  %v5399_v49 = vadd.f32 %v5288_v52, %v1941_v32  ;;  %v5401_v59 = vpop.f32.mrb[50].mxu0 }
 0x1d2   : > { %v2835_v46 = vrot.slane %v2834_v26, 2  ;;  %v2841_v44 = vmax.f32 %v2839_v12, %v2840_v37  ;;  %v2848_v34 = vmax.f32 %v2846_v1, %v2847_v39  ;;  %v2854_v33 = vrot.slane %v2853_v57, 4  ;;  %v1846_v62 = vpop.f32.mrb[51].mxu0 }
 0x1d3   : > { %v2169_v35 = vcombine.high %v2161_v48, %v2161_v48  ;;  %v2170_v43 = vcombine.high %v2168_v0, %v2168_v0  ;;  %v2860_v50 = vsel %vm2775_vm6, %v2161_v48, -inf  ;;  %v2874_v20 = vsel %vm2775_vm6, %v2168_v0, -inf  ;;  %2043 = vst.msk [vmem:[%s5297_s13 + $0x20] sm:$0xff] %vm1090_vm5, %v5396_v24  ;;  %v5408_v5 = vpop.f32.mrb[52].mxu1 }
 0x1d4   : > { %v2836_v11 = vmax.f32 %v2834_v26, %v2835_v46  ;;  %v2842_v32 = vrot.slane %v2841_v44, 2  ;;  %v2849_v17 = vrot.slane %v2848_v34, 2  ;;  %v2855_v36 = vmax.f32 %v2853_v57, %v2854_v33  ;;  %v1593_v12 = vpop.f32.mrb[53].mxu1 }
 0x1d5   : > { %v2861_v1 = vrot.slane %v2860_v50, 4  ;;  %v2867_v53 = vsel %vm2775_vm6, %v2169_v35, -inf  ;;  %v2875_v37 = vrot.slane %v2874_v20, 4  ;;  %v2881_v39 = vsel %vm2775_vm6, %v2170_v43, -inf  ;;  %v5412_v48 = vpop.f32.mrb[54].mxu1 }
 0x1d6   : > { %v2837_v60 = vrot.slane %v2836_v11, 1  ;;  %v2843_v0 = vmax.f32 %v2841_v44, %v2842_v32  ;;  %v2850_v62 = vmax.f32 %v2848_v34, %v2849_v17  ;;  %v2856_v45 = vrot.slane %v2855_v36, 2  ;;  %v1596_v26 = vpop.f32.mrb[55].mxu1 }
 0x1d7   : > { %v2862_v46 = vmax.f32 %v2860_v50, %v2861_v1  ;;  %v2868_v8 = vrot.slane %v2867_v53, 4  ;;  %v2876_v57 = vmax.f32 %v2874_v20, %v2875_v37  ;;  %v2882_v33 = vrot.slane %v2881_v39, 4  ;;  %v5414_v12 = vpop.f32.mrb[52].mxu0 }
 0x1d8   : > { %v2838_v54 = vmax.f32 %v2836_v11, %v2837_v60  ;;  %v2844_v31 = vrot.slane %v2843_v0, 1  ;;  %v2851_v35 = vrot.slane %v2850_v62, 1  ;;  %v2857_v10 = vmax.f32 %v2855_v36, %v2856_v45  ;;  %v1851_v38 = vpop.f32.mrb[53].mxu0 }
 0x1d9   : > { %v2863_v43 = vrot.slane %v2862_v46, 2  ;;  %v2869_v21 = vmax.f32 %v2867_v53, %v2868_v8  ;;  %v2877_v19 = vrot.slane %v2876_v57, 2  ;;  %v2883_v3 = vmax.f32 %v2881_v39, %v2882_v33  ;;  %v5416_v44 = vpop.f32.mrb[54].mxu0 }
 0x1da   : > { %v2845_v34 = vmax.f32 %v2843_v0, %v2844_v31  ;;  %v2852_v32 = vmax.f32 %v2850_v62, %v2851_v35  ;;  %v2858_v50 = vrot.slane %v2857_v10, 1  ;;  %v3673_v20 = vsel %vm1090_vm5, %v2838_v54, -inf  ;;  %v1854_v17 = vpop.f32.mrb[55].mxu0 }
 0x1db   : > { %v3674_v1 = vmax.f32 %v5333_v41, %v3673_v20  ;;  %v2864_v11 = vmax.f32 %v2862_v46, %v2863_v43  ;;  %v2870_v37 = vrot.slane %v2869_v21, 2  ;;  %v2878_v60 = vmax.f32 %v2876_v57, %v2877_v19  ;;  %v5420_v38 = vpop.f32.mrb[56].mxu1 }
 0x1dc   : > { %v2859_v8 = vmax.f32 %v2857_v10, %v2858_v50  ;;  %v3676_v45 = vsel %vm1090_vm5, %v2845_v34, -inf  ;;  %v3679_v36 = vsel %vm1090_vm5, %v2852_v32, -inf  ;;  %v2884_v53 = vrot.slane %v2883_v3, 2  ;;  %v1601_v31 = vpop.f32.mrb[57].mxu1 }
 0x1dd   : > { %v3677_v39 = vmax.f32 %v5336_v2, %v3676_v45  ;;  %v3680_v54 = vmax.f32 %v5339_v4, %v3679_v36  ;;  %v2865_v0 = vrot.slane %v2864_v11, 1  ;;  %v2871_v41 = vmax.f32 %v2869_v21, %v2870_v37  ;;  %v5426_v62 = vpop.f32.mrb[58].mxu1 }
 0x1de   : > { %v3682_v19 = vsel %vm1090_vm5, %v2859_v8, -inf  ;;  %v2879_v26 = vrot.slane %v2878_v60, 1  ;;  %v2885_v10 = vmax.f32 %v2883_v3, %v2884_v53  ;;  %v2171_v46 = vcombine.high %v5396_v24, %v5396_v24  ;;  %v1604_v57 = vpop.f32.mrb[59].mxu1 }
 0x1df   : > { %v3683_v33 = vmax.f32 %v5346_v6, %v3682_v19  ;;  %v3929_v35 = vsel %vm3928_vm7, %v3677_v39, %v3674_v1  ;;  %v2866_v2 = vmax.f32 %v2864_v11, %v2865_v0  ;;  %v2872_v43 = vrot.slane %v2871_v41, 1  ;;  %v5433_v4 = vpop.f32.mrb[56].mxu0 }
 0x1e0   : > { %v3931_v21 = vsel %vm3930_vm8, %v3680_v54, %v3929_v35  ;;  %v2880_v34 = vmax.f32 %v2878_v60, %v2879_v26  ;;  %v2886_v32 = vrot.slane %v2885_v10, 1  ;;  %v2178_v3 = vrot.slane %v5396_v24, %v5291_v18  ;;  %v1859_v50 = vpop.f32.mrb[57].mxu0 }
 0x1e1   : > { %v2873_v20 = vmax.f32 %v2871_v41, %v2872_v43  ;;  %v3685_v17 = vsel %vm1090_vm5, %v2866_v2, -inf  ;;  %v3933_v6 = vsel %vm3932_vm9, %v3683_v33, %v3931_v21  ;;  %v2185_v1 = vrot.slane %v2171_v46, %v5291_v18  ;;  %v5441_v11 = vpop.f32.mrb[58].mxu0 }
 0x1e2   : > { %v2887_v37 = vmax.f32 %v2885_v10, %v2886_v32  ;;  %v3686_v8 = vmax.f32 %v5355_v40, %v3685_v17  ;;  %v3691_v45 = vsel %vm1090_vm5, %v2880_v34, -inf  ;;  %v2186_v60 = vcombine.high %v2178_v3, %v2178_v3  ;;  %v1862_v36 = vpop.f32.mrb[59].mxu0 }
 0x1e3   : > { %v3688_v24 = vsel %vm1090_vm5, %v2873_v20, -inf  ;;  %v3692_v53 = vmax.f32 %v5358_v56, %v3691_v45  ;;  %v2187_v31 = vcombine.high %v2185_v1, %v2185_v1  ;;  %v2888_v39 = vsel %vm2775_vm6, %v2178_v3, -inf  ;;  %v5449_v54 = vpop.f32.mrb[60].mxu1 }
 0x1e4   : > { %v3689_v0 = vmax.f32 %v5369_v63, %v3688_v24  ;;  %v3694_v41 = vsel %vm1090_vm5, %v2887_v37, -inf  ;;  %v3935_v40 = vsel %vm3934_vm10, %v3686_v8, %v3933_v6  ;;  %v2889_v19 = vrot.slane %v2888_v39, 4  ;;  %v1609_v26 = vpop.f32.mrb[61].mxu1 }
 0x1e5   : > { %v3695_v10 = vmax.f32 %v5372_v22, %v3694_v41  ;;  %v2895_v46 = vsel %vm2775_vm6, %v2186_v60, -inf  ;;  %v2902_v57 = vsel %vm2775_vm6, %v2185_v1, -inf  ;;  %v2909_v56 = vsel %vm2775_vm6, %v2187_v31, -inf  ;;  %v5458_v33 = vpop.f32.mrb[62].mxu1 }
 0x1e6   : > { %v3937_v63 = vsel %vm3936_vm11, %v3689_v0, %v3935_v40  ;;  %v2890_v35 = vmax.f32 %v2888_v39, %v2889_v19  ;;  %v2896_v2 = vrot.slane %v2895_v46, 4  ;;  %v2903_v22 = vrot.slane %v2902_v57, 4  ;;  %v1612_v43 = vpop.f32.mrb[63].mxu1 }
 0x1e7   : > { %v3939_v21 = vsel %vm3938_vm12, %v3692_v53, %v3937_v63  ;;  %v2910_v34 = vrot.slane %v2909_v56, 4  ;;  %v2012_v32 = vmax.f32 %v5399_v49, 0.0  ;;  %v1942_v3 = vadd.f32 %v5343_v28, %v5376_v13  ;;  %v5470_v50 = vpop.f32.mrb[60].mxu0 }
 0x1e8   : > { %v3941_v20 = vsel %vm3940_vm13, %v3695_v10, %v3939_v21  ;;  %v2891_v17 = vrot.slane %v2890_v35, 2  ;;  %v2897_v6 = vmax.f32 %v2895_v46, %v2896_v2  ;;  %v2904_v1 = vmax.f32 %v2902_v57, %v2903_v22  ;;  %v1867_v37 = vpop.f32.mrb[61].mxu0 }
 0x1e9   : > { %3999 = vst.msk [vmem:[%s5463_s15] sm:$0xff] %vm1090_vm5, %v3941_v20  ;;  %v2911_v8 = vmax.f32 %v2909_v56, %v2910_v34  ;;  %2044 = vst.msk [vmem:[%s5297_s13 + $0x28] sm:$0xff] %vm1090_vm5, %v2012_v32  ;;  %v2188_v45 = vcombine.high %v2012_v32, %v2012_v32  ;;  %v2195_v60 = vrot.slane %v2012_v32, %v5291_v18  ;;  %v5479_v36 = vpop.f32.mrb[62].mxu0 }
 0x1ea   : > { %v1981_v49 = vadd.f32 %v5288_v52, %v1942_v3  ;;  %v2892_v28 = vmax.f32 %v2890_v35, %v2891_v17  ;;  %v2898_v13 = vrot.slane %v2897_v6, 2  ;;  %v2905_v24 = vrot.slane %v2904_v1, 2  ;;  %v1870_v31 = vpop.f32.mrb[63].mxu0 }
 0x1eb   : > { %v1943_v53 = vadd.f32 %v5352_v55, %v5385_v23  ;;  %v2912_v39 = vrot.slane %v2911_v8, 2  ;;  %v2202_v0 = vrot.slane %v2188_v45, %v5291_v18  ;;  %v2203_v41 = vcombine.high %v2195_v60, %v2195_v60  ;;  %v5485_v19 = vpop.f32.mrb[64].mxu1 }
 0x1ec   : > { %v2916_v40 = vsel %vm2775_vm6, %v2195_v60, -inf  ;;  %v2893_v26 = vrot.slane %v2892_v28, 1  ;;  %v2899_v10 = vmax.f32 %v2897_v6, %v2898_v13  ;;  %v2906_v46 = vmax.f32 %v2904_v1, %v2905_v24  ;;  %v1617_v56 = vpop.f32.mrb[65].mxu1 }
 0x1ed   : > { %v2917_v57 = vrot.slane %v2916_v40, 4  ;;  %v2913_v63 = vmax.f32 %v2911_v8, %v2912_v39  ;;  %v2204_v35 = vcombine.high %v2202_v0, %v2202_v0  ;;  %v2923_v2 = vsel %vm2775_vm6, %v2203_v41, -inf  ;;  %v5489_v23 = vpop.f32.mrb[66].mxu1 }
 0x1ee   : > { %v2930_v55 = vsel %vm2775_vm6, %v2202_v0, -inf  ;;  %v2894_v22 = vmax.f32 %v2892_v28, %v2893_v26  ;;  %v2900_v43 = vrot.slane %v2899_v10, 1  ;;  %v2907_v21 = vrot.slane %v2906_v46, 1  ;;  %v1620_v32 = vpop.f32.mrb[67].mxu1 }
 0x1ef   : > { %v2918_v34 = vmax.f32 %v2916_v40, %v2917_v57  ;;  %v2914_v3 = vrot.slane %v2913_v63, 1  ;;  %v2924_v20 = vrot.slane %v2923_v2, 4  ;;  %v2931_v17 = vrot.slane %v2930_v55, 4  ;;  %v5492_v1 = vpop.f32.mrb[64].mxu0 }
 0x1f0   : > { %v2937_v6 = vsel %vm2775_vm6, %v2204_v35, -inf  ;;  %v2901_v37 = vmax.f32 %v2899_v10, %v2900_v43  ;;  %v2908_v8 = vmax.f32 %v2906_v46, %v2907_v21  ;;  %v5495_v45 = vsel %vm1090_vm5, %v2894_v22, -inf  ;;  %v1875_v13 = vpop.f32.mrb[65].mxu0 }
 0x1f1   : > { %v2919_v60 = vrot.slane %v2918_v34, 2  ;;  %v2915_v24 = vmax.f32 %v2913_v63, %v2914_v3  ;;  %v2925_v28 = vmax.f32 %v2923_v2, %v2924_v20  ;;  %v2932_v31 = vmax.f32 %v2930_v55, %v2931_v17  ;;  %v5497_v0 = vpop.f32.mrb[66].mxu0 }
 0x1f2   : > { %v2938_v39 = vrot.slane %v2937_v6, 4  ;;  %6283 = vst [vmem:[#allocation16_spill] sm:$0xff] %v5497_v0  ;;  %v5500_v41 = vsel %vm1090_vm5, %v2901_v37, -inf  ;;  %v5503_v40 = vsel %vm1090_vm5, %v2908_v8, -inf  ;;  %v2013_v10 = vmax.f32 %v1981_v49, 0.0  ;;  %v1878_v46 = vpop.f32.mrb[67].mxu0 }
 0x1f3   : > { %v2920_v26 = vmax.f32 %v2918_v34, %v2919_v60  ;;  %v5506_v57 = vsel %vm1090_vm5, %v2915_v24, -inf  ;;  %v2926_v56 = vrot.slane %v2925_v28, 2  ;;  %v2933_v63 = vrot.slane %v2932_v31, 2  ;;  %v5508_v2 = vpop.f32.mrb[68].mxu1 }
 0x1f4   : > { %v2939_v35 = vmax.f32 %v2937_v6, %v2938_v39  ;;  %6284 = vst [vmem:[#allocation17_spill] sm:$0xff] %v5508_v2  ;;  %2045 = vst.msk [vmem:[%s5297_s13 + $0x30] sm:$0xff] %vm1090_vm5, %v2013_v10  ;;  %v2205_v22 = vcombine.high %v2013_v10, %v2013_v10  ;;  %v2212_v43 = vrot.slane %v2013_v10, %v5291_v18  ;;  %v1625_v32 = vpop.f32.mrb[69].mxu1 }
 0x1f5   : > { %v2921_v55 = vrot.slane %v2920_v26, 1  ;;  %v1982_v21 = vadd.f32 %v5288_v52, %v1943_v53  ;;  %v2927_v34 = vmax.f32 %v2925_v28, %v2926_v56  ;;  %v2934_v49 = vmax.f32 %v2932_v31, %v2933_v63  ;;  %v5516_v17 = vpop.f32.mrb[70].mxu1 }
 0x1f6   : > { %v2940_v3 = vrot.slane %v2939_v35, 2  ;;  %v1584_v20 = vadd.f32 %v5366_v58, %v5255_v29  ;;  %6285 = vst [vmem:[#allocation18_spill] sm:$0xff] %v5516_v17  ;;  %v2219_v37 = vrot.slane %v2205_v22, %v5291_v18  ;;  %v2220_v8 = vcombine.high %v2212_v43, %v2212_v43  ;;  %v1628_v13 = vpop.f32.mrb[71].mxu1 }
 0x1f7   : > { %v2922_v6 = vmax.f32 %v2920_v26, %v2921_v55  ;;  %v2944_v60 = vsel %vm2775_vm6, %v2212_v43, -inf  ;;  %v2928_v24 = vrot.slane %v2927_v34, 1  ;;  %v2935_v39 = vrot.slane %v2934_v49, 1  ;;  %v5520_v46 = vpop.f32.mrb[68].mxu0 }
 0x1f8   : > { %v2941_v10 = vmax.f32 %v2939_v35, %v2940_v3  ;;  %v2945_v53 = vrot.slane %v2944_v60, 4  ;;  %6286 = vst [vmem:[#allocation19_spill] sm:$0xff] %v5520_v46  ;;  %v2221_v31 = vcombine.high %v2219_v37, %v2219_v37  ;;  %v2951_v29 = vsel %vm2775_vm6, %v2220_v8, -inf  ;;  %v1883_v26 = vpop.f32.mrb[69].mxu0 }
 0x1f9   : > { %v5523_v28 = vsel %vm1090_vm5, %v2922_v6, -inf  ;;  %v2958_v58 = vsel %vm2775_vm6, %v2219_v37, -inf  ;;  %v2929_v56 = vmax.f32 %v2927_v34, %v2928_v24  ;;  %v2936_v63 = vmax.f32 %v2934_v49, %v2935_v39  ;;  %v5527_v43 = vpop.f32.mrb[70].mxu0 }
 0x1fa   : > { %v2942_v55 = vrot.slane %v2941_v10, 1  ;;  %v2946_v22 = vmax.f32 %v2944_v60, %v2945_v53  ;;  %6287 = vst [vmem:[#allocation20_spill] sm:$0xff] %v5527_v43  ;;  %v2952_v35 = vrot.slane %v2951_v29, 4  ;;  %v2959_v32 = vrot.slane %v2958_v58, 4  ;;  %v1886_v6 = vpop.f32.mrb[71].mxu0 }
 0x1fb   : > { %v2965_v3 = vsel %vm2775_vm6, %v2221_v31, -inf  ;;  %v2014_v13 = vmax.f32 %v1982_v21, 0.0  ;;  %v5531_v17 = vsel %vm1090_vm5, %v2929_v56, -inf  ;;  %v5534_v37 = vsel %vm1090_vm5, %v2936_v63, -inf }
 0x1fc   : > { %v2943_v46 = vmax.f32 %v2941_v10, %v2942_v55  ;;  %v2947_v34 = vrot.slane %v2946_v22, 2  ;;  %v2953_v49 = vmax.f32 %v2951_v29, %v2952_v35  ;;  %v2960_v8 = vmax.f32 %v2958_v58, %v2959_v32 }
 0x1fd   : > { %v2966_v24 = vrot.slane %v2965_v3, 4  ;;  %2046 = vst.msk [vmem:[%s5297_s13 + $0x38] sm:$0xff] %vm1090_vm5, %v2014_v13  ;;  %v2222_v60 = vcombine.high %v2014_v13, %v2014_v13  ;;  %v2229_v21 = vrot.slane %v2014_v13, %v5291_v18  ;;  %v5544_v10 = vadd.f32 %v5380_v30, %v5257_v47 }
 0x1fe   : > { %v5539_v39 = vsel %vm1090_vm5, %v2943_v46, -inf  ;;  %v2948_v53 = vmax.f32 %v2946_v22, %v2947_v34  ;;  %v2954_v31 = vrot.slane %v2953_v49, 2  ;;  %v2961_v26 = vrot.slane %v2960_v8, 2 }
 0x1ff   : > { %v2967_v56 = vmax.f32 %v2965_v3, %v2966_v24  ;;  %v2236_v29 = vrot.slane %v2222_v60, %v5291_v18  ;;  %v2237_v63 = vcombine.high %v2229_v21, %v2229_v21  ;;  %v2972_v55 = vsel %vm2775_vm6, %v2229_v21, -inf }
 0x200   : > { %v2949_v58 = vrot.slane %v2948_v53, 1  ;;  %v1944_v35 = vadd.f32 %v5391_v14, %v1584_v20  ;;  %v2955_v46 = vmax.f32 %v2953_v49, %v2954_v31  ;;  %v2962_v32 = vmax.f32 %v2960_v8, %v2961_v26  ;;  %v5553_v20 = vpop.f32.mrb[72].mxu1 }
 0x201   : > { %v2968_v22 = vrot.slane %v2967_v56, 2  ;;  %v2238_v6 = vcombine.high %v2236_v29, %v2236_v29  ;;  %v2973_v34 = vrot.slane %v2972_v55, 4  ;;  %v2979_v47 = vsel %vm2775_vm6, %v2237_v63, -inf  ;;  %v1633_v26 = vpop.f32.mrb[73].mxu1 }
 0x202   : > { %v2950_v13 = vmax.f32 %v2948_v53, %v2949_v58  ;;  %v2986_v30 = vsel %vm2775_vm6, %v2236_v29, -inf  ;;  %v2956_v43 = vrot.slane %v2955_v46, 1  ;;  %v2963_v3 = vrot.slane %v2962_v32, 1 }
 0x203   : > { %v2969_v24 = vmax.f32 %v2967_v56, %v2968_v22  ;;  %v2980_v60 = vrot.slane %v2979_v47, 4  ;;  %v2974_v42 = vmax.f32 %v2972_v55, %v2973_v34  ;;  %v2987_v21 = vrot.slane %v2986_v30, 4  ;;  %v5556_v56 = vpop.f32.mrb[74].mxu1 }
 0x204   : > { %v3697_v2 = vsel %vm1090_vm5, %v2950_v13, -inf  ;;  %v2993_v14 = vsel %vm2775_vm6, %v2238_v6, -inf  ;;  %v2957_v49 = vmax.f32 %v2955_v46, %v2956_v43  ;;  %v2964_v8 = vmax.f32 %v2962_v32, %v2963_v3  ;;  %v1636_v34 = vpop.f32.mrb[75].mxu1  ;;  %v5563_v32 = vpop.f32.mrb[72].mxu0 }
 0x205   : > { %v2970_v53 = vrot.slane %v2969_v24, 1  ;;  %v3698_v31 = vmax.f32 %v5495_v45, %v3697_v2  ;;  %v2975_v58 = vrot.slane %v2974_v42, 2  ;;  %v2981_v29 = vmax.f32 %v2979_v47, %v2980_v60  ;;  %v1891_v60 = vpop.f32.mrb[73].mxu0 }
 0x206   : > { %v2988_v63 = vmax.f32 %v2986_v30, %v2987_v21  ;;  %v2994_v0 = vrot.slane %v2993_v14, 4  ;;  %v3700_v55 = vsel %vm1090_vm5, %v2957_v49, -inf  ;;  %v3703_v13 = vsel %vm1090_vm5, %v2964_v8, -inf }
 0x207   : > { %v2971_v22 = vmax.f32 %v2969_v24, %v2970_v53  ;;  %v1983_v6 = vadd.f32 %v5288_v52, %v1944_v35  ;;  %v3701_v43 = vmax.f32 %v5500_v41, %v3700_v55  ;;  %v3704_v46 = vmax.f32 %v5503_v40, %v3703_v13 }
 0x208   : > { %v2976_v45 = vmax.f32 %v2974_v42, %v2975_v58  ;;  %v2982_v2 = vrot.slane %v2981_v29, 2  ;;  %v2989_v30 = vrot.slane %v2988_v63, 2  ;;  %v2995_v3 = vmax.f32 %v2993_v14, %v2994_v0 }
 0x209   : > { %v3706_v47 = vsel %vm1090_vm5, %v2971_v22, -inf  ;;  %v2015_v24 = vmax.f32 %v1983_v6, 0.0  ;;  %v3942_v35 = vsel %vm3928_vm7, %v3701_v43, %v3698_v31  ;;  %v1945_v31 = vadd.f32 %v5401_v59, %v5544_v10 }
 0x20a   : > { %v3707_v21 = vmax.f32 %v5506_v57, %v3706_v47  ;;  %v2977_v49 = vrot.slane %v2976_v45, 1  ;;  %v2983_v8 = vmax.f32 %v2981_v29, %v2982_v2  ;;  %v3943_v41 = vsel %vm3930_vm8, %v3704_v46, %v3942_v35 }
 0x20b   : > { %v2990_v40 = vmax.f32 %v2988_v63, %v2989_v30  ;;  %v2996_v53 = vrot.slane %v2995_v3, 2  ;;  %2047 = vst.msk [vmem:[%s5297_s13 + $0x40] sm:$0xff] %vm1090_vm5, %v2015_v24  ;;  %v2239_v42 = vcombine.high %v2015_v24, %v2015_v24  ;;  %v2246_v0 = vrot.slane %v2015_v24, %v5291_v18  ;;  %v5582_v24 = vpop.f32.mrb[74].mxu0 }
 0x20c   : > { %v2978_v26 = vmax.f32 %v2976_v45, %v2977_v49  ;;  %v2984_v58 = vrot.slane %v2983_v8, 1  ;;  %v3944_v22 = vsel %vm3932_vm9, %v3707_v21, %v3943_v41  ;;  %v1894_v35 = vpop.f32.mrb[75].mxu0 }
 0x20d   : > { %v2991_v14 = vrot.slane %v2990_v40, 1  ;;  %v2997_v55 = vmax.f32 %v2995_v3, %v2996_v53  ;;  %v2253_v57 = vrot.slane %v2239_v42, %v5291_v18  ;;  %v2254_v13 = vcombine.high %v2246_v0, %v2246_v0 }
 0x20e   : > { %v2985_v29 = vmax.f32 %v2983_v8, %v2984_v58  ;;  %v3709_v63 = vsel %vm1090_vm5, %v2978_v26, -inf  ;;  %v3000_v6 = vsel %vm2775_vm6, %v2246_v0, -inf  ;;  %v1984_v26 = vadd.f32 %v5288_v52, %v1945_v31 }
 0x20f   : > { %v2992_v34 = vmax.f32 %v2990_v40, %v2991_v14  ;;  %v2998_v43 = vrot.slane %v2997_v55, 1  ;;  %v3710_v46 = vmax.f32 %v5523_v28, %v3709_v63  ;;  %v2255_v45 = vcombine.high %v2253_v57, %v2253_v57 }
 0x210   : > { %v3712_v2 = vsel %vm1090_vm5, %v2985_v29, -inf  ;;  %v3001_v47 = vrot.slane %v3000_v6, 4  ;;  %v3007_v30 = vsel %vm2775_vm6, %v2254_v13, -inf  ;;  %v3014_v3 = vsel %vm2775_vm6, %v2253_v57, -inf }
 0x211   : > { %v2999_v59 = vmax.f32 %v2997_v55, %v2998_v43  ;;  %v3713_v10 = vmax.f32 %v5531_v17, %v3712_v2  ;;  %v3715_v60 = vsel %vm1090_vm5, %v2992_v34, -inf  ;;  %v3945_v21 = vsel %vm3934_vm10, %v3710_v46, %v3944_v22 }
 0x212   : > { %v3716_v28 = vmax.f32 %v5534_v37, %v3715_v60  ;;  %v3002_v49 = vmax.f32 %v3000_v6, %v3001_v47  ;;  %v3008_v8 = vrot.slane %v3007_v30, 4  ;;  %v3015_v41 = vrot.slane %v3014_v3, 4  ;;  %v5609_v60 = vpop.f32.mrb[76].mxu1 }
 0x213   : > { %v3718_v40 = vsel %vm1090_vm5, %v2999_v59, -inf  ;;  %v3946_v53 = vsel %vm3936_vm11, %v3713_v10, %v3945_v21  ;;  %v3021_v42 = vsel %vm2775_vm6, %v2255_v45, -inf  ;;  %v2016_v55 = vmax.f32 %v1984_v26, 0.0 }
 0x214   : > { %v3719_v17 = vmax.f32 %v5539_v39, %v3718_v40  ;;  %v3947_v58 = vsel %vm3938_vm12, %v3716_v28, %v3946_v53  ;;  %v3003_v22 = vrot.slane %v3002_v49, 2  ;;  %v3009_v0 = vmax.f32 %v3007_v30, %v3008_v8 }
 0x215   : > { %v3016_v37 = vmax.f32 %v3014_v3, %v3015_v41  ;;  %v3022_v14 = vrot.slane %v3021_v42, 4  ;;  %v1592_v57 = vadd.f32 %v5408_v5, %v5263_v15  ;;  %v1595_v31 = vadd.f32 %v5412_v48, %v5265_v51  ;;  %2048 = vst.msk [vmem:[%s5297_s13 + $0x48] sm:$0xff] %vm1090_vm5, %v2016_v55 }
 0x216   : > { %v3948_v29 = vsel %vm3940_vm13, %v3719_v17, %v3947_v58  ;;  %v3004_v63 = vmax.f32 %v3002_v49, %v3003_v22  ;;  %v3010_v13 = vrot.slane %v3009_v0, 2  ;;  %v2256_v34 = vcombine.high %v2016_v55, %v2016_v55 }
 0x217   : > { %4000 = vst.msk [vmem:[%s5463_s15 + $0x8] sm:$0xff] %vm1090_vm5, %v3948_v29  ;;  %v3017_v39 = vrot.slane %v3016_v37, 2  ;;  %v3023_v6 = vmax.f32 %v3021_v42, %v3022_v14  ;;  %v2263_v43 = vrot.slane %v2016_v55, %v5291_v18  ;;  %v1946_v15 = vadd.f32 %v5414_v12, %v1592_v57  ;;  %v1641_v12 = vpop.f32.mrb[77].mxu1  ;;  %v5622_v55 = vpop.f32.mrb[76].mxu0 }
 0x218   : > { %v3005_v46 = vrot.slane %v3004_v63, 1  ;;  %v3011_v45 = vmax.f32 %v3009_v0, %v3010_v13  ;;  %v1947_v5 = vadd.f32 %v5416_v44, %v1595_v31  ;;  %v2270_v30 = vrot.slane %v2256_v34, %v5291_v18  ;;  %v5616_v53 = vpop.f32.mrb[78].mxu1  ;;  %v1899_v31 = vpop.f32.mrb[77].mxu0 }
 0x219   : > { %v3018_v2 = vmax.f32 %v3016_v37, %v3017_v39  ;;  %v3024_v47 = vrot.slane %v3023_v6, 2  ;;  %v2271_v51 = vcombine.high %v2263_v43, %v2263_v43  ;;  %v3028_v59 = vsel %vm2775_vm6, %v2263_v43, -inf  ;;  %v1644_v58 = vpop.f32.mrb[79].mxu1 }
 0x21a   : > { %v3006_v48 = vmax.f32 %v3004_v63, %v3005_v46  ;;  %v3012_v3 = vrot.slane %v3011_v45, 1  ;;  %v1985_v10 = vadd.f32 %v5288_v52, %v1946_v15  ;;  %v2272_v28 = vcombine.high %v2270_v30, %v2270_v30 }
 0x21b   : > { %v3019_v21 = vrot.slane %v3018_v2, 1  ;;  %v3025_v35 = vmax.f32 %v3023_v6, %v3024_v47  ;;  %v3029_v49 = vrot.slane %v3028_v59, 4  ;;  %v3035_v41 = vsel %vm2775_vm6, %v2271_v51, -inf }
 0x21c   : > { %v3013_v8 = vmax.f32 %v3011_v45, %v3012_v3  ;;  %v5612_v44 = vsel %vm1090_vm5, %v3006_v48, -inf  ;;  %v3042_v40 = vsel %vm2775_vm6, %v2270_v30, -inf  ;;  %v3036_v17 = vrot.slane %v3035_v41, 4 }
 0x21d   : > { %v3020_v42 = vmax.f32 %v3018_v2, %v3019_v21  ;;  %v3026_v26 = vrot.slane %v3025_v35, 1  ;;  %v3030_v52 = vmax.f32 %v3028_v59, %v3029_v49  ;;  %v3043_v0 = vrot.slane %v3042_v40, 4  ;;  %v5636_v2 = vld [vmem:[%s6264_s4] ss:$0 sm:$0xff] }
 0x21e   : > { %v5619_v22 = vsel %vm1090_vm5, %v3013_v8, -inf  ;;  %v3049_v37 = vsel %vm2775_vm6, %v2272_v28, -inf  ;;  %v2017_v14 = vmax.f32 %v1985_v10, 0.0  ;;  %v3037_v13 = vmax.f32 %v3035_v41, %v3036_v17  ;;  %v5641_v41 = vpop.f32.mrb[78].mxu0 }
 0x21f   : > { %v3027_v57 = vmax.f32 %v3025_v35, %v3026_v26  ;;  %v5625_v29 = vsel %vm1090_vm5, %v3020_v42, -inf  ;;  %v3031_v63 = vrot.slane %v3030_v52, 2  ;;  %v3044_v39 = vmax.f32 %v3042_v40, %v3043_v0 }
 0x220   : > { %v3050_v6 = vrot.slane %v3049_v37, 4  ;;  %2049 = vst.msk [vmem:[%s5297_s13 + $0x50] sm:$0xff] %vm1090_vm5, %v2017_v14  ;;  %v2273_v34 = vcombine.high %v2017_v14, %v2017_v14  ;;  %v2280_v43 = vrot.slane %v2017_v14, %v5291_v18  ;;  %v3038_v15 = vrot.slane %v3037_v13, 2 }
 0x221   : > { %v5631_v46 = vsel %vm1090_vm5, %v3027_v57, -inf  ;;  %v3032_v45 = vmax.f32 %v3030_v52, %v3031_v63  ;;  %v1986_v47 = vadd.f32 %v5636_v2, %v1947_v5  ;;  %v3045_v30 = vrot.slane %v3044_v39, 2  ;;  %v1902_v52 = vpop.f32.mrb[79].mxu0 }
 0x222   : > { %v3051_v51 = vmax.f32 %v3049_v37, %v3050_v6  ;;  %v2287_v48 = vrot.slane %v2273_v34, %v5291_v18  ;;  %v2288_v3 = vcombine.high %v2280_v43, %v2280_v43  ;;  %v3039_v10 = vmax.f32 %v3037_v13, %v3038_v15 }
 0x223   : > { %v3033_v59 = vrot.slane %v3032_v45, 1  ;;  %v3056_v21 = vsel %vm2775_vm6, %v2280_v43, -inf  ;;  %v2018_v35 = vmax.f32 %v1986_v47, 0.0  ;;  %v3046_v28 = vmax.f32 %v3044_v39, %v3045_v30 }
 0x224   : > { %v3052_v49 = vrot.slane %v3051_v51, 2  ;;  %v2289_v12 = vcombine.high %v2287_v48, %v2287_v48  ;;  %v3057_v8 = vrot.slane %v3056_v21, 4  ;;  %v3040_v42 = vrot.slane %v3039_v10, 1 }
 0x225   : > { %v3034_v40 = vmax.f32 %v3032_v45, %v3033_v59  ;;  %v3063_v5 = vsel %vm2775_vm6, %v2288_v3, -inf  ;;  %v3070_v26 = vsel %vm2775_vm6, %v2287_v48, -inf  ;;  %2050 = vst.msk [vmem:[%s5297_s13 + $0x58] sm:$0xff] %vm1090_vm5, %v2018_v35  ;;  %v3047_v17 = vrot.slane %v3046_v28, 1 }
 0x226   : > { %v3053_v58 = vmax.f32 %v3051_v51, %v3052_v49  ;;  %v3058_v0 = vmax.f32 %v3056_v21, %v3057_v8  ;;  %v3064_v37 = vrot.slane %v3063_v5, 4  ;;  %v3041_v14 = vmax.f32 %v3039_v10, %v3040_v42 }
 0x227   : > { %v5648_v57 = vsel %vm1090_vm5, %v3034_v40, -inf  ;;  %v3071_v63 = vrot.slane %v3070_v26, 4  ;;  %v3077_v13 = vsel %vm2775_vm6, %v2289_v12, -inf  ;;  %v3048_v31 = vmax.f32 %v3046_v28, %v3047_v17 }
 0x228   : > { %v3054_v39 = vrot.slane %v3053_v58, 1  ;;  %v3059_v6 = vrot.slane %v3058_v0, 2  ;;  %v3065_v34 = vmax.f32 %v3063_v5, %v3064_v37  ;;  %v5652_v43 = vsel %vm1090_vm5, %v3041_v14, -inf }
 0x229   : > { %v3072_v45 = vmax.f32 %v3070_v26, %v3071_v63  ;;  %v3078_v15 = vrot.slane %v3077_v13, 4  ;;  %v2290_v47 = vcombine.high %v2018_v35, %v2018_v35  ;;  %v5655_v51 = vsel %vm1090_vm5, %v3048_v31, -inf }
 0x22a   : > { %v3055_v30 = vmax.f32 %v3053_v58, %v3054_v39  ;;  %v3060_v48 = vmax.f32 %v3058_v0, %v3059_v6  ;;  %v3066_v3 = vrot.slane %v3065_v34, 2  ;;  %v2297_v21 = vrot.slane %v2018_v35, %v5291_v18 }
 0x22b   : > { %v3073_v59 = vrot.slane %v3072_v45, 2  ;;  %v3079_v10 = vmax.f32 %v3077_v13, %v3078_v15  ;;  %v2304_v28 = vrot.slane %v2290_v47, %v5291_v18  ;;  %v1600_v40 = vadd.f32 %v5420_v38, %v5271_v27  ;;  %v5669_v47 = vpop.f32.mrb[80].mxu1 }
 0x22c   : > { %v5660_v49 = vsel %vm1090_vm5, %v3055_v30, -inf  ;;  %v3061_v12 = vrot.slane %v3060_v48, 1  ;;  %v3067_v8 = vmax.f32 %v3065_v34, %v3066_v3  ;;  %v2305_v26 = vcombine.high %v2297_v21, %v2297_v21 }
 0x22d   : > { %v3074_v42 = vmax.f32 %v3072_v45, %v3073_v59  ;;  %v3080_v5 = vrot.slane %v3079_v10, 2  ;;  %v2306_v52 = vcombine.high %v2304_v28, %v2304_v28  ;;  %v3084_v0 = vsel %vm2775_vm6, %v2297_v21, -inf }
 0x22e   : > { %v3062_v17 = vmax.f32 %v3060_v48, %v3061_v12  ;;  %v3068_v58 = vrot.slane %v3067_v8, 1  ;;  %v3098_v35 = vsel %vm2775_vm6, %v2304_v28, -inf  ;;  %v3085_v63 = vrot.slane %v3084_v0, 4 }
 0x22f   : > { %v3075_v37 = vrot.slane %v3074_v42, 1  ;;  %v3081_v14 = vmax.f32 %v3079_v10, %v3080_v5  ;;  %v3091_v13 = vsel %vm2775_vm6, %v2305_v26, -inf  ;;  %v3099_v27 = vrot.slane %v3098_v35, 4  ;;  %v1649_v10 = vpop.f32.mrb[81].mxu1 }
 0x230   : > { %v3069_v31 = vmax.f32 %v3067_v8, %v3068_v58  ;;  %v3721_v39 = vsel %vm1090_vm5, %v3062_v17, -inf  ;;  %v3092_v6 = vrot.slane %v3091_v13, 4  ;;  %v3086_v15 = vmax.f32 %v3084_v0, %v3085_v63 }
 0x231   : > { %v3076_v38 = vmax.f32 %v3074_v42, %v3075_v37  ;;  %v3082_v34 = vrot.slane %v3081_v14, 1  ;;  %v3722_v45 = vmax.f32 %v5612_v44, %v3721_v39  ;;  %v3100_v3 = vmax.f32 %v3098_v35, %v3099_v27  ;;  %v5675_v42 = vpop.f32.mrb[82].mxu1 }
 0x232   : > { %v3724_v30 = vsel %vm1090_vm5, %v3069_v31, -inf  ;;  %v3093_v48 = vmax.f32 %v3091_v13, %v3092_v6  ;;  %v3105_v59 = vsel %vm2775_vm6, %v2306_v52, -inf  ;;  %v3087_v8 = vrot.slane %v3086_v15, 2  ;;  %v1652_v58 = vpop.f32.mrb[83].mxu1 }
 0x233   : > { %v3083_v21 = vmax.f32 %v3081_v14, %v3082_v34  ;;  %v3725_v28 = vmax.f32 %v5619_v22, %v3724_v30  ;;  %v3727_v12 = vsel %vm1090_vm5, %v3076_v38, -inf  ;;  %v3101_v26 = vrot.slane %v3100_v3, 2  ;;  %v5682_v22 = vpop.f32.mrb[80].mxu0 }
 0x234   : > { %v3728_v44 = vmax.f32 %v5625_v29, %v3727_v12  ;;  %v3094_v5 = vrot.slane %v3093_v48, 2  ;;  %v3106_v17 = vrot.slane %v3105_v59, 4  ;;  %v3088_v52 = vmax.f32 %v3086_v15, %v3087_v8  ;;  %v1907_v31 = vpop.f32.mrb[81].mxu0 }
 0x235   : > { %v3730_v0 = vsel %vm1090_vm5, %v3083_v21, -inf  ;;  %v3949_v35 = vsel %vm3928_vm7, %v3725_v28, %v3722_v45  ;;  %v1603_v37 = vadd.f32 %v5426_v62, %v5273_v16  ;;  %v3102_v29 = vmax.f32 %v3100_v3, %v3101_v26 }
 0x236   : > { %v3731_v14 = vmax.f32 %v5631_v46, %v3730_v0  ;;  %v3950_v63 = vsel %vm3930_vm8, %v3728_v44, %v3949_v35  ;;  %v3095_v13 = vmax.f32 %v3093_v48, %v3094_v5  ;;  %v3089_v39 = vrot.slane %v3088_v52, 1 }
 0x237   : > { %v3107_v6 = vmax.f32 %v3105_v59, %v3106_v17  ;;  %v1948_v27 = vadd.f32 %v5433_v4, %v1600_v40  ;;  %v1949_v38 = vadd.f32 %v5441_v11, %v1603_v37  ;;  %v3103_v45 = vrot.slane %v3102_v29, 1 }
 0x238   : > { %v3096_v34 = vrot.slane %v3095_v13, 1  ;;  %v3951_v15 = vsel %vm3932_vm9, %v3731_v14, %v3950_v63  ;;  %v1608_v16 = vadd.f32 %v5449_v54, %v5279_v25  ;;  %v3090_v62 = vmax.f32 %v3088_v52, %v3089_v39 }
 0x239   : > { %v3108_v46 = vrot.slane %v3107_v6, 2  ;;  %v1987_v30 = vadd.f32 %v5636_v2, %v1948_v27  ;;  %v1988_v48 = vadd.f32 %v5636_v2, %v1949_v38  ;;  %v3104_v59 = vmax.f32 %v3102_v29, %v3103_v45 }
 0x23a   : > { %v3097_v3 = vmax.f32 %v3095_v13, %v3096_v34  ;;  %v5695_v4 = vadd.f32 %v5458_v33, %v5281_v61  ;;  %v1950_v11 = vadd.f32 %v5470_v50, %v1608_v16  ;;  %v3733_v10 = vsel %vm1090_vm5, %v3090_v62, -inf  ;;  %v5709_v50 = vpop.f32.mrb[82].mxu0 }
 0x23b   : > { %v3109_v40 = vmax.f32 %v3107_v6, %v3108_v46  ;;  %v2019_v25 = vmax.f32 %v1987_v30, 0.0  ;;  %v2020_v54 = vmax.f32 %v1988_v48, 0.0  ;;  %v3734_v21 = vmax.f32 %v5648_v57, %v3733_v10  ;;  %v1910_v0 = vpop.f32.mrb[83].mxu0 }
 0x23c   : > { %v3736_v28 = vsel %vm1090_vm5, %v3097_v3, -inf  ;;  %v3739_v12 = vsel %vm1090_vm5, %v3104_v59, -inf  ;;  %v1989_v8 = vadd.f32 %v5636_v2, %v1950_v11 }
 0x23d   : > { %v3110_v44 = vrot.slane %v3109_v40, 1  ;;  %v3737_v5 = vmax.f32 %v5652_v43, %v3736_v28  ;;  %v3740_v61 = vmax.f32 %v5655_v51, %v3739_v12  ;;  %2051 = vst.msk [vmem:[%s5297_s13 + $0x60] sm:$0xff] %vm1090_vm5, %v2019_v25  ;;  %v2307_v33 = vcombine.high %v2019_v25, %v2019_v25  ;;  %2052 = vst.msk [vmem:[%s5297_s13 + $0x68] sm:$0xff] %vm1090_vm5, %v2020_v54  ;;  %v5735_v12 = vpop.f32.mrb[84].mxu1 }
 0x23e   : > { %v3952_v57 = vsel %vm3934_vm10, %v3734_v21, %v3951_v15  ;;  %v2314_v26 = vrot.slane %v2019_v25, %v5291_v18  ;;  %v2324_v17 = vcombine.high %v2020_v54, %v2020_v54  ;;  %v2331_v58 = vrot.slane %v2020_v54, %v5291_v18 }
 0x23f   : > { %v3111_v35 = vmax.f32 %v3109_v40, %v3110_v44  ;;  %v3953_v43 = vsel %vm3936_vm11, %v3737_v5, %v3952_v57  ;;  %v2321_v51 = vrot.slane %v2307_v33, %v5291_v18  ;;  %v5716_v52 = vmax.f32 %v1989_v8, 0.0  ;;  %v1657_v33 = vpop.f32.mrb[85].mxu1 }
 0x240   : > { %v3954_v37 = vsel %vm3938_vm12, %v3740_v61, %v3953_v43  ;;  %v2322_v14 = vcombine.high %v2314_v26, %v2314_v26  ;;  %v3112_v63 = vsel %vm2775_vm6, %v2314_v26, -inf  ;;  %v2338_v13 = vrot.slane %v2324_v17, %v5291_v18  ;;  %v5738_v0 = vpop.f32.mrb[86].mxu1 }
 0x241   : > { %v3742_v29 = vsel %vm1090_vm5, %v3111_v35, -inf  ;;  %v2323_v31 = vcombine.high %v2321_v51, %v2321_v51  ;;  %v3113_v39 = vrot.slane %v3112_v63, 4  ;;  %v3126_v6 = vsel %vm2775_vm6, %v2321_v51, -inf  ;;  %2053 = vst.msk [vmem:[%s5297_s13 + $0x70] sm:$0xff] %vm1090_vm5, %v5716_v52 }
 0x242   : > { %v3743_v27 = vmax.f32 %v5660_v49, %v3742_v29  ;;  %v3119_v38 = vsel %vm2775_vm6, %v2322_v14, -inf  ;;  %v3127_v34 = vrot.slane %v3126_v6, 4  ;;  %v2339_v45 = vcombine.high %v2331_v58, %v2331_v58  ;;  %v1660_v14 = vpop.f32.mrb[87].mxu1 }
 0x243   : > { %v3114_v15 = vmax.f32 %v3112_v63, %v3113_v39  ;;  %v3120_v16 = vrot.slane %v3119_v38, 4  ;;  %v3133_v62 = vsel %vm2775_vm6, %v2323_v31, -inf  ;;  %v2340_v46 = vcombine.high %v2338_v13, %v2338_v13  ;;  %v5740_v39 = vpop.f32.mrb[84].mxu0 }
 0x244   : > { %v3955_v30 = vsel %vm3940_vm13, %v3743_v27, %v3954_v37  ;;  %v3128_v48 = vmax.f32 %v3126_v6, %v3127_v34  ;;  %v3134_v3 = vrot.slane %v3133_v62, 4  ;;  %v3140_v59 = vsel %vm2775_vm6, %v2331_v58, -inf }
 0x245   : > { %4001 = vst.msk [vmem:[%s5463_s15 + $0x10] sm:$0xff] %vm1090_vm5, %v3955_v30  ;;  %v3115_v11 = vrot.slane %v3114_v15, 2  ;;  %v3121_v40 = vmax.f32 %v3119_v38, %v3120_v16  ;;  %v3141_v49 = vrot.slane %v3140_v59, 4  ;;  %v3147_v10 = vsel %vm2775_vm6, %v2339_v45, -inf  ;;  %v1915_v45 = vpop.f32.mrb[85].mxu0 }
 0x246   : > { %v3129_v25 = vrot.slane %v3128_v48, 2  ;;  %v3135_v54 = vmax.f32 %v3133_v62, %v3134_v3  ;;  %v3148_v21 = vrot.slane %v3147_v10, 4  ;;  %v3154_v28 = vsel %vm2775_vm6, %v2338_v13, -inf }
 0x247   : > { %v3116_v8 = vmax.f32 %v3114_v15, %v3115_v11  ;;  %v3122_v44 = vrot.slane %v3121_v40, 2  ;;  %v3142_v5 = vmax.f32 %v3140_v59, %v3141_v49  ;;  %v3155_v61 = vrot.slane %v3154_v28, 4 }
 0x248   : > { %v3130_v57 = vmax.f32 %v3128_v48, %v3129_v25  ;;  %v3136_v26 = vrot.slane %v3135_v54, 2  ;;  %v3149_v17 = vmax.f32 %v3147_v10, %v3148_v21  ;;  %v3161_v58 = vsel %vm2775_vm6, %v2340_v46, -inf }
 0x249   : > { %v3117_v35 = vrot.slane %v3116_v8, 1  ;;  %v3123_v43 = vmax.f32 %v3121_v40, %v3122_v44  ;;  %v3143_v51 = vrot.slane %v3142_v5, 2  ;;  %v3156_v37 = vmax.f32 %v3154_v28, %v3155_v61 }
 0x24a   : > { %v3131_v63 = vrot.slane %v3130_v57, 1  ;;  %v3137_v13 = vmax.f32 %v3135_v54, %v3136_v26  ;;  %v3150_v29 = vrot.slane %v3149_v17, 2  ;;  %v3162_v31 = vrot.slane %v3161_v58, 4 }
 0x24b   : > { %v3118_v6 = vmax.f32 %v3116_v8, %v3117_v35  ;;  %v3124_v27 = vrot.slane %v3123_v43, 1  ;;  %v3144_v38 = vmax.f32 %v3142_v5, %v3143_v51  ;;  %v3157_v34 = vrot.slane %v3156_v37, 2 }
 0x24c   : > { %v3132_v15 = vmax.f32 %v3130_v57, %v3131_v63  ;;  %v3138_v16 = vrot.slane %v3137_v13, 1  ;;  %v3151_v62 = vmax.f32 %v3149_v17, %v3150_v29  ;;  %v3163_v46 = vmax.f32 %v3161_v58, %v3162_v31 }
 0x24d   : > { %v3125_v30 = vmax.f32 %v3123_v43, %v3124_v27  ;;  %v5743_v48 = vsel %vm1090_vm5, %v3118_v6, -inf  ;;  %v3145_v3 = vrot.slane %v3144_v38, 1  ;;  %v3158_v59 = vmax.f32 %v3156_v37, %v3157_v34 }
 0x24e   : > { %v3139_v11 = vmax.f32 %v3137_v13, %v3138_v16  ;;  %v5746_v40 = vsel %vm1090_vm5, %v3132_v15, -inf  ;;  %v3152_v49 = vrot.slane %v3151_v62, 1  ;;  %v3164_v10 = vrot.slane %v3163_v46, 2  ;;  %v5772_v13 = vpop.f32.mrb[86].mxu0 }
 0x24f   : > { %v5749_v25 = vsel %vm1090_vm5, %v3125_v30, -inf  ;;  %v3146_v54 = vmax.f32 %v3144_v38, %v3145_v3  ;;  %v3159_v21 = vrot.slane %v3158_v59, 1  ;;  %v2341_v28 = vcombine.high %v5716_v52, %v5716_v52  ;;  %v1918_v6 = vpop.f32.mrb[87].mxu0 }
 0x250   : > { %v5754_v8 = vsel %vm1090_vm5, %v3139_v11, -inf  ;;  %v3153_v44 = vmax.f32 %v3151_v62, %v3152_v49  ;;  %v3165_v5 = vmax.f32 %v3163_v46, %v3164_v10  ;;  %v2348_v61 = vrot.slane %v5716_v52, %v5291_v18 }
 0x251   : > { %v3160_v33 = vmax.f32 %v3158_v59, %v3159_v21  ;;  %v5759_v57 = vsel %vm1090_vm5, %v3146_v54, -inf  ;;  %v2355_v26 = vrot.slane %v2341_v28, %v5291_v18  ;;  %v1951_v17 = vadd.f32 %v5479_v36, %v5695_v4 }
 0x252   : > { %v3166_v58 = vrot.slane %v3165_v5, 1  ;;  %v5765_v35 = vsel %vm1090_vm5, %v3153_v44, -inf  ;;  %v2356_v43 = vcombine.high %v2348_v61, %v2348_v61  ;;  %v3168_v51 = vsel %vm2775_vm6, %v2348_v61, -inf  ;;  %v6288_v44 = vld [vmem:[#allocation16_spill] sm:$0xff] }
 0x253   : > { %v5769_v37 = vsel %vm1090_vm5, %v3160_v33, -inf  ;;  %v2357_v52 = vcombine.high %v2355_v26, %v2355_v26  ;;  %v3169_v14 = vrot.slane %v3168_v51, 4  ;;  %v3182_v63 = vsel %vm2775_vm6, %v2355_v26, -inf }
 0x254   : > { %v3167_v29 = vmax.f32 %v3165_v5, %v3166_v58  ;;  %v3175_v31 = vsel %vm2775_vm6, %v2356_v43, -inf  ;;  %v3183_v36 = vrot.slane %v3182_v63, 4  ;;  %v1990_v4 = vadd.f32 %v5636_v2, %v1951_v17 }
 0x255   : > { %v3170_v27 = vmax.f32 %v3168_v51, %v3169_v14  ;;  %v3176_v38 = vrot.slane %v3175_v31, 4  ;;  %v3189_v34 = vsel %vm2775_vm6, %v2357_v52, -inf  ;;  %v1616_v45 = vadd.f32 %v5485_v19, %v5219_v7 }
 0x256   : > { %v5780_v15 = vsel %vm1090_vm5, %v3167_v29, -inf  ;;  %v3184_v16 = vmax.f32 %v3182_v63, %v3183_v36  ;;  %v3190_v62 = vrot.slane %v3189_v34, 4  ;;  %v2022_v46 = vmax.f32 %v1990_v4, 0.0 }
 0x257   : > { %v3171_v30 = vrot.slane %v3170_v27, 2  ;;  %v3177_v3 = vmax.f32 %v3175_v31, %v3176_v38  ;;  %v1619_v59 = vadd.f32 %v5489_v23, %v5221_v9  ;;  %v1952_v11 = vadd.f32 %v5492_v1, %v1616_v45  ;;  %v5793_v1 = vpop.f32.mrb[88].mxu1 }
 0x258   : > { %v3185_v49 = vrot.slane %v3184_v16, 2  ;;  %v3191_v10 = vmax.f32 %v3189_v34, %v3190_v62  ;;  %2054 = vst.msk [vmem:[%s5297_s13 + $0x78] sm:$0xff] %vm1090_vm5, %v2022_v46  ;;  %v2358_v54 = vcombine.high %v2022_v46, %v2022_v46  ;;  %v2365_v7 = vrot.slane %v2022_v46, %v5291_v18  ;;  %v1665_v51 = vpop.f32.mrb[89].mxu1  ;;  %v5802_v46 = vpop.f32.mrb[88].mxu0 }
 0x259   : > { %v3172_v19 = vmax.f32 %v3170_v27, %v3171_v30  ;;  %v3178_v21 = vrot.slane %v3177_v3, 2  ;;  %v1991_v28 = vadd.f32 %v5636_v2, %v1952_v11  ;;  %v5790_v5 = vadd.f32 %v6288_v44, %v1619_v59  ;;  %v5796_v31 = vpop.f32.mrb[90].mxu1 }
 0x25a   : > { %v3186_v61 = vmax.f32 %v3184_v16, %v3185_v49  ;;  %v3192_v33 = vrot.slane %v3191_v10, 2  ;;  %v2372_v9 = vrot.slane %v2358_v54, %v5291_v18  ;;  %v2373_v23 = vcombine.high %v2365_v7, %v2365_v7  ;;  %v1668_v38 = vpop.f32.mrb[91].mxu1  ;;  %v1923_v49 = vpop.f32.mrb[89].mxu0 }
 0x25b   : > { %v3173_v26 = vrot.slane %v3172_v19, 1  ;;  %v3179_v17 = vmax.f32 %v3177_v3, %v3178_v21  ;;  %v3196_v58 = vsel %vm2775_vm6, %v2365_v7, -inf  ;;  %v2023_v43 = vmax.f32 %v1991_v28, 0.0 }
 0x25c   : > { %v3187_v52 = vrot.slane %v3186_v61, 1  ;;  %v3193_v14 = vmax.f32 %v3191_v10, %v3192_v33  ;;  %v2374_v63 = vcombine.high %v2372_v9, %v2372_v9  ;;  %v3197_v29 = vrot.slane %v3196_v58, 4 }
 0x25d   : > { %v3174_v36 = vmax.f32 %v3172_v19, %v3173_v26  ;;  %v3180_v4 = vrot.slane %v3179_v17, 1  ;;  %v3203_v6 = vsel %vm2775_vm6, %v2373_v23, -inf  ;;  %v3210_v27 = vsel %vm2775_vm6, %v2372_v9, -inf  ;;  %2055 = vst.msk [vmem:[%s5297_s13 + $0x80] sm:$0xff] %vm1090_vm5, %v2023_v43 }
 0x25e   : > { %v3188_v34 = vmax.f32 %v3186_v61, %v3187_v52  ;;  %v3194_v45 = vrot.slane %v3193_v14, 1  ;;  %v3198_v16 = vmax.f32 %v3196_v58, %v3197_v29  ;;  %v3204_v62 = vrot.slane %v3203_v6, 4 }
 0x25f   : > { %v3181_v30 = vmax.f32 %v3179_v17, %v3180_v4  ;;  %v3745_v3 = vsel %vm1090_vm5, %v3174_v36, -inf  ;;  %v3211_v59 = vrot.slane %v3210_v27, 4  ;;  %v3217_v11 = vsel %vm2775_vm6, %v2374_v63, -inf }
 0x260   : > { %v3195_v10 = vmax.f32 %v3193_v14, %v3194_v45  ;;  %v3746_v54 = vmax.f32 %v5743_v48, %v3745_v3  ;;  %v3751_v7 = vsel %vm1090_vm5, %v3188_v34, -inf  ;;  %v3199_v19 = vrot.slane %v3198_v16, 2 }
 0x261   : > { %v3748_v21 = vsel %vm1090_vm5, %v3181_v30, -inf  ;;  %v3752_v28 = vmax.f32 %v5746_v40, %v3751_v7  ;;  %v3205_v44 = vmax.f32 %v3203_v6, %v3204_v62  ;;  %v3212_v61 = vmax.f32 %v3210_v27, %v3211_v59 }
 0x262   : > { %v3749_v33 = vmax.f32 %v5749_v25, %v3748_v21  ;;  %v3754_v9 = vsel %vm1090_vm5, %v3195_v10, -inf  ;;  %v3200_v23 = vmax.f32 %v3198_v16, %v3199_v19  ;;  %v3218_v26 = vrot.slane %v3217_v11, 4 }
 0x263   : > { %v3755_v17 = vmax.f32 %v5754_v8, %v3754_v9  ;;  %v3206_v58 = vrot.slane %v3205_v44, 2  ;;  %v3213_v51 = vrot.slane %v3212_v61, 2  ;;  %v2375_v48 = vcombine.high %v2023_v43, %v2023_v43 }
 0x264   : > { %v3956_v52 = vsel %vm3928_vm7, %v3749_v33, %v3746_v54  ;;  %v3201_v14 = vrot.slane %v3200_v23, 1  ;;  %v3219_v63 = vmax.f32 %v3217_v11, %v3218_v26  ;;  %v2382_v29 = vrot.slane %v2023_v43, %v5291_v18 }
 0x265   : > { %v3957_v40 = vsel %vm3930_vm8, %v3752_v28, %v3956_v52  ;;  %v3207_v36 = vmax.f32 %v3205_v44, %v3206_v58  ;;  %v3214_v4 = vmax.f32 %v3212_v61, %v3213_v51  ;;  %v2389_v25 = vrot.slane %v2375_v48, %v5291_v18  ;;  %v5829_v58 = vpop.f32.mrb[90].mxu0 }
 0x266   : > { %v3202_v6 = vmax.f32 %v3200_v23, %v3201_v14  ;;  %v3220_v27 = vrot.slane %v3219_v63, 2  ;;  %v3958_v38 = vsel %vm3932_vm9, %v3755_v17, %v3957_v40  ;;  %v2390_v8 = vcombine.high %v2382_v29, %v2382_v29 }
 0x267   : > { %v3208_v34 = vrot.slane %v3207_v36, 1  ;;  %v3215_v45 = vrot.slane %v3214_v4, 1  ;;  %v2391_v16 = vcombine.high %v2389_v25, %v2389_v25  ;;  %v3224_v62 = vsel %vm2775_vm6, %v2382_v29, -inf }
 0x268   : > { %v3221_v30 = vmax.f32 %v3219_v63, %v3220_v27  ;;  %v3757_v3 = vsel %vm1090_vm5, %v3202_v6, -inf  ;;  %v3225_v43 = vrot.slane %v3224_v62, 4  ;;  %v3231_v59 = vsel %vm2775_vm6, %v2390_v8, -inf  ;;  %v1926_v63 = vpop.f32.mrb[91].mxu0 }
 0x269   : > { %v3209_v11 = vmax.f32 %v3207_v36, %v3208_v34  ;;  %v3216_v49 = vmax.f32 %v3214_v4, %v3215_v45  ;;  %v3758_v10 = vmax.f32 %v5759_v57, %v3757_v3  ;;  %v3232_v54 = vrot.slane %v3231_v59, 4  ;;  %v6289_v4 = vld [vmem:[#allocation2_spill] sm:$0xff]  ;;  %v6291_v45 = vld [vmem:[#allocation3_spill] sm:$0xff] }
 0x26a   : > { %v3222_v7 = vrot.slane %v3221_v30, 1  ;;  %v3226_v19 = vmax.f32 %v3224_v62, %v3225_v43  ;;  %v3238_v21 = vsel %vm2775_vm6, %v2389_v25, -inf  ;;  %v3245_v28 = vsel %vm2775_vm6, %v2391_v16, -inf  ;;  %v6292_v16 = vld [vmem:[#allocation18_spill] sm:$0xff] }
 0x26b   : > { %v3760_v44 = vsel %vm1090_vm5, %v3209_v11, -inf  ;;  %v3763_v61 = vsel %vm1090_vm5, %v3216_v49, -inf  ;;  %v3959_v33 = vsel %vm3934_vm10, %v3758_v10, %v3958_v38  ;;  %v3233_v9 = vmax.f32 %v3231_v59, %v3232_v54  ;;  %v6293_v59 = vld [vmem:[#allocation19_spill] sm:$0xff]  ;;  %v5843_v49 = vpop.f32.mrb[92].mxu1 }
 0x26c   : > { %v3223_v23 = vmax.f32 %v3221_v30, %v3222_v7  ;;  %v3761_v26 = vmax.f32 %v5765_v35, %v3760_v44  ;;  %v3764_v17 = vmax.f32 %v5769_v37, %v3763_v61  ;;  %v3227_v57 = vrot.slane %v3226_v19, 2  ;;  %v6290_v35 = vld [vmem:[#allocation17_spill] sm:$0xff]  ;;  %v6294_v61 = vld [vmem:[#allocation20_spill] sm:$0xff] }
 0x26d   : > { %v3234_v51 = vrot.slane %v3233_v9, 2  ;;  %v3239_v48 = vrot.slane %v3238_v21, 4  ;;  %v3246_v52 = vrot.slane %v3245_v28, 4  ;;  %v1992_v14 = vadd.f32 %v5636_v2, %v5790_v5 }
 0x26e   : > { %v3766_v29 = vsel %vm1090_vm5, %v3223_v23, -inf  ;;  %v3960_v40 = vsel %vm3936_vm11, %v3761_v26, %v3959_v33  ;;  %v3228_v36 = vmax.f32 %v3226_v19, %v3227_v57  ;;  %v1624_v25 = vadd.f32 %v6290_v35, %v6289_v4  ;;  %v1673_v19 = vpop.f32.mrb[93].mxu1 }
 0x26f   : > { %v3767_v37 = vmax.f32 %v5780_v15, %v3766_v29  ;;  %v3961_v6 = vsel %vm3938_vm12, %v3764_v17, %v3960_v40  ;;  %v3235_v27 = vmax.f32 %v3233_v9, %v3234_v51  ;;  %v3240_v38 = vmax.f32 %v3238_v21, %v3239_v48  ;;  %v5854_v9 = vpop.f32.mrb[94].mxu1  ;;  %v5864_v29 = vpop.f32.mrb[92].mxu0 }
 0x270   : > { %v3229_v8 = vrot.slane %v3228_v36, 1  ;;  %v3247_v34 = vmax.f32 %v3245_v28, %v3246_v52  ;;  %v2024_v5 = vmax.f32 %v1992_v14, 0.0  ;;  %v1627_v62 = vadd.f32 %v6292_v16, %v6291_v45  ;;  %v1676_v51 = vpop.f32.mrb[95].mxu1 }
 0x271   : > { %v3962_v30 = vsel %vm3940_vm13, %v3767_v37, %v3961_v6  ;;  %v3236_v3 = vrot.slane %v3235_v27, 1  ;;  %v3241_v43 = vrot.slane %v3240_v38, 2  ;;  %v1954_v11 = vadd.f32 %v6293_v59, %v1624_v25  ;;  %v1931_v25 = vpop.f32.mrb[93].mxu0 }
 0x272   : > { %4002 = vst.msk [vmem:[%s5463_s15 + $0x18] sm:$0xff] %vm1090_vm5, %v3962_v30  ;;  %v3230_v15 = vmax.f32 %v3228_v36, %v3229_v8  ;;  %v3248_v10 = vrot.slane %v3247_v34, 2  ;;  %2056 = vst.msk [vmem:[%s5297_s13 + $0x88] sm:$0xff] %vm1090_vm5, %v2024_v5  ;;  %v2392_v54 = vcombine.high %v2024_v5, %v2024_v5  ;;  %v2399_v7 = vrot.slane %v2024_v5, %v5291_v18 }
 0x273   : > { %v3237_v21 = vmax.f32 %v3235_v27, %v3236_v3  ;;  %v3242_v28 = vmax.f32 %v3240_v38, %v3241_v43  ;;  %v1993_v44 = vadd.f32 %v5636_v2, %v1954_v11  ;;  %v5852_v33 = vadd.f32 %v6294_v61, %v1627_v62 }
 0x274   : > { %v3249_v23 = vmax.f32 %v3247_v34, %v3248_v10  ;;  %v5857_v26 = vsel %vm1090_vm5, %v3230_v15, -inf  ;;  %v2406_v17 = vrot.slane %v2392_v54, %v5291_v18  ;;  %v2407_v57 = vcombine.high %v2399_v7, %v2399_v7 }
 0x275   : > { %v3243_v48 = vrot.slane %v3242_v28, 1  ;;  %v5861_v52 = vsel %vm1090_vm5, %v3237_v21, -inf  ;;  %v3252_v14 = vsel %vm2775_vm6, %v2399_v7, -inf  ;;  %v2025_v63 = vmax.f32 %v1993_v44, 0.0 }
 0x276   : > { %v3250_v40 = vrot.slane %v3249_v23, 1  ;;  %v2408_v36 = vcombine.high %v2406_v17, %v2406_v17  ;;  %v3253_v4 = vrot.slane %v3252_v14, 4  ;;  %v3259_v35 = vsel %vm2775_vm6, %v2407_v57, -inf }
 0x277   : > { %v3244_v37 = vmax.f32 %v3242_v28, %v3243_v48  ;;  %v3260_v6 = vrot.slane %v3259_v35, 4  ;;  %v3266_v27 = vsel %vm2775_vm6, %v2406_v17, -inf  ;;  %2057 = vst.msk [vmem:[%s5297_s13 + $0x90] sm:$0xff] %vm1090_vm5, %v2025_v63  ;;  %v2409_v38 = vcombine.high %v2025_v63, %v2025_v63 }
 0x278   : > { %v3251_v8 = vmax.f32 %v3249_v23, %v3250_v40  ;;  %v3254_v34 = vmax.f32 %v3252_v14, %v3253_v4  ;;  %v3267_v5 = vrot.slane %v3266_v27, 4  ;;  %v3273_v45 = vsel %vm2775_vm6, %v2408_v36, -inf }
 0x279   : > { %v5872_v16 = vsel %vm1090_vm5, %v3244_v37, -inf  ;;  %v3261_v62 = vmax.f32 %v3259_v35, %v3260_v6  ;;  %v3274_v30 = vrot.slane %v3273_v45, 4  ;;  %v2416_v3 = vrot.slane %v2025_v63, %v5291_v18  ;;  %v5883_v37 = vpop.f32.mrb[94].mxu0 }
 0x27a   : > { %v5876_v43 = vsel %vm1090_vm5, %v3251_v8, -inf  ;;  %v3255_v59 = vrot.slane %v3254_v34, 2  ;;  %v3268_v11 = vmax.f32 %v3266_v27, %v3267_v5  ;;  %v2423_v15 = vrot.slane %v2409_v38, %v5291_v18 }
 0x27b   : > { %v3262_v10 = vrot.slane %v3261_v62, 2  ;;  %v3275_v54 = vmax.f32 %v3273_v45, %v3274_v30  ;;  %v2424_v7 = vcombine.high %v2416_v3, %v2416_v3  ;;  %v3280_v19 = vsel %vm2775_vm6, %v2416_v3, -inf }
 0x27c   : > { %v3256_v21 = vmax.f32 %v3254_v34, %v3255_v59  ;;  %v3269_v28 = vrot.slane %v3268_v11, 2  ;;  %v2425_v44 = vcombine.high %v2423_v15, %v2423_v15  ;;  %v3281_v61 = vrot.slane %v3280_v19, 4  ;;  %v1934_v34 = vpop.f32.mrb[95].mxu0 }
 0x27d   : > { %v3263_v23 = vmax.f32 %v3261_v62, %v3262_v10  ;;  %v3276_v17 = vrot.slane %v3275_v54, 2  ;;  %v3287_v57 = vsel %vm2775_vm6, %v2424_v7, -inf  ;;  %v3294_v51 = vsel %vm2775_vm6, %v2423_v15, -inf }
 0x27e   : > { %v3257_v48 = vrot.slane %v3256_v21, 1  ;;  %v3270_v14 = vmax.f32 %v3268_v11, %v3269_v28  ;;  %v3282_v63 = vmax.f32 %v3280_v19, %v3281_v61  ;;  %v3288_v40 = vrot.slane %v3287_v57, 4 }
 0x27f   : > { %v3264_v36 = vrot.slane %v3263_v23, 1  ;;  %v3277_v4 = vmax.f32 %v3275_v54, %v3276_v17  ;;  %v3295_v35 = vrot.slane %v3294_v51, 4  ;;  %v3301_v25 = vsel %vm2775_vm6, %v2425_v44, -inf }
 0x280   : > { %v3258_v6 = vmax.f32 %v3256_v21, %v3257_v48  ;;  %v3271_v27 = vrot.slane %v3270_v14, 1  ;;  %v3283_v38 = vrot.slane %v3282_v63, 2  ;;  %v3289_v8 = vmax.f32 %v3287_v57, %v3288_v40 }
 0x281   : > { %v3265_v5 = vmax.f32 %v3263_v23, %v3264_v36  ;;  %v3278_v45 = vrot.slane %v3277_v4, 1  ;;  %v3296_v62 = vmax.f32 %v3294_v51, %v3295_v35  ;;  %v3302_v30 = vrot.slane %v3301_v25, 4  ;;  %v6295_v51 = vld [vmem:[#allocation4_spill] sm:$0xff]  ;;  %v6296_v36 = vld [vmem:[#allocation5_spill] sm:$0xff] }
 0x282   : > { %v3272_v3 = vmax.f32 %v3270_v14, %v3271_v27  ;;  %v5886_v59 = vsel %vm1090_vm5, %v3258_v6, -inf  ;;  %v3284_v11 = vmax.f32 %v3282_v63, %v3283_v38  ;;  %v3290_v15 = vrot.slane %v3289_v8, 2  ;;  %v6297_v27 = vld [vmem:[#allocation6_spill] sm:$0xff] }
 0x283   : > { %v3279_v10 = vmax.f32 %v3277_v4, %v3278_v45  ;;  %v5889_v54 = vsel %vm1090_vm5, %v3265_v5, -inf  ;;  %v3297_v7 = vrot.slane %v3296_v62, 2  ;;  %v3303_v19 = vmax.f32 %v3301_v25, %v3302_v30 }
 0x284   : > { %v5892_v21 = vsel %vm1090_vm5, %v3272_v3, -inf  ;;  %v3285_v28 = vrot.slane %v3284_v11, 1  ;;  %v3291_v44 = vmax.f32 %v3289_v8, %v3290_v15  ;;  %v1994_v61 = vadd.f32 %v5636_v2, %v5852_v33 }
 0x285   : > { %v5897_v23 = vsel %vm1090_vm5, %v3279_v10, -inf  ;;  %v3298_v17 = vmax.f32 %v3296_v62, %v3297_v7  ;;  %v3304_v57 = vrot.slane %v3303_v19, 2  ;;  %v1632_v48 = vadd.f32 %v5553_v20, %v6295_v51 }
 0x286   : > { %v3286_v14 = vmax.f32 %v3284_v11, %v3285_v28  ;;  %v3292_v63 = vrot.slane %v3291_v44, 1  ;;  %v2026_v40 = vmax.f32 %v1994_v61, 0.0  ;;  %v1635_v4 = vadd.f32 %v5556_v56, %v6296_v36 }
 0x287   : > { %v3299_v35 = vrot.slane %v3298_v17, 1  ;;  %v3305_v25 = vmax.f32 %v3303_v19, %v3304_v57  ;;  %v1956_v6 = vadd.f32 %v5563_v32, %v1632_v48  ;;  %v1640_v33 = vadd.f32 %v5609_v60, %v6297_v27 }
 0x288   : > { %v3293_v38 = vmax.f32 %v3291_v44, %v3292_v63  ;;  %v3769_v8 = vsel %vm1090_vm5, %v3286_v14, -inf  ;;  %2058 = vst.msk [vmem:[%s5297_s13 + $0x98] sm:$0xff] %vm1090_vm5, %v2026_v40  ;;  %v2426_v34 = vcombine.high %v2026_v40, %v2026_v40  ;;  %v2433_v20 = vrot.slane %v2026_v40, %v5291_v18 }
 0x289   : > { %v3300_v5 = vmax.f32 %v3298_v17, %v3299_v35  ;;  %v3306_v45 = vrot.slane %v3305_v25, 1  ;;  %v3770_v62 = vmax.f32 %v5857_v26, %v3769_v8  ;;  %v1995_v56 = vadd.f32 %v5636_v2, %v1956_v6 }
 0x28a   : > { %v3772_v30 = vsel %vm1090_vm5, %v3293_v38, -inf  ;;  %v2440_v32 = vrot.slane %v2426_v34, %v5291_v18  ;;  %v2441_v3 = vcombine.high %v2433_v20, %v2433_v20  ;;  %v3308_v60 = vsel %vm2775_vm6, %v2433_v20, -inf  ;;  %v6298_v38 = vld [vmem:[#allocation7_spill] sm:$0xff] }
 0x28b   : > { %v3307_v11 = vmax.f32 %v3305_v25, %v3306_v45  ;;  %v3773_v15 = vmax.f32 %v5861_v52, %v3772_v30  ;;  %v3775_v10 = vsel %vm1090_vm5, %v3300_v5, -inf  ;;  %v3309_v7 = vrot.slane %v3308_v60, 4 }
 0x28c   : > { %v3776_v19 = vmax.f32 %v5872_v16, %v3775_v10  ;;  %v2442_v28 = vcombine.high %v2440_v32, %v2440_v32  ;;  %v3315_v26 = vsel %vm2775_vm6, %v2441_v3, -inf  ;;  %v3322_v44 = vsel %vm2775_vm6, %v2440_v32, -inf }
 0x28d   : > { %v3778_v61 = vsel %vm1090_vm5, %v3307_v11, -inf  ;;  %v3963_v17 = vsel %vm3928_vm7, %v3773_v15, %v3770_v62  ;;  %v3310_v57 = vmax.f32 %v3308_v60, %v3309_v7  ;;  %v3316_v51 = vrot.slane %v3315_v26, 4 }
 0x28e   : > { %v3779_v48 = vmax.f32 %v5876_v43, %v3778_v61  ;;  %v3964_v52 = vsel %vm3930_vm8, %v3776_v19, %v3963_v17  ;;  %v3323_v14 = vrot.slane %v3322_v44, 4  ;;  %v3329_v63 = vsel %vm2775_vm6, %v2442_v28, -inf }
 0x28f   : > { %v3311_v16 = vrot.slane %v3310_v57, 2  ;;  %v3317_v40 = vmax.f32 %v3315_v26, %v3316_v51  ;;  %v3330_v36 = vrot.slane %v3329_v63, 4  ;;  %v2027_v35 = vmax.f32 %v1995_v56, 0.0 }
 0x290   : > { %v3324_v25 = vmax.f32 %v3322_v44, %v3323_v14  ;;  %v3965_v6 = vsel %vm3932_vm9, %v3779_v48, %v3964_v52  ;;  %v1957_v27 = vadd.f32 %v5582_v24, %v1635_v4  ;;  %v5929_v8 = vadd.f32 %v5616_v53, %v6298_v38 }
 0x291   : > { %v3312_v34 = vmax.f32 %v3310_v57, %v3311_v16  ;;  %v3318_v43 = vrot.slane %v3317_v40, 2  ;;  %v3331_v20 = vmax.f32 %v3329_v63, %v3330_v36  ;;  %2059 = vst.msk [vmem:[%s5297_s13 + $0xa0] sm:$0xff] %vm1090_vm5, %v2027_v35  ;;  %v2443_v5 = vcombine.high %v2027_v35, %v2027_v35 }
 0x292   : > { %v3325_v45 = vrot.slane %v3324_v25, 2  ;;  %v2450_v62 = vrot.slane %v2027_v35, %v5291_v18  ;;  %v1996_v56 = vadd.f32 %v5636_v2, %v1957_v27  ;;  %v1958_v30 = vadd.f32 %v5622_v55, %v1640_v33 }
 0x293   : > { %v3313_v32 = vrot.slane %v3312_v34, 1  ;;  %v3319_v24 = vmax.f32 %v3317_v40, %v3318_v43  ;;  %v3332_v4 = vrot.slane %v3331_v20, 2  ;;  %v2457_v53 = vrot.slane %v2443_v5, %v5291_v18 }
 0x294   : > { %v3326_v3 = vmax.f32 %v3324_v25, %v3325_v45  ;;  %v2458_v60 = vcombine.high %v2450_v62, %v2450_v62  ;;  %v3336_v11 = vsel %vm2775_vm6, %v2450_v62, -inf  ;;  %v2028_v15 = vmax.f32 %v1996_v56, 0.0 }
 0x295   : > { %v3314_v10 = vmax.f32 %v3312_v34, %v3313_v32  ;;  %v3320_v7 = vrot.slane %v3319_v24, 1  ;;  %v3333_v19 = vmax.f32 %v3331_v20, %v3332_v4  ;;  %v2459_v28 = vcombine.high %v2457_v53, %v2457_v53 }
 0x296   : > { %v3327_v26 = vrot.slane %v3326_v3, 1  ;;  %v3337_v44 = vrot.slane %v3336_v11, 4  ;;  %v3343_v2 = vsel %vm2775_vm6, %v2458_v60, -inf  ;;  %v3350_v55 = vsel %vm2775_vm6, %v2457_v53, -inf  ;;  %2060 = vst.msk [vmem:[%s5297_s13 + $0xa8] sm:$0xff] %vm1090_vm5, %v2028_v15 }
 0x297   : > { %v3321_v33 = vmax.f32 %v3319_v24, %v3320_v7  ;;  %v3334_v61 = vrot.slane %v3333_v19, 1  ;;  %v3781_v17 = vsel %vm1090_vm5, %v3314_v10, -inf  ;;  %v3344_v57 = vrot.slane %v3343_v2, 4  ;;  %v5962_v10 = vld [vmem:[%s6264_s4] ss:$0 sm:$0xff] }
 0x298   : > { %v3328_v51 = vmax.f32 %v3326_v3, %v3327_v26  ;;  %v3782_v48 = vmax.f32 %v5886_v59, %v3781_v17  ;;  %v3338_v52 = vmax.f32 %v3336_v11, %v3337_v44  ;;  %v3351_v14 = vrot.slane %v3350_v55, 4 }
 0x299   : > { %v3335_v63 = vmax.f32 %v3333_v19, %v3334_v61  ;;  %v3784_v16 = vsel %vm1090_vm5, %v3321_v33, -inf  ;;  %v3345_v40 = vmax.f32 %v3343_v2, %v3344_v57  ;;  %v3357_v36 = vsel %vm2775_vm6, %v2459_v28, -inf }
 0x29a   : > { %v3785_v35 = vmax.f32 %v5889_v54, %v3784_v16  ;;  %v3787_v25 = vsel %vm1090_vm5, %v3328_v51, -inf  ;;  %v3966_v27 = vsel %vm3934_vm10, %v3782_v48, %v3965_v6  ;;  %v3339_v38 = vrot.slane %v3338_v52, 2 }
 0x29b   : > { %v3788_v34 = vmax.f32 %v5892_v21, %v3787_v25  ;;  %v3790_v59 = vsel %vm1090_vm5, %v3335_v63, -inf  ;;  %v3346_v43 = vrot.slane %v3345_v40, 2  ;;  %v3352_v20 = vmax.f32 %v3350_v55, %v3351_v14 }
 0x29c   : > { %v3791_v5 = vmax.f32 %v5897_v23, %v3790_v59  ;;  %v3967_v45 = vsel %vm3936_vm11, %v3785_v35, %v3966_v27  ;;  %v3340_v62 = vmax.f32 %v3338_v52, %v3339_v38  ;;  %v3358_v56 = vrot.slane %v3357_v36, 4 }
 0x29d   : > { %v3968_v54 = vsel %vm3938_vm12, %v3788_v34, %v3967_v45  ;;  %v3347_v32 = vmax.f32 %v3345_v40, %v3346_v43  ;;  %v3353_v24 = vrot.slane %v3352_v20, 2  ;;  %v2460_v4 = vcombine.high %v2028_v15, %v2028_v15 }
 0x29e   : > { %v3969_v6 = vsel %vm3940_vm13, %v3791_v5, %v3968_v54  ;;  %v3341_v53 = vrot.slane %v3340_v62, 1  ;;  %v3359_v21 = vmax.f32 %v3357_v36, %v3358_v56  ;;  %v2467_v3 = vrot.slane %v2028_v15, %v5291_v18 }
 0x29f   : > { %4003 = vst.msk [vmem:[%s5463_s15 + $0x20] sm:$0xff] %vm1090_vm5, %v3969_v6  ;;  %v3348_v60 = vrot.slane %v3347_v32, 1  ;;  %v3354_v11 = vmax.f32 %v3352_v20, %v3353_v24  ;;  %v2474_v23 = vrot.slane %v2460_v4, %v5291_v18  ;;  %v1997_v7 = vadd.f32 %v5962_v10, %v1958_v30 }
 0x2a0   : > { %v3342_v19 = vmax.f32 %v3340_v62, %v3341_v53  ;;  %v3360_v28 = vrot.slane %v3359_v21, 2  ;;  %v2475_v26 = vcombine.high %v2467_v3, %v2467_v3  ;;  %v3364_v44 = vsel %vm2775_vm6, %v2467_v3, -inf }
 0x2a1   : > { %v3349_v2 = vmax.f32 %v3347_v32, %v3348_v60  ;;  %v3355_v15 = vrot.slane %v3354_v11, 1  ;;  %v2476_v55 = vcombine.high %v2474_v23, %v2474_v23  ;;  %v3365_v33 = vrot.slane %v3364_v44, 4 }
 0x2a2   : > { %v3361_v61 = vmax.f32 %v3359_v21, %v3360_v28  ;;  %v5967_v17 = vsel %vm1090_vm5, %v3342_v19, -inf  ;;  %v3371_v57 = vsel %vm2775_vm6, %v2475_v26, -inf  ;;  %v3378_v51 = vsel %vm2775_vm6, %v2474_v23, -inf }
 0x2a3   : > { %v3356_v48 = vmax.f32 %v3354_v11, %v3355_v15  ;;  %v5972_v30 = vsel %vm1090_vm5, %v3349_v2, -inf  ;;  %v3366_v52 = vmax.f32 %v3364_v44, %v3365_v33  ;;  %v3372_v14 = vrot.slane %v3371_v57, 4 }
 0x2a4   : > { %v3362_v63 = vrot.slane %v3361_v61, 1  ;;  %v3379_v16 = vrot.slane %v3378_v51, 4  ;;  %v3385_v40 = vsel %vm2775_vm6, %v2476_v55, -inf  ;;  %v2029_v36 = vmax.f32 %v1997_v7, 0.0 }
 0x2a5   : > { %v5976_v35 = vsel %vm1090_vm5, %v3356_v48, -inf  ;;  %v3367_v25 = vrot.slane %v3366_v52, 2  ;;  %v3373_v27 = vmax.f32 %v3371_v57, %v3372_v14  ;;  %v3386_v38 = vrot.slane %v3385_v40, 4 }
 0x2a6   : > { %v3363_v34 = vmax.f32 %v3361_v61, %v3362_v63  ;;  %v3380_v59 = vmax.f32 %v3378_v51, %v3379_v16  ;;  %2061 = vst.msk [vmem:[%s5297_s13 + $0xb0] sm:$0xff] %vm1090_vm5, %v2029_v36  ;;  %v2477_v43 = vcombine.high %v2029_v36, %v2029_v36  ;;  %v2484_v20 = vrot.slane %v2029_v36, %v5291_v18 }
 0x2a7   : > { %v3368_v5 = vmax.f32 %v3366_v52, %v3367_v25  ;;  %v3374_v45 = vrot.slane %v3373_v27, 2  ;;  %v3387_v62 = vmax.f32 %v3385_v40, %v3386_v38  ;;  %v1959_v56 = vadd.f32 %v5641_v41, %v5929_v8 }
 0x2a8   : > { %v5984_v54 = vsel %vm1090_vm5, %v3363_v34, -inf  ;;  %v3381_v32 = vrot.slane %v3380_v59, 2  ;;  %v2491_v24 = vrot.slane %v2477_v43, %v5291_v18  ;;  %v2492_v4 = vcombine.high %v2484_v20, %v2484_v20 }
 0x2a9   : > { %v3369_v6 = vrot.slane %v3368_v5, 1  ;;  %v3375_v53 = vmax.f32 %v3373_v27, %v3374_v45  ;;  %v3388_v21 = vrot.slane %v3387_v62, 2  ;;  %v3392_v3 = vsel %vm2775_vm6, %v2484_v20, -inf }
 0x2aa   : > { %v3382_v60 = vmax.f32 %v3380_v59, %v3381_v32  ;;  %v2493_v11 = vcombine.high %v2491_v24, %v2491_v24  ;;  %v3393_v23 = vrot.slane %v3392_v3, 4  ;;  %v3399_v7 = vsel %vm2775_vm6, %v2492_v4, -inf  ;;  %v6300_v4 = vld [vmem:[#allocation9_spill] sm:$0xff] }
 0x2ab   : > { %v3370_v19 = vmax.f32 %v3368_v5, %v3369_v6  ;;  %v3376_v28 = vrot.slane %v3375_v53, 1  ;;  %v3389_v41 = vmax.f32 %v3387_v62, %v3388_v21  ;;  %v3400_v8 = vrot.slane %v3399_v7, 4  ;;  %v6299_v5 = vld [vmem:[#allocation8_spill] sm:$0xff] }
 0x2ac   : > { %v3383_v26 = vrot.slane %v3382_v60, 1  ;;  %v3394_v44 = vmax.f32 %v3392_v3, %v3393_v23  ;;  %v3406_v2 = vsel %vm2775_vm6, %v2491_v24, -inf  ;;  %v3413_v15 = vsel %vm2775_vm6, %v2493_v11, -inf }
 0x2ad   : > { %v3377_v55 = vmax.f32 %v3375_v53, %v3376_v28  ;;  %v3390_v33 = vrot.slane %v3389_v41, 1  ;;  %v5992_v61 = vsel %vm1090_vm5, %v3370_v19, -inf  ;;  %v3401_v57 = vmax.f32 %v3399_v7, %v3400_v8 }
 0x2ae   : > { %v3384_v51 = vmax.f32 %v3382_v60, %v3383_v26  ;;  %v3395_v48 = vrot.slane %v3394_v44, 2  ;;  %v3407_v52 = vrot.slane %v3406_v2, 4  ;;  %v3414_v14 = vrot.slane %v3413_v15, 4 }
 0x2af   : > { %v3391_v63 = vmax.f32 %v3389_v41, %v3390_v33  ;;  %v5995_v16 = vsel %vm1090_vm5, %v3377_v55, -inf  ;;  %v3402_v40 = vrot.slane %v3401_v57, 2  ;;  %v1998_v36 = vadd.f32 %v5962_v10, %v1959_v56 }
 0x2b0   : > { %v5999_v25 = vsel %vm1090_vm5, %v3384_v51, -inf  ;;  %v3396_v27 = vmax.f32 %v3394_v44, %v3395_v48  ;;  %v3408_v38 = vmax.f32 %v3406_v2, %v3407_v52  ;;  %v3415_v34 = vmax.f32 %v3413_v15, %v3414_v14 }
 0x2b1   : > { %v6002_v59 = vsel %vm1090_vm5, %v3391_v63, -inf  ;;  %v3403_v43 = vmax.f32 %v3401_v57, %v3402_v40  ;;  %v2030_v20 = vmax.f32 %v1998_v36, 0.0  ;;  %v1648_v45 = vadd.f32 %v5669_v47, %v6299_v5 }
 0x2b2   : > { %v3397_v62 = vrot.slane %v3396_v27, 1  ;;  %v3409_v32 = vrot.slane %v3408_v38, 2  ;;  %v3416_v24 = vrot.slane %v3415_v34, 2  ;;  %v1651_v56 = vadd.f32 %v5675_v42, %v6300_v4 }
 0x2b3   : > { %v3404_v6 = vrot.slane %v3403_v43, 1  ;;  %2062 = vst.msk [vmem:[%s5297_s13 + $0xb8] sm:$0xff] %vm1090_vm5, %v2030_v20  ;;  %v2494_v53 = vcombine.high %v2030_v20, %v2030_v20  ;;  %v2501_v21 = vrot.slane %v2030_v20, %v5291_v18  ;;  %v1960_v3 = vadd.f32 %v5682_v22, %v1648_v45 }
 0x2b4   : > { %v3398_v60 = vmax.f32 %v3396_v27, %v3397_v62  ;;  %v3410_v11 = vmax.f32 %v3408_v38, %v3409_v32  ;;  %v3417_v23 = vmax.f32 %v3415_v34, %v3416_v24  ;;  %v1961_v7 = vadd.f32 %v5709_v50, %v1651_v56  ;;  %v6301_v56 = vld [vmem:[#allocation10_spill] sm:$0xff] }
 0x2b5   : > { %v3405_v47 = vmax.f32 %v3403_v43, %v3404_v6  ;;  %v2508_v19 = vrot.slane %v2494_v53, %v5291_v18  ;;  %v2509_v28 = vcombine.high %v2501_v21, %v2501_v21  ;;  %v3420_v41 = vsel %vm2775_vm6, %v2501_v21, -inf }
 0x2b6   : > { %v3411_v42 = vrot.slane %v3410_v11, 1  ;;  %v3418_v8 = vrot.slane %v3417_v23, 1  ;;  %v3793_v26 = vsel %vm1090_vm5, %v3398_v60, -inf  ;;  %v3421_v44 = vrot.slane %v3420_v41, 4 }
 0x2b7   : > { %v3794_v2 = vmax.f32 %v5967_v17, %v3793_v26  ;;  %v3796_v22 = vsel %vm1090_vm5, %v3405_v47, -inf  ;;  %v2510_v15 = vcombine.high %v2508_v19, %v2508_v19  ;;  %v3427_v55 = vsel %vm2775_vm6, %v2509_v28, -inf  ;;  %v6302_v28 = vld [vmem:[#allocation11_spill] sm:$0xff] }
 0x2b8   : > { %v3412_v33 = vmax.f32 %v3410_v11, %v3411_v42  ;;  %v3419_v50 = vmax.f32 %v3417_v23, %v3418_v8  ;;  %v3797_v57 = vmax.f32 %v5972_v30, %v3796_v22  ;;  %v3422_v51 = vmax.f32 %v3420_v41, %v3421_v44 }
 0x2b9   : > { %v3428_v48 = vrot.slane %v3427_v55, 4  ;;  %v3434_v52 = vsel %vm2775_vm6, %v2508_v19, -inf  ;;  %v3441_v14 = vsel %vm2775_vm6, %v2510_v15, -inf  ;;  %v1999_v63 = vadd.f32 %v5962_v10, %v1960_v3 }
 0x2ba   : > { %v3799_v40 = vsel %vm1090_vm5, %v3412_v33, -inf  ;;  %v3802_v17 = vsel %vm1090_vm5, %v3419_v50, -inf  ;;  %v3970_v36 = vsel %vm3928_vm7, %v3797_v57, %v3794_v2  ;;  %v3423_v27 = vrot.slane %v3422_v51, 2 }
 0x2bb   : > { %v3800_v38 = vmax.f32 %v5976_v35, %v3799_v40  ;;  %v3803_v30 = vmax.f32 %v5984_v54, %v3802_v17  ;;  %v3429_v34 = vmax.f32 %v3427_v55, %v3428_v48  ;;  %v3435_v43 = vrot.slane %v3434_v52, 4 }
 0x2bc   : > { %v3424_v20 = vmax.f32 %v3422_v51, %v3423_v27  ;;  %v3442_v5 = vrot.slane %v3441_v14, 4  ;;  %v2031_v45 = vmax.f32 %v1999_v63, 0.0  ;;  %v2000_v62 = vadd.f32 %v5962_v10, %v1961_v7 }
 0x2bd   : > { %v3971_v32 = vsel %vm3930_vm8, %v3800_v38, %v3970_v36  ;;  %v3430_v24 = vrot.slane %v3429_v34, 2  ;;  %v3436_v4 = vmax.f32 %v3434_v52, %v3435_v43  ;;  %v6032_v6 = vadd.f32 %v5735_v12, %v6301_v56 }
 0x2be   : > { %v3425_v53 = vrot.slane %v3424_v20, 1  ;;  %v3443_v21 = vmax.f32 %v3441_v14, %v3442_v5  ;;  %v3972_v35 = vsel %vm3932_vm9, %v3803_v30, %v3971_v32  ;;  %2063 = vst.msk [vmem:[%s5297_s13 + $0xc0] sm:$0xff] %vm1090_vm5, %v2031_v45  ;;  %v2511_v54 = vcombine.high %v2031_v45, %v2031_v45 }
 0x2bf   : > { %v3431_v3 = vmax.f32 %v3429_v34, %v3430_v24  ;;  %v3437_v60 = vrot.slane %v3436_v4, 2  ;;  %v2518_v11 = vrot.slane %v2031_v45, %v5291_v18  ;;  %v2032_v23 = vmax.f32 %v2000_v62, 0.0 }
 0x2c0   : > { %v3426_v7 = vmax.f32 %v3424_v20, %v3425_v53  ;;  %v3444_v47 = vrot.slane %v3443_v21, 2  ;;  %v2525_v19 = vrot.slane %v2511_v54, %v5291_v18  ;;  %v6041_v12 = vadd.f32 %v5738_v0, %v6302_v28 }
 0x2c1   : > { %v3432_v41 = vrot.slane %v3431_v3, 1  ;;  %v3438_v42 = vmax.f32 %v3436_v4, %v3437_v60  ;;  %v2526_v8 = vcombine.high %v2518_v11, %v2518_v11  ;;  %v3448_v26 = vsel %vm2775_vm6, %v2518_v11, -inf  ;;  %2064 = vst.msk [vmem:[%s5297_s13 + $0xc8] sm:$0xff] %vm1090_vm5, %v2032_v23 }
 0x2c2   : > { %v3445_v44 = vmax.f32 %v3443_v21, %v3444_v47  ;;  %v3805_v2 = vsel %vm1090_vm5, %v3426_v7, -inf  ;;  %v2527_v22 = vcombine.high %v2525_v19, %v2525_v19  ;;  %v3449_v15 = vrot.slane %v3448_v26, 4 }
 0x2c3   : > { %v3433_v55 = vmax.f32 %v3431_v3, %v3432_v41  ;;  %v3439_v33 = vrot.slane %v3438_v42, 1  ;;  %v3806_v50 = vmax.f32 %v5992_v61, %v3805_v2  ;;  %v3455_v57 = vsel %vm2775_vm6, %v2526_v8, -inf }
 0x2c4   : > { %v3446_v0 = vrot.slane %v3445_v44, 1  ;;  %v3450_v51 = vmax.f32 %v3448_v26, %v3449_v15  ;;  %v3456_v48 = vrot.slane %v3455_v57, 4  ;;  %v3462_v52 = vsel %vm2775_vm6, %v2525_v19, -inf }
 0x2c5   : > { %v3440_v14 = vmax.f32 %v3438_v42, %v3439_v33  ;;  %v3808_v63 = vsel %vm1090_vm5, %v3433_v55, -inf  ;;  %v3973_v40 = vsel %vm3934_vm10, %v3806_v50, %v3972_v35  ;;  %v3463_v17 = vrot.slane %v3462_v52, 4 }
 0x2c6   : > { %v3447_v36 = vmax.f32 %v3445_v44, %v3446_v0  ;;  %v3809_v27 = vmax.f32 %v5995_v16, %v3808_v63  ;;  %v3451_v38 = vrot.slane %v3450_v51, 2  ;;  %v3457_v30 = vmax.f32 %v3455_v57, %v3456_v48 }
 0x2c7   : > { %v3811_v61 = vsel %vm1090_vm5, %v3440_v14, -inf  ;;  %v3464_v34 = vmax.f32 %v3462_v52, %v3463_v17  ;;  %v3469_v43 = vsel %vm2775_vm6, %v2527_v22, -inf  ;;  %v2528_v20 = vcombine.high %v2032_v23, %v2032_v23 }
 0x2c8   : > { %v3812_v5 = vmax.f32 %v5999_v25, %v3811_v61  ;;  %v3814_v45 = vsel %vm1090_vm5, %v3447_v36, -inf  ;;  %v3974_v62 = vsel %vm3936_vm11, %v3809_v27, %v3973_v40  ;;  %v3452_v32 = vmax.f32 %v3450_v51, %v3451_v38 }
 0x2c9   : > { %v3815_v24 = vmax.f32 %v6002_v59, %v3814_v45  ;;  %v3458_v4 = vrot.slane %v3457_v30, 2  ;;  %v3465_v16 = vrot.slane %v3464_v34, 2  ;;  %v3470_v56 = vrot.slane %v3469_v43, 4 }
 0x2ca   : > { %v3975_v53 = vsel %vm3938_vm12, %v3812_v5, %v3974_v62  ;;  %v3453_v21 = vrot.slane %v3452_v32, 1  ;;  %v2535_v35 = vrot.slane %v2032_v23, %v5291_v18  ;;  %v2542_v54 = vrot.slane %v2528_v20, %v5291_v18 }
 0x2cb   : > { %v3976_v25 = vsel %vm3940_vm13, %v3815_v24, %v3975_v53  ;;  %v3459_v3 = vmax.f32 %v3457_v30, %v3458_v4  ;;  %v3466_v60 = vmax.f32 %v3464_v34, %v3465_v16  ;;  %v3471_v11 = vmax.f32 %v3469_v43, %v3470_v56 }
 0x2cc   : > { %4004 = vst.msk [vmem:[%s5463_s15 + $0x28] sm:$0xff] %vm1090_vm5, %v3976_v25  ;;  %v3454_v7 = vmax.f32 %v3452_v32, %v3453_v21  ;;  %v2543_v47 = vcombine.high %v2535_v35, %v2535_v35  ;;  %v2544_v59 = vcombine.high %v2542_v54, %v2542_v54  ;;  %v3476_v19 = vsel %vm2775_vm6, %v2535_v35, -inf  ;;  %v6304_v32 = vld [vmem:[#allocation13_spill] sm:$0xff] }
 0x2cd   : > { %v3460_v28 = vrot.slane %v3459_v3, 1  ;;  %v3467_v41 = vrot.slane %v3466_v60, 1  ;;  %v3472_v42 = vrot.slane %v3471_v11, 2  ;;  %v3477_v8 = vrot.slane %v3476_v19, 4 }
 0x2ce   : > { %v3483_v23 = vsel %vm2775_vm6, %v2543_v47, -inf  ;;  %v3490_v26 = vsel %vm2775_vm6, %v2542_v54, -inf  ;;  %v3497_v44 = vsel %vm2775_vm6, %v2544_v59, -inf  ;;  %v1962_v0 = vadd.f32 %v5740_v39, %v6032_v6  ;;  %v6303_v6 = vld [vmem:[#allocation12_spill] sm:$0xff] }
 0x2cf   : > { %v3461_v2 = vmax.f32 %v3459_v3, %v3460_v28  ;;  %v3468_v22 = vmax.f32 %v3466_v60, %v3467_v41  ;;  %v3473_v15 = vmax.f32 %v3471_v11, %v3472_v42  ;;  %v3478_v55 = vmax.f32 %v3476_v19, %v3477_v8 }
 0x2d0   : > { %v3484_v33 = vrot.slane %v3483_v23, 4  ;;  %v3491_v50 = vrot.slane %v3490_v26, 4  ;;  %v3498_v57 = vrot.slane %v3497_v44, 4  ;;  %v6072_v48 = vsel %vm1090_vm5, %v3454_v7, -inf }
 0x2d1   : > { %v3474_v51 = vrot.slane %v3473_v15, 1  ;;  %v6075_v52 = vsel %vm1090_vm5, %v3461_v2, -inf  ;;  %v3479_v14 = vrot.slane %v3478_v55, 2  ;;  %v2001_v36 = vadd.f32 %v5962_v10, %v1962_v0 }
 0x2d2   : > { %v3485_v63 = vmax.f32 %v3483_v23, %v3484_v33  ;;  %v3492_v40 = vmax.f32 %v3490_v26, %v3491_v50  ;;  %v3499_v17 = vmax.f32 %v3497_v44, %v3498_v57  ;;  %v6079_v27 = vsel %vm1090_vm5, %v3468_v22, -inf }
 0x2d3   : > { %v3480_v38 = vmax.f32 %v3478_v55, %v3479_v14  ;;  %v1963_v39 = vadd.f32 %v5772_v13, %v6041_v12  ;;  %v1664_v30 = vadd.f32 %v5793_v1, %v6303_v6  ;;  %v2033_v20 = vmax.f32 %v2001_v36, 0.0 }
 0x2d4   : > { %v3486_v61 = vrot.slane %v3485_v63, 2  ;;  %v3493_v34 = vrot.slane %v3492_v40, 2  ;;  %v3500_v43 = vrot.slane %v3499_v17, 2  ;;  %v3475_v5 = vmax.f32 %v3473_v15, %v3474_v51 }
 0x2d5   : > { %v3481_v45 = vrot.slane %v3480_v38, 1  ;;  %v2002_v62 = vadd.f32 %v5962_v10, %v1963_v39  ;;  %v6088_v24 = vadd.f32 %v5796_v31, %v6304_v32  ;;  %2065 = vst.msk [vmem:[%s5297_s13 + $0xd0] sm:$0xff] %vm1090_vm5, %v2033_v20  ;;  %v2545_v13 = vcombine.high %v2033_v20, %v2033_v20 }
 0x2d6   : > { %v3487_v4 = vmax.f32 %v3485_v63, %v3486_v61  ;;  %v3494_v16 = vmax.f32 %v3492_v40, %v3493_v34  ;;  %v3501_v56 = vmax.f32 %v3499_v17, %v3500_v43  ;;  %v2552_v12 = vrot.slane %v2033_v20, %v5291_v18 }
 0x2d7   : > { %v3482_v1 = vmax.f32 %v3480_v38, %v3481_v45  ;;  %v2034_v53 = vmax.f32 %v2002_v62, 0.0  ;;  %v6094_v21 = vadd.f32 %v5802_v46, %v1664_v30  ;;  %v2559_v31 = vrot.slane %v2545_v13, %v5291_v18 }
 0x2d8   : > { %v3488_v35 = vrot.slane %v3487_v4, 1  ;;  %v3495_v54 = vrot.slane %v3494_v16, 1  ;;  %v3502_v25 = vrot.slane %v3501_v56, 1  ;;  %v6098_v3 = vsel %vm1090_vm5, %v3475_v5, -inf }
 0x2d9   : > { %v2560_v60 = vcombine.high %v2552_v12, %v2552_v12  ;;  %v3504_v11 = vsel %vm2775_vm6, %v2552_v12, -inf  ;;  %2066 = vst.msk [vmem:[%s5297_s13 + $0xd8] sm:$0xff] %vm1090_vm5, %v2034_v53  ;;  %v2562_v7 = vcombine.high %v2034_v53, %v2034_v53  ;;  %v6104_v19 = vsel %vm1090_vm5, %v3482_v1, -inf }
 0x2da   : > { %v3489_v47 = vmax.f32 %v3487_v4, %v3488_v35  ;;  %v3496_v59 = vmax.f32 %v3494_v16, %v3495_v54  ;;  %v2561_v46 = vcombine.high %v2559_v31, %v2559_v31  ;;  %v3505_v28 = vrot.slane %v3504_v11, 4 }
 0x2db   : > { %v3511_v41 = vsel %vm2775_vm6, %v2560_v60, -inf  ;;  %v3518_v42 = vsel %vm2775_vm6, %v2559_v31, -inf  ;;  %v2569_v8 = vrot.slane %v2034_v53, %v5291_v18  ;;  %v6109_v23 = vmax.f32 %v3501_v56, %v3502_v25 }
 0x2dc   : > { %v6112_v26 = vsel %vm1090_vm5, %v3489_v47, -inf  ;;  %v6115_v44 = vsel %vm1090_vm5, %v3496_v59, -inf  ;;  %v3512_v2 = vrot.slane %v3511_v41, 4  ;;  %v3506_v22 = vmax.f32 %v3504_v11, %v3505_v28 }
 0x2dd   : > { %v3519_v15 = vrot.slane %v3518_v42, 4  ;;  %v3525_v55 = vsel %vm2775_vm6, %v2561_v46, -inf  ;;  %v2576_v33 = vrot.slane %v2562_v7, %v5291_v18  ;;  %v2577_v0 = vcombine.high %v2569_v8, %v2569_v8 }
 0x2de   : > { %v3513_v50 = vmax.f32 %v3511_v41, %v3512_v2  ;;  %v3526_v57 = vrot.slane %v3525_v55, 4  ;;  %v3532_v51 = vsel %vm2775_vm6, %v2569_v8, -inf  ;;  %v3507_v14 = vrot.slane %v3506_v22, 2 }
 0x2df   : > { %v3520_v63 = vmax.f32 %v3518_v42, %v3519_v15  ;;  %v2578_v40 = vcombine.high %v2576_v33, %v2576_v33  ;;  %v3533_v17 = vrot.slane %v3532_v51, 4  ;;  %v3539_v39 = vsel %vm2775_vm6, %v2577_v0, -inf }
 0x2e0   : > { %v3514_v36 = vrot.slane %v3513_v50, 2  ;;  %v3527_v38 = vmax.f32 %v3525_v55, %v3526_v57  ;;  %v3546_v6 = vsel %vm2775_vm6, %v2576_v33, -inf  ;;  %v3508_v30 = vmax.f32 %v3506_v22, %v3507_v14 }
 0x2e1   : > { %v3521_v61 = vrot.slane %v3520_v63, 2  ;;  %v3534_v34 = vmax.f32 %v3532_v51, %v3533_v17  ;;  %v3540_v43 = vrot.slane %v3539_v39, 4  ;;  %v3547_v45 = vrot.slane %v3546_v6, 4 }
 0x2e2   : > { %v3515_v20 = vmax.f32 %v3513_v50, %v3514_v36  ;;  %v3528_v5 = vrot.slane %v3527_v38, 2  ;;  %v3553_v62 = vsel %vm2775_vm6, %v2578_v40, -inf  ;;  %v3509_v32 = vrot.slane %v3508_v30, 1 }
 0x2e3   : > { %v3522_v4 = vmax.f32 %v3520_v63, %v3521_v61  ;;  %v3535_v16 = vrot.slane %v3534_v34, 2  ;;  %v3541_v56 = vmax.f32 %v3539_v39, %v3540_v43  ;;  %v3548_v12 = vmax.f32 %v3546_v6, %v3547_v45 }
 0x2e4   : > { %v3516_v13 = vrot.slane %v3515_v20, 1  ;;  %v3529_v1 = vmax.f32 %v3527_v38, %v3528_v5  ;;  %v3554_v53 = vrot.slane %v3553_v62, 4  ;;  %v3510_v35 = vmax.f32 %v3508_v30, %v3509_v32 }
 0x2e5   : > { %v3523_v54 = vrot.slane %v3522_v4, 1  ;;  %v3536_v25 = vmax.f32 %v3534_v34, %v3535_v16  ;;  %v3542_v31 = vrot.slane %v3541_v56, 2  ;;  %v3549_v7 = vrot.slane %v3548_v12, 2 }
 0x2e6   : > { %v3517_v60 = vmax.f32 %v3515_v20, %v3516_v13  ;;  %v3530_v11 = vrot.slane %v3529_v1, 1  ;;  %v3555_v47 = vmax.f32 %v3553_v62, %v3554_v53  ;;  %v3817_v46 = vsel %vm1090_vm5, %v3510_v35, -inf  ;;  %v6305_v62 = vld [vmem:[#allocation14_spill] sm:$0xff] }
 0x2e7   : > { %v3524_v59 = vmax.f32 %v3522_v4, %v3523_v54  ;;  %v3537_v28 = vrot.slane %v3536_v25, 1  ;;  %v3543_v41 = vmax.f32 %v3541_v56, %v3542_v31  ;;  %v3818_v8 = vmax.f32 %v6072_v48, %v3817_v46 }
 0x2e8   : > { %v3531_v42 = vmax.f32 %v3529_v1, %v3530_v11  ;;  %v3820_v2 = vsel %vm1090_vm5, %v3517_v60, -inf  ;;  %v3550_v22 = vmax.f32 %v3548_v12, %v3549_v7  ;;  %v3556_v14 = vrot.slane %v3555_v47, 2 }
 0x2e9   : > { %v3821_v15 = vmax.f32 %v6075_v52, %v3820_v2  ;;  %v3823_v55 = vsel %vm1090_vm5, %v3524_v59, -inf  ;;  %v3538_v33 = vmax.f32 %v3536_v25, %v3537_v28  ;;  %v3544_v50 = vrot.slane %v3543_v41, 1 }
 0x2ea   : > { %v3824_v57 = vmax.f32 %v6079_v27, %v3823_v55  ;;  %v3826_v0 = vsel %vm1090_vm5, %v3531_v42, -inf  ;;  %v3551_v51 = vrot.slane %v3550_v22, 1  ;;  %v3557_v38 = vmax.f32 %v3555_v47, %v3556_v14 }
 0x2eb   : > { %v3827_v63 = vmax.f32 %v6098_v3, %v3826_v0  ;;  %v3977_v40 = vsel %vm3928_vm7, %v3821_v15, %v3818_v8  ;;  %v3545_v48 = vmax.f32 %v3543_v41, %v3544_v50  ;;  %v3829_v17 = vsel %vm1090_vm5, %v3538_v33, -inf }
 0x2ec   : > { %v3978_v36 = vsel %vm3930_vm8, %v3824_v57, %v3977_v40  ;;  %v3552_v52 = vmax.f32 %v3550_v22, %v3551_v51  ;;  %v3830_v39 = vmax.f32 %v6104_v19, %v3829_v17  ;;  %v2003_v30 = vadd.f32 %v5962_v10, %v6094_v21 }
 0x2ed   : > { %v3832_v6 = vsel %vm1090_vm5, %v3545_v48, -inf  ;;  %v3979_v27 = vsel %vm3932_vm9, %v3827_v63, %v3978_v36  ;;  %v1965_v3 = vadd.f32 %v5829_v58, %v6088_v24  ;;  %v3558_v61 = vrot.slane %v3557_v38, 1  ;;  %v6306_v58 = vld [vmem:[#allocation15_spill] sm:$0xff] }
 0x2ee   : > { %v3833_v34 = vmax.f32 %v6112_v26, %v3832_v6  ;;  %v3835_v43 = vsel %vm1090_vm5, %v3552_v52, -inf  ;;  %v3980_v20 = vsel %vm3934_vm10, %v3830_v39, %v3979_v27  ;;  %v2035_v5 = vmax.f32 %v2003_v30, 0.0 }
 0x2ef   : > { %v3836_v19 = vmax.f32 %v6115_v44, %v3835_v43  ;;  %v2004_v45 = vadd.f32 %v5962_v10, %v1965_v3  ;;  %v1672_v32 = vadd.f32 %v5843_v49, %v6305_v62  ;;  %v3559_v4 = vmax.f32 %v3557_v38, %v3558_v61 }
 0x2f0   : > { %v3981_v21 = vsel %vm3936_vm11, %v3833_v34, %v3980_v20  ;;  %v1675_v24 = vadd.f32 %v5854_v9, %v6306_v58  ;;  %2067 = vst.msk [vmem:[%s5297_s13 + $0xe0] sm:$0xff] %vm1090_vm5, %v2035_v5  ;;  %v2579_v16 = vcombine.high %v2035_v5, %v2035_v5  ;;  %v2586_v44 = vrot.slane %v2035_v5, %v5291_v18 }
 0x2f1   : > { %v3982_v26 = vsel %vm3938_vm12, %v3836_v19, %v3981_v21  ;;  %v2036_v56 = vmax.f32 %v2004_v45, 0.0  ;;  %v3837_v13 = vsel %vm1090_vm5, %v6109_v23, -inf  ;;  %v3838_v49 = vsel %vm1090_vm5, %v3559_v4, -inf }
 0x2f2   : > { %v1966_v1 = vadd.f32 %v5864_v29, %v1672_v32  ;;  %v6160_v12 = vadd.f32 %v5883_v37, %v1675_v24  ;;  %v3839_v9 = vmax.f32 %v3837_v13, %v3838_v49  ;;  %v2593_v53 = vrot.slane %v2579_v16, %v5291_v18 }
 0x2f3   : > { %v2594_v35 = vcombine.high %v2586_v44, %v2586_v44  ;;  %v3560_v54 = vsel %vm2775_vm6, %v2586_v44, -inf  ;;  %2068 = vst.msk [vmem:[%s5297_s13 + $0xe8] sm:$0xff] %vm1090_vm5, %v2036_v56  ;;  %v2596_v31 = vcombine.high %v2036_v56, %v2036_v56  ;;  %v2603_v23 = vrot.slane %v2036_v56, %v5291_v18 }
 0x2f4   : > { %v3561_v25 = vrot.slane %v3560_v54, 4  ;;  %v2005_v60 = vadd.f32 %v5962_v10, %v1966_v1  ;;  %v3983_v11 = vsel %vm3940_vm13, %v3839_v9, %v3982_v26  ;;  %v2595_v29 = vcombine.high %v2593_v53, %v2593_v53 }
 0x2f5   : > { %v3567_v37 = vsel %vm2775_vm6, %v2594_v35, -inf  ;;  %v3574_v7 = vsel %vm2775_vm6, %v2593_v53, -inf  ;;  %4005 = vst.msk [vmem:[%s5463_s15 + $0x30] sm:$0xff] %vm1090_vm5, %v3983_v11  ;;  %v2610_v28 = vrot.slane %v2596_v31, %v5291_v18  ;;  %v2611_v42 = vcombine.high %v2603_v23, %v2603_v23 }
 0x2f6   : > { %v3562_v47 = vmax.f32 %v3560_v54, %v3561_v25  ;;  %v3568_v59 = vrot.slane %v3567_v37, 4  ;;  %v3575_v46 = vrot.slane %v3574_v7, 4  ;;  %v3581_v41 = vsel %vm2775_vm6, %v2595_v29, -inf }
 0x2f7   : > { %v3588_v8 = vsel %vm2775_vm6, %v2603_v23, -inf  ;;  %v2037_v2 = vmax.f32 %v2005_v60, 0.0  ;;  %v3582_v33 = vrot.slane %v3581_v41, 4  ;;  %v2612_v50 = vcombine.high %v2610_v28, %v2610_v28 }
 0x2f8   : > { %v3563_v22 = vrot.slane %v3562_v47, 2  ;;  %v3569_v15 = vmax.f32 %v3567_v37, %v3568_v59  ;;  %v3576_v55 = vmax.f32 %v3574_v7, %v3575_v46  ;;  %v3589_v57 = vrot.slane %v3588_v8, 4 }
 0x2f9   : > { %v3595_v0 = vsel %vm2775_vm6, %v2611_v42, -inf  ;;  %v3602_v51 = vsel %vm2775_vm6, %v2610_v28, -inf  ;;  %2069 = vst.msk [vmem:[%s5297_s13 + $0xf0] sm:$0xff] %vm1090_vm5, %v2037_v2  ;;  %v3583_v48 = vmax.f32 %v3581_v41, %v3582_v33  ;;  %v3609_v38 = vsel %vm2775_vm6, %v2612_v50, -inf }
 0x2fa   : > { %v3564_v14 = vmax.f32 %v3562_v47, %v3563_v22  ;;  %v3570_v63 = vrot.slane %v3569_v15, 2  ;;  %v3577_v40 = vrot.slane %v3576_v55, 2  ;;  %v3590_v17 = vmax.f32 %v3588_v8, %v3589_v57 }
 0x2fb   : > { %v3596_v36 = vrot.slane %v3595_v0, 4  ;;  %v3603_v52 = vrot.slane %v3602_v51, 4  ;;  %v3584_v30 = vrot.slane %v3583_v48, 2  ;;  %v3610_v43 = vrot.slane %v3609_v38, 4 }
 0x2fc   : > { %v3565_v39 = vrot.slane %v3564_v14, 1  ;;  %v3571_v6 = vmax.f32 %v3569_v15, %v3570_v63  ;;  %v3578_v27 = vmax.f32 %v3576_v55, %v3577_v40  ;;  %v3591_v3 = vrot.slane %v3590_v17, 2 }
 0x2fd   : > { %v3597_v61 = vmax.f32 %v3595_v0, %v3596_v36  ;;  %v3604_v34 = vmax.f32 %v3602_v51, %v3603_v52  ;;  %v3585_v19 = vmax.f32 %v3583_v48, %v3584_v30  ;;  %v3611_v24 = vmax.f32 %v3609_v38, %v3610_v43 }
 0x2fe   : > { %v3572_v20 = vrot.slane %v3571_v6, 1  ;;  %v3579_v5 = vrot.slane %v3578_v27, 1  ;;  %v3592_v45 = vmax.f32 %v3590_v17, %v3591_v3  ;;  %v3566_v32 = vmax.f32 %v3564_v14, %v3565_v39 }
 0x2ff   : > { %v3598_v62 = vrot.slane %v3597_v61, 2  ;;  %v3586_v21 = vrot.slane %v3585_v19, 1  ;;  %v3605_v58 = vrot.slane %v3604_v34, 2  ;;  %v2613_v26 = vcombine.high %v2037_v2, %v2037_v2 }
 0x300   : > { %v3573_v4 = vmax.f32 %v3571_v6, %v3572_v20  ;;  %v3580_v16 = vmax.f32 %v3578_v27, %v3579_v5  ;;  %v3593_v44 = vrot.slane %v3592_v45, 1  ;;  %v6184_v13 = vsel %vm1090_vm5, %v3566_v32, -inf }
 0x301   : > { %v6181_v56 = vmax.f32 %v3597_v61, %v3598_v62  ;;  %v2620_v49 = vrot.slane %v2037_v2, %v5291_v18  ;;  %v2627_v1 = vrot.slane %v2613_v26, %v5291_v18  ;;  %v2006_v9 = vadd.f32 %v5962_v10, %v6160_v12 }
 0x302   : > { %v3587_v53 = vmax.f32 %v3585_v19, %v3586_v21  ;;  %v6191_v35 = vsel %vm1090_vm5, %v3573_v4, -inf  ;;  %v6193_v54 = vmax.f32 %v3604_v34, %v3605_v58  ;;  %v3612_v25 = vrot.slane %v3611_v24, 2 }
 0x303   : > { %v2628_v31 = vcombine.high %v2620_v49, %v2620_v49  ;;  %v2629_v23 = vcombine.high %v2627_v1, %v2627_v1  ;;  %v3616_v60 = vsel %vm2775_vm6, %v2620_v49, -inf  ;;  %v3630_v11 = vsel %vm2775_vm6, %v2627_v1, -inf }
 0x304   : > { %v6198_v29 = vsel %vm1090_vm5, %v3580_v16, -inf  ;;  %v6200_v37 = vmax.f32 %v3592_v45, %v3593_v44  ;;  %v3600_v10 = vrot.slane %v6181_v56, 1  ;;  %v3617_v12 = vrot.slane %v3616_v60, 4 }
 0x305   : > { %v3623_v7 = vsel %vm2775_vm6, %v2628_v31, -inf  ;;  %v3631_v47 = vrot.slane %v3630_v11, 4  ;;  %v3637_v59 = vsel %vm2775_vm6, %v2629_v23, -inf  ;;  %v2038_v46 = vmax.f32 %v2006_v9, 0.0 }
 0x306   : > { %v3607_v28 = vrot.slane %v6193_v54, 1  ;;  %v3618_v41 = vmax.f32 %v3616_v60, %v3617_v12  ;;  %v3624_v42 = vrot.slane %v3623_v7, 4  ;;  %v3638_v8 = vrot.slane %v3637_v59, 4 }
 0x307   : > { %v6206_v2 = vmax.f32 %v3611_v24, %v3612_v25  ;;  %v3632_v22 = vmax.f32 %v3630_v11, %v3631_v47  ;;  %2070 = vst.msk [vmem:[%s5297_s13 + $0xf8] sm:$0xff] %vm1090_vm5, %v2038_v46  ;;  %v2630_v15 = vcombine.high %v2038_v46, %v2038_v46  ;;  %v2637_v55 = vrot.slane %v2038_v46, %v5291_v18 }
 0x308   : > { %v6212_v33 = vsel %vm1090_vm5, %v3587_v53, -inf  ;;  %v3619_v50 = vrot.slane %v3618_v41, 2  ;;  %v3625_v57 = vmax.f32 %v3623_v7, %v3624_v42  ;;  %v3639_v0 = vmax.f32 %v3637_v59, %v3638_v8 }
 0x309   : > { %v3633_v51 = vrot.slane %v3632_v22, 2  ;;  %v2644_v14 = vrot.slane %v2630_v15, %v5291_v18  ;;  %v2645_v63 = vcombine.high %v2637_v55, %v2637_v55  ;;  %v3644_v40 = vsel %vm2775_vm6, %v2637_v55, -inf }
 0x30a   : > { %v3620_v48 = vmax.f32 %v3618_v41, %v3619_v50  ;;  %v3626_v17 = vrot.slane %v3625_v57, 2  ;;  %v3640_v36 = vrot.slane %v3639_v0, 2  ;;  %v3645_v52 = vrot.slane %v3644_v40, 4 }
 0x30b   : > { %v3634_v38 = vmax.f32 %v3632_v22, %v3633_v51  ;;  %v2646_v39 = vcombine.high %v2644_v14, %v2644_v14  ;;  %v3651_v6 = vsel %vm2775_vm6, %v2645_v63, -inf  ;;  %v3658_v27 = vsel %vm2775_vm6, %v2644_v14, -inf }
 0x30c   : > { %v3621_v30 = vrot.slane %v3620_v48, 1  ;;  %v3627_v3 = vmax.f32 %v3625_v57, %v3626_v17  ;;  %v3641_v61 = vmax.f32 %v3639_v0, %v3640_v36  ;;  %v3646_v34 = vmax.f32 %v3644_v40, %v3645_v52 }
 0x30d   : > { %v3635_v43 = vrot.slane %v3634_v38, 1  ;;  %v3652_v20 = vrot.slane %v3651_v6, 4  ;;  %v3659_v18 = vrot.slane %v3658_v27, 4  ;;  %v3665_v19 = vsel %vm2775_vm6, %v2646_v39, -inf }
 0x30e   : > { %v3622_v5 = vmax.f32 %v3620_v48, %v3621_v30  ;;  %v3628_v45 = vrot.slane %v3627_v3, 1  ;;  %v3642_v62 = vrot.slane %v3641_v61, 1  ;;  %v3647_v32 = vrot.slane %v3646_v34, 2 }
 0x30f   : > { %v3636_v4 = vmax.f32 %v3634_v38, %v3635_v43  ;;  %v3653_v21 = vmax.f32 %v3651_v6, %v3652_v20  ;;  %v3660_v58 = vmax.f32 %v3658_v27, %v3659_v18  ;;  %v3666_v24 = vrot.slane %v3665_v19, 4 }
 0x310   : > { %v3629_v26 = vmax.f32 %v3627_v3, %v3628_v45  ;;  %v3643_v16 = vmax.f32 %v3641_v61, %v3642_v62  ;;  %v3841_v44 = vsel %vm1090_vm5, %v3622_v5, -inf  ;;  %v3648_v49 = vmax.f32 %v3646_v34, %v3647_v32 }
 0x311   : > { %v3842_v1 = vmax.f32 %v6184_v13, %v3841_v44  ;;  %v3847_v9 = vsel %vm1090_vm5, %v3636_v4, -inf  ;;  %v3654_v53 = vrot.slane %v3653_v21, 2  ;;  %v3661_v25 = vrot.slane %v3660_v58, 2 }
 0x312   : > { %v3844_v31 = vsel %vm1090_vm5, %v3629_v26, -inf  ;;  %v3848_v23 = vmax.f32 %v6198_v29, %v3847_v9  ;;  %v3850_v60 = vsel %vm1090_vm5, %v3643_v16, -inf  ;;  %v3649_v11 = vrot.slane %v3648_v49, 1 }
 0x313   : > { %v3845_v12 = vmax.f32 %v6191_v35, %v3844_v31  ;;  %v3851_v7 = vmax.f32 %v6212_v33, %v3850_v60  ;;  %v3655_v47 = vmax.f32 %v3653_v21, %v3654_v53  ;;  %v3662_v59 = vmax.f32 %v3660_v58, %v3661_v25 }
 0x314   : > { %v3601_v13 = vmax.f32 %v6181_v56, %v3600_v10  ;;  %v3608_v46 = vmax.f32 %v6193_v54, %v3607_v28  ;;  %v3650_v41 = vmax.f32 %v3648_v49, %v3649_v11  ;;  %v3667_v42 = vmax.f32 %v3665_v19, %v3666_v24 }
 0x315   : > { %v3614_v8 = vrot.slane %v6206_v2, 1  ;;  %v3984_v29 = vsel %vm3928_vm7, %v3845_v12, %v3842_v1  ;;  %v3656_v22 = vrot.slane %v3655_v47, 1  ;;  %v3663_v15 = vrot.slane %v3662_v59, 1 }
 0x316   : > { %v3852_v35 = vsel %vm1090_vm5, %v6200_v37, -inf  ;;  %v3985_v55 = vsel %vm3930_vm8, %v3848_v23, %v3984_v29  ;;  %v3668_v33 = vrot.slane %v3667_v42, 2  ;;  %v3853_v50 = vsel %vm1090_vm5, %v3650_v41, -inf }
 0x317   : > { %v3657_v57 = vmax.f32 %v3655_v47, %v3656_v22  ;;  %v3664_v56 = vmax.f32 %v3662_v59, %v3663_v15  ;;  %v3854_v10 = vmax.f32 %v3852_v35, %v3853_v50  ;;  %v3986_v54 = vsel %vm3932_vm9, %v3851_v7, %v3985_v55 }
 0x318   : > { %v3855_v28 = vsel %vm1090_vm5, %v3601_v13, -inf  ;;  %v3669_v0 = vmax.f32 %v3667_v42, %v3668_v33  ;;  %v3858_v51 = vsel %vm1090_vm5, %v3608_v46, -inf  ;;  %v3615_v40 = vmax.f32 %v6206_v2, %v3614_v8 }
 0x319   : > { %v3856_v14 = vsel %vm1090_vm5, %v3657_v57, -inf  ;;  %v3859_v37 = vsel %vm1090_vm5, %v3664_v56, -inf  ;;  %v3987_v63 = vsel %vm3934_vm10, %v3854_v10, %v3986_v54 }
 0x31a   : > { %v3670_v48 = vrot.slane %v3669_v0, 1  ;;  %v3857_v17 = vmax.f32 %v3855_v28, %v3856_v14  ;;  %v3860_v36 = vmax.f32 %v3858_v51, %v3859_v37  ;;  %v3861_v6 = vsel %vm1090_vm5, %v3615_v40, -inf }
 0x31c   : > { %v3671_v52 = vmax.f32 %v3669_v0, %v3670_v48  ;;  %v3988_v38 = vsel %vm3936_vm11, %v3857_v17, %v3987_v63 }
 0x31d   : > { %v3989_v39 = vsel %vm3938_vm12, %v3860_v36, %v3988_v38 }
 0x31e   : > { %v3862_v27 = vsel %vm1090_vm5, %v3671_v52, -inf }
 0x31f   : > { %v3863_v30 = vmax.f32 %v3861_v6, %v3862_v27 }
 0x321   : > { %v3990_v3 = vsel %vm3940_vm13, %v3863_v30, %v3989_v39 }
 0x322   : > { %4006 = vst.msk [vmem:[%s5463_s15 + $0x38] sm:$0xff] %vm1090_vm5, %v3990_v3 }
 0x323 PF: > { %s17_s23 = sadd.s32 1, %s4415_s23   ;;  %s6307_s21 = smov %s4411_s22 }
 0x324   : > { %p14_p5 = scmp.ge.s32.totalorder %s17_s23, 6   ;;  %s6308_s22 = smov %s6310_s24 }
 0x326   :  { %16 = sbr.rel (!%p14_p5) target bundleno = 2 (0x2), region = 88 }

// kernel: vgg_perceptual_loss.12
= control target key start
LH: loop header
LB: loop body
LE: loop exit
PB: predicated region body
PF: predicated region fallthrough
CT: control target
= control target key end

     0   :  { %v111_v0 = vlaneseq  ;;  %v421_v3 = vmov 1966171168   ;;  %s613_s0 = inlined_call_operand.vmem [shape: f32[32,1024], index: 0, kind: input, shape index: {}, may-alias: {0,1}]   ;;  %s614_s1 = inlined_call_operand.vmem [shape: f32[32,1024], index: 1, kind: input, shape index: {}, may-alias: {0,1}]   ;;  %s615_s2 = inlined_call_operand.vmem [shape: f32[1,1024], index: 2, kind: input, shape index: {}]   ;;  %s616_s3 = inlined_call_operand.hbm [shape: f32[1,1], index: 3, kind: output, shape index: {}]  }
   0x1   :  { %v45_v1 = vld [vmem:[%s613_s0] sm:$0xff]  ;;  %v46_v2 = vld [vmem:[%s613_s0 + $0x8] sm:$0xff]  ;;  %v237_v4 = vunpack.c.l.s4 %v421_v3  ;;  %v47_v5 = vld [vmem:[%s613_s0 + $0x10] sm:$0xff] }
   0x2   :  { %v48_v6 = vld [vmem:[%s613_s0 + $0x18] sm:$0xff]  ;;  %v49_v7 = vld [vmem:[%s613_s0 + $0x20] sm:$0xff]  ;;  %v458_v8 = vshrl.u32 %v111_v0, 7  ;;  %v50_v9 = vld [vmem:[%s613_s0 + $0x28] sm:$0xff] }
   0x3   :  { %v51_v10 = vld [vmem:[%s613_s0 + $0x30] sm:$0xff]  ;;  %v52_v11 = vld [vmem:[%s613_s0 + $0x38] sm:$0xff]  ;;  %v238_v12 = vunpack.c.0.s8 %v237_v4  ;;  %v53_v13 = vld [vmem:[%s613_s0 + $0x40] sm:$0xff] }
   0x4   :  { %v54_v14 = vld [vmem:[%s613_s0 + $0x48] sm:$0xff]  ;;  %v55_v15 = vld [vmem:[%s613_s0 + $0x50] sm:$0xff]  ;;  %v113_v16 = vsub.s32 0, %v458_v8  ;;  %v117_v17 = vsub.s32 1, %v458_v8  ;;  %v56_v18 = vld [vmem:[%s613_s0 + $0x58] sm:$0xff]  ;;  %v121_v23 = vsub.s32 2, %v458_v8 }
   0x5   :  { %v57_v19 = vld [vmem:[%s613_s0 + $0x60] sm:$0xff]  ;;  %v58_v20 = vld [vmem:[%s613_s0 + $0x68] sm:$0xff]  ;;  %v125_v24 = vsub.s32 3, %v458_v8  ;;  %v129_v25 = vsub.s32 4, %v458_v8  ;;  %v133_v26 = vsub.s32 5, %v458_v8  ;;  %v59_v27 = vld [vmem:[%s613_s0 + $0x70] sm:$0xff]  ;;  %v516_v35 = vsub.s32 %v238_v12, %v458_v8 }
   0x6   :  { %v377_v21 = vld [vmem:[%s614_s1 + $0x80] sm:$0xff]  ;;  %v378_v22 = vld [vmem:[%s614_s1 + $0x88] sm:$0xff]  ;;  %v60_v28 = vld [vmem:[%s613_s0 + $0x78] sm:$0xff]  ;;  %v137_v34 = vsub.s32 6, %v458_v8  ;;  %v141_v42 = vsub.s32 7, %v458_v8 }
   0x7   :  { %v379_v29 = vld [vmem:[%s614_s1 + $0x90] sm:$0xff]  ;;  %v380_v30 = vld [vmem:[%s614_s1 + $0x98] sm:$0xff]  ;;  %v381_v31 = vld [vmem:[%s614_s1 + $0xa0] sm:$0xff]  ;;  %v77_v32 = vsub.f32 %v45_v1, %v377_v21  ;;  %v78_v33 = vsub.f32 %v46_v2, %v378_v22 }
   0x8   :  { %v382_v36 = vld [vmem:[%s614_s1 + $0xa8] sm:$0xff]  ;;  %v383_v37 = vld [vmem:[%s614_s1 + $0xb0] sm:$0xff]  ;;  %v384_v38 = vld [vmem:[%s614_s1 + $0xb8] sm:$0xff]  ;;  %v79_v39 = vsub.f32 %v47_v5, %v379_v29  ;;  %v80_v40 = vsub.f32 %v48_v6, %v380_v30  ;;  %v81_v41 = vsub.f32 %v49_v7, %v381_v31 }
   0x9   :  { %v385_v43 = vld [vmem:[%s614_s1 + $0xc0] sm:$0xff]  ;;  %v386_v44 = vld [vmem:[%s614_s1 + $0xc8] sm:$0xff]  ;;  %v387_v45 = vld [vmem:[%s614_s1 + $0xd0] sm:$0xff]  ;;  %v82_v46 = vsub.f32 %v50_v9, %v382_v36  ;;  %v83_v47 = vsub.f32 %v51_v10, %v383_v37  ;;  %v84_v48 = vsub.f32 %v52_v11, %v384_v38  ;;  %v93_v49 = vand.u32 2147483647, %v77_v32 }
   0xa   :  { %v388_v50 = vld [vmem:[%s614_s1 + $0xd8] sm:$0xff]  ;;  %v389_v51 = vld [vmem:[%s614_s1 + $0xe0] sm:$0xff]  ;;  %v390_v52 = vld [vmem:[%s614_s1 + $0xe8] sm:$0xff]  ;;  %v85_v53 = vsub.f32 %v53_v13, %v385_v43  ;;  %v86_v54 = vsub.f32 %v54_v14, %v386_v44  ;;  %v87_v55 = vsub.f32 %v55_v15, %v387_v45  ;;  %v94_v56 = vand.u32 2147483647, %v78_v33 }
   0xb   :  { %v391_v57 = vld [vmem:[%s614_s1 + $0xf0] sm:$0xff]  ;;  %v392_v58 = vld [vmem:[%s614_s1 + $0xf8] sm:$0xff]  ;;  %v88_v59 = vsub.f32 %v56_v18, %v388_v50  ;;  %v89_v60 = vsub.f32 %v57_v19, %v389_v51  ;;  %v90_v61 = vsub.f32 %v58_v20, %v390_v52  ;;  %v95_v62 = vand.u32 2147483647, %v79_v39  ;;  %v109_v63 = vld [vmem:[%s615_s2] sm:$0xff] }
   0xc   :  { %v91_v0 = vsub.f32 %v59_v27, %v391_v57  ;;  %v92_v1 = vsub.f32 %v60_v28, %v392_v58  ;;  %v96_v2 = vand.u32 2147483647, %v80_v40  ;;  %v97_v3 = vand.u32 2147483647, %v81_v41 }
   0xd   :  { %8 = vsyncpa [#allocation4], 0  ;;  %v98_v4 = vand.u32 2147483647, %v82_v46  ;;  %v99_v5 = vand.u32 2147483647, %v83_v47  ;;  %v114_v7 = vrot.slane %v109_v63, %v113_v16  ;;  %v118_v12 = vrot.slane %v109_v63, %v117_v17 }
   0xe   :  { %v100_v6 = vand.u32 2147483647, %v84_v48  ;;  %v101_v9 = vand.u32 2147483647, %v85_v53  ;;  %v102_v10 = vand.u32 2147483647, %v86_v54  ;;  %v122_v18 = vrot.slane %v109_v63, %v121_v23 }
   0xf   :  { %v103_v11 = vand.u32 2147483647, %v87_v55  ;;  %v104_v13 = vand.u32 2147483647, %v88_v59  ;;  %v105_v14 = vand.u32 2147483647, %v89_v60  ;;  %v126_v21 = vrot.slane %v109_v63, %v125_v24 }
  0x10   :  { %v106_v15 = vand.u32 2147483647, %v90_v61  ;;  %v107_v19 = vand.u32 2147483647, %v91_v0  ;;  %v108_v20 = vand.u32 2147483647, %v92_v1  ;;  %v130_v22 = vrot.slane %v109_v63, %v129_v25 }
  0x11   :  { %v134_v27 = vrot.slane %v109_v63, %v133_v26  ;;  %v138_v28 = vrot.slane %v109_v63, %v137_v34  ;;  %v142_v29 = vrot.slane %v109_v63, %v141_v42  ;;  %v151_v30 = vmul.f32 %v114_v7, %v93_v49  ;;  %s422_s1 = smov [#allocation3]  }
  0x12   :  { %v152_v31 = vmul.f32 %v118_v12, %v94_v56  ;;  %v153_v32 = vmul.f32 %v122_v18, %v95_v62  ;;  %v154_v33 = vmul.f32 %v126_v21, %v96_v2  ;;  %v155_v36 = vmul.f32 %v130_v22, %v97_v3  ;;  %s363_s2 = sshll.u32 %s422_s1, 4  ;;  %s364_s2 = int_to_ptr.vmem [resolvable:$true] %s363_s2 }
  0x13   :  { %v156_v37 = vmul.f32 %v134_v27, %v98_v4  ;;  %v157_v38 = vmul.f32 %v138_v28, %v99_v5  ;;  %v158_v39 = vmul.f32 %v142_v29, %v100_v6  ;;  %v159_v40 = vmul.f32 %v114_v7, %v101_v9  ;;  %s397_s24 = scalar_lea.vmem %s364_s2, 16  ;;  %s401_s25 = scalar_lea.vmem %s364_s2, 32 }
  0x14   :  { %v160_v41 = vmul.f32 %v118_v12, %v102_v10  ;;  %v161_v43 = vmul.f32 %v122_v18, %v103_v11  ;;  %v162_v44 = vmul.f32 %v126_v21, %v104_v13  ;;  %v163_v45 = vmul.f32 %v130_v22, %v105_v14  ;;  %p398_p0 = scmp.ne.s32.totalorder %s364_s2, %s397_s24  ;;  %p402_p1 = scmp.lt.s32.totalorder %s364_s2, %s364_s2 }
  0x15   :  { %v164_v46 = vmul.f32 %v134_v27, %v106_v15  ;;  %v165_v47 = vmul.f32 %v138_v28, %v107_v19  ;;  %v166_v48 = vmul.f32 %v142_v29, %v108_v20  ;;  %v168_v50 = vadd.f32 %v159_v40, %v151_v30  ;;  %p403_p2 = scmp.lt.s32.totalorder %s401_s25, %s397_s24 }
  0x16   :  { %v175_v51 = vadd.f32 %v160_v41, %v152_v31  ;;  %v182_v52 = vadd.f32 %v161_v43, %v153_v32  ;;  %v189_v53 = vadd.f32 %v162_v44, %v154_v33  ;;  %v196_v49 = vadd.f32 %v163_v45, %v155_v36 }
  0x17   :  { %v169_v54 = vrot.slane %v168_v50, 4  ;;  %v203_v55 = vadd.f32 %v164_v46, %v156_v37  ;;  %v210_v56 = vadd.f32 %v165_v47, %v157_v38  ;;  %v217_v57 = vadd.f32 %v166_v48, %v158_v39  ;;  %p404_p3 = por %p403_p2, %p402_p1 }
  0x18   :  { %v176_v58 = vrot.slane %v175_v51, 4  ;;  %v183_v59 = vrot.slane %v182_v52, 4  ;;  %v190_v60 = vrot.slane %v189_v53, 4  ;;  %v197_v61 = vrot.slane %v196_v49, 4 }
  0x19   :  { %v170_v62 = vadd.f32 %v169_v54, %v168_v50  ;;  %v204_v63 = vrot.slane %v203_v55, 4  ;;  %v211_v0 = vrot.slane %v210_v56, 4  ;;  %v218_v1 = vrot.slane %v217_v57, 4  ;;  %p405_p4 = pnand %p404_p3, %p398_p0 }
  0x1a   :  { %v177_v2 = vadd.f32 %v176_v58, %v175_v51  ;;  %v184_v3 = vadd.f32 %v183_v59, %v182_v52  ;;  %v191_v4 = vadd.f32 %v190_v60, %v189_v53  ;;  %v198_v5 = vadd.f32 %v197_v61, %v196_v49 }
  0x1b   :  { %v171_v6 = vrot.slane %v170_v62, 2  ;;  %v205_v7 = vadd.f32 %v204_v63, %v203_v55  ;;  %v212_v9 = vadd.f32 %v211_v0, %v210_v56  ;;  %v219_v10 = vadd.f32 %v218_v1, %v217_v57 }
  0x1c   :  { %v178_v11 = vrot.slane %v177_v2, 2  ;;  %v185_v12 = vrot.slane %v184_v3, 2  ;;  %v192_v13 = vrot.slane %v191_v4, 2  ;;  %v199_v14 = vrot.slane %v198_v5, 2 }
  0x1d   :  { %v172_v15 = vadd.f32 %v171_v6, %v170_v62  ;;  %v206_v18 = vrot.slane %v205_v7, 2  ;;  %v213_v19 = vrot.slane %v212_v9, 2  ;;  %v220_v20 = vrot.slane %v219_v10, 2 }
  0x1e   :  { %v179_v21 = vadd.f32 %v178_v11, %v177_v2  ;;  %v186_v22 = vadd.f32 %v185_v12, %v184_v3  ;;  %v193_v27 = vadd.f32 %v192_v13, %v191_v4  ;;  %v200_v28 = vadd.f32 %v199_v14, %v198_v5 }
  0x1f   :  { %v173_v29 = vrot.slane %v172_v15, 1  ;;  %v207_v30 = vadd.f32 %v206_v18, %v205_v7  ;;  %v214_v31 = vadd.f32 %v213_v19, %v212_v9  ;;  %v221_v32 = vadd.f32 %v220_v20, %v219_v10 }
  0x20   :  { %v180_v33 = vrot.slane %v179_v21, 1  ;;  %v187_v36 = vrot.slane %v186_v22, 1  ;;  %v194_v37 = vrot.slane %v193_v27, 1  ;;  %v201_v38 = vrot.slane %v200_v28, 1 }
  0x21   :  { %v174_v39 = vadd.f32 %v173_v29, %v172_v15  ;;  %v208_v40 = vrot.slane %v207_v30, 1  ;;  %v215_v41 = vrot.slane %v214_v31, 1  ;;  %v222_v43 = vrot.slane %v221_v32, 1 }
  0x22   :  { %v181_v44 = vadd.f32 %v180_v33, %v179_v21  ;;  %v188_v45 = vadd.f32 %v187_v36, %v186_v22  ;;  %v195_v46 = vadd.f32 %v194_v37, %v193_v27  ;;  %v202_v47 = vadd.f32 %v201_v38, %v200_v28 }
  0x23   :  { %v209_v48 = vadd.f32 %v208_v40, %v207_v30  ;;  %v216_v50 = vadd.f32 %v215_v41, %v214_v31  ;;  %v223_v51 = vadd.f32 %v222_v43, %v221_v32  ;;  %vm329_vm0 = vcmask 1040384  }
  0x24   :  { %v232_v52 = vcombine.low %v174_v39, %v181_v44  ;;  %v233_v53 = vcombine.low %v188_v45, %v195_v46  ;;  %vm355_vm1 = vcmask 0  }
  0x25   :  { %v234_v49 = vcombine.low %v202_v47, %v209_v48  ;;  %v235_v54 = vcombine.low %v216_v50, %v223_v51 }
  0x26   :  { %v242_v55 = vrot.slane %v232_v52, %v516_v35  ;;  %v249_v56 = vrot.slane %v233_v53, %v516_v35 }
  0x27   :  { %v256_v57 = vrot.slane %v234_v49, %v516_v35  ;;  %v263_v58 = vrot.slane %v235_v54, %v516_v35 }
  0x28   :  { %v264_v59 = vcombine.low %v242_v55, %v249_v56 }
  0x29   :  { %v265_v60 = vcombine.low %v256_v57, %v263_v58 }
  0x2a   :  { %v272_v61 = vrot.slane %v264_v59, %v516_v35 }
  0x2b   :  { %v279_v62 = vrot.slane %v265_v60, %v516_v35 }
  0x2d   :  { %v280_v63 = vcombine.low %v272_v61, %v279_v62 }
  0x2f   :  { %v292_v0 = vrot.slane %v280_v63, %v113_v16  ;;  %v296_v1 = vrot.slane %v280_v63, %v117_v17  ;;  %v300_v2 = vrot.slane %v280_v63, %v121_v23  ;;  %v304_v3 = vrot.slane %v280_v63, %v125_v24 }
  0x30   :  { %v308_v4 = vrot.slane %v280_v63, %v129_v25  ;;  %v312_v16 = vrot.slane %v280_v63, %v133_v26  ;;  %v316_v23 = vrot.slane %v280_v63, %v137_v34  ;;  %v320_v25 = vrot.slane %v280_v63, %v141_v42 }
  0x31   :  { %v330_v5 = vsel %vm329_vm0, %v292_v0, 0.0  ;;  %v331_v35 = vsel %vm329_vm0, %v296_v1, 0.0  ;;  %v333_v6 = vsel %vm329_vm0, %v300_v2, 0.0  ;;  %v335_v17 = vsel %vm329_vm0, %v304_v3, 0.0 }
  0x32   :  { %v332_v7 = vadd.f32 %v331_v35, %v330_v5  ;;  %v337_v24 = vsel %vm329_vm0, %v308_v4, 0.0  ;;  %v339_v11 = vsel %vm329_vm0, %v312_v16, 0.0  ;;  %v341_v13 = vsel %vm329_vm0, %v316_v23, 0.0 }
  0x33   :  { %v343_v26 = vsel %vm329_vm0, %v320_v25, 0.0 }
  0x34   :  { %v334_v9 = vadd.f32 %v333_v6, %v332_v7 }
  0x36   :  { %v336_v10 = vadd.f32 %v335_v17, %v334_v9 }
  0x38   :  { %v338_v12 = vadd.f32 %v337_v24, %v336_v10 }
  0x3a   :  { %v340_v14 = vadd.f32 %v339_v11, %v338_v12 }
  0x3c   :  { %v342_v15 = vadd.f32 %v341_v13, %v340_v14 }
  0x3e   :  { %v344_v18 = vadd.f32 %v343_v26, %v342_v15 }
  0x40   :  { %345 = vadd.xlane.f32.xlu0 %v344_v18 }
  0xcd   :  { %v346_v19 = vpop.xlane.xlu0 %345 }
  0xce   :  { %v347_v20 = vrot.slane %v346_v19, 4 }
  0xd0   :  { %v348_v34 = vadd.f32 %v347_v20, %v346_v19 }
  0xd2   :  { %v349_v21 = vrot.slane %v348_v34, 2 }
  0xd4   :  { %v350_v22 = vadd.f32 %v349_v21, %v348_v34 }
  0xd6   :  { %v351_v27 = vrot.slane %v350_v22, 1 }
  0xd8   :  { %v352_v28 = vadd.f32 %v351_v27, %v350_v22 }
  0xda   :  { %393 = vpush %v352_v28 }
 0x10b   :  { %s394_s23 = spop %393 }
 0x10c   :  { %v354_v8 = vstv %s394_s23 }
 0x10d   :  { %356 = vst.msk [vmem:[#allocation3] sm:$0x1] %vm355_vm1, %v354_v8 }
 0x10e   :  { %408 = shalt.err (!%p405_p4)
}
 0x10f   :  { %s409_s27 = scalar_lea.hbm %s616_s3, 16 }
 0x110   :  { %p410_p5 = scmp.ne.s32.totalorder %s616_s3, %s409_s27  ;;  %p413_p6 = scmp.lt.u32.totalorder %s409_s27, %s616_s3 }
 0x112   :  { %p415_p7 = pnand %p413_p6, %p410_p5 }
 0x114   :  { %418 = shalt.err (!%p415_p7)
}
 0x115   :  { %366 = dma.vmem_to_hbm [thread:$0]  %s364_s2, 16, %s616_s3, [#allocation4]  }
 0x116   :  { %419 = dma.done.wait [#allocation4], 16  }
 0x117   :  { %420 = vsyncadd [#allocation4], 4294967280 }
 0x118   :  { %370 = vsyncpa [#allocation4], 1 }

// kernel: tile.6
= control target key start
LH: loop header
LB: loop body
LE: loop exit
PB: predicated region body
PF: predicated region fallthrough
CT: control target
= control target key end

     0   :  { %s28_s0 = inlined_call_operand.vmem [shape: f32[3], index: 0, kind: input, shape index: {}]   ;;  %s29_s1 = inlined_call_operand.vmem [shape: f32[16,3], index: 1, kind: output, shape index: {}]  }
   0x1   :  { %v4_v0 = vld [vmem:[%s28_s0] ss:$0 sm:$0xff] }
   0x2   :  { %5 = vst [vmem:[%s29_s1] sm:$0xff] %v4_v0  ;;  %8 = vst [vmem:[%s29_s1 + $0x8] sm:$0xff] %v4_v0 }

// kernel: tile.7
= control target key start
LH: loop header
LB: loop body
LE: loop exit
PB: predicated region body
PF: predicated region fallthrough
CT: control target
= control target key end

     0   :  { %s131_s10 = smov 45   ;;  %s132_s11 = smov 39   ;;  %vm3_vm0 = vcmask 23552   ;;  %vm9_vm1 = vcmask 392552   ;;  %vm15_vm2 = vcmask 367952   ;;  %vm21_vm3 = vcmask 343352   ;;  %s207_s0 = inlined_call_operand.vmem [shape: f32[16,3], index: 0, kind: input, shape index: {}]   ;;  %s208_s1 = inlined_call_operand.vmem [shape: f32[1,48], index: 1, kind: output, shape index: {}]  }
   0x1   :  { %v101_v0 = vld [vmem:[%s207_s0 + $0xf] sm:$0x1]   ;;  %v103_v1 = vld [vmem:[%s207_s0 + $0xd] sm:$0x1]   ;;  %v102_v2 = vld [vmem:[%s207_s0 + $0xe] sm:$0x1]  }
   0x2   :  { %7 = vrot.lane.b32.xlu0 %v101_v0, %s131_s10  ;;  %19 = vrot.lane.b32.xlu1 %v103_v1, %s132_s11  ;;  %v104_v3 = vld [vmem:[%s207_s0 + $0xc] sm:$0x1]   ;;  %s133_s16 = smov 42   ;;  %s134_s17 = smov 36   ;;  %v105_v4 = vld [vmem:[%s207_s0 + $0xb] sm:$0x1]  }
   0x3   :  { %v106_v5 = vld [vmem:[%s207_s0 + $0xa] sm:$0x1]   ;;  %v2_v6 = vld [vmem:[%s207_s0] sm:$0x1]   ;;  %s135_s24 = smov 33   ;;  %s136_s25 = smov 30  }
   0x4   :  { %4 = vst.msk [vmem:[#allocation0] sm:$0x1] %vm3_vm0, %v2_v6   ;;  %v107_v7 = vld [vmem:[%s207_s0 + $0x9] sm:$0x1]   ;;  %v108_v8 = vld [vmem:[%s207_s0 + $0x8] sm:$0x1]  }
   0x5   :  { %s137_s30 = smov 27   ;;  %s138_s2 = smov 24   ;;  %v109_v9 = vld [vmem:[%s207_s0 + $0x7] sm:$0x1]   ;;  %v110_v10 = vld [vmem:[%s207_s0 + $0x6] sm:$0x1]  }
   0x6   :  { %13 = vrot.lane.b32.xlu0 %v102_v2, %s133_s16  ;;  %25 = vrot.lane.b32.xlu1 %v104_v3, %s134_s17  ;;  %s139_s7 = smov 21   ;;  %s140_s8 = smov 18   ;;  %v111_v11 = vld [vmem:[%s207_s0 + $0x5] sm:$0x1]   ;;  %v112_v12 = vld [vmem:[%s207_s0 + $0x4] sm:$0x1]  }
   0x7   :  { %s141_s13 = smov 15   ;;  %s142_s14 = smov 12   ;;  %v113_v13 = vld [vmem:[%s207_s0 + $0x3] sm:$0x1]   ;;  %v114_v14 = vld [vmem:[%s207_s0 + $0x2] sm:$0x1]  }
   0x8   :  { %s143_s19 = smov 9   ;;  %s144_s20 = smov 6   ;;  %v115_v15 = vld [vmem:[%s207_s0 + $0x1] sm:$0x1]   ;;  %vm27_vm4 = vcmask 318752   ;;  %vm33_vm5 = vcmask 294152  }
   0x9   :  { %s145_s0 = smov 3   ;;  %vm39_vm6 = vcmask 269552   ;;  %vm45_vm7 = vcmask 244952   ;;  %vm51_vm8 = vcmask 220352   ;;  %vm57_vm9 = vcmask 195752  }
   0xa   :  { %31 = vrot.lane.b32.xlu0 %v105_v4, %s135_s24  ;;  %37 = vrot.lane.b32.xlu1 %v106_v5, %s136_s25  ;;  %vm63_vm10 = vcmask 171152   ;;  %vm69_vm11 = vcmask 146552   ;;  %vm75_vm12 = vcmask 121952   ;;  %vm81_vm13 = vcmask 97352  }
   0xb   :  { %vm87_vm14 = vcmask 72752   ;;  %vm93_vm15 = vcmask 48152  }
   0xe   :  { %43 = vrot.lane.b32.xlu0 %v107_v7, %s137_s30  ;;  %49 = vrot.lane.b32.xlu1 %v108_v8, %s138_s2 }
  0x12   :  { %55 = vrot.lane.b32.xlu0 %v109_v9, %s139_s7  ;;  %61 = vrot.lane.b32.xlu1 %v110_v10, %s140_s8 }
  0x16   :  { %67 = vrot.lane.b32.xlu0 %v111_v11, %s141_s13  ;;  %73 = vrot.lane.b32.xlu1 %v112_v12, %s142_s14 }
  0x1a   :  { %79 = vrot.lane.b32.xlu0 %v113_v13, %s143_s19  ;;  %85 = vrot.lane.b32.xlu1 %v114_v14, %s144_s20 }
  0x1e   :  { %91 = vrot.lane.b32.xlu0 %v115_v15, %s145_s0 }
  0x74   :  { %v8_v16 = vpop.permute.xlu0 %7   ;;  %v20_v17 = vpop.permute.xlu1 %19  }
  0x75   :  { %10 = vst.msk [vmem:[#allocation0] sm:$0x1] %vm9_vm1, %v8_v16  }
  0x78   :  { %v14_v18 = vpop.permute.xlu0 %13   ;;  %v26_v19 = vpop.permute.xlu1 %25  }
  0x79   :  { %16 = vst.msk [vmem:[#allocation0] sm:$0x1] %vm15_vm2, %v14_v18  }
  0x7a   :  { %22 = vst.msk [vmem:[#allocation0] sm:$0x1] %vm21_vm3, %v20_v17  }
  0x7b   :  { %28 = vst.msk [vmem:[#allocation0] sm:$0x1] %vm27_vm4, %v26_v19  }
  0x7c   :  { %v32_v20 = vpop.permute.xlu0 %31   ;;  %v38_v21 = vpop.permute.xlu1 %37  }
  0x7d   :  { %34 = vst.msk [vmem:[#allocation0] sm:$0x1] %vm33_vm5, %v32_v20  }
  0x7e   :  { %40 = vst.msk [vmem:[#allocation0] sm:$0x1] %vm39_vm6, %v38_v21  }
  0x80   :  { %v44_v22 = vpop.permute.xlu0 %43   ;;  %v50_v23 = vpop.permute.xlu1 %49  }
  0x81   :  { %46 = vst.msk [vmem:[#allocation0] sm:$0x1] %vm45_vm7, %v44_v22  }
  0x82   :  { %52 = vst.msk [vmem:[#allocation0] sm:$0x1] %vm51_vm8, %v50_v23  }
  0x84   :  { %v56_v24 = vpop.permute.xlu0 %55   ;;  %v62_v25 = vpop.permute.xlu1 %61  }
  0x85   :  { %58 = vst.msk [vmem:[#allocation0] sm:$0x1] %vm57_vm9, %v56_v24  }
  0x86   :  { %64 = vst.msk [vmem:[#allocation0] sm:$0x1] %vm63_vm10, %v62_v25  }
  0x88   :  { %v68_v26 = vpop.permute.xlu0 %67   ;;  %v74_v27 = vpop.permute.xlu1 %73  }
  0x89   :  { %70 = vst.msk [vmem:[#allocation0] sm:$0x1] %vm69_vm11, %v68_v26  }
  0x8a   :  { %76 = vst.msk [vmem:[#allocation0] sm:$0x1] %vm75_vm12, %v74_v27  }
  0x8c   :  { %v80_v28 = vpop.permute.xlu0 %79   ;;  %v86_v29 = vpop.permute.xlu1 %85  }
  0x8d   :  { %82 = vst.msk [vmem:[#allocation0] sm:$0x1] %vm81_vm13, %v80_v28  }
  0x8e   :  { %88 = vst.msk [vmem:[#allocation0] sm:$0x1] %vm87_vm14, %v86_v29  }
  0x90   :  { %v92_v30 = vpop.permute.xlu0 %91  }
  0x91   :  { %94 = vst.msk [vmem:[#allocation0] sm:$0x1] %vm93_vm15, %v92_v30  }
  0x98   :  { %v98_v31 = vld [vmem:[#allocation0] sm:$0x1] }
  0x99   :  { %100 = vst [vmem:[%s208_s1] sm:$0x1] %v98_v31 }

// kernel: vgg_perceptual_loss.9
= control target key start
LH: loop header
LB: loop body
LE: loop exit
PB: predicated region body
PF: predicated region fallthrough
CT: control target
= control target key end

     0   :  { %v175_v0 = vlaneseq  ;;  %v533_v1 = vmov 1966171168   ;;  %s947_s0 = inlined_call_operand.vmem [shape: f32[64,1024], index: 0, kind: input, shape index: {}, may-alias: {0,1}]   ;;  %s948_s1 = inlined_call_operand.vmem [shape: f32[64,1024], index: 1, kind: input, shape index: {}, may-alias: {0,1}]   ;;  %s949_s2 = inlined_call_operand.vmem [shape: f32[1,1024], index: 2, kind: input, shape index: {}]   ;;  %s950_s3 = inlined_call_operand.hbm [shape: f32[1,1], index: 3, kind: output, shape index: {}]  }
   0x1   :  { %v333_v2 = vunpack.c.l.s4 %v533_v1  ;;  %v45_v4 = vld [vmem:[%s947_s0] sm:$0xff]  ;;  %v46_v5 = vld [vmem:[%s947_s0 + $0x8] sm:$0xff]  ;;  %v566_v6 = vld [vmem:[%s947_s0 + $0x10] sm:$0xff] }
   0x2   :  { %v555_v3 = vshrl.u32 %v175_v0, 7  ;;  %v571_v7 = vld [vmem:[%s947_s0 + $0x18] sm:$0xff]  ;;  %v576_v9 = vld [vmem:[%s947_s0 + $0x20] sm:$0xff]  ;;  %v581_v10 = vld [vmem:[%s947_s0 + $0x28] sm:$0xff] }
   0x3   :  { %v334_v8 = vunpack.c.0.s8 %v333_v2  ;;  %v586_v11 = vld [vmem:[%s947_s0 + $0x30] sm:$0xff]  ;;  %v591_v12 = vld [vmem:[%s947_s0 + $0x38] sm:$0xff]  ;;  %v596_v13 = vld [vmem:[%s947_s0 + $0x40] sm:$0xff] }
   0x4   :  { %v601_v14 = vld [vmem:[%s947_s0 + $0x48] sm:$0xff]  ;;  %v177_v15 = vsub.s32 0, %v555_v3  ;;  %v607_v16 = vld [vmem:[%s947_s0 + $0x50] sm:$0xff]  ;;  %v612_v17 = vld [vmem:[%s947_s0 + $0x58] sm:$0xff]  ;;  %v181_v20 = vsub.s32 1, %v555_v3  ;;  %v956_v21 = vsub.s32 2, %v555_v3 }
   0x5   :  { %v617_v18 = vld [vmem:[%s947_s0 + $0x60] sm:$0xff]  ;;  %v955_v22 = vsub.s32 3, %v555_v3  ;;  %v954_v23 = vsub.s32 4, %v555_v3  ;;  %v629_v24 = vld [vmem:[%s947_s0 + $0x68] sm:$0xff]  ;;  %v634_v25 = vld [vmem:[%s947_s0 + $0x70] sm:$0xff]  ;;  %v953_v31 = vsub.s32 5, %v555_v3  ;;  %v653_v33 = vsub.s32 %v334_v8, %v555_v3 }
   0x6   :  { %v473_v19 = vld [vmem:[%s948_s1 + $0x100] sm:$0xff]  ;;  %v639_v26 = vld [vmem:[%s947_s0 + $0x78] sm:$0xff]  ;;  %v474_v27 = vld [vmem:[%s948_s1 + $0x108] sm:$0xff]  ;;  %v951_v32 = vsub.s32 6, %v555_v3  ;;  %v952_v43 = vsub.s32 7, %v555_v3 }
   0x7   :  { %v475_v28 = vld [vmem:[%s948_s1 + $0x110] sm:$0xff]  ;;  %v476_v29 = vld [vmem:[%s948_s1 + $0x118] sm:$0xff]  ;;  %v109_v30 = vsub.f32 %v45_v4, %v473_v19  ;;  %v658_v34 = vld [vmem:[%s947_s0 + $0x80] sm:$0xff]  ;;  %v110_v40 = vsub.f32 %v46_v5, %v474_v27 }
   0x8   :  { %v663_v35 = vld [vmem:[%s947_s0 + $0x88] sm:$0xff]  ;;  %v668_v36 = vld [vmem:[%s947_s0 + $0x90] sm:$0xff]  ;;  %v477_v37 = vld [vmem:[%s948_s1 + $0x120] sm:$0xff]  ;;  %v111_v41 = vsub.f32 %v566_v6, %v475_v28  ;;  %v112_v42 = vsub.f32 %v571_v7, %v476_v29 }
   0x9   :  { %v478_v38 = vld [vmem:[%s948_s1 + $0x128] sm:$0xff]  ;;  %v679_v39 = vld [vmem:[%s948_s1 + $0x130] sm:$0xff]  ;;  %v687_v44 = vld [vmem:[%s947_s0 + $0x98] sm:$0xff]  ;;  %v113_v50 = vsub.f32 %v576_v9, %v477_v37  ;;  %v718_v53 = vand.u32 2147483647, %v109_v30 }
   0xa   :  { %v692_v45 = vld [vmem:[%s947_s0 + $0xa0] sm:$0xff]  ;;  %v697_v46 = vld [vmem:[%s947_s0 + $0xa8] sm:$0xff]  ;;  %v702_v47 = vld [vmem:[%s948_s1 + $0x138] sm:$0xff]  ;;  %v114_v51 = vsub.f32 %v581_v10, %v478_v38  ;;  %v115_v52 = vsub.f32 %v586_v11, %v679_v39  ;;  %v756_v63 = vand.u32 2147483647, %v110_v40 }
   0xb   :  { %v707_v48 = vld [vmem:[%s948_s1 + $0x140] sm:$0xff]  ;;  %v712_v49 = vld [vmem:[%s948_s1 + $0x148] sm:$0xff]  ;;  %v723_v54 = vld [vmem:[%s947_s0 + $0xb0] sm:$0xff]  ;;  %v116_v60 = vsub.f32 %v591_v12, %v702_v47  ;;  %v788_v10 = vand.u32 2147483647, %v111_v41 }
   0xc   :  { %v728_v55 = vld [vmem:[%s947_s0 + $0xb8] sm:$0xff]  ;;  %v733_v56 = vld [vmem:[%s947_s0 + $0xc0] sm:$0xff]  ;;  %v738_v57 = vld [vmem:[%s948_s1 + $0x150] sm:$0xff]  ;;  %v117_v61 = vsub.f32 %v596_v13, %v707_v48  ;;  %v118_v62 = vsub.f32 %v601_v14, %v712_v49  ;;  %v817_v28 = vand.u32 2147483647, %v112_v42 }
   0xd   :  { %v743_v58 = vld [vmem:[%s948_s1 + $0x158] sm:$0xff]  ;;  %v748_v59 = vld [vmem:[%s948_s1 + $0x160] sm:$0xff]  ;;  %v761_v0 = vld [vmem:[%s947_s0 + $0xc8] sm:$0xff]  ;;  %v119_v7 = vsub.f32 %v607_v16, %v738_v57  ;;  %v836_v39 = vand.u32 2147483647, %v113_v50 }
   0xe   :  { %v766_v1 = vld [vmem:[%s947_s0 + $0xd0] sm:$0xff]  ;;  %v771_v2 = vld [vmem:[%s947_s0 + $0xd8] sm:$0xff]  ;;  %v486_v4 = vld [vmem:[%s948_s1 + $0x168] sm:$0xff]  ;;  %v120_v8 = vsub.f32 %v612_v17, %v743_v58  ;;  %v121_v9 = vsub.f32 %v617_v18, %v748_v59  ;;  %v146_v47 = vand.u32 2147483647, %v114_v51 }
   0xf   :  { %v487_v5 = vld [vmem:[%s948_s1 + $0x170] sm:$0xff]  ;;  %v488_v6 = vld [vmem:[%s948_s1 + $0x178] sm:$0xff]  ;;  %v793_v11 = vld [vmem:[%s947_s0 + $0xe0] sm:$0xff]  ;;  %v122_v18 = vsub.f32 %v629_v24, %v486_v4 }
  0x10   :  { %v798_v12 = vld [vmem:[%s947_s0 + $0xe8] sm:$0xff]  ;;  %v803_v13 = vld [vmem:[%s947_s0 + $0xf0] sm:$0xff]  ;;  %v489_v14 = vld [vmem:[%s948_s1 + $0x180] sm:$0xff]  ;;  %v123_v19 = vsub.f32 %v634_v25, %v487_v5  ;;  %v124_v27 = vsub.f32 %v639_v26, %v488_v6 }
  0x11   :  { %v490_v16 = vld [vmem:[%s948_s1 + $0x188] sm:$0xff]  ;;  %v491_v17 = vld [vmem:[%s948_s1 + $0x190] sm:$0xff]  ;;  %v822_v29 = vld [vmem:[%s947_s0 + $0xf8] sm:$0xff]  ;;  %v125_v25 = vsub.f32 %v658_v34, %v489_v14 }
  0x12   :  { %v492_v30 = vld [vmem:[%s948_s1 + $0x198] sm:$0xff]  ;;  %v493_v37 = vld [vmem:[%s948_s1 + $0x1a0] sm:$0xff]  ;;  %v494_v24 = vld [vmem:[%s948_s1 + $0x1a8] sm:$0xff]  ;;  %v126_v26 = vsub.f32 %v663_v35, %v490_v16  ;;  %v127_v38 = vsub.f32 %v668_v36, %v491_v17  ;;  %v149_v16 = vand.u32 2147483647, %v117_v61 }
  0x13   :  { %v495_v40 = vld [vmem:[%s948_s1 + $0x1b0] sm:$0xff]  ;;  %v496_v41 = vld [vmem:[%s948_s1 + $0x1b8] sm:$0xff]  ;;  %v497_v42 = vld [vmem:[%s948_s1 + $0x1c0] sm:$0xff]  ;;  %v128_v34 = vsub.f32 %v687_v44, %v492_v30  ;;  %v129_v35 = vsub.f32 %v692_v45, %v493_v37  ;;  %v130_v36 = vsub.f32 %v697_v46, %v494_v24  ;;  %v147_v46 = vand.u32 2147483647, %v115_v52 }
  0x14   :  { %v498_v48 = vld [vmem:[%s948_s1 + $0x1c8] sm:$0xff]  ;;  %v499_v49 = vld [vmem:[%s948_s1 + $0x1d0] sm:$0xff]  ;;  %v500_v50 = vld [vmem:[%s948_s1 + $0x1d8] sm:$0xff]  ;;  %v131_v57 = vsub.f32 %v723_v54, %v495_v40  ;;  %v132_v44 = vsub.f32 %v728_v55, %v496_v41  ;;  %v133_v45 = vsub.f32 %v733_v56, %v497_v42  ;;  %v148_v56 = vand.u32 2147483647, %v116_v60 }
  0x15   :  { %v501_v51 = vld [vmem:[%s948_s1 + $0x1e0] sm:$0xff]  ;;  %v502_v58 = vld [vmem:[%s948_s1 + $0x1e8] sm:$0xff]  ;;  %v503_v59 = vld [vmem:[%s948_s1 + $0x1f0] sm:$0xff]  ;;  %v134_v4 = vsub.f32 %v761_v0, %v498_v48  ;;  %v135_v54 = vsub.f32 %v766_v1, %v499_v49  ;;  %v136_v55 = vsub.f32 %v771_v2, %v500_v50 }
  0x16   :  { %v504_v52 = vld [vmem:[%s948_s1 + $0x1f8] sm:$0xff]  ;;  %v137_v5 = vsub.f32 %v793_v11, %v501_v51  ;;  %v138_v6 = vsub.f32 %v798_v12, %v502_v58  ;;  %v139_v14 = vsub.f32 %v803_v13, %v503_v59  ;;  %v173_v0 = vld [vmem:[%s949_s2] sm:$0xff] }
  0x17   :  { %8 = vsyncpa [#allocation4], 0  ;;  %v140_v1 = vsub.f32 %v822_v29, %v504_v52  ;;  %v150_v2 = vand.u32 2147483647, %v118_v62  ;;  %v151_v60 = vand.u32 2147483647, %v119_v7  ;;  %v178_v11 = vrot.slane %v173_v0, %v177_v15 }
  0x18   :  { %v152_v17 = vand.u32 2147483647, %v120_v8  ;;  %v153_v30 = vand.u32 2147483647, %v121_v9  ;;  %v154_v37 = vand.u32 2147483647, %v122_v18  ;;  %v182_v61 = vrot.slane %v173_v0, %v181_v20 }
  0x19   :  { %v155_v24 = vand.u32 2147483647, %v123_v19  ;;  %v156_v12 = vand.u32 2147483647, %v124_v27  ;;  %v157_v40 = vand.u32 2147483647, %v125_v25  ;;  %v186_v62 = vrot.slane %v173_v0, %v956_v21 }
  0x1a   :  { %v158_v13 = vand.u32 2147483647, %v126_v26  ;;  %v159_v41 = vand.u32 2147483647, %v127_v38  ;;  %v160_v42 = vand.u32 2147483647, %v128_v34  ;;  %v190_v18 = vrot.slane %v173_v0, %v955_v22 }
  0x1b   :  { %v161_v48 = vand.u32 2147483647, %v129_v35  ;;  %v162_v7 = vand.u32 2147483647, %v130_v36  ;;  %v163_v8 = vand.u32 2147483647, %v131_v57  ;;  %v194_v25 = vrot.slane %v173_v0, %v954_v23 }
  0x1c   :  { %v164_v9 = vand.u32 2147483647, %v132_v44  ;;  %v165_v19 = vand.u32 2147483647, %v133_v45  ;;  %v166_v29 = vand.u32 2147483647, %v134_v4  ;;  %v198_v34 = vrot.slane %v173_v0, %v953_v31 }
  0x1d   :  { %v167_v27 = vand.u32 2147483647, %v135_v54  ;;  %v168_v26 = vand.u32 2147483647, %v136_v55  ;;  %v169_v49 = vand.u32 2147483647, %v137_v5  ;;  %v202_v36 = vrot.slane %v173_v0, %v951_v32 }
  0x1e   :  { %v170_v38 = vand.u32 2147483647, %v138_v6  ;;  %v171_v35 = vand.u32 2147483647, %v139_v14  ;;  %v172_v50 = vand.u32 2147483647, %v140_v1  ;;  %v206_v57 = vrot.slane %v173_v0, %v952_v43 }
  0x1f   :  { %v215_v44 = vmul.f32 %v178_v11, %v718_v53  ;;  %v216_v45 = vmul.f32 %v182_v61, %v756_v63  ;;  %v217_v51 = vmul.f32 %v186_v62, %v788_v10  ;;  %v218_v58 = vmul.f32 %v190_v18, %v817_v28  ;;  %s534_s1 = smov [#allocation3]  }
  0x20   :  { %v219_v59 = vmul.f32 %v194_v25, %v836_v39  ;;  %v220_v4 = vmul.f32 %v198_v34, %v146_v47  ;;  %v221_v54 = vmul.f32 %v202_v36, %v147_v46  ;;  %v222_v55 = vmul.f32 %v206_v57, %v148_v56  ;;  %s459_s2 = sshll.u32 %s534_s1, 4  ;;  %s460_s2 = int_to_ptr.vmem [resolvable:$true] %s459_s2 }
  0x21   :  { %v223_v52 = vmul.f32 %v178_v11, %v149_v16  ;;  %v224_v5 = vmul.f32 %v182_v61, %v150_v2  ;;  %v225_v6 = vmul.f32 %v186_v62, %v151_v60  ;;  %v226_v14 = vmul.f32 %v190_v18, %v152_v17  ;;  %s509_s7 = scalar_lea.vmem %s460_s2, 16  ;;  %s513_s8 = scalar_lea.vmem %s460_s2, 32 }
  0x22   :  { %v227_v1 = vmul.f32 %v194_v25, %v153_v30  ;;  %v228_v32 = vmul.f32 %v198_v34, %v154_v37  ;;  %v229_v0 = vmul.f32 %v202_v36, %v155_v24  ;;  %v230_v43 = vmul.f32 %v206_v57, %v156_v12  ;;  %p510_p0 = scmp.ne.s32.totalorder %s460_s2, %s509_s7  ;;  %p514_p1 = scmp.lt.s32.totalorder %s460_s2, %s460_s2 }
  0x23   :  { %v231_v53 = vmul.f32 %v178_v11, %v157_v40  ;;  %v232_v31 = vmul.f32 %v182_v61, %v158_v13  ;;  %v233_v63 = vmul.f32 %v186_v62, %v159_v41  ;;  %v234_v23 = vmul.f32 %v190_v18, %v160_v42  ;;  %p515_p2 = scmp.lt.s32.totalorder %s513_s8, %s509_s7 }
  0x24   :  { %v235_v10 = vmul.f32 %v194_v25, %v161_v48  ;;  %v236_v22 = vmul.f32 %v198_v34, %v162_v7  ;;  %v237_v28 = vmul.f32 %v202_v36, %v163_v8  ;;  %v238_v21 = vmul.f32 %v206_v57, %v164_v9 }
  0x25   :  { %v239_v39 = vmul.f32 %v178_v11, %v165_v19  ;;  %v240_v47 = vmul.f32 %v182_v61, %v166_v29  ;;  %v241_v46 = vmul.f32 %v186_v62, %v167_v27  ;;  %v242_v56 = vmul.f32 %v190_v18, %v168_v26  ;;  %p516_p3 = por %p515_p2, %p514_p1 }
  0x26   :  { %v243_v16 = vmul.f32 %v194_v25, %v169_v49  ;;  %v244_v2 = vmul.f32 %v198_v34, %v170_v38  ;;  %v245_v60 = vmul.f32 %v202_v36, %v171_v35  ;;  %v246_v17 = vmul.f32 %v206_v57, %v172_v50 }
  0x27   :  { %v248_v30 = vadd.f32 %v223_v52, %v215_v44  ;;  %v257_v37 = vadd.f32 %v224_v5, %v216_v45  ;;  %v266_v24 = vadd.f32 %v225_v6, %v217_v51  ;;  %v275_v12 = vadd.f32 %v226_v14, %v218_v58  ;;  %p517_p4 = pnand %p516_p3, %p510_p0 }
  0x28   :  { %v284_v40 = vadd.f32 %v227_v1, %v219_v59  ;;  %v293_v13 = vadd.f32 %v228_v32, %v220_v4  ;;  %v302_v41 = vadd.f32 %v229_v0, %v221_v54  ;;  %v311_v42 = vadd.f32 %v230_v43, %v222_v55 }
  0x29   :  { %v249_v48 = vadd.f32 %v248_v30, %v231_v53  ;;  %v258_v7 = vadd.f32 %v257_v37, %v232_v31  ;;  %v267_v8 = vadd.f32 %v266_v24, %v233_v63  ;;  %v276_v9 = vadd.f32 %v275_v12, %v234_v23 }
  0x2a   :  { %v285_v11 = vadd.f32 %v284_v40, %v235_v10  ;;  %v294_v61 = vadd.f32 %v293_v13, %v236_v22  ;;  %v303_v62 = vadd.f32 %v302_v41, %v237_v28  ;;  %v312_v18 = vadd.f32 %v311_v42, %v238_v21 }
  0x2b   :  { %v250_v19 = vadd.f32 %v249_v48, %v239_v39  ;;  %v259_v29 = vadd.f32 %v258_v7, %v240_v47  ;;  %v268_v27 = vadd.f32 %v267_v8, %v241_v46  ;;  %v277_v25 = vadd.f32 %v276_v9, %v242_v56 }
  0x2c   :  { %v286_v26 = vadd.f32 %v285_v11, %v243_v16  ;;  %v295_v49 = vadd.f32 %v294_v61, %v244_v2  ;;  %v304_v38 = vadd.f32 %v303_v62, %v245_v60  ;;  %v313_v34 = vadd.f32 %v312_v18, %v246_v17 }
  0x2d   :  { %v251_v35 = vrot.slane %v250_v19, 4  ;;  %v260_v32 = vrot.slane %v259_v29, 4  ;;  %v269_v50 = vrot.slane %v268_v27, 4  ;;  %v278_v43 = vrot.slane %v277_v25, 4 }
  0x2e   :  { %v287_v36 = vrot.slane %v286_v26, 4  ;;  %v296_v31 = vrot.slane %v295_v49, 4  ;;  %v305_v57 = vrot.slane %v304_v38, 4  ;;  %v314_v23 = vrot.slane %v313_v34, 4 }
  0x2f   :  { %v252_v44 = vadd.f32 %v251_v35, %v250_v19  ;;  %v261_v22 = vadd.f32 %v260_v32, %v259_v29  ;;  %v270_v45 = vadd.f32 %v269_v50, %v268_v27  ;;  %v279_v21 = vadd.f32 %v278_v43, %v277_v25 }
  0x30   :  { %v288_v51 = vadd.f32 %v287_v36, %v286_v26  ;;  %v297_v58 = vadd.f32 %v296_v31, %v295_v49  ;;  %v306_v59 = vadd.f32 %v305_v57, %v304_v38  ;;  %v315_v4 = vadd.f32 %v314_v23, %v313_v34 }
  0x31   :  { %v253_v54 = vrot.slane %v252_v44, 2  ;;  %v262_v55 = vrot.slane %v261_v22, 2  ;;  %v271_v52 = vrot.slane %v270_v45, 2  ;;  %v280_v5 = vrot.slane %v279_v21, 2 }
  0x32   :  { %v289_v6 = vrot.slane %v288_v51, 2  ;;  %v298_v14 = vrot.slane %v297_v58, 2  ;;  %v307_v1 = vrot.slane %v306_v59, 2  ;;  %v316_v0 = vrot.slane %v315_v4, 2 }
  0x33   :  { %v254_v53 = vadd.f32 %v253_v54, %v252_v44  ;;  %v263_v63 = vadd.f32 %v262_v55, %v261_v22  ;;  %v272_v10 = vadd.f32 %v271_v52, %v270_v45  ;;  %v281_v28 = vadd.f32 %v280_v5, %v279_v21 }
  0x34   :  { %v290_v39 = vadd.f32 %v289_v6, %v288_v51  ;;  %v299_v47 = vadd.f32 %v298_v14, %v297_v58  ;;  %v308_v46 = vadd.f32 %v307_v1, %v306_v59  ;;  %v317_v56 = vadd.f32 %v316_v0, %v315_v4 }
  0x35   :  { %v255_v16 = vrot.slane %v254_v53, 1  ;;  %v264_v2 = vrot.slane %v263_v63, 1  ;;  %v273_v60 = vrot.slane %v272_v10, 1  ;;  %v282_v17 = vrot.slane %v281_v28, 1 }
  0x36   :  { %v291_v30 = vrot.slane %v290_v39, 1  ;;  %v300_v37 = vrot.slane %v299_v47, 1  ;;  %v309_v24 = vrot.slane %v308_v46, 1  ;;  %v318_v12 = vrot.slane %v317_v56, 1 }
  0x37   :  { %v256_v40 = vadd.f32 %v255_v16, %v254_v53  ;;  %v265_v13 = vadd.f32 %v264_v2, %v263_v63  ;;  %v274_v41 = vadd.f32 %v273_v60, %v272_v10  ;;  %v283_v42 = vadd.f32 %v282_v17, %v281_v28 }
  0x38   :  { %v292_v48 = vadd.f32 %v291_v30, %v290_v39  ;;  %v301_v7 = vadd.f32 %v300_v37, %v299_v47  ;;  %v310_v8 = vadd.f32 %v309_v24, %v308_v46  ;;  %v319_v9 = vadd.f32 %v318_v12, %v317_v56 }
  0x39   :  { %v328_v11 = vcombine.low %v256_v40, %v265_v13  ;;  %v329_v61 = vcombine.low %v274_v41, %v283_v42  ;;  %vm425_vm0 = vcmask 1040384   ;;  %v957_v43 = vsub.s32 2, %v555_v3 }
  0x3a   :  { %v330_v62 = vcombine.low %v292_v48, %v301_v7  ;;  %v331_v18 = vcombine.low %v310_v8, %v319_v9  ;;  %v958_v31 = vsub.s32 3, %v555_v3  ;;  %v959_v23 = vsub.s32 4, %v555_v3 }
  0x3b   :  { %v338_v19 = vrot.slane %v328_v11, %v653_v33  ;;  %v345_v29 = vrot.slane %v329_v61, %v653_v33  ;;  %v961_v59 = vsub.s32 6, %v555_v3  ;;  %v962_v52 = vsub.s32 7, %v555_v3 }
  0x3c   :  { %v352_v27 = vrot.slane %v330_v62, %v653_v33  ;;  %v359_v25 = vrot.slane %v331_v18, %v653_v33  ;;  %vm451_vm1 = vcmask 0  }
  0x3d   :  { %v360_v26 = vcombine.low %v338_v19, %v345_v29 }
  0x3e   :  { %v361_v49 = vcombine.low %v352_v27, %v359_v25 }
  0x3f   :  { %v368_v38 = vrot.slane %v360_v26, %v653_v33 }
  0x40   :  { %v375_v34 = vrot.slane %v361_v49, %v653_v33 }
  0x42   :  { %v376_v35 = vcombine.low %v368_v38, %v375_v34 }
  0x44   :  { %v388_v32 = vrot.slane %v376_v35, %v177_v15  ;;  %v392_v50 = vrot.slane %v376_v35, %v181_v20  ;;  %v396_v36 = vrot.slane %v376_v35, %v957_v43  ;;  %v400_v57 = vrot.slane %v376_v35, %v958_v31 }
  0x45   :  { %v404_v44 = vrot.slane %v376_v35, %v959_v23  ;;  %v960_v15 = vsub.s32 5, %v555_v3  ;;  %v412_v4 = vrot.slane %v376_v35, %v961_v59  ;;  %v416_v5 = vrot.slane %v376_v35, %v962_v52 }
  0x46   :  { %v426_v22 = vsel %vm425_vm0, %v388_v32, 0.0  ;;  %v427_v33 = vsel %vm425_vm0, %v392_v50, 0.0  ;;  %v429_v45 = vsel %vm425_vm0, %v396_v36, 0.0  ;;  %v431_v20 = vsel %vm425_vm0, %v400_v57, 0.0 }
  0x47   :  { %v428_v21 = vadd.f32 %v427_v33, %v426_v22  ;;  %v408_v51 = vrot.slane %v376_v35, %v960_v15  ;;  %v433_v54 = vsel %vm425_vm0, %v404_v44, 0.0  ;;  %v437_v1 = vsel %vm425_vm0, %v412_v4, 0.0 }
  0x48   :  { %v439_v53 = vsel %vm425_vm0, %v416_v5, 0.0 }
  0x49   :  { %v430_v58 = vadd.f32 %v429_v45, %v428_v21  ;;  %v435_v6 = vsel %vm425_vm0, %v408_v51, 0.0 }
  0x4b   :  { %v432_v55 = vadd.f32 %v431_v20, %v430_v58 }
  0x4d   :  { %v434_v14 = vadd.f32 %v433_v54, %v432_v55 }
  0x4f   :  { %v436_v0 = vadd.f32 %v435_v6, %v434_v14 }
  0x51   :  { %v438_v63 = vadd.f32 %v437_v1, %v436_v0 }
  0x53   :  { %v440_v10 = vadd.f32 %v439_v53, %v438_v63 }
  0x55   :  { %441 = vadd.xlane.f32.xlu0 %v440_v10 }
  0xe2   :  { %v442_v28 = vpop.xlane.xlu0 %441 }
  0xe3   :  { %v443_v39 = vrot.slane %v442_v28, 4 }
  0xe5   :  { %v444_v47 = vadd.f32 %v443_v39, %v442_v28 }
  0xe7   :  { %v445_v46 = vrot.slane %v444_v47, 2 }
  0xe9   :  { %v446_v56 = vadd.f32 %v445_v46, %v444_v47 }
  0xeb   :  { %v447_v16 = vrot.slane %v446_v56, 1 }
  0xed   :  { %v448_v2 = vadd.f32 %v447_v16, %v446_v56 }
  0xef   :  { %505 = vpush %v448_v2 }
 0x120   :  { %s506_s6 = spop %505 }
 0x121   :  { %v450_v3 = vstv %s506_s6 }
 0x122   :  { %452 = vst.msk [vmem:[#allocation3] sm:$0x1] %vm451_vm1, %v450_v3 }
 0x123   :  { %520 = shalt.err (!%p517_p4)
}
 0x124   :  { %s521_s11 = scalar_lea.hbm %s950_s3, 16 }
 0x125   :  { %p522_p5 = scmp.ne.s32.totalorder %s950_s3, %s521_s11  ;;  %p525_p6 = scmp.lt.u32.totalorder %s521_s11, %s950_s3 }
 0x127   :  { %p527_p7 = pnand %p525_p6, %p522_p5 }
 0x129   :  { %530 = shalt.err (!%p527_p7)
}
 0x12a   :  { %462 = dma.vmem_to_hbm [thread:$0]  %s460_s2, 16, %s950_s3, [#allocation4]  }
 0x12b   :  { %531 = dma.done.wait [#allocation4], 16  }
 0x12c   :  { %532 = vsyncadd [#allocation4], 4294967280 }
 0x12d   :  { %466 = vsyncpa [#allocation4], 1 }

// kernel: vgg_perceptual_loss.13
= control target key start
LH: loop header
LB: loop body
LE: loop exit
PB: predicated region body
PF: predicated region fallthrough
CT: control target
= control target key end

     0   :  { %vm41_vm0 = vcmask 385024   ;;  %v158_v3 = vmov 0.0   ;;  %s222_s0 = inlined_call_operand.vmem [shape: f32[64,48], index: 0, kind: input, shape index: {}, may-alias: {0,1}]   ;;  %s223_s1 = inlined_call_operand.vmem [shape: f32[64,48], index: 1, kind: input, shape index: {}, may-alias: {0,1}]   ;;  %s224_s2 = inlined_call_operand.vmem [shape: f32[1,48], index: 2, kind: input, shape index: {}]   ;;  %s225_s3 = inlined_call_operand.hbm [shape: f32[1,1], index: 3, kind: output, shape index: {}]  }
   0x1   :  { %v43_v0 = vld [vmem:[%s222_s0] sm:$0xff]  ;;  %v44_v1 = vld [vmem:[%s222_s0 + $0x8] sm:$0xff]  ;;  %v45_v2 = vld [vmem:[%s222_s0 + $0x10] sm:$0xff]  ;;  %42 = vst.msk [vmem:[#allocation2] sm:$0x1] %vm41_vm0, %v158_v3 }
   0x2   :  { %v46_v4 = vld [vmem:[%s222_s0 + $0x18] sm:$0xff]  ;;  %v125_v5 = vld [vmem:[%s223_s1 + $0x20] sm:$0xff]  ;;  %v126_v6 = vld [vmem:[%s223_s1 + $0x28] sm:$0xff] }
   0x3   :  { %v127_v7 = vld [vmem:[%s223_s1 + $0x30] sm:$0xff]  ;;  %v128_v8 = vld [vmem:[%s223_s1 + $0x38] sm:$0xff]  ;;  %v51_v9 = vsub.f32 %v43_v0, %v125_v5  ;;  %v52_v10 = vsub.f32 %v44_v1, %v126_v6  ;;  %v129_v13 = vld [vmem:[%s224_s2] ss:$0 sm:$0xff] }
   0x4   :  { %v53_v11 = vsub.f32 %v45_v2, %v127_v7  ;;  %v54_v12 = vsub.f32 %v46_v4, %v128_v8 }
   0x5   :  { %8 = vsyncpa [#allocation4], 0  ;;  %v55_v14 = vand.u32 2147483647, %v51_v9  ;;  %v56_v15 = vand.u32 2147483647, %v52_v10 }
   0x6   :  { %v57_v16 = vand.u32 2147483647, %v53_v11  ;;  %v58_v17 = vand.u32 2147483647, %v54_v12  ;;  %vm71_vm1 = vcmask 392192   ;;  %s159_s1 = smov [#allocation3]  }
   0x7   :  { %v66_v18 = vmul.f32 %v129_v13, %v55_v14  ;;  %v67_v19 = vmul.f32 %v129_v13, %v56_v15  ;;  %s111_s2 = sshll.u32 %s159_s1, 4  ;;  %vm103_vm2 = vcmask 0   ;;  %s112_s2 = int_to_ptr.vmem [resolvable:$true] %s111_s2 }
   0x8   :  { %v68_v20 = vmul.f32 %v129_v13, %v57_v16  ;;  %v69_v21 = vmul.f32 %v129_v13, %v58_v17  ;;  %v70_v34 = vld [vmem:[#allocation2] sm:$0x1]  ;;  %s134_s30 = scalar_lea.vmem %s112_s2, 16  ;;  %s138_s4 = scalar_lea.vmem %s112_s2, 32 }
   0x9   :  { %v72_v22 = vsel %vm71_vm1, %v66_v18, 0.0  ;;  %v73_v23 = vsel %vm71_vm1, %v67_v19, 0.0  ;;  %p135_p0 = scmp.ne.s32.totalorder %s112_s2, %s134_s30  ;;  %p139_p1 = scmp.lt.s32.totalorder %s112_s2, %s112_s2 }
   0xa   :  { %v74_v24 = vadd.f32 %v73_v23, %v72_v22  ;;  %v75_v25 = vsel %vm71_vm1, %v68_v20, 0.0  ;;  %v77_v26 = vsel %vm71_vm1, %v69_v21, 0.0  ;;  %p140_p2 = scmp.lt.s32.totalorder %s138_s4, %s134_s30 }
   0xc   :  { %v76_v27 = vadd.f32 %v75_v25, %v74_v24  ;;  %p141_p3 = por %p140_p2, %p139_p1 }
   0xe   :  { %v78_v28 = vadd.f32 %v77_v26, %v76_v27  ;;  %p142_p4 = pnand %p141_p3, %p135_p0 }
  0x10   :  { %v79_v29 = vrot.slane %v78_v28, 4 }
  0x12   :  { %v80_v30 = vadd.f32 %v79_v29, %v78_v28 }
  0x14   :  { %v81_v31 = vrot.slane %v80_v30, 2 }
  0x16   :  { %v82_v32 = vadd.f32 %v81_v31, %v80_v30 }
  0x18   :  { %v83_v33 = vrot.slane %v82_v32, 1 }
  0x1a   :  { %v84_v35 = vadd.f32 %v83_v33, %v82_v32 }
  0x1c   :  { %v85_v36 = vadd.f32 %v84_v35, %v70_v34 }
  0x1e   :  { %87 = vst.msk [vmem:[#allocation2] sm:$0x1] %vm41_vm0, %v85_v36 }
  0x25   :  { %v91_v37 = vld [vmem:[#allocation2] sm:$0x1] }
  0x26   :  { %v92_v38 = vsel %vm41_vm0, %v91_v37, 0.0 }
  0x27   :  { %93 = vadd.xlane.f32.xlu0 %v92_v38 }
  0xb4   :  { %v94_v39 = vpop.xlane.xlu0 %93 }
  0xb5   :  { %v95_v40 = vrot.slane %v94_v39, 4 }
  0xb7   :  { %v96_v41 = vadd.f32 %v95_v40, %v94_v39 }
  0xb9   :  { %v97_v42 = vrot.slane %v96_v41, 2 }
  0xbb   :  { %v98_v43 = vadd.f32 %v97_v42, %v96_v41 }
  0xbd   :  { %v99_v44 = vrot.slane %v98_v43, 1 }
  0xbf   :  { %v100_v45 = vadd.f32 %v99_v44, %v98_v43 }
  0xc1   :  { %130 = vpush %v100_v45 }
  0xf2   :  { %s131_s29 = spop %130 }
  0xf3   :  { %v102_v46 = vstv %s131_s29 }
  0xf4   :  { %104 = vst.msk [vmem:[#allocation3] sm:$0x1] %vm103_vm2, %v102_v46 }
  0xf5   :  { %145 = shalt.err (!%p142_p4)
}
  0xf6   :  { %s146_s7 = scalar_lea.hbm %s225_s3, 16 }
  0xf7   :  { %p147_p5 = scmp.ne.s32.totalorder %s225_s3, %s146_s7  ;;  %p150_p6 = scmp.lt.u32.totalorder %s146_s7, %s225_s3 }
  0xf9   :  { %p152_p7 = pnand %p150_p6, %p147_p5 }
  0xfb   :  { %155 = shalt.err (!%p152_p7)
}
  0xfc   :  { %114 = dma.vmem_to_hbm [thread:$0]  %s112_s2, 16, %s225_s3, [#allocation4]  }
  0xfd   :  { %156 = dma.done.wait [#allocation4], 16  }
  0xfe   :  { %157 = vsyncadd [#allocation4], 4294967280 }
  0xff   :  { %118 = vsyncpa [#allocation4], 1 }

</bundles_post_ra>
